<compile_context>
chip_gen: v6e
topology: v6e:2x2x1
jax: 0.10.0
libtpu: 0.0.40
codegen_flags: <defaults>
</compile_context>

<pallas_src>
import functools

import jax
import jax.numpy as jnp
import numpy as np
from jax.experimental import pallas as pl
from jax.experimental.pallas import tpu as pltpu


def _round_up(x, m):
    return (x + m - 1) // m * m


def _chunk_starts(total, chunk):
    """Static (start, size) pairs tiling [0, total)."""
    out, s = [], 0
    while s < total:
        out.append((s, min(chunk, total - s)))
        s += chunk
    return out


def _basic_block_kernel(x_ref, w1_ref, s1_ref, b1_ref, w2_ref, s2_ref, b2_ref,
                        out_ref, mid_ref, *, Wp, W, Mp, Mv, Cp, B_blk, chunk):
    """Fused BasicBlock for a block of B_blk images (flattened padded geometry).

    x_ref   : (B_blk, Mp, Cp)  padded input images (spatial halo + channel pad)
    w*_ref  : (9*Cp, Cp)       3x3 weights, taps folded into the K dim, bf16
    s*,b*   : (1, Cp)          folded BatchNorm scale / bias (f32)
    out_ref : (B_blk, Mv, Cp)  valid output span only (no halo writeback)
    mid_ref : (Mp, Cp)         bf16 VMEM scratch for conv1's padded activation
    """
    p0 = Wp + 1                       # flat index of output pixel (1, 1)
    tail = Mp - (p0 + Mv)             # rows after the valid span
    chunks = _chunk_starts(Mv, chunk)

    # Halo rows of the intermediate map act as conv2's zero padding.  The span
    # rows are fully overwritten per image, so zero the halo once per step
    # (per-step, NOT pl.when(program_id==0): grid may be split across cores).
    mid_ref[pl.ds(0, p0), :] = jnp.zeros((p0, Cp), mid_ref.dtype)
    mid_ref[pl.ds(p0 + Mv, tail), :] = jnp.zeros((tail, Cp), mid_ref.dtype)

    def col_mask(m0, ch):
        # 1 where the span position is a real output pixel (padded col 1..W).
        pos = p0 + m0 + jax.lax.broadcasted_iota(jnp.int32, (ch, 1), 0)
        col = pos % Wp
        return (col >= 1) & (col <= W)

    def conv_chunk(src_load, m0, ch, w_ref, s_ref, b_ref):
        # im2col for this chunk only: 9 shifted windows of the flattened padded
        # image concatenated along the lane-dense channel axis -> one MXU
        # matmul with K = 9*Cp.  bf16 operands, f32 accumulation.
        patch = jnp.concatenate(
            [src_load(m0 + kh * Wp + kw, ch).astype(jnp.bfloat16)
             for kh in range(3) for kw in range(3)], axis=1)      # (ch, 9*Cp)
        y = jnp.dot(patch, w_ref[...], preferred_element_type=jnp.float32)
        return y * s_ref[...] + b_ref[...]           # folded BN, f32 epilogue

    for b in range(B_blk):
        x_load = lambda off, ch, b=b: x_ref[b, pl.ds(off, ch), :]
        mid_load = lambda off, ch: mid_ref[pl.ds(off, ch), :]

        # ---- conv1 -> BN1 -> ReLU -> masked store to VMEM intermediate -----
        for m0, ch in chunks:
            y1 = jnp.maximum(conv_chunk(x_load, m0, ch, w1_ref, s1_ref, b1_ref),
                             0.0)
            y1 = jnp.where(col_mask(m0, ch), y1, 0.0)   # conv2's zero padding
            mid_ref[pl.ds(p0 + m0, ch), :] = y1.astype(mid_ref.dtype)

        # ---- conv2 -> BN2 -> +identity -> ReLU (valid span only) -----------
        for m0, ch in chunks:
            y2 = conv_chunk(mid_load, m0, ch, w2_ref, s2_ref, b2_ref)
            y2 = y2 + x_ref[b, pl.ds(p0 + m0, ch), :].astype(jnp.float32)
            out_ref[b, pl.ds(m0, ch), :] = jnp.maximum(y2, 0.0).astype(
                out_ref.dtype)


def _prep_weight(w_oihw, cp, dtype):
    """PyTorch OIHW 3x3 weight -> (9*Cp, Cp), taps folded into the K dim."""
    cout, cin = w_oihw.shape[:2]
    w = jnp.transpose(w_oihw, (2, 3, 1, 0))                       # -> HWIO
    w = jnp.pad(w, ((0, 0), (0, 0), (0, cp - cin), (0, cp - cout)))
    return w.reshape(9 * cp, cp).astype(dtype)


def _prep_affine(v, cp):
    c = v.shape[0]
    return jnp.pad(v.reshape(1, c), ((0, 0), (0, cp - c))).astype(jnp.float32)


def basic_block_forward(x_nchw, params, stride=1):
    """BasicBlock.forward for the downsample=None path (stride=1, in==out ch)."""
    n, c, h, w = x_nchw.shape
    assert stride == 1 and params["w1"].shape[0] == c, (
        "fused kernel implements the stride=1 / downsample=None path only")

    cp = _round_up(c, 128)            # lane-dense channel count
    hp, wp = h + 2, w + 2             # zero-padded spatial extent
    mp = hp * wp                      # flattened padded image length
    mv = h * wp - 2                   # contiguous span covering all real pixels
    dtype = x_nchw.dtype
    x_isz = jnp.dtype(dtype).itemsize

    # NCHW -> NHWC + zero pad (spatial halo + channels) in ONE materialization,
    # then flatten spatial so the kernel sees a lane-dense (Mp, Cp) image.
    x = jnp.transpose(x_nchw, (0, 2, 3, 1))
    x = jnp.pad(x, ((0, 0), (1, 1), (1, 1), (0, cp - c)))
    x = x.reshape(n, mp, cp)

    # bf16 MXU operands; BN scale/bias stay f32.
    w1 = _prep_weight(params["w1"], cp, jnp.bfloat16)
    w2 = _prep_weight(params["w2"], cp, jnp.bfloat16)
    s1 = _prep_affine(params["scale1"], cp)
    b1 = _prep_affine(params["bias1"], cp)
    s2 = _prep_affine(params["scale2"], cp)
    b2 = _prep_affine(params["bias2"], cp)

    chunk = min(mv, 512)              # bound im2col patch temporaries

    # Per-generation VMEM budget (128 MiB on v5e/v6e, 64 MiB on v7x).
    try:
        vmem_cap = int(pltpu.get_tpu_info().vmem_capacity_bytes)
    except Exception:
        vmem_cap = 64 << 20           # conservative fallback (v7x physical)
    budget = int(vmem_cap * 0.8)

    per_image = 2 * (mp * cp * x_isz + mv * cp * x_isz)   # dbl-buffered x+out
    fixed = (2 * 2 * 9 * cp * cp * 2          # w1+w2 bf16, double-buffered
             + mp * cp * 2                    # mid scratch (bf16)
             + 2 * chunk * 9 * cp * 2         # im2col patch temporaries
             + 2 * chunk * cp * 4             # f32 epilogue temporaries
             + (4 << 20))                     # slack

    # Batch blocking: largest divisor of n that fits the budget (capped at 8).
    b_cap = max(1, (budget - fixed) // max(per_image, 1))
    b_blk = 1
    for d in range(1, n + 1):
        if n % d == 0 and d <= min(b_cap, 8):
            b_blk = d

    vmem_est = int(fixed + b_blk * per_image)
    if vmem_est > budget:
        raise ValueError(
            f"BasicBlock kernel needs ~{vmem_est>>20} MiB VMEM, budget is "
            f"{budget>>20} MiB; add output-row tiling for this shape.")
    vmem_limit = int(min(max(vmem_est, 16 << 20), budget))

    flops = 2 * 2 * n * mv * (9 * cp) * cp                        # two convs
    bytes_accessed = int(n * (mp + mv) * cp * x_isz + 2 * 9 * cp * cp * 2)

    kernel = functools.partial(_basic_block_kernel, Wp=wp, W=w, Mp=mp, Mv=mv,
                               Cp=cp, B_blk=b_blk, chunk=chunk)

    out_span = pl.pallas_call(
        kernel,
        out_shape=jax.ShapeDtypeStruct((n, mv, cp), dtype),
        grid=(n // b_blk,),
        in_specs=[
            pl.BlockSpec((b_blk, mp, cp), lambda i: (i, 0, 0)),   # x
            pl.BlockSpec((9 * cp, cp), lambda i: (0, 0)),         # w1 (bf16)
            pl.BlockSpec((1, cp), lambda i: (0, 0)),              # scale1
            pl.BlockSpec((1, cp), lambda i: (0, 0)),              # bias1
            pl.BlockSpec((9 * cp, cp), lambda i: (0, 0)),         # w2 (bf16)
            pl.BlockSpec((1, cp), lambda i: (0, 0)),              # scale2
            pl.BlockSpec((1, cp), lambda i: (0, 0)),              # bias2
        ],
        out_specs=pl.BlockSpec((b_blk, mv, cp), lambda i: (i, 0, 0)),
        scratch_shapes=[pltpu.VMEM((mp, cp), jnp.bfloat16)],
        compiler_params=pltpu.CompilerParams(
            dimension_semantics=("parallel",),
            vmem_limit_bytes=vmem_limit),
        cost_estimate=pl.CostEstimate(
            flops=flops, transcendentals=0, bytes_accessed=bytes_accessed),
    )(x, w1, s1, b1, w2, s2, b2)

    # Valid span -> NCHW: span covers padded flat [Wp+1, Wp+1+Mv); pad one row
    # on each side to reach H*Wp rows, reshape, crop halo columns + channels.
    out = jnp.pad(out_span, ((0, 0), (1, 1), (0, 0)))
    out = out.reshape(n, h, wp, cp)[:, :, 1:w + 1, :c]
    return jnp.transpose(out, (0, 3, 1, 2))


def init_params(key, inplanes, planes):
    ks = jax.random.split(key, 12)
    w1 = 0.1 * jax.random.normal(ks[0], (planes, inplanes, 3, 3), jnp.float32)
    w2 = 0.1 * jax.random.normal(ks[1], (planes, planes, 3, 3), jnp.float32)

    def bn_params(kg, kb, km, kv, c):
        gamma = 1.0 + 0.1 * jax.random.normal(kg, (c,), jnp.float32)
        beta = 0.1 * jax.random.normal(kb, (c,), jnp.float32)
        mean = 0.1 * jax.random.normal(km, (c,), jnp.float32)
        var = jnp.abs(jax.random.normal(kv, (c,), jnp.float32)) + 0.5
        eps = 1e-5
        scale = gamma / jnp.sqrt(var + eps)
        bias = beta - mean * scale
        return scale, bias

    scale1, bias1 = bn_params(ks[2], ks[3], ks[4], ks[5], planes)
    scale2, bias2 = bn_params(ks[6], ks[7], ks[8], ks[9], planes)
    return {"w1": w1, "scale1": scale1, "bias1": bias1,
            "w2": w2, "scale2": scale2, "bias2": bias2}


def _reference(x_nchw, params):
    """Pure-JAX (XLA, f32) reference for a numerical sanity check."""
    def conv_bn(x, w, scale, bias):
        y = jax.lax.conv_general_dilated(
            x, w, window_strides=(1, 1), padding=((1, 1), (1, 1)),
            dimension_numbers=("NCHW", "OIHW", "NCHW"))
        return y * scale[None, :, None, None] + bias[None, :, None, None]

    out = jnp.maximum(conv_bn(x_nchw, params["w1"], params["scale1"],
                              params["bias1"]), 0.0)
    out = conv_bn(out, params["w2"], params["scale2"], params["bias2"])
    out = out + x_nchw
    return jnp.maximum(out, 0.0)


if __name__ == "__main__":
    key = jax.random.PRNGKey(0)
    kx, kp = jax.random.split(key)

    # Small shapes consistent with the module: batch=2, channels=4, spatial=16.
    N, C, H, W = 2, 4, 16, 16
    inplanes = planes = C                        # downsample=None path
    x = jax.random.normal(kx, (N, C, H, W), jnp.float32)
    params = init_params(kp, inplanes, planes)

    fwd = jax.jit(basic_block_forward)
    out = jax.block_until_ready(fwd(x, params))

    ref = jax.block_until_ready(_reference(x, params))
    assert out.shape == (N, planes, H, W)
    # bf16 MXU operands (f32 accumulation) vs. pure-f32 reference.
    np.testing.assert_allclose(np.asarray(out), np.asarray(ref),
                               rtol=2e-2, atol=2e-2)
    print("KERNEL_OK")
</pallas_src>

<mosaic_0001>
module attributes {stable_mosaic.version = 11 : i64} {
  func.func @_basic_block_kernel(%arg0: i32, %arg1: memref<2x324x128xf32, #tpu.memory_space<vmem>>, %arg2: memref<1152x128xbf16, #tpu.memory_space<vmem>>, %arg3: memref<1x128xf32, #tpu.memory_space<vmem>>, %arg4: memref<1x128xf32, #tpu.memory_space<vmem>>, %arg5: memref<1152x128xbf16, #tpu.memory_space<vmem>>, %arg6: memref<1x128xf32, #tpu.memory_space<vmem>>, %arg7: memref<1x128xf32, #tpu.memory_space<vmem>>, %arg8: memref<2x286x128xf32, #tpu.memory_space<vmem>>, %arg9: memref<324x128xbf16, #tpu.memory_space<vmem>>) attributes {dimension_semantics = [#tpu.dimension_semantics<parallel>], iteration_bounds = array<i64: 1>, scalar_prefetch = 0 : i64, scratch_operands = 1 : i64, tpu.core_type = #tpu.core_type<tc>, window_params = [{transform_indices = @transform_0, window_bounds = array<i64: 2, 324, 128>}, {pipeline_mode = #tpu.pipeline_mode<synchronous>, transform_indices = @transform_1, window_bounds = array<i64: 1152, 128>}, {pipeline_mode = #tpu.pipeline_mode<synchronous>, transform_indices = @transform_2, window_bounds = array<i64: 1, 128>}, {pipeline_mode = #tpu.pipeline_mode<synchronous>, transform_indices = @transform_3, window_bounds = array<i64: 1, 128>}, {pipeline_mode = #tpu.pipeline_mode<synchronous>, transform_indices = @transform_4, window_bounds = array<i64: 1152, 128>}, {pipeline_mode = #tpu.pipeline_mode<synchronous>, transform_indices = @transform_5, window_bounds = array<i64: 1, 128>}, {pipeline_mode = #tpu.pipeline_mode<synchronous>, transform_indices = @transform_6, window_bounds = array<i64: 1, 128>}, {transform_indices = @transform_7, window_bounds = array<i64: 2, 286, 128>}]} {
    %cst = arith.constant 0.000000e+00 : bf16
    %0 = vector.broadcast %cst : bf16 to vector<19x128xbf16>
    %c0 = arith.constant 0 : index
    %c0_0 = arith.constant 0 : index
    %1 = vector.load %arg9[%c0, %c0_0] : memref<324x128xbf16, #tpu.memory_space<vmem>>, vector<19x128xbf16>
    tpu.vector_store %arg9[%c0, %c0_0], %0 {strides = array<i32>} : memref<324x128xbf16, #tpu.memory_space<vmem>>, vector<19x128xbf16>,
    %cst_1 = arith.constant 0.000000e+00 : bf16
    %2 = vector.broadcast %cst_1 : bf16 to vector<19x128xbf16>
    %c305 = arith.constant 305 : index
    %c0_2 = arith.constant 0 : index
    %3 = vector.load %arg9[%c305, %c0_2] : memref<324x128xbf16, #tpu.memory_space<vmem>>, vector<19x128xbf16>
    tpu.vector_store %arg9[%c305, %c0_2], %2 {strides = array<i32>} : memref<324x128xbf16, #tpu.memory_space<vmem>>, vector<19x128xbf16>,
    %c0_3 = arith.constant 0 : index
    %c0_4 = arith.constant 0 : index
    %c0_5 = arith.constant 0 : index
    %4 = vector.load %arg1[%c0_3, %c0_4, %c0_5] : memref<2x324x128xf32, #tpu.memory_space<vmem>>, vector<1x286x128xf32>
    %5 = vector.shape_cast %4 : vector<1x286x128xf32> to vector<286x128xf32>
    %6 = arith.truncf %5 : vector<286x128xf32> to vector<286x128xbf16>
    %c0_6 = arith.constant 0 : index
    %c1 = arith.constant 1 : index
    %c0_7 = arith.constant 0 : index
    %7 = vector.load %arg1[%c0_6, %c1, %c0_7] : memref<2x324x128xf32, #tpu.memory_space<vmem>>, vector<1x286x128xf32>
    %8 = vector.shape_cast %7 : vector<1x286x128xf32> to vector<286x128xf32>
    %9 = arith.truncf %8 : vector<286x128xf32> to vector<286x128xbf16>
    %c0_8 = arith.constant 0 : index
    %c2 = arith.constant 2 : index
    %c0_9 = arith.constant 0 : index
    %10 = vector.load %arg1[%c0_8, %c2, %c0_9] : memref<2x324x128xf32, #tpu.memory_space<vmem>>, vector<1x286x128xf32>
    %11 = vector.shape_cast %10 : vector<1x286x128xf32> to vector<286x128xf32>
    %12 = arith.truncf %11 : vector<286x128xf32> to vector<286x128xbf16>
    %c0_10 = arith.constant 0 : index
    %c18 = arith.constant 18 : index
    %c0_11 = arith.constant 0 : index
    %13 = vector.load %arg1[%c0_10, %c18, %c0_11] : memref<2x324x128xf32, #tpu.memory_space<vmem>>, vector<1x286x128xf32>
    %14 = vector.shape_cast %13 : vector<1x286x128xf32> to vector<286x128xf32>
    %15 = arith.truncf %14 : vector<286x128xf32> to vector<286x128xbf16>
    %c0_12 = arith.constant 0 : index
    %c19 = arith.constant 19 : index
    %c0_13 = arith.constant 0 : index
    %16 = vector.load %arg1[%c0_12, %c19, %c0_13] : memref<2x324x128xf32, #tpu.memory_space<vmem>>, vector<1x286x128xf32>
    %17 = vector.shape_cast %16 : vector<1x286x128xf32> to vector<286x128xf32>
    %18 = arith.truncf %17 : vector<286x128xf32> to vector<286x128xbf16>
    %c0_14 = arith.constant 0 : index
    %c20 = arith.constant 20 : index
    %c0_15 = arith.constant 0 : index
    %19 = vector.load %arg1[%c0_14, %c20, %c0_15] : memref<2x324x128xf32, #tpu.memory_space<vmem>>, vector<1x286x128xf32>
    %20 = vector.shape_cast %19 : vector<1x286x128xf32> to vector<286x128xf32>
    %21 = arith.truncf %20 : vector<286x128xf32> to vector<286x128xbf16>
    %c0_16 = arith.constant 0 : index
    %c36 = arith.constant 36 : index
    %c0_17 = arith.constant 0 : index
    %22 = vector.load %arg1[%c0_16, %c36, %c0_17] : memref<2x324x128xf32, #tpu.memory_space<vmem>>, vector<1x286x128xf32>
    %23 = vector.shape_cast %22 : vector<1x286x128xf32> to vector<286x128xf32>
    %24 = arith.truncf %23 : vector<286x128xf32> to vector<286x128xbf16>
    %c0_18 = arith.constant 0 : index
    %c37 = arith.constant 37 : index
    %c0_19 = arith.constant 0 : index
    %25 = vector.load %arg1[%c0_18, %c37, %c0_19] : memref<2x324x128xf32, #tpu.memory_space<vmem>>, vector<1x286x128xf32>
    %26 = vector.shape_cast %25 : vector<1x286x128xf32> to vector<286x128xf32>
    %27 = arith.truncf %26 : vector<286x128xf32> to vector<286x128xbf16>
    %c0_20 = arith.constant 0 : index
    %c38 = arith.constant 38 : index
    %c0_21 = arith.constant 0 : index
    %28 = vector.load %arg1[%c0_20, %c38, %c0_21] : memref<2x324x128xf32, #tpu.memory_space<vmem>>, vector<1x286x128xf32>
    %29 = vector.shape_cast %28 : vector<1x286x128xf32> to vector<286x128xf32>
    %30 = arith.truncf %29 : vector<286x128xf32> to vector<286x128xbf16>
    %31 = tpu.concatenate %6, %9, %12, %15, %18, %21, %24, %27, %30 in 1 : vector<286x128xbf16>, vector<286x128xbf16>, vector<286x128xbf16>, vector<286x128xbf16>, vector<286x128xbf16>, vector<286x128xbf16>, vector<286x128xbf16>, vector<286x128xbf16>, vector<286x128xbf16> -> vector<286x1152xbf16>
    %c0_22 = arith.constant 0 : index
    %c0_23 = arith.constant 0 : index
    %32 = vector.load %arg2[%c0_22, %c0_23] : memref<1152x128xbf16, #tpu.memory_space<vmem>>, vector<1152x128xbf16>
    %cst_24 = arith.constant dense<0.000000e+00> : vector<286x128xf32>
    %33 = tpu.matmul %31, %32, %cst_24 {dimension_numbers = #tpu.dot_dimension_numbers<[1], [0], [0], [1], [0, 0, 1, 1], [], []>} : vector<286x1152xbf16>, vector<1152x128xbf16>, vector<286x128xf32> -> vector<286x128xf32>
    %c0_25 = arith.constant 0 : index
    %c0_26 = arith.constant 0 : index
    %34 = vector.load %arg3[%c0_25, %c0_26] : memref<1x128xf32, #tpu.memory_space<vmem>>, vector<1x128xf32>
    %35 = vector.broadcast %34 : vector<1x128xf32> to vector<286x128xf32>
    %36 = arith.mulf %33, %35 : vector<286x128xf32>
    %c0_27 = arith.constant 0 : index
    %c0_28 = arith.constant 0 : index
    %37 = vector.load %arg4[%c0_27, %c0_28] : memref<1x128xf32, #tpu.memory_space<vmem>>, vector<1x128xf32>
    %38 = vector.broadcast %37 : vector<1x128xf32> to vector<286x128xf32>
    %39 = arith.addf %36, %38 : vector<286x128xf32>
    %cst_29 = arith.constant 0.000000e+00 : f32
    %40 = vector.broadcast %cst_29 : f32 to vector<286x128xf32>
    %41 = arith.maximumf %39, %40 : vector<286x128xf32>
    %42 = tpu.iota {dimensions = array<i32: 0>} : vector<286x1xi32>
    %c19_i32 = arith.constant 19 : i32
    %43 = vector.broadcast %c19_i32 : i32 to vector<286x1xi32>
    %44 = arith.addi %43, %42 : vector<286x1xi32>
    %c18_i32 = arith.constant 18 : i32
    %c0_i32 = arith.constant 0 : i32
    %45 = arith.cmpi eq, %c18_i32, %c0_i32 : i32
    %c1_i32 = arith.constant 1 : i32
    %46 = arith.select %45, %c1_i32, %c18_i32 : i32
    %47 = vector.broadcast %46 : i32 to vector<286x1xi32>
    %48 = arith.remsi %44, %47 : vector<286x1xi32>
    %c0_i32_30 = arith.constant 0 : i32
    %49 = vector.broadcast %c0_i32_30 : i32 to vector<286x1xi32>
    %50 = arith.cmpi ne, %48, %49 : vector<286x1xi32>
    %c0_i32_31 = arith.constant 0 : i32
    %51 = vector.broadcast %c0_i32_31 : i32 to vector<286x1xi32>
    %52 = arith.cmpi slt, %48, %51 : vector<286x1xi32>
    %c0_i32_32 = arith.constant 0 : i32
    %53 = arith.cmpi slt, %46, %c0_i32_32 : i32
    %54 = vector.broadcast %53 : i1 to vector<286x1xi1>
    %55 = vector.broadcast %54 : vector<286x1xi1> to vector<286x1xi1>
    %56 = arith.xori %52, %55 : vector<286x1xi1>
    %57 = arith.andi %56, %50 : vector<286x1xi1>
    %58 = vector.broadcast %46 : i32 to vector<286x1xi32>
    %59 = arith.addi %48, %58 : vector<286x1xi32>
    %60 = arith.select %57, %59, %48 : vector<286x1xi1>, vector<286x1xi32>
    %c1_i32_33 = arith.constant 1 : i32
    %61 = vector.broadcast %c1_i32_33 : i32 to vector<286x1xi32>
    %62 = arith.cmpi sge, %60, %61 : vector<286x1xi32>
    %c16_i32 = arith.constant 16 : i32
    %63 = vector.broadcast %c16_i32 : i32 to vector<286x1xi32>
    %64 = arith.cmpi sle, %60, %63 : vector<286x1xi32>
    %65 = arith.andi %62, %64 : vector<286x1xi1>
    %cst_34 = arith.constant 0.000000e+00 : f32
    %66 = vector.shape_cast %65 : vector<286x1xi1> to vector<286x1xi1>
    %67 = vector.broadcast %66 : vector<286x1xi1> to vector<286x128xi1>
    %68 = vector.broadcast %cst_34 : f32 to vector<286x128xf32>
    %69 = arith.select %67, %41, %68 : vector<286x128xi1>, vector<286x128xf32>
    %70 = arith.truncf %69 : vector<286x128xf32> to vector<286x128xbf16>
    %c19_35 = arith.constant 19 : index
    %c0_36 = arith.constant 0 : index
    %71 = vector.load %arg9[%c19_35, %c0_36] : memref<324x128xbf16, #tpu.memory_space<vmem>>, vector<286x128xbf16>
    tpu.vector_store %arg9[%c19_35, %c0_36], %70 {strides = array<i32>} : memref<324x128xbf16, #tpu.memory_space<vmem>>, vector<286x128xbf16>,
    %c0_37 = arith.constant 0 : index
    %c0_38 = arith.constant 0 : index
    %72 = vector.load %arg9[%c0_37, %c0_38] : memref<324x128xbf16, #tpu.memory_space<vmem>>, vector<286x128xbf16>
    %c1_39 = arith.constant 1 : index
    %c0_40 = arith.constant 0 : index
    %73 = vector.load %arg9[%c1_39, %c0_40] : memref<324x128xbf16, #tpu.memory_space<vmem>>, vector<286x128xbf16>
    %c2_41 = arith.constant 2 : index
    %c0_42 = arith.constant 0 : index
    %74 = vector.load %arg9[%c2_41, %c0_42] : memref<324x128xbf16, #tpu.memory_space<vmem>>, vector<286x128xbf16>
    %c18_43 = arith.constant 18 : index
    %c0_44 = arith.constant 0 : index
    %75 = vector.load %arg9[%c18_43, %c0_44] : memref<324x128xbf16, #tpu.memory_space<vmem>>, vector<286x128xbf16>
    %c19_45 = arith.constant 19 : index
    %c0_46 = arith.constant 0 : index
    %76 = vector.load %arg9[%c19_45, %c0_46] : memref<324x128xbf16, #tpu.memory_space<vmem>>, vector<286x128xbf16>
    %c20_47 = arith.constant 20 : index
    %c0_48 = arith.constant 0 : index
    %77 = vector.load %arg9[%c20_47, %c0_48] : memref<324x128xbf16, #tpu.memory_space<vmem>>, vector<286x128xbf16>
    %c36_49 = arith.constant 36 : index
    %c0_50 = arith.constant 0 : index
    %78 = vector.load %arg9[%c36_49, %c0_50] : memref<324x128xbf16, #tpu.memory_space<vmem>>, vector<286x128xbf16>
    %c37_51 = arith.constant 37 : index
    %c0_52 = arith.constant 0 : index
    %79 = vector.load %arg9[%c37_51, %c0_52] : memref<324x128xbf16, #tpu.memory_space<vmem>>, vector<286x128xbf16>
    %c38_53 = arith.constant 38 : index
    %c0_54 = arith.constant 0 : index
    %80 = vector.load %arg9[%c38_53, %c0_54] : memref<324x128xbf16, #tpu.memory_space<vmem>>, vector<286x128xbf16>
    %81 = tpu.concatenate %72, %73, %74, %75, %76, %77, %78, %79, %80 in 1 : vector<286x128xbf16>, vector<286x128xbf16>, vector<286x128xbf16>, vector<286x128xbf16>, vector<286x128xbf16>, vector<286x128xbf16>, vector<286x128xbf16>, vector<286x128xbf16>, vector<286x128xbf16> -> vector<286x1152xbf16>
    %c0_55 = arith.constant 0 : index
    %c0_56 = arith.constant 0 : index
    %82 = vector.load %arg5[%c0_55, %c0_56] : memref<1152x128xbf16, #tpu.memory_space<vmem>>, vector<1152x128xbf16>
    %cst_57 = arith.constant dense<0.000000e+00> : vector<286x128xf32>
    %83 = tpu.matmul %81, %82, %cst_57 {dimension_numbers = #tpu.dot_dimension_numbers<[1], [0], [0], [1], [0, 0, 1, 1], [], []>} : vector<286x1152xbf16>, vector<1152x128xbf16>, vector<286x128xf32> -> vector<286x128xf32>
    %c0_58 = arith.constant 0 : index
    %c0_59 = arith.constant 0 : index
    %84 = vector.load %arg6[%c0_58, %c0_59] : memref<1x128xf32, #tpu.memory_space<vmem>>, vector<1x128xf32>
    %85 = vector.broadcast %84 : vector<1x128xf32> to vector<286x128xf32>
    %86 = arith.mulf %83, %85 : vector<286x128xf32>
    %c0_60 = arith.constant 0 : index
    %c0_61 = arith.constant 0 : index
    %87 = vector.load %arg7[%c0_60, %c0_61] : memref<1x128xf32, #tpu.memory_space<vmem>>, vector<1x128xf32>
    %88 = vector.broadcast %87 : vector<1x128xf32> to vector<286x128xf32>
    %89 = arith.addf %86, %88 : vector<286x128xf32>
    %c0_62 = arith.constant 0 : index
    %c19_63 = arith.constant 19 : index
    %c0_64 = arith.constant 0 : index
    %90 = vector.load %arg1[%c0_62, %c19_63, %c0_64] : memref<2x324x128xf32, #tpu.memory_space<vmem>>, vector<1x286x128xf32>
    %91 = vector.shape_cast %90 : vector<1x286x128xf32> to vector<286x128xf32>
    %92 = arith.addf %89, %91 : vector<286x128xf32>
    %cst_65 = arith.constant 0.000000e+00 : f32
    %93 = vector.broadcast %cst_65 : f32 to vector<286x128xf32>
    %94 = arith.maximumf %92, %93 : vector<286x128xf32>
    %c0_66 = arith.constant 0 : index
    %c0_67 = arith.constant 0 : index
    %c0_68 = arith.constant 0 : index
    %95 = vector.load %arg8[%c0_66, %c0_67, %c0_68] : memref<2x286x128xf32, #tpu.memory_space<vmem>>, vector<1x286x128xf32>
    %96 = vector.shape_cast %95 : vector<1x286x128xf32> to vector<286x128xf32>
    %97 = vector.shape_cast %94 : vector<286x128xf32> to vector<1x286x128xf32>
    tpu.vector_store %arg8[%c0_66, %c0_67, %c0_68], %97 {strides = array<i32>} : memref<2x286x128xf32, #tpu.memory_space<vmem>>, vector<1x286x128xf32>,
    %c1_69 = arith.constant 1 : index
    %c0_70 = arith.constant 0 : index
    %c0_71 = arith.constant 0 : index
    %98 = vector.load %arg1[%c1_69, %c0_70, %c0_71] : memref<2x324x128xf32, #tpu.memory_space<vmem>>, vector<1x286x128xf32>
    %99 = vector.shape_cast %98 : vector<1x286x128xf32> to vector<286x128xf32>
    %100 = arith.truncf %99 : vector<286x128xf32> to vector<286x128xbf16>
    %c1_72 = arith.constant 1 : index
    %c1_73 = arith.constant 1 : index
    %c0_74 = arith.constant 0 : index
    %101 = vector.load %arg1[%c1_72, %c1_73, %c0_74] : memref<2x324x128xf32, #tpu.memory_space<vmem>>, vector<1x286x128xf32>
    %102 = vector.shape_cast %101 : vector<1x286x128xf32> to vector<286x128xf32>
    %103 = arith.truncf %102 : vector<286x128xf32> to vector<286x128xbf16>
    %c1_75 = arith.constant 1 : index
    %c2_76 = arith.constant 2 : index
    %c0_77 = arith.constant 0 : index
    %104 = vector.load %arg1[%c1_75, %c2_76, %c0_77] : memref<2x324x128xf32, #tpu.memory_space<vmem>>, vector<1x286x128xf32>
    %105 = vector.shape_cast %104 : vector<1x286x128xf32> to vector<286x128xf32>
    %106 = arith.truncf %105 : vector<286x128xf32> to vector<286x128xbf16>
    %c1_78 = arith.constant 1 : index
    %c18_79 = arith.constant 18 : index
    %c0_80 = arith.constant 0 : index
    %107 = vector.load %arg1[%c1_78, %c18_79, %c0_80] : memref<2x324x128xf32, #tpu.memory_space<vmem>>, vector<1x286x128xf32>
    %108 = vector.shape_cast %107 : vector<1x286x128xf32> to vector<286x128xf32>
    %109 = arith.truncf %108 : vector<286x128xf32> to vector<286x128xbf16>
    %c1_81 = arith.constant 1 : index
    %c19_82 = arith.constant 19 : index
    %c0_83 = arith.constant 0 : index
    %110 = vector.load %arg1[%c1_81, %c19_82, %c0_83] : memref<2x324x128xf32, #tpu.memory_space<vmem>>, vector<1x286x128xf32>
    %111 = vector.shape_cast %110 : vector<1x286x128xf32> to vector<286x128xf32>
    %112 = arith.truncf %111 : vector<286x128xf32> to vector<286x128xbf16>
    %c1_84 = arith.constant 1 : index
    %c20_85 = arith.constant 20 : index
    %c0_86 = arith.constant 0 : index
    %113 = vector.load %arg1[%c1_84, %c20_85, %c0_86] : memref<2x324x128xf32, #tpu.memory_space<vmem>>, vector<1x286x128xf32>
    %114 = vector.shape_cast %113 : vector<1x286x128xf32> to vector<286x128xf32>
    %115 = arith.truncf %114 : vector<286x128xf32> to vector<286x128xbf16>
    %c1_87 = arith.constant 1 : index
    %c36_88 = arith.constant 36 : index
    %c0_89 = arith.constant 0 : index
    %116 = vector.load %arg1[%c1_87, %c36_88, %c0_89] : memref<2x324x128xf32, #tpu.memory_space<vmem>>, vector<1x286x128xf32>
    %117 = vector.shape_cast %116 : vector<1x286x128xf32> to vector<286x128xf32>
    %118 = arith.truncf %117 : vector<286x128xf32> to vector<286x128xbf16>
    %c1_90 = arith.constant 1 : index
    %c37_91 = arith.constant 37 : index
    %c0_92 = arith.constant 0 : index
    %119 = vector.load %arg1[%c1_90, %c37_91, %c0_92] : memref<2x324x128xf32, #tpu.memory_space<vmem>>, vector<1x286x128xf32>
    %120 = vector.shape_cast %119 : vector<1x286x128xf32> to vector<286x128xf32>
    %121 = arith.truncf %120 : vector<286x128xf32> to vector<286x128xbf16>
    %c1_93 = arith.constant 1 : index
    %c38_94 = arith.constant 38 : index
    %c0_95 = arith.constant 0 : index
    %122 = vector.load %arg1[%c1_93, %c38_94, %c0_95] : memref<2x324x128xf32, #tpu.memory_space<vmem>>, vector<1x286x128xf32>
    %123 = vector.shape_cast %122 : vector<1x286x128xf32> to vector<286x128xf32>
    %124 = arith.truncf %123 : vector<286x128xf32> to vector<286x128xbf16>
    %125 = tpu.concatenate %100, %103, %106, %109, %112, %115, %118, %121, %124 in 1 : vector<286x128xbf16>, vector<286x128xbf16>, vector<286x128xbf16>, vector<286x128xbf16>, vector<286x128xbf16>, vector<286x128xbf16>, vector<286x128xbf16>, vector<286x128xbf16>, vector<286x128xbf16> -> vector<286x1152xbf16>
    %c0_96 = arith.constant 0 : index
    %c0_97 = arith.constant 0 : index
    %126 = vector.load %arg2[%c0_96, %c0_97] : memref<1152x128xbf16, #tpu.memory_space<vmem>>, vector<1152x128xbf16>
    %cst_98 = arith.constant dense<0.000000e+00> : vector<286x128xf32>
    %127 = tpu.matmul %125, %126, %cst_98 {dimension_numbers = #tpu.dot_dimension_numbers<[1], [0], [0], [1], [0, 0, 1, 1], [], []>} : vector<286x1152xbf16>, vector<1152x128xbf16>, vector<286x128xf32> -> vector<286x128xf32>
    %c0_99 = arith.constant 0 : index
    %c0_100 = arith.constant 0 : index
    %128 = vector.load %arg3[%c0_99, %c0_100] : memref<1x128xf32, #tpu.memory_space<vmem>>, vector<1x128xf32>
    %129 = vector.broadcast %128 : vector<1x128xf32> to vector<286x128xf32>
    %130 = arith.mulf %127, %129 : vector<286x128xf32>
    %c0_101 = arith.constant 0 : index
    %c0_102 = arith.constant 0 : index
    %131 = vector.load %arg4[%c0_101, %c0_102] : memref<1x128xf32, #tpu.memory_space<vmem>>, vector<1x128xf32>
    %132 = vector.broadcast %131 : vector<1x128xf32> to vector<286x128xf32>
    %133 = arith.addf %130, %132 : vector<286x128xf32>
    %cst_103 = arith.constant 0.000000e+00 : f32
    %134 = vector.broadcast %cst_103 : f32 to vector<286x128xf32>
    %135 = arith.maximumf %133, %134 : vector<286x128xf32>
    %136 = tpu.iota {dimensions = array<i32: 0>} : vector<286x1xi32>
    %c19_i32_104 = arith.constant 19 : i32
    %137 = vector.broadcast %c19_i32_104 : i32 to vector<286x1xi32>
    %138 = arith.addi %137, %136 : vector<286x1xi32>
    %c18_i32_105 = arith.constant 18 : i32
    %c0_i32_106 = arith.constant 0 : i32
    %139 = arith.cmpi eq, %c18_i32_105, %c0_i32_106 : i32
    %c1_i32_107 = arith.constant 1 : i32
    %140 = arith.select %139, %c1_i32_107, %c18_i32_105 : i32
    %141 = vector.broadcast %140 : i32 to vector<286x1xi32>
    %142 = arith.remsi %138, %141 : vector<286x1xi32>
    %c0_i32_108 = arith.constant 0 : i32
    %143 = vector.broadcast %c0_i32_108 : i32 to vector<286x1xi32>
    %144 = arith.cmpi ne, %142, %143 : vector<286x1xi32>
    %c0_i32_109 = arith.constant 0 : i32
    %145 = vector.broadcast %c0_i32_109 : i32 to vector<286x1xi32>
    %146 = arith.cmpi slt, %142, %145 : vector<286x1xi32>
    %c0_i32_110 = arith.constant 0 : i32
    %147 = arith.cmpi slt, %140, %c0_i32_110 : i32
    %148 = vector.broadcast %147 : i1 to vector<286x1xi1>
    %149 = vector.broadcast %148 : vector<286x1xi1> to vector<286x1xi1>
    %150 = arith.xori %146, %149 : vector<286x1xi1>
    %151 = arith.andi %150, %144 : vector<286x1xi1>
    %152 = vector.broadcast %140 : i32 to vector<286x1xi32>
    %153 = arith.addi %142, %152 : vector<286x1xi32>
    %154 = arith.select %151, %153, %142 : vector<286x1xi1>, vector<286x1xi32>
    %c1_i32_111 = arith.constant 1 : i32
    %155 = vector.broadcast %c1_i32_111 : i32 to vector<286x1xi32>
    %156 = arith.cmpi sge, %154, %155 : vector<286x1xi32>
    %c16_i32_112 = arith.constant 16 : i32
    %157 = vector.broadcast %c16_i32_112 : i32 to vector<286x1xi32>
    %158 = arith.cmpi sle, %154, %157 : vector<286x1xi32>
    %159 = arith.andi %156, %158 : vector<286x1xi1>
    %cst_113 = arith.constant 0.000000e+00 : f32
    %160 = vector.shape_cast %159 : vector<286x1xi1> to vector<286x1xi1>
    %161 = vector.broadcast %160 : vector<286x1xi1> to vector<286x128xi1>
    %162 = vector.broadcast %cst_113 : f32 to vector<286x128xf32>
    %163 = arith.select %161, %135, %162 : vector<286x128xi1>, vector<286x128xf32>
    %164 = arith.truncf %163 : vector<286x128xf32> to vector<286x128xbf16>
    %c19_114 = arith.constant 19 : index
    %c0_115 = arith.constant 0 : index
    %165 = vector.load %arg9[%c19_114, %c0_115] : memref<324x128xbf16, #tpu.memory_space<vmem>>, vector<286x128xbf16>
    tpu.vector_store %arg9[%c19_114, %c0_115], %164 {strides = array<i32>} : memref<324x128xbf16, #tpu.memory_space<vmem>>, vector<286x128xbf16>,
    %c0_116 = arith.constant 0 : index
    %c0_117 = arith.constant 0 : index
    %166 = vector.load %arg9[%c0_116, %c0_117] : memref<324x128xbf16, #tpu.memory_space<vmem>>, vector<286x128xbf16>
    %c1_118 = arith.constant 1 : index
    %c0_119 = arith.constant 0 : index
    %167 = vector.load %arg9[%c1_118, %c0_119] : memref<324x128xbf16, #tpu.memory_space<vmem>>, vector<286x128xbf16>
    %c2_120 = arith.constant 2 : index
    %c0_121 = arith.constant 0 : index
    %168 = vector.load %arg9[%c2_120, %c0_121] : memref<324x128xbf16, #tpu.memory_space<vmem>>, vector<286x128xbf16>
    %c18_122 = arith.constant 18 : index
    %c0_123 = arith.constant 0 : index
    %169 = vector.load %arg9[%c18_122, %c0_123] : memref<324x128xbf16, #tpu.memory_space<vmem>>, vector<286x128xbf16>
    %c19_124 = arith.constant 19 : index
    %c0_125 = arith.constant 0 : index
    %170 = vector.load %arg9[%c19_124, %c0_125] : memref<324x128xbf16, #tpu.memory_space<vmem>>, vector<286x128xbf16>
    %c20_126 = arith.constant 20 : index
    %c0_127 = arith.constant 0 : index
    %171 = vector.load %arg9[%c20_126, %c0_127] : memref<324x128xbf16, #tpu.memory_space<vmem>>, vector<286x128xbf16>
    %c36_128 = arith.constant 36 : index
    %c0_129 = arith.constant 0 : index
    %172 = vector.load %arg9[%c36_128, %c0_129] : memref<324x128xbf16, #tpu.memory_space<vmem>>, vector<286x128xbf16>
    %c37_130 = arith.constant 37 : index
    %c0_131 = arith.constant 0 : index
    %173 = vector.load %arg9[%c37_130, %c0_131] : memref<324x128xbf16, #tpu.memory_space<vmem>>, vector<286x128xbf16>
    %c38_132 = arith.constant 38 : index
    %c0_133 = arith.constant 0 : index
    %174 = vector.load %arg9[%c38_132, %c0_133] : memref<324x128xbf16, #tpu.memory_space<vmem>>, vector<286x128xbf16>
    %175 = tpu.concatenate %166, %167, %168, %169, %170, %171, %172, %173, %174 in 1 : vector<286x128xbf16>, vector<286x128xbf16>, vector<286x128xbf16>, vector<286x128xbf16>, vector<286x128xbf16>, vector<286x128xbf16>, vector<286x128xbf16>, vector<286x128xbf16>, vector<286x128xbf16> -> vector<286x1152xbf16>
    %c0_134 = arith.constant 0 : index
    %c0_135 = arith.constant 0 : index
    %176 = vector.load %arg5[%c0_134, %c0_135] : memref<1152x128xbf16, #tpu.memory_space<vmem>>, vector<1152x128xbf16>
    %cst_136 = arith.constant dense<0.000000e+00> : vector<286x128xf32>
    %177 = tpu.matmul %175, %176, %cst_136 {dimension_numbers = #tpu.dot_dimension_numbers<[1], [0], [0], [1], [0, 0, 1, 1], [], []>} : vector<286x1152xbf16>, vector<1152x128xbf16>, vector<286x128xf32> -> vector<286x128xf32>
    %c0_137 = arith.constant 0 : index
    %c0_138 = arith.constant 0 : index
    %178 = vector.load %arg6[%c0_137, %c0_138] : memref<1x128xf32, #tpu.memory_space<vmem>>, vector<1x128xf32>
    %179 = vector.broadcast %178 : vector<1x128xf32> to vector<286x128xf32>
    %180 = arith.mulf %177, %179 : vector<286x128xf32>
    %c0_139 = arith.constant 0 : index
    %c0_140 = arith.constant 0 : index
    %181 = vector.load %arg7[%c0_139, %c0_140] : memref<1x128xf32, #tpu.memory_space<vmem>>, vector<1x128xf32>
    %182 = vector.broadcast %181 : vector<1x128xf32> to vector<286x128xf32>
    %183 = arith.addf %180, %182 : vector<286x128xf32>
    %c1_141 = arith.constant 1 : index
    %c19_142 = arith.constant 19 : index
    %c0_143 = arith.constant 0 : index
    %184 = vector.load %arg1[%c1_141, %c19_142, %c0_143] : memref<2x324x128xf32, #tpu.memory_space<vmem>>, vector<1x286x128xf32>
    %185 = vector.shape_cast %184 : vector<1x286x128xf32> to vector<286x128xf32>
    %186 = arith.addf %183, %185 : vector<286x128xf32>
    %cst_144 = arith.constant 0.000000e+00 : f32
    %187 = vector.broadcast %cst_144 : f32 to vector<286x128xf32>
    %188 = arith.maximumf %186, %187 : vector<286x128xf32>
    %c1_145 = arith.constant 1 : index
    %c0_146 = arith.constant 0 : index
    %c0_147 = arith.constant 0 : index
    %189 = vector.load %arg8[%c1_145, %c0_146, %c0_147] : memref<2x286x128xf32, #tpu.memory_space<vmem>>, vector<1x286x128xf32>
    %190 = vector.shape_cast %189 : vector<1x286x128xf32> to vector<286x128xf32>
    %191 = vector.shape_cast %188 : vector<286x128xf32> to vector<1x286x128xf32>
    tpu.vector_store %arg8[%c1_145, %c0_146, %c0_147], %191 {strides = array<i32>} : memref<2x286x128xf32, #tpu.memory_space<vmem>>, vector<1x286x128xf32>,
    return
  }
  func.func @transform_0(%arg0: i32) -> (i32, i32, i32) {
    %c0_i32 = arith.constant 0 : i32
    %c0_i32_0 = arith.constant 0 : i32
    %c0_i32_1 = arith.constant 0 : i32
    return %arg0, %c0_i32, %c0_i32_0 : i32, i32, i32
  }
  func.func @transform_1(%arg0: i32) -> (i32, i32) {
    %c0_i32 = arith.constant 0 : i32
    %c0_i32_0 = arith.constant 0 : i32
    %c0_i32_1 = arith.constant 0 : i32
    return %c0_i32, %c0_i32_0 : i32, i32
  }
  func.func @transform_2(%arg0: i32) -> (i32, i32) {
    %c0_i32 = arith.constant 0 : i32
    %c0_i32_0 = arith.constant 0 : i32
    %c0_i32_1 = arith.constant 0 : i32
    return %c0_i32, %c0_i32_0 : i32, i32
  }
  func.func @transform_3(%arg0: i32) -> (i32, i32) {
    %c0_i32 = arith.constant 0 : i32
    %c0_i32_0 = arith.constant 0 : i32
    %c0_i32_1 = arith.constant 0 : i32
    return %c0_i32, %c0_i32_0 : i32, i32
  }
  func.func @transform_4(%arg0: i32) -> (i32, i32) {
    %c0_i32 = arith.constant 0 : i32
    %c0_i32_0 = arith.constant 0 : i32
    %c0_i32_1 = arith.constant 0 : i32
    return %c0_i32, %c0_i32_0 : i32, i32
  }
  func.func @transform_5(%arg0: i32) -> (i32, i32) {
    %c0_i32 = arith.constant 0 : i32
    %c0_i32_0 = arith.constant 0 : i32
    %c0_i32_1 = arith.constant 0 : i32
    return %c0_i32, %c0_i32_0 : i32, i32
  }
  func.func @transform_6(%arg0: i32) -> (i32, i32) {
    %c0_i32 = arith.constant 0 : i32
    %c0_i32_0 = arith.constant 0 : i32
    %c0_i32_1 = arith.constant 0 : i32
    return %c0_i32, %c0_i32_0 : i32, i32
  }
  func.func @transform_7(%arg0: i32) -> (i32, i32, i32) {
    %c0_i32 = arith.constant 0 : i32
    %c0_i32_0 = arith.constant 0 : i32
    %c0_i32_1 = arith.constant 0 : i32
    return %arg0, %c0_i32, %c0_i32_0 : i32, i32, i32
  }
}

</mosaic_0001>

<bundles_post_ra>
// kernel: basic_block_forward.1
= control target key start
LH: loop header
LB: loop body
LE: loop exit
PB: predicated region body
PF: predicated region fallthrough
CT: control target
= control target key end

     0   :  { %v20304_v0 = vmov 0   ;;  %vm29_vm0 = vcmask 1041408   ;;  %vm20307_vm1 = vsmask.f32 1280  ;;  %s20296_s1 = inlined_call_operand.vmem [shape: bf16[1152,128], index: 1, kind: input, shape index: {}]   ;;  %s20297_s0 = inlined_call_operand.vmem [shape: f32[2,324,128], index: 0, kind: input, shape index: {}]   ;;  %s20298_s4 = inlined_call_operand.vmem [shape: bf16[1152,128], index: 4, kind: input, shape index: {}]   ;;  %s20299_s2 = inlined_call_operand.vmem [shape: f32[1,128], index: 2, kind: input, shape index: {}]   ;;  %s20300_s3 = inlined_call_operand.vmem [shape: f32[1,128], index: 3, kind: input, shape index: {}]   ;;  %s20301_s5 = inlined_call_operand.vmem [shape: f32[1,128], index: 5, kind: input, shape index: {}]   ;;  %s20302_s6 = inlined_call_operand.vmem [shape: f32[1,128], index: 6, kind: input, shape index: {}]   ;;  %s20303_s7 = inlined_call_operand.vmem [shape: f32[2,286,128], index: 7, kind: output, shape index: {}]  }
   0x1   :  { %1007 = vmatprep.subr.bf16.mxu0 %v20304_v0  ;;  %27 = vst [vmem:[#allocation2] sm:$0xf] %v20304_v0  ;;  %28 = vst [vmem:[#allocation2 + $0x4] sm:$0xf] %v20304_v0  ;;  %1184 = vmatprep.subr.bf16.mxu1 %v20304_v0  ;;  %v12083_v1 = vld [vmem:[%s20296_s1 + $0x38] sm:$0xff]   ;;  %v12085_v3 = vld [vmem:[%s20296_s1 + $0x30] sm:$0xff]  }
   0x2   :  { %41 = vst [vmem:[#allocation2 + $0x9c] sm:$0xf] %v20304_v0  ;;  %42 = vst [vmem:[#allocation2 + $0xa0] sm:$0x3] %v20304_v0  ;;  %v12084_v2 = vld [vmem:[%s20296_s1 + $0xb8] sm:$0xff]   ;;  %1008 = vmatpush1.bf16.msra.mxu0 %v12083_v1  ;;  %v12086_v4 = vld [vmem:[%s20296_s1 + $0xb0] sm:$0xff]  }
   0x3   :  { %1185 = vmatpush1.bf16.msra.mxu1 %v12084_v2  ;;  %1009 = vmatprep.subr.bf16.mxu0 %v20304_v0  ;;  %v12087_v5 = vld [vmem:[%s20296_s1 + $0x28] sm:$0xff]   ;;  %v12089_v7 = vld [vmem:[%s20296_s1 + $0x20] sm:$0xff]   ;;  %v12091_v9 = vld [vmem:[%s20296_s1 + $0x18] sm:$0xff]  }
   0x4   :  { %1186 = vmatprep.subr.bf16.mxu1 %v20304_v0  ;;  %v12088_v6 = vld [vmem:[%s20296_s1 + $0xa8] sm:$0xff]   ;;  %v12090_v8 = vld [vmem:[%s20296_s1 + $0xa0] sm:$0xff]   ;;  %v12092_v10 = vld [vmem:[%s20296_s1 + $0x98] sm:$0xff]  }
   0x5   :  { %v12093_v11 = vld [vmem:[%s20296_s1 + $0x10] sm:$0xff]   ;;  %v12095_v13 = vld [vmem:[%s20296_s1 + $0x8] sm:$0xff]   ;;  %v12097_v15 = vld [vmem:[%s20296_s1] sm:$0xff]  }
   0x6   :  { %1010 = vmatpush1.bf16.msra.mxu0 %v12085_v3  ;;  %v12094_v12 = vld [vmem:[%s20296_s1 + $0x90] sm:$0xff]   ;;  %v12096_v14 = vld [vmem:[%s20296_s1 + $0x88] sm:$0xff]   ;;  %v12098_v16 = vld [vmem:[%s20296_s1 + $0x80] sm:$0xff]  }
   0x7   :  { %1187 = vmatpush1.bf16.msra.mxu1 %v12086_v4  ;;  %1011 = vmatprep.subr.bf16.mxu0 %v20304_v0  ;;  %v12099_v17 = vld [vmem:[%s20296_s1 + $0x78] sm:$0xff]   ;;  %v97_v19 = vld [vmem:[%s20297_s0 + $0x1] sm:$0xff]  ;;  %v98_v20 = vld [vmem:[%s20297_s0 + $0x9] sm:$0xff] }
   0x8   :  { %1188 = vmatprep.subr.bf16.mxu1 %v20304_v0  ;;  %v12100_v18 = vld [vmem:[%s20296_s1 + $0xf8] sm:$0xff]   ;;  %v133_v22 = vpack.c.bf16 %v98_v20, %v97_v19  ;;  %v12101_v24 = vld [vmem:[%s20296_s1 + $0x70] sm:$0xff]   ;;  %v12103_v27 = vld [vmem:[%s20296_s1 + $0x68] sm:$0xff]  }
   0x9   :  { %v153_v21 = vld [vmem:[%s20297_s0 + $0x12] sm:$0xff]  ;;  %v154_v23 = vld [vmem:[%s20297_s0 + $0x1a] sm:$0xff]  ;;  %v12104_v28 = vld [vmem:[%s20296_s1 + $0xe8] sm:$0xff]  }
   0xa   :  { %1012 = vmatpush1.bf16.msra.mxu0 %v12087_v5  ;;  %v12598_v25 = vpack.c.bf16 %v154_v23, %v153_v21  ;;  %v12102_v26 = vld [vmem:[%s20296_s1 + $0xf0] sm:$0xff]   ;;  %1039 = vmatprep.mubr.bf16.mxu0 %v133_v22  ;;  %v12105_v29 = vld [vmem:[%s20296_s1 + $0x60] sm:$0xff]   ;;  %v12107_v31 = vld [vmem:[%s20296_s1 + $0x58] sm:$0xff]  }
   0xb   :  { %1189 = vmatpush1.bf16.msra.mxu1 %v12088_v6  ;;  %1013 = vmatprep.subr.bf16.mxu0 %v20304_v0  ;;  %v12106_v30 = vld [vmem:[%s20296_s1 + $0xe0] sm:$0xff]   ;;  %v12108_v32 = vld [vmem:[%s20296_s1 + $0xd8] sm:$0xff]   ;;  %v12109_v33 = vld [vmem:[%s20296_s1 + $0x50] sm:$0xff]  }
   0xc   :  { %1190 = vmatprep.subr.bf16.mxu1 %v20304_v0  ;;  %1216 = vmatprep.mubr.bf16.mxu1 %v12598_v25  ;;  %v12110_v34 = vld [vmem:[%s20296_s1 + $0xd0] sm:$0xff]   ;;  %v12111_v35 = vld [vmem:[%s20296_s1 + $0x48] sm:$0xff]   ;;  %v12113_v37 = vld [vmem:[%s20296_s1 + $0x40] sm:$0xff]  }
   0xd   :  { %v12112_v36 = vld [vmem:[%s20296_s1 + $0xc8] sm:$0xff]   ;;  %v12114_v38 = vld [vmem:[%s20296_s1 + $0xc0] sm:$0xff]   ;;  %v99_v43 = vld [vmem:[%s20297_s0 + $0x11] sm:$0xff] }
   0xe   :  { %1014 = vmatpush1.bf16.msra.mxu0 %v12089_v7  ;;  %v43_v39 = vld [vmem:[%s20297_s0] sm:$0xff]  ;;  %v44_v40 = vld [vmem:[%s20297_s0 + $0x8] sm:$0xff]  ;;  %v12115_v49 = vld [vmem:[%s20296_s1 + $0x138] sm:$0xff]  }
   0xf   :  { %1191 = vmatpush1.bf16.msra.mxu1 %v12090_v8  ;;  %1015 = vmatprep.subr.bf16.mxu0 %v20304_v0  ;;  %v151_v41 = vld [vmem:[%s20297_s0 + $0x2] sm:$0xff]  ;;  %v152_v42 = vld [vmem:[%s20297_s0 + $0xa] sm:$0xff]  ;;  %v100_v44 = vld [vmem:[%s20297_s0 + $0x19] sm:$0xff]  ;;  %v79_v47 = vpack.c.bf16 %v44_v40, %v43_v39 }
  0x10   :  { %1192 = vmatprep.subr.bf16.mxu1 %v20304_v0  ;;  %v155_v45 = vld [vmem:[%s20297_s0 + $0x22] sm:$0xff]  ;;  %v156_v46 = vld [vmem:[%s20297_s0 + $0x2a] sm:$0xff]  ;;  %v187_v48 = vpack.c.bf16 %v152_v42, %v151_v41  ;;  %v134_v50 = vpack.c.bf16 %v100_v44, %v99_v43  ;;  %v46_v53 = vld [vmem:[%s20297_s0 + $0x18] sm:$0xff] }
  0x11   :  { %v189_v51 = vpack.c.bf16 %v156_v46, %v155_v45  ;;  %v45_v52 = vld [vmem:[%s20297_s0 + $0x10] sm:$0xff]  ;;  %v12125_v54 = vld [vmem:[%s20296_s1 + $0x1b8] sm:$0xff]   ;;  %v101_v56 = vld [vmem:[%s20297_s0 + $0x21] sm:$0xff] }
  0x12   :  { %1016 = vmatpush1.bf16.msra.mxu0 %v12091_v9  ;;  %v12116_v55 = vld [vmem:[%s20296_s1 + $0x130] sm:$0xff]   ;;  %v158_v59 = vld [vmem:[%s20297_s0 + $0x3a] sm:$0xff]  ;;  %v80_v61 = vpack.c.bf16 %v46_v53, %v45_v52  ;;  %v12117_v1 = vld [vmem:[%s20296_s1 + $0x128] sm:$0xff]  }
  0x13   :  { %1193 = vmatpush1.bf16.msra.mxu1 %v12092_v10  ;;  %1017 = vmatprep.subr.bf16.mxu0 %v20304_v0  ;;  %v102_v57 = vld [vmem:[%s20297_s0 + $0x29] sm:$0xff]  ;;  %v157_v58 = vld [vmem:[%s20297_s0 + $0x32] sm:$0xff]  ;;  %v47_v3 = vld [vmem:[%s20297_s0 + $0x20] sm:$0xff] }
  0x14   :  { %1194 = vmatprep.subr.bf16.mxu1 %v20304_v0  ;;  %v12126_v60 = vld [vmem:[%s20296_s1 + $0x1b0] sm:$0xff]   ;;  %v135_v62 = vpack.c.bf16 %v102_v57, %v101_v56  ;;  %v190_v63 = vpack.c.bf16 %v158_v59, %v157_v58  ;;  %v12128_v2 = vld [vmem:[%s20296_s1 + $0x1a8] sm:$0xff]   ;;  %v104_v6 = vld [vmem:[%s20297_s0 + $0x39] sm:$0xff] }
  0x15   :  { %v48_v4 = vld [vmem:[%s20297_s0 + $0x28] sm:$0xff]  ;;  %v103_v5 = vld [vmem:[%s20297_s0 + $0x31] sm:$0xff]  ;;  %v12118_v7 = vld [vmem:[%s20296_s1 + $0x120] sm:$0xff]  }
  0x16   :  { %1018 = vmatpush1.bf16.msra.mxu0 %v12093_v11  ;;  %v159_v8 = vld [vmem:[%s20297_s0 + $0x42] sm:$0xff]  ;;  %v160_v9 = vld [vmem:[%s20297_s0 + $0x4a] sm:$0xff]  ;;  %v81_v11 = vpack.c.bf16 %v48_v4, %v47_v3  ;;  %v161_v20 = vld [vmem:[%s20297_s0 + $0x52] sm:$0xff] }
  0x17   :  { %1195 = vmatpush1.bf16.msra.mxu1 %v12094_v12  ;;  %1019 = vmatprep.subr.bf16.mxu0 %v20304_v0  ;;  %v12129_v10 = vld [vmem:[%s20296_s1 + $0x1a0] sm:$0xff]   ;;  %v136_v12 = vpack.c.bf16 %v104_v6, %v103_v5  ;;  %v106_v19 = vld [vmem:[%s20297_s0 + $0x49] sm:$0xff]  ;;  %v12123_v40 = vld [vmem:[%s20296_s1 + $0x178] sm:$0xff]  }
  0x18   :  { %1196 = vmatprep.subr.bf16.mxu1 %v20304_v0  ;;  %v162_v21 = vld [vmem:[%s20297_s0 + $0x5a] sm:$0xff]  ;;  %v12120_v22 = vld [vmem:[%s20296_s1 + $0x110] sm:$0xff]   ;;  %v12127_v53 = vld [vmem:[%s20296_s1 + $0x168] sm:$0xff]  }
  0x19   :  { %v12132_v23 = vld [vmem:[%s20296_s1 + $0x190] sm:$0xff]   ;;  %v12136_v42 = vld [vmem:[%s20296_s1 + $0x1f8] sm:$0xff]   ;;  %v109_v44 = vld [vmem:[%s20297_s0 + $0x61] sm:$0xff] }
  0x1a   :  { %1020 = vmatpush1.bf16.msra.mxu0 %v12095_v13  ;;  %v191_v13 = vpack.c.bf16 %v160_v9, %v159_v8  ;;  %v53_v41 = vld [vmem:[%s20297_s0 + $0x50] sm:$0xff]  ;;  %v54_v43 = vld [vmem:[%s20297_s0 + $0x58] sm:$0xff]  ;;  %v56_v56 = vld [vmem:[%s20297_s0 + $0x68] sm:$0xff] }
  0x1b   :  { %1197 = vmatpush1.bf16.msra.mxu1 %v12096_v14  ;;  %1021 = vmatprep.subr.bf16.mxu0 %v20304_v0  ;;  %v12119_v14 = vld [vmem:[%s20296_s1 + $0x118] sm:$0xff]   ;;  %v110_v45 = vld [vmem:[%s20297_s0 + $0x69] sm:$0xff]  ;;  %vm31_vm2 = vmand %vm29_vm0, %vm20307_vm1 }
  0x1c   :  { %1198 = vmatprep.subr.bf16.mxu1 %v20304_v0  ;;  %v165_v46 = vld [vmem:[%s20297_s0 + $0x72] sm:$0xff]  ;;  %v167_v59 = vld [vmem:[%s20297_s0 + $0x82] sm:$0xff] }
  0x1d   :  { %v111_v57 = vld [vmem:[%s20297_s0 + $0x71] sm:$0xff]  ;;  %v112_v58 = vld [vmem:[%s20297_s0 + $0x79] sm:$0xff]  ;;  %v114_v8 = vld [vmem:[%s20297_s0 + $0x89] sm:$0xff] }
  0x1e   :  { %1022 = vmatpush1.bf16.msra.mxu0 %v12097_v15  ;;  %v49_v15 = vld [vmem:[%s20297_s0 + $0x30] sm:$0xff]  ;;  %v12134_v3 = vld [vmem:[%s20296_s1 + $0x158] sm:$0xff]  }
  0x1f   :  { %1199 = vmatpush1.bf16.msra.mxu1 %v12098_v16  ;;  %1023 = vmatprep.subr.bf16.mxu0 %v20304_v0  ;;  %v12130_v16 = vld [vmem:[%s20296_s1 + $0x198] sm:$0xff]   ;;  %v57_v4 = vld [vmem:[%s20297_s0 + $0x70] sm:$0xff] }
  0x20   :  { %1200 = vmatprep.subr.bf16.mxu1 %v20304_v0  ;;  %v58_v5 = vld [vmem:[%s20297_s0 + $0x78] sm:$0xff] }
  0x21   :  { %v12142_v6 = vld [vmem:[%s20296_s1 + $0x1d8] sm:$0xff]  }
  0x22   :  { %1024 = vmatpush2.bf16.msra.mxu0 %v12099_v17  ;;  %v50_v17 = vld [vmem:[%s20297_s0 + $0x38] sm:$0xff] }
  0x23   :  { %1201 = vmatpush2.bf16.msra.mxu1 %v12100_v18  ;;  %1025 = vmatprep.subr.bf16.mxu0 %v20304_v0  ;;  %v105_v18 = vld [vmem:[%s20297_s0 + $0x41] sm:$0xff]  ;;  %v169_v9 = vld [vmem:[%s20297_s0 + $0x92] sm:$0xff] }
  0x24   :  { %1202 = vmatprep.subr.bf16.mxu1 %v20304_v0 }
  0x26   :  { %1026 = vmatpush2.bf16.msra.mxu0 %v12101_v24  ;;  %v82_v24 = vpack.c.bf16 %v50_v17, %v49_v15  ;;  %v59_v17 = vld [vmem:[%s20297_s0 + $0x80] sm:$0xff] }
  0x27   :  { %1203 = vmatpush2.bf16.msra.mxu1 %v12102_v26  ;;  %1027 = vmatprep.subr.bf16.mxu0 %v20304_v0  ;;  %v192_v26 = vpack.c.bf16 %v162_v21, %v161_v20  ;;  %v115_v20 = vld [vmem:[%s20297_s0 + $0x91] sm:$0xff]  ;;  %v116_v21 = vld [vmem:[%s20297_s0 + $0x99] sm:$0xff] }
  0x28   :  { %1204 = vmatprep.subr.bf16.mxu1 %v20304_v0 }
  0x2a   :  { %1028 = vmatpush2.bf16.msra.mxu0 %v12103_v27  ;;  %v12121_v27 = vld [vmem:[%s20296_s1 + $0x108] sm:$0xff]  }
  0x2b   :  { %1205 = vmatpush2.bf16.msra.mxu1 %v12104_v28  ;;  %1029 = vmatprep.subr.bf16.mxu0 %v20304_v0  ;;  %v51_v28 = vld [vmem:[%s20297_s0 + $0x40] sm:$0xff] }
  0x2c   :  { %1206 = vmatprep.subr.bf16.mxu1 %v20304_v0 }
  0x2e   :  { %1030 = vmatpush2.bf16.msra.mxu0 %v12105_v29  ;;  %v12133_v29 = vld [vmem:[%s20296_s1 + $0x188] sm:$0xff]  }
  0x2f   :  { %1207 = vmatpush2.bf16.msra.mxu1 %v12106_v30  ;;  %1031 = vmatprep.subr.bf16.mxu0 %v20304_v0  ;;  %v52_v30 = vld [vmem:[%s20297_s0 + $0x48] sm:$0xff] }
  0x30   :  { %1208 = vmatprep.subr.bf16.mxu1 %v20304_v0 }
  0x32   :  { %1032 = vmatpush2.bf16.msra.mxu0 %v12107_v31  ;;  %v107_v31 = vld [vmem:[%s20297_s0 + $0x51] sm:$0xff] }
  0x33   :  { %1209 = vmatpush2.bf16.msra.mxu1 %v12108_v32  ;;  %1033 = vmatprep.subr.bf16.mxu0 %v20304_v0  ;;  %v108_v32 = vld [vmem:[%s20297_s0 + $0x59] sm:$0xff] }
  0x34   :  { %1210 = vmatprep.subr.bf16.mxu1 %v20304_v0 }
  0x36   :  { %1034 = vmatpush2.bf16.msra.mxu0 %v12109_v33  ;;  %v163_v33 = vld [vmem:[%s20297_s0 + $0x62] sm:$0xff] }
  0x37   :  { %1211 = vmatpush2.bf16.msra.mxu1 %v12110_v34  ;;  %1035 = vmatprep.subr.bf16.mxu0 %v20304_v0  ;;  %v164_v34 = vld [vmem:[%s20297_s0 + $0x6a] sm:$0xff] }
  0x38   :  { %1212 = vmatprep.subr.bf16.mxu1 %v20304_v0  ;;  %v193_v39 = vpack.c.bf16 %v164_v34, %v163_v33  ;;  %v118_v33 = vld [vmem:[%s20297_s0 + $0xa9] sm:$0xff]  ;;  %v173_v34 = vld [vmem:[%s20297_s0 + $0xb2] sm:$0xff] }
  0x3a   :  { %1036 = vmatpush2.bf16.msra.mxu0 %v12111_v35  ;;  %v12122_v35 = vld [vmem:[%s20296_s1 + $0x100] sm:$0xff]  }
  0x3b   :  { %1213 = vmatpush2.bf16.msra.mxu1 %v12112_v36  ;;  %1037 = vmatprep.subr.bf16.mxu0 %v20304_v0  ;;  %v12135_v36 = vld [vmem:[%s20296_s1 + $0x180] sm:$0xff]  }
  0x3c   :  { %1214 = vmatprep.subr.bf16.mxu1 %v20304_v0 }
  0x3e   :  { %1038 = vmatpush2.bf16.msra.mxu0 %v12113_v37  ;;  %v83_v37 = vpack.c.bf16 %v52_v30, %v51_v28  ;;  %v142_v28 = vpack.c.bf16 %v116_v21, %v115_v20  ;;  %v61_v30 = vld [vmem:[%s20297_s0 + $0x90] sm:$0xff] }
  0x3f   :  { %1215 = vmatpush2.bf16.msra.mxu1 %v12114_v38  ;;  %1361 = vmatprep.subr.bf16.mxu0 %v20304_v0  ;;  %v138_v38 = vpack.c.bf16 %v108_v32, %v107_v31  ;;  %v62_v31 = vld [vmem:[%s20297_s0 + $0x98] sm:$0xff]  ;;  %v117_v32 = vld [vmem:[%s20297_s0 + $0xa1] sm:$0xff]  ;;  %v73_v21 = vld [vmem:[%s20297_s0 + $0xf0] sm:$0xff] }
  0x40   :  { %1538 = vmatprep.subr.bf16.mxu1 %v20304_v0 }
  0x41   :  { %1040 = vmatmul.mubr.bf16.vlgmr.msra.gmra.mxu0 %v79_v47  ;;  %v12124_v47 = vld [vmem:[%s20296_s1 + $0x170] sm:$0xff]  }
  0x42   :  { %1217 = vmatmul.mubr.bf16.vlgmr.msra.gmra.mxu1 %v187_v48  ;;  %1362 = vmatpush1.bf16.msra.mxu0 %v12115_v49  ;;  %v166_v48 = vld [vmem:[%s20297_s0 + $0x7a] sm:$0xff]  ;;  %v12138_v49 = vld [vmem:[%s20296_s1 + $0x1f0] sm:$0xff]  }
  0x43   :  { %1047 = vmatprep.mubr.bf16.mxu0 %v134_v50  ;;  %1224 = vmatprep.mubr.bf16.mxu1 %v189_v51  ;;  %v84_v50 = vpack.c.bf16 %v54_v43, %v53_v41  ;;  %v194_v52 = vpack.c.bf16 %v166_v48, %v165_v46  ;;  %v119_v41 = vld [vmem:[%s20297_s0 + $0xb1] sm:$0xff]  ;;  %v175_v43 = vld [vmem:[%s20297_s0 + $0xc2] sm:$0xff] }
  0x44   :  { %1363 = vmatprep.subr.bf16.mxu0 %v20304_v0  ;;  %1539 = vmatpush1.bf16.msra.mxu1 %v12125_v54  ;;  %v12139_v54 = vld [vmem:[%s20296_s1 + $0x1e8] sm:$0xff]   ;;  %v65_v48 = vld [vmem:[%s20297_s0 + $0xb0] sm:$0xff] }
  0x45   :  { %1540 = vmatprep.subr.bf16.mxu1 %v20304_v0 }
  0x46   :  { %1364 = vmatpush1.bf16.msra.mxu0 %v12116_v55  ;;  %v55_v55 = vld [vmem:[%s20297_s0 + $0x60] sm:$0xff] }
  0x47   :  { %1365 = vmatprep.subr.bf16.mxu0 %v20304_v0 }
  0x48   :  { %1541 = vmatpush1.bf16.msra.mxu1 %v12126_v60  ;;  %v12131_v60 = vld [vmem:[%s20296_s1 + $0x160] sm:$0xff]  }
  0x49   :  { %1048 = vmatmul.mubr.bf16.gmra.mxu0 %v80_v61  ;;  %1542 = vmatprep.subr.bf16.mxu1 %v20304_v0  ;;  %v168_v61 = vld [vmem:[%s20297_s0 + $0x8a] sm:$0xff] }
  0x4a   :  { %1225 = vmatmul.mubr.bf16.gmra.mxu1 %v12598_v25  ;;  %1055 = vmatprep.mubr.bf16.mxu0 %v135_v62  ;;  %v137_v25 = vpack.c.bf16 %v106_v19, %v105_v18  ;;  %v12141_v62 = vld [vmem:[%s20296_s1 + $0x1e0] sm:$0xff]   ;;  %v60_v18 = vld [vmem:[%s20297_s0 + $0x88] sm:$0xff] }
  0x4b   :  { %1232 = vmatprep.mubr.bf16.mxu1 %v190_v63  ;;  %1366 = vmatpush1.bf16.msra.mxu0 %v12117_v1  ;;  %v140_v1 = vpack.c.bf16 %v112_v58, %v111_v57  ;;  %v12145_v19 = vld [vmem:[%s20296_s1 + $0x1c8] sm:$0xff]   ;;  %v67_v57 = vld [vmem:[%s20297_s0 + $0xc0] sm:$0xff] }
  0x4c   :  { %1367 = vmatprep.subr.bf16.mxu0 %v20304_v0  ;;  %1543 = vmatpush1.bf16.msra.mxu1 %v12128_v2  ;;  %v195_v2 = vpack.c.bf16 %v168_v61, %v167_v59  ;;  %v68_v58 = vld [vmem:[%s20297_s0 + $0xc8] sm:$0xff]  ;;  %v123_v59 = vld [vmem:[%s20297_s0 + $0xd1] sm:$0xff] }
  0x4d   :  { %1544 = vmatprep.subr.bf16.mxu1 %v20304_v0  ;;  %v179_v61 = vld [vmem:[%s20297_s0 + $0xe2] sm:$0xff] }
  0x4f   :  { %1368 = vmatpush1.bf16.msra.mxu0 %v12118_v7  ;;  %v113_v7 = vld [vmem:[%s20297_s0 + $0x81] sm:$0xff] }
  0x50   :  { %1369 = vmatprep.subr.bf16.mxu0 %v20304_v0  ;;  %1545 = vmatpush1.bf16.msra.mxu1 %v12129_v10  ;;  %v170_v10 = vld [vmem:[%s20297_s0 + $0x9a] sm:$0xff]  ;;  %v141_v15 = vpack.c.bf16 %v114_v8, %v113_v7  ;;  %v181_v7 = vld [vmem:[%s20297_s0 + $0xf2] sm:$0xff] }
  0x51   :  { %1056 = vmatmul.mubr.bf16.gmra.mxu0 %v81_v11  ;;  %1546 = vmatprep.subr.bf16.mxu1 %v20304_v0  ;;  %v12137_v11 = vld [vmem:[%s20296_s1 + $0x150] sm:$0xff]   ;;  %v182_v8 = vld [vmem:[%s20297_s0 + $0xfa] sm:$0xff] }
  0x52   :  { %1233 = vmatmul.mubr.bf16.gmra.mxu1 %v189_v51  ;;  %1063 = vmatprep.mubr.bf16.mxu0 %v136_v12  ;;  %v139_v51 = vpack.c.bf16 %v110_v45, %v109_v44  ;;  %v12143_v12 = vld [vmem:[%s20296_s1 + $0x1d0] sm:$0xff]  }
  0x53   :  { %1240 = vmatprep.mubr.bf16.mxu1 %v191_v13  ;;  %1370 = vmatpush1.bf16.msra.mxu0 %v12119_v14  ;;  %v12140_v14 = vld [vmem:[%s20296_s1 + $0x148] sm:$0xff]  }
  0x54   :  { %1371 = vmatprep.subr.bf16.mxu0 %v20304_v0  ;;  %1547 = vmatpush1.bf16.msra.mxu1 %v12130_v16  ;;  %v196_v16 = vpack.c.bf16 %v170_v10, %v169_v9  ;;  %v176_v44 = vld [vmem:[%s20297_s0 + $0xca] sm:$0xff] }
  0x55   :  { %1548 = vmatprep.subr.bf16.mxu1 %v20304_v0 }
  0x57   :  { %1372 = vmatpush1.bf16.msra.mxu0 %v12120_v22  ;;  %v12144_v22 = vld [vmem:[%s20296_s1 + $0x140] sm:$0xff]  }
  0x58   :  { %1373 = vmatprep.subr.bf16.mxu0 %v20304_v0  ;;  %1549 = vmatpush1.bf16.msra.mxu1 %v12132_v23  ;;  %v171_v23 = vld [vmem:[%s20297_s0 + $0xa2] sm:$0xff] }
  0x59   :  { %1064 = vmatmul.mubr.bf16.gmra.mxu0 %v82_v24  ;;  %1550 = vmatprep.subr.bf16.mxu1 %v20304_v0  ;;  %v172_v24 = vld [vmem:[%s20297_s0 + $0xaa] sm:$0xff] }
  0x5a   :  { %1241 = vmatmul.mubr.bf16.gmra.mxu1 %v190_v63  ;;  %1071 = vmatprep.mubr.bf16.mxu0 %v137_v25  ;;  %v85_v63 = vpack.c.bf16 %v56_v56, %v55_v55  ;;  %v12146_v25 = vld [vmem:[%s20296_s1 + $0x1c0] sm:$0xff]  }
  0x5b   :  { %1248 = vmatprep.mubr.bf16.mxu1 %v192_v26  ;;  %1374 = vmatpush1.bf16.msra.mxu0 %v12121_v27  ;;  %v87_v27 = vpack.c.bf16 %v60_v18, %v59_v17  ;;  %v184_v17 = vld [vmem:[%s20297_s0 + $0x10a] sm:$0xff] }
  0x5c   :  { %1375 = vmatprep.subr.bf16.mxu0 %v20304_v0  ;;  %1551 = vmatpush1.bf16.msra.mxu1 %v12133_v29  ;;  %v197_v29 = vpack.c.bf16 %v172_v24, %v171_v23  ;;  %v129_v23 = vld [vmem:[%s20297_s0 + $0x101] sm:$0xff]  ;;  %v130_v24 = vld [vmem:[%s20297_s0 + $0x109] sm:$0xff] }
  0x5d   :  { %1552 = vmatprep.subr.bf16.mxu1 %v20304_v0 }
  0x5f   :  { %1376 = vmatpush1.bf16.msra.mxu0 %v12122_v35  ;;  %v174_v35 = vld [vmem:[%s20297_s0 + $0xba] sm:$0xff] }
  0x60   :  { %1377 = vmatprep.subr.bf16.mxu0 %v20304_v0  ;;  %1553 = vmatpush1.bf16.msra.mxu1 %v12135_v36  ;;  %v88_v36 = vpack.c.bf16 %v62_v31, %v61_v30  ;;  %v75_v31 = vld [vmem:[%s20297_s0 + $0x100] sm:$0xff] }
  0x61   :  { %1072 = vmatmul.mubr.bf16.gmra.mxu0 %v83_v37  ;;  %1554 = vmatprep.subr.bf16.mxu1 %v20304_v0  ;;  %v143_v37 = vpack.c.bf16 %v118_v33, %v117_v32  ;;  %v76_v32 = vld [vmem:[%s20297_s0 + $0x108] sm:$0xff]  ;;  %v131_v33 = vld [vmem:[%s20297_s0 + $0x111] sm:$0xff] }
  0x62   :  { %1249 = vmatmul.mubr.bf16.gmra.mxu1 %v191_v13  ;;  %1079 = vmatprep.mubr.bf16.mxu0 %v138_v38  ;;  %v86_v13 = vpack.c.bf16 %v58_v5, %v57_v4  ;;  %v198_v38 = vpack.c.bf16 %v174_v35, %v173_v34  ;;  %v70_v4 = vld [vmem:[%s20297_s0 + $0xd8] sm:$0xff]  ;;  %v125_v5 = vld [vmem:[%s20297_s0 + $0xe1] sm:$0xff] }
  0x63   :  { %1256 = vmatprep.mubr.bf16.mxu1 %v193_v39  ;;  %1378 = vmatpush2.bf16.msra.mxu0 %v12123_v40  ;;  %v64_v40 = vld [vmem:[%s20297_s0 + $0xa8] sm:$0xff]  ;;  %v132_v34 = vld [vmem:[%s20297_s0 + $0x119] sm:$0x3f] }
  0x64   :  { %1379 = vmatprep.subr.bf16.mxu0 %v20304_v0  ;;  %1555 = vmatpush2.bf16.msra.mxu1 %v12136_v42  ;;  %v120_v42 = vld [vmem:[%s20297_s0 + $0xb9] sm:$0xff]  ;;  %v206_v35 = vld [vmem:[%s20297_s0 + $0x122] sm:$0xff] }
  0x65   :  { %1556 = vmatprep.subr.bf16.mxu1 %v20304_v0  ;;  %v144_v46 = vpack.c.bf16 %v120_v42, %v119_v41  ;;  %v78_v41 = vld [vmem:[%s20297_s0 + $0x118] sm:$0x3f] }
  0x66   :  { %v186_v42 = vld [vmem:[%s20297_s0 + $0x11a] sm:$0x3f] }
  0x67   :  { %1380 = vmatpush2.bf16.msra.mxu0 %v12124_v47  ;;  %v199_v47 = vpack.c.bf16 %v176_v44, %v175_v43  ;;  %v264_v43 = vld [vmem:[%s20297_s0 + $0x14] sm:$0xff]  ;;  %v265_v44 = vld [vmem:[%s20297_s0 + $0x1c] sm:$0xff] }
  0x68   :  { %1381 = vmatprep.subr.bf16.mxu0 %v20304_v0  ;;  %1557 = vmatpush2.bf16.msra.mxu1 %v12138_v49  ;;  %v66_v49 = vld [vmem:[%s20297_s0 + $0xb8] sm:$0xff] }
  0x69   :  { %1080 = vmatmul.mubr.bf16.gmra.mxu0 %v84_v50  ;;  %1558 = vmatprep.subr.bf16.mxu1 %v20304_v0  ;;  %v121_v50 = vld [vmem:[%s20297_s0 + $0xc1] sm:$0xff] }
  0x6a   :  { %1257 = vmatmul.mubr.bf16.gmra.mxu1 %v192_v26  ;;  %1087 = vmatprep.mubr.bf16.mxu0 %v139_v51  ;;  %v12952_v26 = vld [vmem:[%s20296_s1 + $0x238] sm:$0xff]   ;;  %v122_v51 = vld [vmem:[%s20297_s0 + $0xc9] sm:$0xff] }
  0x6b   :  { %1264 = vmatprep.mubr.bf16.mxu1 %v194_v52  ;;  %1382 = vmatpush2.bf16.msra.mxu0 %v12127_v53  ;;  %v178_v53 = vld [vmem:[%s20297_s0 + $0xda] sm:$0xff]  ;;  %v145_v55 = vpack.c.bf16 %v122_v51, %v121_v50 }
  0x6c   :  { %1383 = vmatprep.subr.bf16.mxu0 %v20304_v0  ;;  %1559 = vmatpush2.bf16.msra.mxu1 %v12139_v54  ;;  %v90_v54 = vpack.c.bf16 %v66_v49, %v65_v48  ;;  %v300_v49 = vpack.c.bf16 %v265_v44, %v264_v43  ;;  %v210_v51 = vld [vmem:[%s20297_s0 + $0x13] sm:$0xff]  ;;  %v277_v43 = vld [vmem:[%s20297_s0 + $0x7c] sm:$0xff]  ;;  %v335_v44 = vld [vmem:[%s20297_s0 + $0x85] sm:$0xff] }
  0x6d   :  { %1560 = vmatprep.subr.bf16.mxu1 %v20304_v0 }
  0x6f   :  { %1384 = vmatpush2.bf16.msra.mxu0 %v12131_v60  ;;  %v124_v60 = vld [vmem:[%s20297_s0 + $0xd9] sm:$0xff] }
  0x70   :  { %1385 = vmatprep.subr.bf16.mxu0 %v20304_v0  ;;  %1561 = vmatpush2.bf16.msra.mxu1 %v12141_v62  ;;  %v180_v62 = vld [vmem:[%s20297_s0 + $0xea] sm:$0xff] }
  0x71   :  { %1088 = vmatmul.mubr.bf16.gmra.mxu0 %v85_v63  ;;  %1562 = vmatprep.subr.bf16.mxu1 %v20304_v0  ;;  %v91_v63 = vpack.c.bf16 %v68_v58, %v67_v57 }
  0x72   :  { %1265 = vmatmul.mubr.bf16.gmra.mxu1 %v193_v39  ;;  %1095 = vmatprep.mubr.bf16.mxu0 %v140_v1  ;;  %v63_v39 = vld [vmem:[%s20297_s0 + $0xa0] sm:$0xff]  ;;  %v146_v1 = vpack.c.bf16 %v124_v60, %v123_v59  ;;  %v12148_v60 = vld [vmem:[%s20296_s1 + $0x230] sm:$0xff]  }
  0x73   :  { %1272 = vmatprep.mubr.bf16.mxu1 %v195_v2  ;;  %1386 = vmatpush2.bf16.msra.mxu0 %v12134_v3  ;;  %v89_v45 = vpack.c.bf16 %v64_v40, %v63_v39  ;;  %v69_v3 = vld [vmem:[%s20297_s0 + $0xd0] sm:$0xff] }
  0x74   :  { %1387 = vmatprep.subr.bf16.mxu0 %v20304_v0  ;;  %1563 = vmatpush2.bf16.msra.mxu1 %v12142_v6  ;;  %v126_v6 = vld [vmem:[%s20297_s0 + $0xe9] sm:$0xff]  ;;  %v92_v9 = vpack.c.bf16 %v70_v4, %v69_v3 }
  0x75   :  { %1564 = vmatprep.subr.bf16.mxu1 %v20304_v0  ;;  %v147_v10 = vpack.c.bf16 %v126_v6, %v125_v5  ;;  %v77_v40 = vld [vmem:[%s20297_s0 + $0x110] sm:$0xff] }
  0x76   :  { %v328_v3 = vld [vmem:[%s20297_s0 + $0x4d] sm:$0xff] }
  0x77   :  { %1388 = vmatpush2.bf16.msra.mxu0 %v12137_v11  ;;  %v202_v11 = vpack.c.bf16 %v182_v8, %v181_v7  ;;  %v12150_v7 = vld [vmem:[%s20296_s1 + $0x220] sm:$0xff]   ;;  %v214_v8 = vld [vmem:[%s20297_s0 + $0x33] sm:$0xff] }
  0x78   :  { %1389 = vmatprep.subr.bf16.mxu0 %v20304_v0  ;;  %1565 = vmatpush2.bf16.msra.mxu1 %v12143_v12  ;;  %v71_v12 = vld [vmem:[%s20297_s0 + $0xe0] sm:$0xff] }
  0x79   :  { %1096 = vmatmul.mubr.bf16.gmra.mxu0 %v86_v13  ;;  %1566 = vmatprep.subr.bf16.mxu1 %v20304_v0  ;;  %v72_v13 = vld [vmem:[%s20297_s0 + $0xe8] sm:$0xff] }
  0x7a   :  { %1273 = vmatmul.mubr.bf16.gmra.mxu1 %v194_v52  ;;  %1103 = vmatprep.mubr.bf16.mxu0 %v141_v15  ;;  %v177_v52 = vld [vmem:[%s20297_s0 + $0xd2] sm:$0xff]  ;;  %v93_v18 = vpack.c.bf16 %v72_v13, %v71_v12  ;;  %v330_v13 = vld [vmem:[%s20297_s0 + $0x5d] sm:$0xff] }
  0x7b   :  { %1280 = vmatprep.mubr.bf16.mxu1 %v196_v16  ;;  %1390 = vmatpush2.bf16.msra.mxu0 %v12140_v14  ;;  %v200_v56 = vpack.c.bf16 %v178_v53, %v177_v52  ;;  %v127_v14 = vld [vmem:[%s20297_s0 + $0xf1] sm:$0xff]  ;;  %v128_v15 = vld [vmem:[%s20297_s0 + $0xf9] sm:$0xff]  ;;  %v266_v53 = vld [vmem:[%s20297_s0 + $0x24] sm:$0xff] }
  0x7c   :  { %1391 = vmatprep.subr.bf16.mxu0 %v20304_v0  ;;  %1567 = vmatpush2.bf16.msra.mxu1 %v12145_v19  ;;  %v148_v19 = vpack.c.bf16 %v128_v15, %v127_v14  ;;  %v211_v52 = vld [vmem:[%s20297_s0 + $0x1b] sm:$0xff] }
  0x7d   :  { %1568 = vmatprep.subr.bf16.mxu1 %v20304_v0  ;;  %v246_v57 = vpack.c.bf16 %v211_v52, %v210_v51  ;;  %v329_v12 = vld [vmem:[%s20297_s0 + $0x55] sm:$0xff]  ;;  %v278_v51 = vld [vmem:[%s20297_s0 + $0x84] sm:$0xff]  ;;  %v279_v52 = vld [vmem:[%s20297_s0 + $0x8c] sm:$0xff] }
  0x7e   :  { %v12151_v14 = vld [vmem:[%s20296_s1 + $0x218] sm:$0xff]  }
  0x7f   :  { %1392 = vmatpush2.bf16.msra.mxu0 %v12144_v22  ;;  %v74_v22 = vld [vmem:[%s20297_s0 + $0xf8] sm:$0xff] }
  0x80   :  { %1569 = vmatpush2.bf16.msra.mxu1 %v12146_v25  ;;  %11802 = vmatprep.subr.bf16.mxu0 %v12952_v26  ;;  %v185_v25 = vld [vmem:[%s20297_s0 + $0x112] sm:$0xff] }
  0x81   :  { %1104 = vmatmul.mubr.bf16.gmra.mxu0 %v87_v27  ;;  %4760 = vmatprep.subr.bf16.mxu1 %v20304_v0  ;;  %v205_v27 = vld [vmem:[%s20297_s0 + $0x11a] sm:$0xff]  ;;  %v204_v48 = vpack.c.bf16 %v186_v42, %v185_v25 }
  0x82   :  { %1281 = vmatmul.mubr.bf16.gmra.mxu1 %v195_v2  ;;  %1111 = vmatprep.mubr.bf16.mxu0 %v142_v28  ;;  %v201_v2 = vpack.c.bf16 %v180_v62, %v179_v61  ;;  %v94_v28 = vpack.c.bf16 %v74_v22, %v73_v21  ;;  %v208_v30 = vpack.c.bf16 %v205_v27, %v185_v25  ;;  %v212_v61 = vld [vmem:[%s20297_s0 + $0x23] sm:$0xff]  ;;  %v213_v62 = vld [vmem:[%s20297_s0 + $0x2b] sm:$0xff]  ;;  %v272_v21 = vld [vmem:[%s20297_s0 + $0x54] sm:$0xff] }
  0x83   :  { %1288 = vmatprep.mubr.bf16.mxu1 %v197_v29  ;;  %v247_v4 = vpack.c.bf16 %v213_v62, %v212_v61  ;;  %v273_v22 = vld [vmem:[%s20297_s0 + $0x5c] sm:$0xff]  ;;  %v12153_v25 = vld [vmem:[%s20296_s1 + $0x208] sm:$0xff]   ;;  %v276_v42 = vld [vmem:[%s20297_s0 + $0x74] sm:$0xff] }
  0x84   :  { %v225_v61 = vld [vmem:[%s20297_s0 + $0x8b] sm:$0xff] }
  0x89   :  { %1112 = vmatmul.mubr.bf16.gmra.mxu0 %v88_v36  ;;  %v207_v36 = vld [vmem:[%s20297_s0 + $0x12a] sm:$0x3f] }
  0x8a   :  { %1289 = vmatmul.mubr.bf16.gmra.mxu1 %v196_v16  ;;  %1119 = vmatprep.mubr.bf16.mxu0 %v143_v37  ;;  %v183_v16 = vld [vmem:[%s20297_s0 + $0x102] sm:$0xff]  ;;  %v95_v37 = vpack.c.bf16 %v76_v32, %v75_v31  ;;  %v209_v39 = vpack.c.bf16 %v207_v36, %v206_v35  ;;  %v218_v31 = vld [vmem:[%s20297_s0 + $0x53] sm:$0xff] }
  0x8b   :  { %1296 = vmatprep.mubr.bf16.mxu1 %v198_v38  ;;  %v203_v20 = vpack.c.bf16 %v184_v17, %v183_v16  ;;  %v362_v17 = vpack.c.bf16 %v330_v13, %v329_v12  ;;  %v219_v32 = vld [vmem:[%s20297_s0 + $0x5b] sm:$0xff] }
  0x8c   :  { %v333_v35 = vld [vmem:[%s20297_s0 + $0x75] sm:$0xff]  ;;  %v334_v36 = vld [vmem:[%s20297_s0 + $0x7d] sm:$0xff] }
  0x91   :  { %1120 = vmatmul.mubr.bf16.gmra.mxu0 %v89_v45  ;;  %v323_v45 = vld [vmem:[%s20297_s0 + $0x25] sm:$0xff] }
  0x92   :  { %1297 = vmatmul.mubr.bf16.gmra.mxu1 %v197_v29  ;;  %1127 = vmatprep.mubr.bf16.mxu0 %v144_v46  ;;  %v149_v29 = vpack.c.bf16 %v130_v24, %v129_v23  ;;  %v324_v46 = vld [vmem:[%s20297_s0 + $0x2d] sm:$0xff]  ;;  %v331_v23 = vld [vmem:[%s20297_s0 + $0x65] sm:$0xff] }
  0x93   :  { %1304 = vmatprep.mubr.bf16.mxu1 %v199_v47  ;;  %v359_v50 = vpack.c.bf16 %v324_v46, %v323_v45  ;;  %v332_v24 = vld [vmem:[%s20297_s0 + $0x6d] sm:$0xff] }
  0x94   :  { %v336_v45 = vld [vmem:[%s20297_s0 + $0x8d] sm:$0xff] }
  0x99   :  { %1128 = vmatmul.mubr.bf16.gmra.mxu0 %v90_v54  ;;  %v267_v54 = vld [vmem:[%s20297_s0 + $0x2c] sm:$0xff] }
  0x9a   :  { %1305 = vmatmul.mubr.bf16.gmra.mxu1 %v198_v38  ;;  %1135 = vmatprep.mubr.bf16.mxu0 %v145_v55  ;;  %v150_v38 = vpack.c.bf16 %v132_v34, %v131_v33  ;;  %v325_v55 = vld [vmem:[%s20297_s0 + $0x35] sm:$0xff]  ;;  %v301_v58 = vpack.c.bf16 %v267_v54, %v266_v53  ;;  %v274_v33 = vld [vmem:[%s20297_s0 + $0x64] sm:$0xff]  ;;  %v275_v34 = vld [vmem:[%s20297_s0 + $0x6c] sm:$0xff] }
  0x9b   :  { %1312 = vmatprep.mubr.bf16.mxu1 %v200_v56  ;;  %v337_v53 = vld [vmem:[%s20297_s0 + $0x95] sm:$0xff]  ;;  %v338_v54 = vld [vmem:[%s20297_s0 + $0x9d] sm:$0xff] }
  0xa1   :  { %1136 = vmatmul.mubr.bf16.gmra.mxu0 %v91_v63  ;;  %v268_v63 = vld [vmem:[%s20297_s0 + $0x34] sm:$0xff] }
  0xa2   :  { %1313 = vmatmul.mubr.bf16.gmra.mxu1 %v199_v47  ;;  %1143 = vmatprep.mubr.bf16.mxu0 %v146_v1  ;;  %v96_v47 = vpack.c.bf16 %v78_v41, %v77_v40  ;;  %v269_v1 = vld [vmem:[%s20297_s0 + $0x3c] sm:$0xff]  ;;  %v221_v41 = vld [vmem:[%s20297_s0 + $0x6b] sm:$0xff] }
  0xa3   :  { %1320 = vmatprep.mubr.bf16.mxu1 %v201_v2  ;;  %v302_v5 = vpack.c.bf16 %v269_v1, %v268_v63  ;;  %v220_v40 = vld [vmem:[%s20297_s0 + $0x63] sm:$0xff]  ;;  %v280_v1 = vld [vmem:[%s20297_s0 + $0x94] sm:$0xff] }
  0xa4   :  { %v251_v46 = vpack.c.bf16 %v221_v41, %v220_v40  ;;  %v285_v40 = vld [vmem:[%s20297_s0 + $0xbc] sm:$0xff] }
  0xa9   :  { %1144 = vmatmul.mubr.bf16.gmra.mxu0 %v92_v9  ;;  %v215_v9 = vld [vmem:[%s20297_s0 + $0x3b] sm:$0xff] }
  0xaa   :  { %1321 = vmatmul.mubr.bf16.gmra.mxu1 %v200_v56  ;;  %1151 = vmatprep.mubr.bf16.mxu0 %v147_v10  ;;  %v326_v56 = vld [vmem:[%s20297_s0 + $0x3d] sm:$0xff]  ;;  %v248_v15 = vpack.c.bf16 %v215_v9, %v214_v8 }
  0xab   :  { %1328 = vmatprep.mubr.bf16.mxu1 %v202_v11  ;;  %v360_v59 = vpack.c.bf16 %v326_v56, %v325_v55  ;;  %v270_v10 = vld [vmem:[%s20297_s0 + $0x44] sm:$0xff]  ;;  %v307_v56 = vpack.c.bf16 %v279_v52, %v278_v51 }
  0xb1   :  { %1152 = vmatmul.mubr.bf16.gmra.mxu0 %v93_v18  ;;  %v12152_v18 = vld [vmem:[%s20296_s1 + $0x210] sm:$0xff]  }
  0xb2   :  { %1329 = vmatmul.mubr.bf16.gmra.mxu1 %v201_v2  ;;  %1159 = vmatprep.mubr.bf16.mxu0 %v148_v19  ;;  %v327_v2 = vld [vmem:[%s20297_s0 + $0x45] sm:$0xff] }
  0xb3   :  { %1336 = vmatprep.mubr.bf16.mxu1 %v203_v20  ;;  %v361_v6 = vpack.c.bf16 %v328_v3, %v327_v2  ;;  %v216_v19 = vld [vmem:[%s20297_s0 + $0x43] sm:$0xff] }
  0xb4   :  { %v339_v3 = vld [vmem:[%s20297_s0 + $0xa5] sm:$0xff] }
  0xb9   :  { %1160 = vmatmul.mubr.bf16.gmra.mxu0 %v94_v28  ;;  %v304_v28 = vpack.c.bf16 %v273_v22, %v272_v21  ;;  %v341_v22 = vld [vmem:[%s20297_s0 + $0xb5] sm:$0xff] }
  0xba   :  { %1337 = vmatmul.mubr.bf16.gmra.mxu1 %v202_v11  ;;  %1167 = vmatprep.mubr.bf16.mxu0 %v149_v29  ;;  %v271_v11 = vld [vmem:[%s20297_s0 + $0x4c] sm:$0xff]  ;;  %v363_v29 = vpack.c.bf16 %v332_v24, %v331_v23  ;;  %v342_v23 = vld [vmem:[%s20297_s0 + $0xbd] sm:$0xff] }
  0xbb   :  { %1344 = vmatprep.mubr.bf16.mxu1 %v208_v30  ;;  %v303_v16 = vpack.c.bf16 %v271_v11, %v270_v10  ;;  %v12154_v30 = vld [vmem:[%s20296_s1 + $0x200] sm:$0xff]  }
  0xc1   :  { %1168 = vmatmul.mubr.bf16.gmra.mxu0 %v95_v37  ;;  %v250_v37 = vpack.c.bf16 %v219_v32, %v218_v31  ;;  %v368_v31 = vpack.c.bf16 %v342_v23, %v341_v22 }
  0xc2   :  { %1345 = vmatmul.mubr.bf16.gmra.mxu1 %v203_v20  ;;  %1175 = vmatprep.mubr.bf16.mxu0 %v150_v38  ;;  %v217_v20 = vld [vmem:[%s20297_s0 + $0x4b] sm:$0xff]  ;;  %v305_v38 = vpack.c.bf16 %v275_v34, %v274_v33 }
  0xc3   :  { %1352 = vmatprep.mubr.bf16.mxu1 %v209_v39  ;;  %v249_v27 = vpack.c.bf16 %v217_v20, %v216_v19  ;;  %v364_v39 = vpack.c.bf16 %v334_v36, %v333_v35  ;;  %v282_v19 = vld [vmem:[%s20297_s0 + $0xa4] sm:$0xff]  ;;  %v283_v20 = vld [vmem:[%s20297_s0 + $0xac] sm:$0xff] }
  0xc4   :  { %v228_v35 = vld [vmem:[%s20297_s0 + $0xa3] sm:$0xff]  ;;  %v229_v36 = vld [vmem:[%s20297_s0 + $0xab] sm:$0xff] }
  0xc9   :  { %1176 = vmatmul.mubr.bf16.gmra.mxu0 %v96_v47  ;;  %v306_v47 = vpack.c.bf16 %v277_v43, %v276_v42  ;;  %v343_v42 = vld [vmem:[%s20297_s0 + $0xc5] sm:$0xff]  ;;  %v344_v43 = vld [vmem:[%s20297_s0 + $0xcd] sm:$0xff] }
  0xca   :  { %1353 = vmatmul.mubr.bf16.gmra.mxu1 %v204_v48  ;;  %1393 = vmatprep.mubr.bf16.mxu0 %v300_v49  ;;  %v365_v48 = vpack.c.bf16 %v336_v45, %v335_v44  ;;  %v222_v49 = vld [vmem:[%s20297_s0 + $0x73] sm:$0xff]  ;;  %v255_v45 = vpack.c.bf16 %v229_v36, %v228_v35 }
  0xcb   :  { %1570 = vmatprep.mubr.bf16.mxu1 %v359_v50  ;;  %v223_v50 = vld [vmem:[%s20297_s0 + $0x7b] sm:$0xff] }
  0xcc   :  { %v252_v55 = vpack.c.bf16 %v223_v50, %v222_v49  ;;  %v369_v50 = vpack.c.bf16 %v344_v43, %v343_v42  ;;  %v350_v42 = vld [vmem:[%s20297_s0 + $0xfd] sm:$0xff] }
  0xd1   :  { %1394 = vmatmul.mubr.bf16.vlgmr.msra.gmra.mxu0 %v246_v57  ;;  %v366_v57 = vpack.c.bf16 %v338_v54, %v337_v53  ;;  %v230_v54 = vld [vmem:[%s20297_s0 + $0xb3] sm:$0xff] }
  0xd2   :  { %11803 = vmatpush3.bf16.msra.mxu0 %v12952_v26  ;;  %1571 = vmatmul.mubr.bf16.vlgmr.msra.gmra.mxu1 %v301_v58  ;;  %v12149_v26 = vld [vmem:[%s20296_s1 + $0x228] sm:$0xff]  }
  0xd3   :  { %1401 = vmatprep.mubr.bf16.mxu0 %v301_v58  ;;  %1578 = vmatprep.mubr.bf16.mxu1 %v360_v59 }
  0xd4   :  { %11804 = vmatprep.subr.bf16.mxu0 %v12148_v60 }
  0xd6   :  { %11805 = vmatpush3.bf16.msra.mxu0 %v12148_v60  ;;  %v224_v60 = vld [vmem:[%s20297_s0 + $0x83] sm:$0xff] }
  0xd7   :  { %11806 = vmatprep.subr.bf16.mxu0 %v12149_v26 }
  0xd9   :  { %1402 = vmatmul.mubr.bf16.gmra.mxu0 %v247_v4  ;;  %v340_v4 = vld [vmem:[%s20297_s0 + $0xad] sm:$0xff] }
  0xda   :  { %1579 = vmatmul.mubr.bf16.gmra.mxu1 %v302_v5  ;;  %1409 = vmatprep.mubr.bf16.mxu0 %v302_v5  ;;  %v367_v11 = vpack.c.bf16 %v340_v4, %v339_v3 }
  0xdb   :  { %1586 = vmatprep.mubr.bf16.mxu1 %v361_v6  ;;  %11807 = vmatpush3.bf16.msra.mxu0 %v12149_v26  ;;  %v281_v26 = vld [vmem:[%s20297_s0 + $0x9c] sm:$0xff]  ;;  %v253_v6 = vpack.c.bf16 %v225_v61, %v224_v60 }
  0xdc   :  { %11808 = vmatprep.subr.bf16.mxu0 %v12150_v7  ;;  %v308_v8 = vpack.c.bf16 %v281_v26, %v280_v1  ;;  %v345_v61 = vld [vmem:[%s20297_s0 + $0xd5] sm:$0xff] }
  0xdf   :  { %11809 = vmatpush3.bf16.msra.mxu0 %v12150_v7 }
  0xe0   :  { %11810 = vmatprep.subr.bf16.mxu0 %v12151_v14 }
  0xe1   :  { %1410 = vmatmul.mubr.bf16.gmra.mxu0 %v248_v15  ;;  %v226_v15 = vld [vmem:[%s20297_s0 + $0x93] sm:$0xff] }
  0xe2   :  { %1587 = vmatmul.mubr.bf16.gmra.mxu1 %v303_v16  ;;  %1417 = vmatprep.mubr.bf16.mxu0 %v303_v16  ;;  %v227_v16 = vld [vmem:[%s20297_s0 + $0x9b] sm:$0xff] }
  0xe3   :  { %1594 = vmatprep.mubr.bf16.mxu1 %v362_v17  ;;  %11811 = vmatpush3.bf16.msra.mxu0 %v12151_v14 }
  0xe4   :  { %11812 = vmatprep.subr.bf16.mxu0 %v12152_v18 }
  0xe7   :  { %11813 = vmatpush3.bf16.msra.mxu0 %v12152_v18 }
  0xe8   :  { %11814 = vmatprep.subr.bf16.mxu0 %v12153_v25 }
  0xe9   :  { %1418 = vmatmul.mubr.bf16.gmra.mxu0 %v249_v27 }
  0xea   :  { %1595 = vmatmul.mubr.bf16.gmra.mxu1 %v304_v28  ;;  %1425 = vmatprep.mubr.bf16.mxu0 %v304_v28  ;;  %v309_v28 = vpack.c.bf16 %v283_v20, %v282_v19  ;;  %v347_v19 = vld [vmem:[%s20297_s0 + $0xe5] sm:$0xff]  ;;  %v348_v20 = vld [vmem:[%s20297_s0 + $0xed] sm:$0xff] }
  0xeb   :  { %1602 = vmatprep.mubr.bf16.mxu1 %v363_v29  ;;  %11815 = vmatpush3.bf16.msra.mxu0 %v12153_v25  ;;  %v254_v25 = vpack.c.bf16 %v227_v16, %v226_v15  ;;  %v288_v15 = vld [vmem:[%s20297_s0 + $0xd4] sm:$0xff]  ;;  %v289_v16 = vld [vmem:[%s20297_s0 + $0xdc] sm:$0xff] }
  0xec   :  { %11816 = vmatprep.subr.bf16.mxu0 %v12154_v30 }
  0xef   :  { %11817 = vmatpush3.bf16.msra.mxu0 %v12154_v30 }
  0xf0   :  { %4937 = vmatprep.subr.bf16.mxu0 %v20304_v0 }
  0xf1   :  { %1426 = vmatmul.mubr.bf16.gmra.mxu0 %v250_v37 }
  0xf2   :  { %1603 = vmatmul.mubr.bf16.gmra.mxu1 %v305_v38  ;;  %1433 = vmatprep.mubr.bf16.mxu0 %v305_v38 }
  0xf3   :  { %1610 = vmatprep.mubr.bf16.mxu1 %v364_v39  ;;  %v284_v39 = vld [vmem:[%s20297_s0 + $0xb4] sm:$0xff] }
  0xf9   :  { %1434 = vmatmul.mubr.bf16.gmra.mxu0 %v251_v46 }
  0xfa   :  { %1611 = vmatmul.mubr.bf16.gmra.mxu1 %v306_v47  ;;  %1441 = vmatprep.mubr.bf16.mxu0 %v306_v47  ;;  %v310_v47 = vpack.c.bf16 %v285_v40, %v284_v39  ;;  %v291_v39 = vld [vmem:[%s20297_s0 + $0xec] sm:$0xff] }
  0xfb   :  { %1618 = vmatprep.mubr.bf16.mxu1 %v365_v48 }
 0x101   :  { %v1041_v58 = vpop.f32.mrf.mxu0  ;;  %1442 = vmatmul.mubr.bf16.gmra.mxu0 %v252_v55  ;;  %v231_v55 = vld [vmem:[%s20297_s0 + $0xbb] sm:$0xff] }
 0x102   :  { %v1218_v59 = vpop.f32.mrf.mxu1  ;;  %1619 = vmatmul.mubr.bf16.gmra.mxu1 %v307_v56  ;;  %1449 = vmatprep.mubr.bf16.mxu0 %v307_v56  ;;  %v256_v26 = vpack.c.bf16 %v231_v55, %v230_v54  ;;  %v236_v54 = vld [vmem:[%s20297_s0 + $0xe3] sm:$0xff]  ;;  %v237_v55 = vld [vmem:[%s20297_s0 + $0xeb] sm:$0xff] }
 0x103   :  { %v13278_v62 = vadd.f32 %v1218_v59, %v1041_v58  ;;  %v1043_v63 = vpop.f32.mrf.mxu0  ;;  %1626 = vmatprep.mubr.bf16.mxu1 %v366_v57  ;;  %v286_v58 = vld [vmem:[%s20297_s0 + $0xc4] sm:$0xff]  ;;  %v287_v59 = vld [vmem:[%s20297_s0 + $0xcc] sm:$0xff] }
 0x104   :  { %v1220_v2 = vpop.f32.mrf.mxu1  ;;  %v346_v63 = vld [vmem:[%s20297_s0 + $0xdd] sm:$0xff]  ;;  %v311_v3 = vpack.c.bf16 %v287_v59, %v286_v58  ;;  %v292_v59 = vld [vmem:[%s20297_s0 + $0xf4] sm:$0xff] }
 0x105   :  { %v1044_v5 = vpop.f32.mrf.mxu0 }
 0x106   :  { %v1221_v7 = vpop.f32.mrf.mxu1 }
 0x107   :  { %v13292_v9 = vadd.f32 %v1221_v7, %v1044_v5  ;;  %v1046_v10 = vpop.f32.mrf.mxu0 }
 0x108   :  { %v1223_v12 = vpop.f32.mrf.mxu1 }
 0x109   :  { %v1049_v13 = vpop.f32.mrf.mxu0  ;;  %1450 = vmatmul.mubr.bf16.gmra.mxu0 %v253_v6  ;;  %v370_v6 = vpack.c.bf16 %v346_v63, %v345_v61  ;;  %v233_v12 = vld [vmem:[%s20297_s0 + $0xcb] sm:$0xff] }
 0x10a   :  { %v1226_v14 = vpop.f32.mrf.mxu1  ;;  %1627 = vmatmul.mubr.bf16.gmra.mxu1 %v308_v8  ;;  %1457 = vmatprep.mubr.bf16.mxu0 %v308_v8  ;;  %v351_v63 = vld [vmem:[%s20297_s0 + $0x105] sm:$0xff] }
 0x10b   :  { %v13300_v17 = vadd.f32 %v1226_v14, %v1049_v13  ;;  %v1051_v18 = vpop.f32.mrf.mxu0  ;;  %1634 = vmatprep.mubr.bf16.mxu1 %v367_v11  ;;  %v232_v11 = vld [vmem:[%s20297_s0 + $0xc3] sm:$0xff] }
 0x10c   :  { %v1228_v21 = vpop.f32.mrf.mxu1  ;;  %v257_v22 = vpack.c.bf16 %v233_v12, %v232_v11 }
 0x10d   :  { %v1052_v24 = vpop.f32.mrf.mxu0 }
 0x10e   :  { %v1229_v27 = vpop.f32.mrf.mxu1 }
 0x10f   :  { %v13314_v29 = vadd.f32 %v1229_v27, %v1052_v24  ;;  %v1054_v30 = vpop.f32.mrf.mxu0  ;;  %v312_v24 = vpack.c.bf16 %v289_v16, %v288_v15  ;;  %v239_v15 = vld [vmem:[%s20297_s0 + $0xfb] sm:$0xff] }
 0x110   :  { %v1231_v32 = vpop.f32.mrf.mxu1 }
 0x111   :  { %v1057_v33 = vpop.f32.mrf.mxu0  ;;  %1458 = vmatmul.mubr.bf16.gmra.mxu0 %v254_v25 }
 0x112   :  { %v1234_v34 = vpop.f32.mrf.mxu1  ;;  %1635 = vmatmul.mubr.bf16.gmra.mxu1 %v309_v28  ;;  %1465 = vmatprep.mubr.bf16.mxu0 %v309_v28  ;;  %v371_v28 = vpack.c.bf16 %v348_v20, %v347_v19  ;;  %v294_v19 = vld [vmem:[%s20297_s0 + $0x104] sm:$0xff]  ;;  %v295_v20 = vld [vmem:[%s20297_s0 + $0x10c] sm:$0xff] }
 0x113   :  { %v13322_v37 = vadd.f32 %v1234_v34, %v1057_v33  ;;  %v1059_v38 = vpop.f32.mrf.mxu0  ;;  %1642 = vmatprep.mubr.bf16.mxu1 %v368_v31  ;;  %v234_v33 = vld [vmem:[%s20297_s0 + $0xd3] sm:$0xff]  ;;  %v235_v34 = vld [vmem:[%s20297_s0 + $0xdb] sm:$0xff] }
 0x114   :  { %v1236_v41 = vpop.f32.mrf.mxu1  ;;  %v290_v38 = vld [vmem:[%s20297_s0 + $0xe4] sm:$0xff] }
 0x115   :  { %v1060_v44 = vpop.f32.mrf.mxu0  ;;  %v349_v41 = vld [vmem:[%s20297_s0 + $0xf5] sm:$0xff] }
 0x116   :  { %v1237_v46 = vpop.f32.mrf.mxu1 }
 0x117   :  { %v13336_v48 = vadd.f32 %v1237_v46, %v1060_v44  ;;  %v1062_v49 = vpop.f32.mrf.mxu0  ;;  %v258_v44 = vpack.c.bf16 %v235_v34, %v234_v33  ;;  %v313_v46 = vpack.c.bf16 %v291_v39, %v290_v38  ;;  %v240_v39 = vld [vmem:[%s20297_s0 + $0x103] sm:$0xff] }
 0x118   :  { %v1239_v51 = vpop.f32.mrf.mxu1 }
 0x119   :  { %v1065_v52 = vpop.f32.mrf.mxu0  ;;  %1466 = vmatmul.mubr.bf16.gmra.mxu0 %v255_v45 }
 0x11a   :  { %v1242_v53 = vpop.f32.mrf.mxu1  ;;  %1643 = vmatmul.mubr.bf16.gmra.mxu1 %v310_v47  ;;  %1473 = vmatprep.mubr.bf16.mxu0 %v310_v47 }
 0x11b   :  { %v13344_v56 = vadd.f32 %v1242_v53, %v1065_v52  ;;  %v1067_v57 = vpop.f32.mrf.mxu0  ;;  %1650 = vmatprep.mubr.bf16.mxu1 %v369_v50  ;;  %v372_v50 = vpack.c.bf16 %v350_v42, %v349_v41 }
 0x11c   :  { %v1244_v60 = vpop.f32.mrf.mxu1 }
 0x11d   :  { %v1068_v1 = vpop.f32.mrf.mxu0  ;;  %v293_v60 = vld [vmem:[%s20297_s0 + $0xfc] sm:$0xff] }
 0x11e   :  { %v1245_v2 = vpop.f32.mrf.mxu1 }
 0x11f   :  { %v13358_v4 = vadd.f32 %v1245_v2, %v1068_v1  ;;  %v1070_v5 = vpop.f32.mrf.mxu0  ;;  %v352_v1 = vld [vmem:[%s20297_s0 + $0x10d] sm:$0xff]  ;;  %v259_v2 = vpack.c.bf16 %v237_v55, %v236_v54 }
 0x120   :  { %v1247_v7 = vpop.f32.mrf.mxu1  ;;  %v314_v5 = vpack.c.bf16 %v293_v60, %v292_v59 }
 0x121   :  { %v1073_v8 = vpop.f32.mrf.mxu0  ;;  %1474 = vmatmul.mubr.bf16.gmra.mxu0 %v256_v26 }
 0x122   :  { %v1250_v10 = vpop.f32.mrf.mxu1  ;;  %1651 = vmatmul.mubr.bf16.gmra.mxu1 %v311_v3  ;;  %1481 = vmatprep.mubr.bf16.mxu0 %v311_v3 }
 0x123   :  { %v13366_v13 = vadd.f32 %v1250_v10, %v1073_v8  ;;  %v1075_v14 = vpop.f32.mrf.mxu0  ;;  %1658 = vmatprep.mubr.bf16.mxu1 %v370_v6  ;;  %v373_v8 = vpack.c.bf16 %v352_v1, %v351_v63  ;;  %v242_v63 = vld [vmem:[%s20297_s0 + $0x113] sm:$0xff]  ;;  %v243_v1 = vld [vmem:[%s20297_s0 + $0x11b] sm:$0xff] }
 0x124   :  { %v1252_v18 = vpop.f32.mrf.mxu1  ;;  %v238_v14 = vld [vmem:[%s20297_s0 + $0xf3] sm:$0xff] }
 0x125   :  { %v1076_v21 = vpop.f32.mrf.mxu0 }
 0x126   :  { %v1253_v23 = vpop.f32.mrf.mxu1 }
 0x127   :  { %v13380_v25 = vadd.f32 %v1253_v23, %v1076_v21  ;;  %v1078_v27 = vpop.f32.mrf.mxu0  ;;  %v354_v23 = vld [vmem:[%s20297_s0 + $0x11d] sm:$0xff] }
 0x128   :  { %v1255_v30 = vpop.f32.mrf.mxu1  ;;  %v260_v27 = vpack.c.bf16 %v239_v15, %v238_v14  ;;  %v262_v14 = vpack.c.bf16 %v243_v1, %v242_v63  ;;  %v382_v63 = vld [vmem:[%s20297_s0 + $0x4e] sm:$0xff] }
 0x129   :  { %v1081_v31 = vpop.f32.mrf.mxu0  ;;  %1482 = vmatmul.mubr.bf16.gmra.mxu0 %v257_v22  ;;  %v353_v22 = vld [vmem:[%s20297_s0 + $0x115] sm:$0xff]  ;;  %v315_v30 = vpack.c.bf16 %v295_v20, %v294_v19 }
 0x12a   :  { %v1258_v32 = vpop.f32.mrf.mxu1  ;;  %1659 = vmatmul.mubr.bf16.gmra.mxu1 %v312_v24  ;;  %1489 = vmatprep.mubr.bf16.mxu0 %v312_v24  ;;  %v374_v33 = vpack.c.bf16 %v354_v23, %v353_v22 }
 0x12b   :  { %v13388_v35 = vadd.f32 %v1258_v32, %v1081_v31  ;;  %v1083_v36 = vpop.f32.mrf.mxu0  ;;  %1666 = vmatprep.mubr.bf16.mxu1 %v371_v28 }
 0x12c   :  { %v1260_v40 = vpop.f32.mrf.mxu1 }
 0x12d   :  { %v1084_v43 = vpop.f32.mrf.mxu0  ;;  %v241_v40 = vld [vmem:[%s20297_s0 + $0x10b] sm:$0xff] }
 0x12e   :  { %v1261_v45 = vpop.f32.mrf.mxu1 }
 0x12f   :  { %v13402_v47 = vadd.f32 %v1261_v45, %v1084_v43  ;;  %v1086_v49 = vpop.f32.mrf.mxu0  ;;  %v296_v43 = vld [vmem:[%s20297_s0 + $0x114] sm:$0xff] }
 0x130   :  { %v1263_v51 = vpop.f32.mrf.mxu1  ;;  %v356_v49 = vld [vmem:[%s20297_s0 + $0x12d] sm:$0xff] }
 0x131   :  { %v1089_v52 = vpop.f32.mrf.mxu0  ;;  %1490 = vmatmul.mubr.bf16.gmra.mxu0 %v258_v44  ;;  %v297_v44 = vld [vmem:[%s20297_s0 + $0x11c] sm:$0xff]  ;;  %v261_v51 = vpack.c.bf16 %v241_v40, %v240_v39  ;;  %v378_v39 = vld [vmem:[%s20297_s0 + $0x2e] sm:$0xff] }
 0x132   :  { %v1266_v53 = vpop.f32.mrf.mxu1  ;;  %1667 = vmatmul.mubr.bf16.gmra.mxu1 %v313_v46  ;;  %1497 = vmatprep.mubr.bf16.mxu0 %v313_v46  ;;  %v355_v46 = vld [vmem:[%s20297_s0 + $0x125] sm:$0xff] }
 0x133   :  { %v13410_v57 = vadd.f32 %v1266_v53, %v1089_v52  ;;  %v1091_v58 = vpop.f32.mrf.mxu0  ;;  %1674 = vmatprep.mubr.bf16.mxu1 %v372_v50  ;;  %v316_v53 = vpack.c.bf16 %v297_v44, %v296_v43 }
 0x134   :  { %v1268_v61 = vpop.f32.mrf.mxu1  ;;  %v375_v58 = vpack.c.bf16 %v356_v49, %v355_v46 }
 0x135   :  { %v1092_v26 = vpop.f32.mrf.mxu0 }
 0x136   :  { %v1269_v3 = vpop.f32.mrf.mxu1 }
 0x137   :  { %v13424_v6 = vadd.f32 %v1269_v3, %v1092_v26  ;;  %v1094_v7 = vpop.f32.mrf.mxu0  ;;  %v298_v3 = vld [vmem:[%s20297_s0 + $0x124] sm:$0xff] }
 0x138   :  { %v1271_v10 = vpop.f32.mrf.mxu1  ;;  %v299_v7 = vld [vmem:[%s20297_s0 + $0x12c] sm:$0x3f] }
 0x139   :  { %v1097_v11 = vpop.f32.mrf.mxu0  ;;  %1498 = vmatmul.mubr.bf16.gmra.mxu0 %v259_v2  ;;  %v357_v10 = vld [vmem:[%s20297_s0 + $0x135] sm:$0xff]  ;;  %v317_v19 = vpack.c.bf16 %v299_v7, %v298_v3 }
 0x13a   :  { %v1274_v12 = vpop.f32.mrf.mxu1  ;;  %1675 = vmatmul.mubr.bf16.gmra.mxu1 %v314_v5  ;;  %1505 = vmatprep.mubr.bf16.mxu0 %v314_v5  ;;  %v318_v5 = vld [vmem:[%s20297_s0 + $0x12c] sm:$0xff] }
 0x13b   :  { %v13432_v16 = vadd.f32 %v1274_v12, %v1097_v11  ;;  %v1099_v18 = vpop.f32.mrf.mxu0  ;;  %1682 = vmatprep.mubr.bf16.mxu1 %v373_v8  ;;  %v358_v11 = vld [vmem:[%s20297_s0 + $0x13d] sm:$0x3f] }
 0x13c   :  { %v1276_v21 = vpop.f32.mrf.mxu1  ;;  %v321_v18 = vpack.c.bf16 %v318_v5, %v298_v3  ;;  %v376_v22 = vpack.c.bf16 %v358_v11, %v357_v10 }
 0x13d   :  { %v1100_v24 = vpop.f32.mrf.mxu0 }
 0x13e   :  { %v1277_v28 = vpop.f32.mrf.mxu1 }
 0x13f   :  { %v13446_v31 = vadd.f32 %v1277_v28, %v1100_v24  ;;  %v1102_v32 = vpop.f32.mrf.mxu0  ;;  %v244_v28 = vld [vmem:[%s20297_s0 + $0x123] sm:$0xff] }
 0x140   :  { %v1279_v34 = vpop.f32.mrf.mxu1  ;;  %v319_v32 = vld [vmem:[%s20297_s0 + $0x134] sm:$0xff] }
 0x141   :  { %v1105_v36 = vpop.f32.mrf.mxu0  ;;  %1506 = vmatmul.mubr.bf16.gmra.mxu0 %v260_v27 }
 0x142   :  { %v1282_v38 = vpop.f32.mrf.mxu1  ;;  %1683 = vmatmul.mubr.bf16.gmra.mxu1 %v315_v30  ;;  %1513 = vmatprep.mubr.bf16.mxu0 %v315_v30  ;;  %v245_v30 = vld [vmem:[%s20297_s0 + $0x12b] sm:$0x3f] }
 0x143   :  { %v13454_v41 = vadd.f32 %v1282_v38, %v1105_v36  ;;  %v1107_v42 = vpop.f32.mrf.mxu0  ;;  %1690 = vmatprep.mubr.bf16.mxu1 %v374_v33  ;;  %v320_v36 = vld [vmem:[%s20297_s0 + $0x13c] sm:$0x3f]  ;;  %v377_v38 = vld [vmem:[%s20297_s0 + $0x26] sm:$0xff]  ;;  %v263_v43 = vpack.c.bf16 %v245_v30, %v244_v28 }
 0x144   :  { %v1284_v45 = vpop.f32.mrf.mxu1  ;;  %v413_v46 = vpack.c.bf16 %v378_v39, %v377_v38 }
 0x145   :  { %v1108_v50 = vpop.f32.mrf.mxu0  ;;  %v322_v45 = vpack.c.bf16 %v320_v36, %v319_v32 }
 0x146   :  { %v1285_v52 = vpop.f32.mrf.mxu1 }
 0x147   :  { %v13468_v54 = vadd.f32 %v1285_v52, %v1108_v50  ;;  %v1110_v55 = vpop.f32.mrf.mxu0 }
 0x148   :  { %v1287_v59 = vpop.f32.mrf.mxu1  ;;  %v379_v55 = vld [vmem:[%s20297_s0 + $0x36] sm:$0xff] }
 0x149   :  { %v1113_v60 = vpop.f32.mrf.mxu0  ;;  %1514 = vmatmul.mubr.bf16.gmra.mxu0 %v261_v51 }
 0x14a   :  { %v1290_v61 = vpop.f32.mrf.mxu1  ;;  %1691 = vmatmul.mubr.bf16.gmra.mxu1 %v316_v53  ;;  %1521 = vmatprep.mubr.bf16.mxu0 %v316_v53 }
 0x14b   :  { %v13476_v26 = vadd.f32 %v1290_v61, %v1113_v60  ;;  %v1115_v2 = vpop.f32.mrf.mxu0  ;;  %1698 = vmatprep.mubr.bf16.mxu1 %v375_v58  ;;  %v380_v58 = vld [vmem:[%s20297_s0 + $0x3e] sm:$0xff]  ;;  %v381_v61 = vld [vmem:[%s20297_s0 + $0x46] sm:$0xff] }
 0x14c   :  { %v1292_v8 = vpop.f32.mrf.mxu1  ;;  %v414_v3 = vpack.c.bf16 %v380_v58, %v379_v55  ;;  %v415_v7 = vpack.c.bf16 %v382_v63, %v381_v61 }
 0x14d   :  { %v1116_v12 = vpop.f32.mrf.mxu0 }
 0x14e   :  { %v1293_v15 = vpop.f32.mrf.mxu1 }
 0x14f   :  { %v13493_v20 = vadd.f32 %v1293_v15, %v1116_v12  ;;  %v1118_v21 = vpop.f32.mrf.mxu0  ;;  %v383_v15 = vld [vmem:[%s20297_s0 + $0x56] sm:$0xff] }
 0x150   :  { %v1295_v23 = vpop.f32.mrf.mxu1 }
 0x151   :  { %v1121_v24 = vpop.f32.mrf.mxu0  ;;  %1522 = vmatmul.mubr.bf16.gmra.mxu0 %v262_v14  ;;  %v386_v23 = vld [vmem:[%s20297_s0 + $0x6e] sm:$0xff] }
 0x152   :  { %v1298_v27 = vpop.f32.mrf.mxu1  ;;  %1699 = vmatmul.mubr.bf16.gmra.mxu1 %v321_v18  ;;  %1529 = vmatprep.mubr.bf16.mxu0 %v317_v19  ;;  %v384_v18 = vld [vmem:[%s20297_s0 + $0x5e] sm:$0xff] }
 0x153   :  { %v13504_v33 = vadd.f32 %v1298_v27, %v1121_v24  ;;  %v1123_v34 = vpop.f32.mrf.mxu0  ;;  %1706 = vmatprep.mubr.bf16.mxu1 %v376_v22  ;;  %v385_v22 = vld [vmem:[%s20297_s0 + $0x66] sm:$0xff]  ;;  %v416_v28 = vpack.c.bf16 %v384_v18, %v383_v15 }
 0x154   :  { %v1300_v40 = vpop.f32.mrf.mxu1  ;;  %v417_v32 = vpack.c.bf16 %v386_v23, %v385_v22 }
 0x155   :  { %v1124_v42 = vpop.f32.mrf.mxu0 }
 0x156   :  { %v1301_v44 = vpop.f32.mrf.mxu1 }
 0x157   :  { %v13515_v49 = vadd.f32 %v1301_v44, %v1124_v42  ;;  %v1126_v50 = vpop.f32.mrf.mxu0  ;;  %v387_v42 = vld [vmem:[%s20297_s0 + $0x76] sm:$0xff] }
 0x158   :  { %v1303_v51 = vpop.f32.mrf.mxu1  ;;  %v390_v50 = vld [vmem:[%s20297_s0 + $0x8e] sm:$0xff] }
 0x159   :  { %v1129_v52 = vpop.f32.mrf.mxu0  ;;  %1530 = vmatmul.mubr.bf16.gmra.mxu0 %v263_v43  ;;  %v388_v43 = vld [vmem:[%s20297_s0 + $0x7e] sm:$0xff] }
 0x15a   :  { %v1306_v53 = vpop.f32.mrf.mxu1  ;;  %1707 = vmatmul.mubr.bf16.gmra.mxu1 %v322_v45  ;;  %11818 = vmatprep.mubr.bf16.mxu0 %v413_v46  ;;  %v389_v46 = vld [vmem:[%s20297_s0 + $0x86] sm:$0xff] }
 0x15b   :  { %v13523_v59 = vadd.f32 %v1306_v53, %v1129_v52  ;;  %v1131_v60 = vpop.f32.mrf.mxu0  ;;  %v418_v53 = vpack.c.bf16 %v388_v43, %v387_v42  ;;  %v419_v58 = vpack.c.bf16 %v390_v50, %v389_v46  ;;  %v398_v42 = vld [vmem:[%s20297_s0 + $0xce] sm:$0xff] }
 0x15c   :  { %v1308_v1 = vpop.f32.mrf.mxu1 }
 0x15d   :  { %v1132_v2 = vpop.f32.mrf.mxu0 }
 0x15e   :  { %v1309_v5 = vpop.f32.mrf.mxu1 }
 0x15f   :  { %v13531_v8 = vadd.f32 %v1309_v5, %v1132_v2  ;;  %v1134_v10 = vpop.f32.mrf.mxu0  ;;  %v392_v5 = vld [vmem:[%s20297_s0 + $0x9e] sm:$0xff] }
 0x160   :  { %v1311_v11 = vpop.f32.mrf.mxu1 }
 0x161   :  { %v1137_v12 = vpop.f32.mrf.mxu0  ;;  %11819 = vmatmul.mubr.bf16.vlgmr.msra.gmra.mxu0 %v414_v3  ;;  %v391_v3 = vld [vmem:[%s20297_s0 + $0x96] sm:$0xff]  ;;  %v393_v11 = vld [vmem:[%s20297_s0 + $0xa6] sm:$0xff] }
 0x162   :  { %v1314_v14 = vpop.f32.mrf.mxu1  ;;  %11822 = vmatprep.mubr.bf16.mxu0 %v415_v7  ;;  %v420_v18 = vpack.c.bf16 %v392_v5, %v391_v3  ;;  %v401_v5 = vld [vmem:[%s20297_s0 + $0xe6] sm:$0xff] }
 0x163   :  { %v13539_v19 = vadd.f32 %v1314_v14, %v1137_v12  ;;  %v1139_v21 = vpop.f32.mrf.mxu0  ;;  %v394_v12 = vld [vmem:[%s20297_s0 + $0xae] sm:$0xff] }
 0x164   :  { %v1316_v24 = vpop.f32.mrf.mxu1  ;;  %v421_v22 = vpack.c.bf16 %v394_v12, %v393_v11 }
 0x165   :  { %v1140_v27 = vpop.f32.mrf.mxu0 }
 0x166   :  { %v1317_v30 = vpop.f32.mrf.mxu1 }
 0x167   :  { %v13547_v34 = vadd.f32 %v1317_v30, %v1140_v27  ;;  %v1142_v36 = vpop.f32.mrf.mxu0 }
 0x168   :  { %v1319_v38 = vpop.f32.mrf.mxu1  ;;  %v396_v36 = vld [vmem:[%s20297_s0 + $0xbe] sm:$0xff] }
 0x169   :  { %v1145_v39 = vpop.f32.mrf.mxu0  ;;  %11823 = vmatmul.mubr.bf16.gmra.mxu0 %v416_v28 }
 0x16a   :  { %v1322_v40 = vpop.f32.mrf.mxu1  ;;  %11826 = vmatprep.mubr.bf16.mxu0 %v417_v32  ;;  %v395_v32 = vld [vmem:[%s20297_s0 + $0xb6] sm:$0xff] }
 0x16b   :  { %v13555_v44 = vadd.f32 %v1322_v40, %v1145_v39  ;;  %v1147_v45 = vpop.f32.mrf.mxu0  ;;  %v397_v40 = vld [vmem:[%s20297_s0 + $0xc6] sm:$0xff]  ;;  %v422_v46 = vpack.c.bf16 %v396_v36, %v395_v32  ;;  %v404_v32 = vld [vmem:[%s20297_s0 + $0xfe] sm:$0xff]  ;;  %v12157_v36 = vld [vmem:[%s20298_s4 + $0xb0] sm:$0xff]  }
 0x16c   :  { %v1324_v51 = vpop.f32.mrf.mxu1 }
 0x16d   :  { %v1148_v52 = vpop.f32.mrf.mxu0  ;;  %v423_v51 = vpack.c.bf16 %v398_v42, %v397_v40  ;;  %v405_v40 = vld [vmem:[%s20297_s0 + $0x106] sm:$0xff]  ;;  %v406_v42 = vld [vmem:[%s20297_s0 + $0x10e] sm:$0xff] }
 0x16e   :  { %v1325_v55 = vpop.f32.mrf.mxu1 }
 0x16f   :  { %v13563_v60 = vadd.f32 %v1325_v55, %v1148_v52  ;;  %v1150_v61 = vpop.f32.mrf.mxu0 }
 0x170   :  { %v1327_v63 = vpop.f32.mrf.mxu1 }
 0x171   :  { %v1153_v1 = vpop.f32.mrf.mxu0  ;;  %11827 = vmatmul.mubr.bf16.gmra.mxu0 %v418_v53  ;;  %v399_v63 = vld [vmem:[%s20297_s0 + $0xd6] sm:$0xff] }
 0x172   :  { %v1330_v2 = vpop.f32.mrf.mxu1  ;;  %11830 = vmatprep.mubr.bf16.mxu0 %v419_v58 }
 0x173   :  { %v13571_v7 = vadd.f32 %v1330_v2, %v1153_v1  ;;  %v1155_v10 = vpop.f32.mrf.mxu0  ;;  %v400_v1 = vld [vmem:[%s20297_s0 + $0xde] sm:$0xff] }
 0x174   :  { %v1332_v14 = vpop.f32.mrf.mxu1  ;;  %v402_v10 = vld [vmem:[%s20297_s0 + $0xee] sm:$0xff] }
 0x175   :  { %v1156_v15 = vpop.f32.mrf.mxu0  ;;  %v424_v14 = vpack.c.bf16 %v400_v1, %v399_v63  ;;  %v427_v63 = vpack.c.bf16 %v406_v42, %v405_v40 }
 0x176   :  { %v1333_v21 = vpop.f32.mrf.mxu1 }
 0x177   :  { %v13579_v23 = vadd.f32 %v1333_v21, %v1156_v15  ;;  %v1158_v24 = vpop.f32.mrf.mxu0  ;;  %v12155_v15 = vld [vmem:[%s20298_s4 + $0x38] sm:$0xff]   ;;  %v425_v21 = vpack.c.bf16 %v402_v10, %v401_v5 }
 0x178   :  { %v1335_v27 = vpop.f32.mrf.mxu1  ;;  %4761 = vmatpush1.bf16.msra.mxu1 %v12155_v15  ;;  %v407_v10 = vld [vmem:[%s20297_s0 + $0x116] sm:$0xff]  ;;  %v410_v15 = vld [vmem:[%s20297_s0 + $0x12e] sm:$0xff] }
 0x179   :  { %v1161_v28 = vpop.f32.mrf.mxu0  ;;  %11831 = vmatmul.mubr.bf16.gmra.mxu0 %v420_v18  ;;  %4762 = vmatprep.subr.bf16.mxu1 %v20304_v0 }
 0x17a   :  { %v1338_v30 = vpop.f32.mrf.mxu1  ;;  %11834 = vmatprep.mubr.bf16.mxu0 %v421_v22  ;;  %v12156_v22 = vld [vmem:[%s20298_s4 + $0xb8] sm:$0xff]  }
 0x17b   :  { %v13587_v38 = vadd.f32 %v1338_v30, %v1161_v28  ;;  %v1163_v39 = vpop.f32.mrf.mxu0  ;;  %v403_v30 = vld [vmem:[%s20297_s0 + $0xf6] sm:$0xff]  ;;  %4938 = vmatpush1.bf16.msra.mxu0 %v12156_v22  ;;  %v12160_v22 = vld [vmem:[%s20298_s4 + $0xa0] sm:$0xff]  }
 0x17c   :  { %v1340_v43 = vpop.f32.mrf.mxu1  ;;  %4939 = vmatprep.subr.bf16.mxu0 %v20304_v0 }
 0x17d   :  { %v1164_v45 = vpop.f32.mrf.mxu0 }
 0x17e   :  { %v1341_v50 = vpop.f32.mrf.mxu1 }
 0x17f   :  { %v13595_v52 = vadd.f32 %v1341_v50, %v1164_v45  ;;  %v1166_v53 = vpop.f32.mrf.mxu0  ;;  %4940 = vmatpush1.bf16.msra.mxu0 %v12157_v36 }
 0x180   :  { %v1343_v55 = vpop.f32.mrf.mxu1  ;;  %v12159_v53 = vld [vmem:[%s20298_s4 + $0xa8] sm:$0xff]   ;;  %4941 = vmatprep.subr.bf16.mxu0 %v20304_v0 }
 0x181   :  { %v1169_v58 = vpop.f32.mrf.mxu0  ;;  %11835 = vmatmul.mubr.bf16.gmra.mxu0 %v422_v46 }
 0x182   :  { %v1346_v61 = vpop.f32.mrf.mxu1  ;;  %11838 = vmatprep.mubr.bf16.mxu0 %v423_v51  ;;  %v12158_v51 = vld [vmem:[%s20298_s4 + $0x30] sm:$0xff]  }
 0x183   :  { %v13603_v2 = vadd.f32 %v1346_v61, %v1169_v58  ;;  %v1171_v3 = vpop.f32.mrf.mxu0  ;;  %v426_v58 = vpack.c.bf16 %v404_v32, %v403_v30  ;;  %4763 = vmatpush1.bf16.msra.mxu1 %v12158_v51  ;;  %4942 = vmatpush1.bf16.msra.mxu0 %v12159_v53 }
 0x184   :  { %v1348_v11 = vpop.f32.mrf.mxu1  ;;  %4764 = vmatprep.subr.bf16.mxu1 %v20304_v0  ;;  %4943 = vmatprep.subr.bf16.mxu0 %v20304_v0 }
 0x185   :  { %v1172_v12 = vpop.f32.mrf.mxu0  ;;  %v408_v11 = vld [vmem:[%s20297_s0 + $0x11e] sm:$0xff] }
 0x186   :  { %v1349_v18 = vpop.f32.mrf.mxu1 }
 0x187   :  { %v13617_v24 = vadd.f32 %v1349_v18, %v1172_v12  ;;  %v1174_v27 = vpop.f32.mrf.mxu0  ;;  %4944 = vmatpush1.bf16.msra.mxu0 %v12160_v22  ;;  %v12167_v22 = vld [vmem:[%s20298_s4 + $0x10] sm:$0xff]  }
 0x188   :  { %v1351_v28 = vpop.f32.mrf.mxu1  ;;  %v12161_v27 = vld [vmem:[%s20298_s4 + $0x28] sm:$0xff]   ;;  %4945 = vmatprep.subr.bf16.mxu0 %v20304_v0 }
 0x189   :  { %v1177_v39 = vpop.f32.mrf.mxu0  ;;  %11839 = vmatmul.mubr.bf16.gmra.mxu0 %v424_v14  ;;  %v409_v14 = vld [vmem:[%s20297_s0 + $0x126] sm:$0xff]  ;;  %4765 = vmatpush1.bf16.msra.mxu1 %v12161_v27 }
 0x18a   :  { %v1354_v43 = vpop.f32.mrf.mxu1  ;;  %11842 = vmatprep.mubr.bf16.mxu0 %v425_v21  ;;  %4766 = vmatprep.subr.bf16.mxu1 %v20304_v0  ;;  %v429_v42 = vpack.c.bf16 %v410_v15, %v409_v14 }
 0x18b   :  { %v13636_v45 = vadd.f32 %v1354_v43, %v1177_v39  ;;  %v1179_v46 = vpop.f32.mrf.mxu0  ;;  %v428_v39 = vpack.c.bf16 %v408_v11, %v407_v10  ;;  %v12162_v43 = vld [vmem:[%s20298_s4 + $0x98] sm:$0xff]  }
 0x18c   :  { %v1356_v50 = vpop.f32.mrf.mxu1  ;;  %v12163_v46 = vld [vmem:[%s20298_s4 + $0x20] sm:$0xff]   ;;  %4946 = vmatpush1.bf16.msra.mxu0 %v12162_v43 }
 0x18d   :  { %v1180_v55 = vpop.f32.mrf.mxu0  ;;  %4767 = vmatpush1.bf16.msra.mxu1 %v12163_v46  ;;  %4947 = vmatprep.subr.bf16.mxu0 %v20304_v0 }
 0x18e   :  { %v1357_v61 = vpop.f32.mrf.mxu1  ;;  %4768 = vmatprep.subr.bf16.mxu1 %v20304_v0 }
 0x18f   :  { %v13645_v1 = vadd.f32 %v1357_v61, %v1180_v55  ;;  %v1182_v3 = vpop.f32.mrf.mxu0  ;;  %v411_v55 = vld [vmem:[%s20297_s0 + $0x136] sm:$0xff] }
 0x190   :  { %v1359_v5 = vpop.f32.mrf.mxu1  ;;  %v12164_v3 = vld [vmem:[%s20298_s4 + $0x90] sm:$0xff]  }
 0x191   :  { %v1395_v12 = vpop.f32.mrf.mxu0  ;;  %11843 = vmatmul.mubr.bf16.gmra.mxu0 %v426_v58  ;;  %v12165_v5 = vld [vmem:[%s20298_s4 + $0x18] sm:$0xff]  }
 0x192   :  { %v1396_v18 = vadd.f32 %v1395_v12, %v13278_v62  ;;  %v1572_v21 = vpop.f32.mrf.mxu1  ;;  %11846 = vmatprep.mubr.bf16.mxu0 %v427_v63  ;;  %4948 = vmatpush1.bf16.msra.mxu0 %v12164_v3 }
 0x193   :  { %v1397_v28 = vpop.f32.mrf.mxu0  ;;  %4769 = vmatpush1.bf16.msra.mxu1 %v12165_v5  ;;  %4949 = vmatprep.subr.bf16.mxu0 %v20304_v0 }
 0x194   :  { %v13668_v30 = vadd.f32 %v1572_v21, %v1396_v18  ;;  %v1574_v32 = vpop.f32.mrf.mxu1  ;;  %4770 = vmatprep.subr.bf16.mxu1 %v20304_v0  ;;  %v12166_v21 = vld [vmem:[%s20298_s4 + $0x88] sm:$0xff]  }
 0x195   :  { %v1398_v36 = vpop.f32.mrf.mxu0 }
 0x196   :  { %20399 = vst [vmem:[#allocation3_spill] sm:$0xff] %v13668_v30  ;;  %v1399_v62 = vadd.f32 %v1398_v36, %v13292_v9  ;;  %v1575_v40 = vpop.f32.mrf.mxu1  ;;  %v412_v9 = vld [vmem:[%s20297_s0 + $0x13e] sm:$0x3f]  ;;  %4950 = vmatpush1.bf16.msra.mxu0 %v12166_v21 }
 0x197   :  { %v1400_v50 = vpop.f32.mrf.mxu0  ;;  %4771 = vmatpush1.bf16.msra.mxu1 %v12167_v22  ;;  %4951 = vmatprep.subr.bf16.mxu0 %v20304_v0 }
 0x198   :  { %v13679_v51 = vadd.f32 %v1575_v40, %v1399_v62  ;;  %v1577_v53 = vpop.f32.mrf.mxu1  ;;  %4772 = vmatprep.subr.bf16.mxu1 %v20304_v0  ;;  %v12168_v62 = vld [vmem:[%s20298_s4 + $0x8] sm:$0xff]  }
 0x199   :  { %v1403_v58 = vpop.f32.mrf.mxu0  ;;  %11847 = vmatmul.mubr.bf16.gmra.mxu0 %v428_v39 }
 0x19a   :  { %20400 = vst [vmem:[#allocation4_spill] sm:$0xff] %v13679_v51  ;;  %v1404_v61 = vadd.f32 %v1403_v58, %v13300_v17  ;;  %v1580_v63 = vpop.f32.mrf.mxu1  ;;  %11850 = vmatprep.mubr.bf16.mxu0 %v429_v42  ;;  %v430_v17 = vpack.c.bf16 %v412_v9, %v411_v55  ;;  %v12170_v55 = vld [vmem:[%s20298_s4] sm:$0xff]  }
 0x19b   :  { %v1405_v10 = vpop.f32.mrf.mxu0  ;;  %4773 = vmatpush1.bf16.msra.mxu1 %v12168_v62 }
 0x19c   :  { %v13696_v11 = vadd.f32 %v1580_v63, %v1404_v61  ;;  %v1582_v12 = vpop.f32.mrf.mxu1  ;;  %4774 = vmatprep.subr.bf16.mxu1 %v20304_v0  ;;  %v2014_v63 = vlaneseq  ;;  %v12171_v10 = vld [vmem:[%s20298_s4 + $0xf8] sm:$0xff]  }
 0x19d   :  { %v1406_v14 = vpop.f32.mrf.mxu0 }
 0x19e   :  { %20401 = vst [vmem:[#allocation5_spill] sm:$0xff] %v13696_v11  ;;  %v1407_v15 = vadd.f32 %v1406_v14, %v13314_v29  ;;  %v1583_v18 = vpop.f32.mrf.mxu1 }
 0x19f   :  { %v1408_v27 = vpop.f32.mrf.mxu0  ;;  %4775 = vmatpush1.bf16.msra.mxu1 %v12170_v55 }
 0x1a0   :  { %v13707_v28 = vadd.f32 %v1583_v18, %v1407_v15  ;;  %v1585_v32 = vpop.f32.mrf.mxu1  ;;  %4776 = vmatprep.subr.bf16.mxu1 %v20304_v0  ;;  %v13735_v15 = vshrl.u32 %v2014_v63, 7  ;;  %v32_v18 = vld [vmem:[#allocation2 + $0x8] sm:$0x3] }
 0x1a1   :  { %v1411_v36 = vpop.f32.mrf.mxu0  ;;  %11851 = vmatmul.mubr.bf16.gmra.mxu0 %v430_v17  ;;  %v33_v22 = vsel %vm31_vm2, 0, %v32_v18  ;;  %v12175_v18 = vld [vmem:[%s20298_s4 + $0xe8] sm:$0xff]  }
 0x1a2   :  { %20402 = vst [vmem:[#allocation6_spill] sm:$0xff] %v13707_v28  ;;  %v1412_v29 = vadd.f32 %v1411_v36, %v13322_v37  ;;  %v1588_v39 = vpop.f32.mrf.mxu1  ;;  %v12169_v37 = vld [vmem:[%s20298_s4 + $0x80] sm:$0xff]   ;;  %34 = vst [vmem:[#allocation2 + $0x8] sm:$0x3] %v33_v22  ;;  %v2017_v62 = vadd.s32 16, %v13735_v15  ;;  %v2039_v11 = vadd.s32 192, %v13735_v15 }
 0x1a3   :  { %v1413_v40 = vpop.f32.mrf.mxu0  ;;  %4952 = vmatpush1.bf16.msra.mxu0 %v12169_v37 }
 0x1a4   :  { %v13715_v42 = vadd.f32 %v1588_v39, %v1412_v29  ;;  %v1590_v43 = vpop.f32.mrf.mxu1  ;;  %4953 = vmatprep.subr.bf16.mxu0 %v20304_v0  ;;  %v12173_v40 = vld [vmem:[%s20298_s4 + $0xf0] sm:$0xff]   ;;  %v13754_v55 = vadd.s32 19, %v2017_v62 }
 0x1a5   :  { %v1414_v46 = vpop.f32.mrf.mxu0 }
 0x1a6   :  { %20403 = vst [vmem:[#allocation7_spill] sm:$0xff] %v13715_v42  ;;  %v1415_v50 = vadd.f32 %v1414_v46, %v13336_v48  ;;  %v1591_v53 = vpop.f32.mrf.mxu1 }
 0x1a7   :  { %v1416_v9 = vpop.f32.mrf.mxu0  ;;  %4954 = vmatpush2.bf16.msra.mxu0 %v12171_v10 }
 0x1a8   :  { %v13725_v58 = vadd.f32 %v1591_v53, %v1415_v50  ;;  %v1593_v61 = vpop.f32.mrf.mxu1  ;;  %4955 = vmatprep.subr.bf16.mxu0 %v20304_v0 }
 0x1a9   :  { %v1419_v3 = vpop.f32.mrf.mxu0  ;;  %v12174_v61 = vld [vmem:[%s20298_s4 + $0x70] sm:$0xff]  }
 0x1aa   :  { %20404 = vst [vmem:[#allocation8_spill] sm:$0xff] %v13725_v58  ;;  %v1420_v48 = vadd.f32 %v1419_v3, %v13344_v56  ;;  %v1596_v5 = vpop.f32.mrf.mxu1  ;;  %v12172_v56 = vld [vmem:[%s20298_s4 + $0x78] sm:$0xff]  }
 0x1ab   :  { %v1421_v12 = vpop.f32.mrf.mxu0  ;;  %4777 = vmatpush2.bf16.msra.mxu1 %v12172_v56  ;;  %4956 = vmatpush2.bf16.msra.mxu0 %v12173_v40  ;;  %v2016_v40 = vadd.s32 8, %v13735_v15 }
 0x1ac   :  { %v13733_v14 = vadd.f32 %v1596_v5, %v1420_v48  ;;  %v1598_v17 = vpop.f32.mrf.mxu1  ;;  %4778 = vmatprep.subr.bf16.mxu1 %v20304_v0  ;;  %4957 = vmatprep.subr.bf16.mxu0 %v20304_v0  ;;  %v13763_v10 = vmul.u32.u64.low 3817748708, %v13754_v55  ;;  %v13764_v12 = vmul.u32.u64.high 3817748708, %v13754_v55, %v13763_v10 }
 0x1ad   :  { %v1422_v21 = vpop.f32.mrf.mxu0  ;;  %v13800_v10 = vadd.s32 19, %v2016_v40 }
 0x1ae   :  { %20405 = vst [vmem:[#allocation9_spill] sm:$0xff] %v13733_v14  ;;  %v1423_v27 = vadd.f32 %v1422_v21, %v13358_v4  ;;  %v1599_v32 = vpop.f32.mrf.mxu1 }
 0x1af   :  { %v1424_v36 = vpop.f32.mrf.mxu0  ;;  %4779 = vmatpush2.bf16.msra.mxu1 %v12174_v61  ;;  %4958 = vmatpush2.bf16.msra.mxu0 %v12175_v18  ;;  %v12178_v61 = vld [vmem:[%s20298_s4 + $0x60] sm:$0xff]  }
 0x1b0   :  { %v13744_v29 = vadd.f32 %v1599_v32, %v1423_v27  ;;  %v1601_v39 = vpop.f32.mrf.mxu1  ;;  %4780 = vmatprep.subr.bf16.mxu1 %v20304_v0  ;;  %v13775_v27 = vadd.s32 19, %v13735_v15  ;;  %v2018_v32 = vadd.s32 24, %v13735_v15  ;;  %4959 = vmatprep.subr.bf16.mxu0 %v20304_v0 }
 0x1b1   :  { %v1427_v43 = vpop.f32.mrf.mxu0 }
 0x1b2   :  { %20406 = vst [vmem:[#allocation10_spill] sm:$0xff] %v13744_v29  ;;  %v1428_v46 = vadd.f32 %v1427_v43, %v13366_v13  ;;  %v1604_v50 = vpop.f32.mrf.mxu1 }
 0x1b3   :  { %v1429_v4 = vpop.f32.mrf.mxu0 }
 0x1b4   :  { %v13752_v53 = vadd.f32 %v1604_v50, %v1428_v46  ;;  %v1606_v37 = vpop.f32.mrf.mxu1  ;;  %v12177_v46 = vld [vmem:[%s20298_s4 + $0xe0] sm:$0xff]  }
 0x1b5   :  { %v1430_v9 = vpop.f32.mrf.mxu0  ;;  %v13788_v4 = vmul.u32.u64.low 3817748708, %v13775_v27  ;;  %v13789_v37 = vmul.u32.u64.high 3817748708, %v13775_v27, %v13788_v4  ;;  %4960 = vmatpush2.bf16.msra.mxu0 %v12177_v46  ;;  %v2019_v46 = vadd.s32 32, %v13735_v15 }
 0x1b6   :  { %20407 = vst [vmem:[#allocation11_spill] sm:$0xff] %v13752_v53  ;;  %v1431_v63 = vadd.f32 %v1430_v9, %v13380_v25  ;;  %v1607_v3 = vpop.f32.mrf.mxu1  ;;  %v12176_v25 = vld [vmem:[%s20298_s4 + $0x68] sm:$0xff]   ;;  %v13791_v9 = vadd.s32 19, %v2018_v32  ;;  %4961 = vmatprep.subr.bf16.mxu0 %v20304_v0 }
 0x1b7   :  { %v1432_v48 = vpop.f32.mrf.mxu0  ;;  %4781 = vmatpush2.bf16.msra.mxu1 %v12176_v25  ;;  %v2093_v4 = vshrl.u32 %v13789_v37, 4  ;;  %v2022_v37 = vadd.s32 56, %v13735_v15 }
 0x1b8   :  { %v13760_v13 = vadd.f32 %v1607_v3, %v1431_v63  ;;  %v1609_v5 = vpop.f32.mrf.mxu1  ;;  %4782 = vmatprep.subr.bf16.mxu1 %v20304_v0  ;;  %v2021_v48 = vadd.s32 48, %v13735_v15 }
 0x1b9   :  { %v1435_v17 = vpop.f32.mrf.mxu0 }
 0x1ba   :  { %20408 = vst [vmem:[#allocation12_spill] sm:$0xff] %v13760_v13  ;;  %v1436_v56 = vadd.f32 %v1435_v17, %v13388_v35  ;;  %v1612_v21 = vpop.f32.mrf.mxu1 }
 0x1bb   :  { %v1437_v22 = vpop.f32.mrf.mxu0  ;;  %4783 = vmatpush2.bf16.msra.mxu1 %v12178_v61 }
 0x1bc   :  { %v13778_v36 = vadd.f32 %v1612_v21, %v1436_v56  ;;  %v1614_v39 = vpop.f32.mrf.mxu1  ;;  %4784 = vmatprep.subr.bf16.mxu1 %v20304_v0  ;;  %v13806_v56 = vmul.u32.u64.low 3817748708, %v13791_v9  ;;  %v13807_v21 = vmul.u32.u64.high 3817748708, %v13791_v9, %v13806_v56 }
 0x1bd   :  { %v1438_v62 = vpop.f32.mrf.mxu0  ;;  %v13811_v39 = vadd.s32 19, %v2021_v48 }
 0x1be   :  { %20409 = vst [vmem:[#allocation13_spill] sm:$0xff] %v13778_v36  ;;  %v1439_v35 = vadd.f32 %v1438_v62, %v13402_v47  ;;  %v1615_v43 = vpop.f32.mrf.mxu1  ;;  %v2115_v47 = vshrl.u32 %v13764_v12, 4 }
 0x1bf   :  { %v1440_v50 = vpop.f32.mrf.mxu0 }
 0x1c0   :  { %v13796_v63 = vadd.f32 %v1615_v43, %v1439_v35  ;;  %v1617_v3 = vpop.f32.mrf.mxu1  ;;  %v2116_v32 = vmul.u32 18, %v2115_v47  ;;  %v13814_v40 = vmul.u32.u64.low 3817748708, %v13800_v10  ;;  %v13815_v35 = vmul.u32.u64.high 3817748708, %v13800_v10, %v13814_v40 }
 0x1c1   :  { %v1443_v5 = vpop.f32.mrf.mxu0 }
 0x1c2   :  { %20410 = vst [vmem:[#allocation14_spill] sm:$0xff] %v13796_v63  ;;  %v1444_v17 = vadd.f32 %v1443_v5, %v13410_v57  ;;  %v1620_v18 = vpop.f32.mrf.mxu1  ;;  %v2117_v47 = vsub.s32 %v13754_v55, %v2116_v32  ;;  %v13824_v48 = vmul.u32.u64.low 3817748708, %v13811_v39  ;;  %v13825_v5 = vmul.u32.u64.high 3817748708, %v13811_v39, %v13824_v48 }
 0x1c3   :  { %v1445_v25 = vpop.f32.mrf.mxu0  ;;  %v2126_v32 = vshrl.u32 %v13807_v21, 4 }
 0x1c4   :  { %v13809_v12 = vadd.f32 %v1620_v18, %v1444_v17  ;;  %v1622_v22 = vpop.f32.mrf.mxu1  ;;  %v12179_v17 = vld [vmem:[%s20298_s4 + $0xd8] sm:$0xff]   ;;  %vm2485_vm3 = vcmp.ne.s32.totalorder %v2117_v47, 0  ;;  %vm2521_vm4 = vcmp.lt.s32.totalorder %v2117_v47, 0 }
 0x1c5   :  { %v1446_v62 = vpop.f32.mrf.mxu0  ;;  %v13835_v22 = vadd.s32 19, %v2019_v46  ;;  %4962 = vmatpush2.bf16.msra.mxu0 %v12179_v17  ;;  %v13843_v46 = vadd.s32 19, %v2022_v37  ;;  %v2127_v37 = vmul.u32 18, %v2126_v32  ;;  %vm13867_vm5 = vmand %vm2521_vm4, %vm2485_vm3 }
 0x1c6   :  { %20411 = vst [vmem:[#allocation15_spill] sm:$0xff] %v13809_v12  ;;  %v1447_v57 = vadd.f32 %v1446_v62, %v13424_v6  ;;  %v1623_v43 = vpop.f32.mrf.mxu1  ;;  %v12180_v6 = vld [vmem:[%s20298_s4 + $0x58] sm:$0xff]   ;;  %4963 = vmatprep.subr.bf16.mxu0 %v20304_v0  ;;  %v2030_v12 = vadd.s32 120, %v13735_v15 }
 0x1c7   :  { %v1448_v50 = vpop.f32.mrf.mxu0  ;;  %4785 = vmatpush2.bf16.msra.mxu1 %v12180_v6  ;;  %v13848_v48 = vmul.u32.u64.low 3817748708, %v13835_v22  ;;  %v13849_v17 = vmul.u32.u64.high 3817748708, %v13835_v22, %v13848_v48  ;;  %v2025_v6 = vadd.s32 80, %v13735_v15 }
 0x1c8   :  { %v13820_v61 = vadd.f32 %v1623_v43, %v1447_v57  ;;  %v1625_v3 = vpop.f32.mrf.mxu1  ;;  %4786 = vmatprep.subr.bf16.mxu1 %v20304_v0  ;;  %v2094_v57 = vmul.u32 18, %v2093_v4  ;;  %v2020_v50 = vadd.s32 40, %v13735_v15  ;;  %v12181_v4 = vld [vmem:[%s20298_s4 + $0xd0] sm:$0xff]   ;;  %v2024_v0 = vadd.s32 72, %v13735_v15 }
 0x1c9   :  { %v1451_v18 = vpop.f32.mrf.mxu0  ;;  %4964 = vmatpush2.bf16.msra.mxu0 %v12181_v4  ;;  %v13880_v4 = vadd.s32 19, %v2025_v6  ;;  %v13972_v36 = vadd.s32 19, %v2030_v12 }
 0x1ca   :  { %20412 = vst [vmem:[#allocation16_spill] sm:$0xff] %v13820_v61  ;;  %v1452_v25 = vadd.f32 %v1451_v18, %v13432_v16  ;;  %v1628_v56 = vpop.f32.mrf.mxu1  ;;  %v2104_v16 = vshrl.u32 %v13815_v35, 4  ;;  %v12182_v35 = vld [vmem:[%s20298_s4 + $0x50] sm:$0xff]  }
 0x1cb   :  { %v1453_v55 = vpop.f32.mrf.mxu0  ;;  %4787 = vmatpush2.bf16.msra.mxu1 %v12182_v35  ;;  %v12183_v35 = vld [vmem:[%s20298_s4 + $0xc8] sm:$0xff]  }
 0x1cc   :  { %v13840_v62 = vadd.f32 %v1628_v56, %v1452_v25  ;;  %v1630_v40 = vpop.f32.mrf.mxu1  ;;  %v2023_v25 = vadd.s32 64, %v13735_v15  ;;  %v2593_v55 = vadd.s32 18, %v2117_v47  ;;  %v2105_v32 = vmul.u32 18, %v2104_v16 }
 0x1cd   :  { %v1454_v43 = vpop.f32.mrf.mxu0  ;;  %v13862_v40 = vsub.s32 %v13775_v27, %v2094_v57  ;;  %v20417_v27 = vmov 0  }
 0x1ce   :  { %20413 = vst [vmem:[#allocation17_spill] sm:$0xff] %v13840_v62  ;;  %v1455_v3 = vadd.f32 %v1454_v43, %v13446_v31  ;;  %v1631_v21 = vpop.f32.mrf.mxu1  ;;  %v2159_v43 = vshrl.u32 %v13825_v5, 4  ;;  %4965 = vmatprep.subr.bf16.mxu0 %v20417_v27  ;;  %4788 = vmatprep.subr.bf16.mxu1 %v20417_v27 }
 0x1cf   :  { %v1456_v18 = vpop.f32.mrf.mxu0  ;;  %v13898_v6 = vadd.s32 18, %v13862_v40  ;;  %4966 = vmatpush2.bf16.msra.mxu0 %v12183_v35  ;;  %vm2483_vm6 = vcmp.ne.s32.totalorder %v13862_v40, 0  ;;  %vm2519_vm7 = vcmp.lt.s32.totalorder %v13862_v40, 0 }
 0x1d0   :  { %v13859_v31 = vadd.f32 %v1631_v21, %v1455_v3  ;;  %v1633_v56 = vpop.f32.mrf.mxu1  ;;  %v13872_v3 = vmul.u32.u64.low 3817748708, %v13843_v46  ;;  %v13873_v21 = vmul.u32.u64.high 3817748708, %v13843_v46, %v13872_v3  ;;  %v13875_v18 = vadd.s32 19, %v2020_v50  ;;  %4967 = vmatprep.subr.bf16.mxu0 %v20417_v27  ;;  %vm14000_vm14 = vmand %vm2519_vm7, %vm2483_vm6 }
 0x1d1   :  { %v1459_v48 = vpop.f32.mrf.mxu0  ;;  %v13886_v56 = vsub.s32 %v13791_v9, %v2127_v37  ;;  %v13888_v3 = vadd.s32 19, %v2023_v25  ;;  %v2026_v50 = vadd.s32 88, %v13735_v15  ;;  %v12184_v9 = vld [vmem:[%s20298_s4 + $0x48] sm:$0xff]   ;;  %v13904_v25 = vsub.s32 %v13800_v10, %v2105_v32 }
 0x1d2   :  { %20414 = vst [vmem:[#allocation18_spill] sm:$0xff] %v13859_v31  ;;  %v1460_v5 = vadd.f32 %v1459_v48, %v13454_v41  ;;  %v1636_v57 = vpop.f32.mrf.mxu1  ;;  %v13895_v41 = vsel %vm13867_vm5, %v2593_v55, %v2117_v47  ;;  %v2160_v48 = vmul.u32 18, %v2159_v43  ;;  %v2137_v43 = vshrl.u32 %v13849_v17, 4  ;;  %4789 = vmatpush2.bf16.msra.mxu1 %v12184_v9 }
 0x1d3   :  { %v1461_v16 = vpop.f32.mrf.mxu0  ;;  %v13917_v10 = vmul.u32.u64.low 3817748708, %v13880_v4  ;;  %v13918_v32 = vmul.u32.u64.high 3817748708, %v13880_v4, %v13917_v10  ;;  %vm2486_vm8 = vcmp.ne.s32.totalorder %v13886_v56, 0  ;;  %4790 = vmatprep.subr.bf16.mxu1 %v20417_v27  ;;  %vm2522_vm9 = vcmp.lt.s32.totalorder %v13886_v56, 0 }
 0x1d4   :  { %v13891_v61 = vadd.f32 %v1636_v57, %v1460_v5  ;;  %v1638_v31 = vpop.f32.mrf.mxu1  ;;  %v13922_v35 = vmul.u32.u64.low 3817748708, %v13888_v3  ;;  %v13923_v16 = vmul.u32.u64.high 3817748708, %v13888_v3, %v13922_v35  ;;  %v13933_v9 = vsub.s32 %v13811_v39, %v2160_v48  ;;  %vm14015_vm15 = vmand %vm2522_vm9, %vm2486_vm8 }
 0x1d5   :  { %v1462_v37 = vpop.f32.mrf.mxu0  ;;  %v13907_v5 = vmul.u32.u64.low 3817748708, %v13875_v18  ;;  %v13908_v31 = vmul.u32.u64.high 3817748708, %v13875_v18, %v13907_v5  ;;  %v2027_v10 = vadd.s32 96, %v13735_v15  ;;  %v13940_v35 = vadd.s32 19, %v2024_v0  ;;  %v12186_v0 = vld [vmem:[%s20298_s4 + $0xc0] sm:$0xff]  }
 0x1d6   :  { %20418 = vst [vmem:[#allocation19_spill] sm:$0xff] %v13891_v61  ;;  %v1463_v47 = vadd.f32 %v1462_v37, %v13468_v54  ;;  %v1639_v55 = vpop.f32.mrf.mxu1  ;;  %v13925_v54 = vadd.s32 19, %v2026_v50  ;;  %v2029_v37 = vadd.s32 112, %v13735_v15  ;;  %v13937_v61 = vadd.s32 18, %v13886_v56  ;;  %4968 = vmatpush2.bf16.msra.mxu0 %v12186_v0 }
 0x1d7   :  { %v1464_v57 = vpop.f32.mrf.mxu0  ;;  %v2170_v50 = vshrl.u32 %v13873_v21, 4  ;;  %vm2484_vm10 = vcmp.ne.s32.totalorder %v13904_v25, 0  ;;  %vm2520_vm11 = vcmp.lt.s32.totalorder %v13904_v25, 0  ;;  %v2138_v39 = vmul.u32 18, %v2137_v43  ;;  %5291 = vmatprep.subr.bf16.mxu0 %v20417_v27 }
 0x1d8   :  { %v13929_v5 = vadd.f32 %v1639_v55, %v1463_v47  ;;  %v1641_v17 = vpop.f32.mrf.mxu1  ;;  %v13953_v21 = vadd.s32 19, %v2029_v37  ;;  %vm2489_vm12 = vcmp.ne.s32.totalorder %v13933_v9, 0  ;;  %vm2525_vm13 = vcmp.lt.s32.totalorder %v13933_v9, 0  ;;  %vm14028_vm0 = vmand %vm2520_vm11, %vm2484_vm10 }
 0x1d9   :  { %v1467_v57 = vpop.f32.mrf.mxu0  ;;  %v13947_v17 = vadd.s32 18, %v13904_v25  ;;  %v2028_v37 = vadd.s32 104, %v13735_v15  ;;  %v2171_v13 = vmul.u32 18, %v2170_v50  ;;  %v2181_v12 = vshrl.u32 %v13923_v16, 4  ;;  %vm14073_vm2 = vmand %vm2525_vm13, %vm2489_vm12 }
 0x1da   :  { %20419 = vst [vmem:[#allocation20_spill] sm:$0xff] %v13929_v5  ;;  %v1468_v47 = vadd.f32 %v1467_v57, %v13476_v26  ;;  %v1644_v55 = vpop.f32.mrf.mxu1  ;;  %v13950_v5 = vmul.u32.u64.low 3817748708, %v13925_v54  ;;  %v13951_v62 = vmul.u32.u64.high 3817748708, %v13925_v54, %v13950_v5  ;;  %v12185_v26 = vld [vmem:[%s20298_s4 + $0x40] sm:$0xff]   ;;  %v2597_v16 = vadd.s32 18, %v13933_v9 }
 0x1db   :  { %v1469_v48 = vpop.f32.mrf.mxu0  ;;  %v13969_v63 = vmul.u32.u64.low 3817748708, %v13940_v35  ;;  %v13970_v53 = vmul.u32.u64.high 3817748708, %v13940_v35, %v13969_v63  ;;  %4791 = vmatpush2.bf16.msra.mxu1 %v12185_v26  ;;  %v2182_v42 = vmul.u32 18, %v2181_v12  ;;  %v14047_v28 = vsel %vm14000_vm14, %v13898_v6, %v13862_v40 }
 0x1dc   :  { %v13961_v57 = vadd.f32 %v1644_v55, %v1468_v47  ;;  %v1646_v43 = vpop.f32.mrf.mxu1  ;;  %v13965_v48 = vadd.s32 19, %v2027_v10  ;;  %v2148_v10 = vshrl.u32 %v13908_v31, 4  ;;  %5114 = vmatprep.subr.bf16.mxu1 %v20417_v27  ;;  %v2203_v63 = vshrl.u32 %v13918_v32, 4 }
 0x1dd   :  { %v1470_v5 = vpop.f32.mrf.mxu0  ;;  %v13976_v43 = vsub.s32 %v13835_v22, %v2138_v39  ;;  %v2192_v12 = vshrl.u32 %v13970_v53, 4  ;;  %v14063_v32 = vsel %vm14028_vm0, %v13947_v17, %v13904_v25 }
 0x1de   :  { %20420 = vst [vmem:[#allocation21_spill] sm:$0xff] %v13961_v57  ;;  %v1471_v47 = vadd.f32 %v1470_v5, %v13493_v20  ;;  %v1647_v55 = vpop.f32.mrf.mxu1  ;;  %v2033_v57 = vadd.s32 144, %v13735_v15  ;;  %v13985_v26 = vmul.u32.u64.low 3817748708, %v13953_v21  ;;  %v13986_v20 = vmul.u32.u64.high 3817748708, %v13953_v21, %v13985_v26  ;;  %20429 = vst [vmem:[#allocation24_spill] sm:$0xff] %v14063_v32 }
 0x1df   :  { %v1472_v50 = vpop.f32.mrf.mxu0  ;;  %v13991_v31 = vmul.u32.u64.low 3817748708, %v13965_v48  ;;  %v13992_v39 = vmul.u32.u64.high 3817748708, %v13965_v48, %v13991_v31  ;;  %v13994_v5 = vadd.s32 19, %v2028_v37  ;;  %v2149_v27 = vmul.u32 18, %v2148_v10 }
 0x1e0   :  { %v13988_v0 = vadd.f32 %v1647_v55, %v1471_v47  ;;  %v1649_v22 = vpop.f32.mrf.mxu1  ;;  %v14006_v47 = vmul.u32.u64.low 3817748708, %v13972_v36  ;;  %v14007_v55 = vmul.u32.u64.high 3817748708, %v13972_v36, %v14006_v47  ;;  %v2031_v50 = vadd.s32 128, %v13735_v15 }
 0x1e1   :  { %v1475_v58 = vpop.f32.mrf.mxu0  ;;  %v14020_v31 = vsub.s32 %v13843_v46, %v2171_v13  ;;  %v2204_v29 = vmul.u32 18, %v2203_v63  ;;  %v2034_v13 = vadd.s32 152, %v13735_v15  ;;  %v2214_v10 = vshrl.u32 %v13951_v62, 4 }
 0x1e2   :  { %20421 = vst [vmem:[#allocation22_spill] sm:$0xff] %v13988_v0  ;;  %v1476_v37 = vadd.f32 %v1475_v58, %v13504_v33  ;;  %v1652_v26 = vpop.f32.mrf.mxu1  ;;  %v14022_v0 = vadd.s32 19, %v2033_v57  ;;  %v14033_v58 = vadd.s32 18, %v13976_v43  ;;  %v14053_v63 = vsel %vm14015_vm15, %v13937_v61, %v13886_v56 }
 0x1e3   :  { %v1477_v47 = vpop.f32.mrf.mxu0  ;;  %v14056_v62 = vadd.s32 19, %v2031_v50  ;;  %v2247_v61 = vshrl.u32 %v13986_v20, 4  ;;  %v14084_v56 = vadd.s32 19, %v2034_v13  ;;  %v14089_v50 = vsub.s32 %v13880_v4, %v2204_v29 }
 0x1e4   :  { %v14036_v46 = vadd.f32 %v1652_v26, %v1476_v37  ;;  %v1654_v57 = vpop.f32.mrf.mxu1  ;;  %v14040_v47 = vmul.u32.u64.low 3817748708, %v13994_v5  ;;  %v14041_v14 = vmul.u32.u64.high 3817748708, %v13994_v5, %v14040_v47  ;;  %v2225_v33 = vshrl.u32 %v13992_v39, 4 }
 0x1e5   :  { %v1478_v51 = vpop.f32.mrf.mxu0  ;;  %v14066_v40 = vmul.u32.u64.low 3817748708, %v14022_v0  ;;  %v14067_v6 = vmul.u32.u64.high 3817748708, %v14022_v0, %v14066_v40  ;;  %v2032_v57 = vadd.s32 136, %v13735_v15  ;;  %vm2487_vm3 = vcmp.ne.s32.totalorder %v13976_v43, 0 }
 0x1e6   :  { %20428 = vst [vmem:[#allocation23_spill] sm:$0xff] %v14036_v46  ;;  %v1479_v37 = vadd.f32 %v1478_v51, %v13515_v49  ;;  %v1655_v26 = vpop.f32.mrf.mxu1  ;;  %v14078_v49 = vadd.s32 18, %v14020_v31  ;;  %v14081_v51 = vsub.s32 %v13875_v18, %v2149_v27  ;;  %vm2523_vm4 = vcmp.lt.s32.totalorder %v13976_v43, 0 }
 0x1e7   :  { %v1480_v22 = vpop.f32.mrf.mxu0  ;;  %v14096_v18 = vsub.s32 %v13888_v3, %v2182_v42  ;;  %v2215_v27 = vmul.u32 18, %v2214_v10  ;;  %v2193_v20 = vmul.u32 18, %v2192_v12  ;;  %v2258_v13 = vshrl.u32 %v14007_v55, 4 }
 0x1e8   :  { %v14086_v25 = vadd.f32 %v1655_v26, %v1479_v37  ;;  %v1657_v17 = vpop.f32.mrf.mxu1  ;;  %v14103_v4 = vsel %vm14073_vm2, %v2597_v16, %v13933_v9  ;;  %vm2490_vm5 = vcmp.ne.s32.totalorder %v14020_v31, 0  ;;  %vm2526_vm6 = vcmp.lt.s32.totalorder %v14020_v31, 0  ;;  %vm14184_vm2 = vmand %vm2523_vm4, %vm2487_vm3 }
 0x1e9   :  { %v1483_v47 = vpop.f32.mrf.mxu0  ;;  %20433 = vst [vmem:[#allocation26_spill] sm:$0xff] %v14103_v4  ;;  %v14108_v39 = vmul.u32.u64.low 3817748708, %v14056_v62  ;;  %v14109_v42 = vmul.u32.u64.high 3817748708, %v14056_v62, %v14108_v39  ;;  %vm2488_vm7 = vcmp.ne.s32.totalorder %v14081_v51, 0  ;;  %vm2524_vm8 = vcmp.lt.s32.totalorder %v14081_v51, 0  ;;  %vm14201_vm3 = vmand %vm2526_vm6, %vm2490_vm5 }
 0x1ea   :  { %20432 = vst [vmem:[#allocation25_spill] sm:$0xff] %v14086_v25  ;;  %v1484_v37 = vadd.f32 %v1483_v47, %v13523_v59  ;;  %v1660_v29 = vpop.f32.mrf.mxu1  ;;  %v14114_v59 = vadd.s32 18, %v14081_v51  ;;  %v2248_v55 = vmul.u32 18, %v2247_v61  ;;  %vm2493_vm9 = vcmp.ne.s32.totalorder %v14089_v50, 0  ;;  %vm14219_vm4 = vmand %vm2524_vm8, %vm2488_vm7 }
 0x1eb   :  { %v1485_v3 = vpop.f32.mrf.mxu0  ;;  %v14117_v9 = vmul.u32.u64.low 3817748708, %v14084_v56  ;;  %v14118_v16 = vmul.u32.u64.high 3817748708, %v14084_v56, %v14117_v9  ;;  %vm2529_vm10 = vcmp.lt.s32.totalorder %v14089_v50, 0  ;;  %v14125_v26 = vadd.s32 18, %v14089_v50 }
 0x1ec   :  { %v14120_v10 = vadd.f32 %v1660_v29, %v1484_v37  ;;  %v1662_v12 = vpop.f32.mrf.mxu1  ;;  %v2226_v40 = vmul.u32 18, %v2225_v33  ;;  %v14127_v22 = vadd.s32 19, %v2032_v57  ;;  %vm2491_vm11 = vcmp.ne.s32.totalorder %v14096_v18, 0  ;;  %vm14237_vm7 = vmand %vm2529_vm10, %vm2493_vm9 }
 0x1ed   :  { %v1486_v53 = vpop.f32.mrf.mxu0  ;;  %v14131_v61 = vsub.s32 %v13925_v54, %v2215_v27  ;;  %v2259_v17 = vmul.u32 18, %v2258_v13  ;;  %v2037_v47 = vadd.s32 176, %v13735_v15  ;;  %vm2527_vm12 = vcmp.lt.s32.totalorder %v14096_v18, 0 }
 0x1ee   :  { %20434 = vst [vmem:[#allocation27_spill] sm:$0xff] %v14120_v10  ;;  %v1487_v37 = vadd.f32 %v1486_v53, %v13531_v8  ;;  %v1663_v29 = vpop.f32.mrf.mxu1  ;;  %v2236_v39 = vshrl.u32 %v14041_v14, 4  ;;  %v2291_v33 = vshrl.u32 %v14067_v6, 4  ;;  %v14139_v3 = vadd.s32 18, %v14096_v18  ;;  %vm14252_vm8 = vmand %vm2527_vm12, %vm2491_vm11 }
 0x1ef   :  { %v1488_v57 = vpop.f32.mrf.mxu0  ;;  %v14142_v9 = vsub.s32 %v13940_v35, %v2193_v20  ;;  %v14145_v54 = vsub.s32 %v13953_v21, %v2248_v55  ;;  %v2035_v27 = vadd.s32 160, %v13735_v15  ;;  %v14151_v12 = vsub.s32 %v13965_v48, %v2226_v40 }
 0x1f0   :  { %v14148_v8 = vadd.f32 %v1663_v29, %v1487_v37  ;;  %v1665_v13 = vpop.f32.mrf.mxu1  ;;  %v14154_v14 = vmul.u32.u64.low 3817748708, %v14127_v22  ;;  %v14155_v6 = vmul.u32.u64.high 3817748708, %v14127_v22, %v14154_v14  ;;  %v14158_v57 = vadd.s32 18, %v14131_v61 }
 0x1f1   :  { %v1491_v53 = vpop.f32.mrf.mxu0  ;;  %v14161_v35 = vsub.s32 %v13972_v36, %v2259_v17  ;;  %v14163_v21 = vadd.s32 19, %v2037_v47  ;;  %v2038_v20 = vadd.s32 184, %v13735_v15  ;;  %vm2494_vm13 = vcmp.ne.s32.totalorder %v14131_v61, 0 }
 0x1f2   :  { %20435 = vst [vmem:[#allocation28_spill] sm:$0xff] %v14148_v8  ;;  %v1492_v55 = vadd.f32 %v1491_v53, %v13539_v19  ;;  %v1668_v37 = vpop.f32.mrf.mxu1  ;;  %vm2530_vm14 = vcmp.lt.s32.totalorder %v14131_v61, 0  ;;  %v2237_v48 = vmul.u32 18, %v2236_v39  ;;  %v2292_v40 = vmul.u32 18, %v2291_v33 }
 0x1f3   :  { %v2269_v29 = vshrl.u32 %v14109_v42, 4  ;;  %v1493_v13 = vpop.f32.mrf.mxu0  ;;  %vm2492_vm15 = vcmp.ne.s32.totalorder %v14142_v9, 0  ;;  %v14173_v36 = vadd.s32 18, %v14142_v9  ;;  %v2302_v17 = vshrl.u32 %v14118_v16, 4 }
 0x1f4   :  { %v14176_v19 = vadd.s32 19, %v2035_v27  ;;  %v14178_v47 = vadd.f32 %v1668_v37, %v1492_v55  ;;  %v1670_v14 = vpop.f32.mrf.mxu1  ;;  %vm2497_vm1 = vcmp.ne.s32.totalorder %v14145_v54, 0  ;;  %vm2533_vm0 = vcmp.lt.s32.totalorder %v14145_v54, 0 }
 0x1f5   :  { %v14191_v39 = vadd.s32 18, %v14145_v54  ;;  %v14194_v16 = vadd.s32 18, %v14151_v12  ;;  %v2036_v33 = vadd.s32 168, %v13735_v15  ;;  %v1494_v27 = vpop.f32.mrf.mxu0  ;;  %v14206_v55 = vadd.s32 18, %v14161_v35 }
 0x1f6   :  { %20436 = vst [vmem:[#allocation29_spill] sm:$0xff] %v14178_v47  ;;  %v14209_v37 = vmul.u32.u64.low 3817748708, %v14163_v21  ;;  %v14210_v13 = vmul.u32.u64.high 3817748708, %v14163_v21, %v14209_v37  ;;  %v14212_v14 = vadd.s32 19, %v2038_v20  ;;  %v1495_v47 = vadd.f32 %v1494_v27, %v13547_v34  ;;  %v1671_v25 = vpop.f32.mrf.mxu1  ;;  %v3432_v27 = vld [vmem:[#allocation2] sm:$0xf] }
 0x1f7   :  { %vm2495_vm5 = vcmp.ne.s32.totalorder %v14151_v12, 0  ;;  %vm2531_vm6 = vcmp.lt.s32.totalorder %v14151_v12, 0  ;;  %v14226_v46 = vsub.s32 %v13994_v5, %v2237_v48  ;;  %v14229_v20 = vsub.s32 %v14022_v0, %v2292_v40  ;;  %v14231_v37 = vld [vmem:[#allocation2 + $0x4] sm:$0xf]  ;;  %v1496_v10 = vpop.f32.mrf.mxu0 }
 0x1f8   :  { %v2270_v34 = vmul.u32 18, %v2269_v29  ;;  %v2303_v30 = vmul.u32 18, %v2302_v17  ;;  %v2041_v0 = vadd.s32 208, %v13735_v15  ;;  %v14246_v40 = vadd.f32 %v1671_v25, %v1495_v47  ;;  %v1673_v29 = vpop.f32.mrf.mxu1 }
 0x1f9   :  { %v14242_v5 = vmul.u32.u64.low 3817748708, %v14176_v19  ;;  %v14243_v48 = vmul.u32.u64.high 3817748708, %v14176_v19, %v14242_v5  ;;  %v2280_v32 = vshrl.u32 %v14155_v6, 4  ;;  %v14257_v17 = vadd.s32 19, %v2036_v33 }
 0x1fa   :  { %20445 = vst [vmem:[#allocation30_spill] sm:$0xff] %v14246_v40  ;;  %v1499_v5 = vpop.f32.mrf.mxu0  ;;  %v14264_v25 = vsel %vm14184_vm2, %v14033_v58, %v13976_v43  ;;  %v14270_v47 = vsel %vm14201_vm3, %v14078_v49, %v14020_v31  ;;  %v14273_v29 = vmul.u32.u64.low 3817748708, %v14212_v14  ;;  %v14274_v6 = vmul.u32.u64.high 3817748708, %v14212_v14, %v14273_v29  ;;  %v1676_v40 = vpop.f32.mrf.mxu1  ;;  %vm14322_vm3 = vmand %vm2530_vm14, %vm2494_vm13 }
 0x1fb   :  { %v1500_v33 = vadd.f32 %v1499_v5, %v13555_v44  ;;  %v14281_v42 = vsel %vm14219_vm4, %v14114_v59, %v14081_v51  ;;  %v14287_v43 = vsel %vm14237_vm7, %v14125_v26, %v14089_v50  ;;  %vm2498_vm9 = vcmp.ne.s32.totalorder %v14161_v35, 0 }
 0x1fc   :  { %vm2534_vm10 = vcmp.lt.s32.totalorder %v14161_v35, 0  ;;  %v14292_v31 = vsub.s32 %v14056_v62, %v2270_v34  ;;  %v1501_v44 = vpop.f32.mrf.mxu0  ;;  %v14298_v58 = vsel %vm14252_vm8, %v14139_v3, %v14096_v18  ;;  %vm2496_vm11 = vcmp.ne.s32.totalorder %v14226_v46, 0  ;;  %v1678_v4 = vpop.f32.mrf.mxu1  ;;  %vm14350_vm8 = vmand %vm2533_vm0, %vm2497_vm1 }
 0x1fd   :  { %vm2532_vm12 = vcmp.lt.s32.totalorder %v14226_v46, 0  ;;  %v14303_v49 = vadd.s32 18, %v14226_v46  ;;  %v14306_v51 = vcombine.low %v3432_v27, %v14231_v37  ;;  %v14308_v50 = vadd.s32 19, %v2041_v0  ;;  %vm14389_vm1 = vmand %vm2531_vm6, %vm2495_vm5 }
 0x1fe   :  { %v14310_v62 = vadd.f32 %v1676_v40, %v1500_v33  ;;  %vm2501_vm2 = vcmp.ne.s32.totalorder %v14229_v20, 0  ;;  %v14314_v18 = vsub.s32 %v14084_v56, %v2303_v30  ;;  %v2281_v59 = vmul.u32 18, %v2280_v32  ;;  %v1502_v3 = vpop.f32.mrf.mxu0  ;;  %v1679_v56 = vpop.f32.mrf.mxu1  ;;  %vm14423_vm6 = vmand %vm2534_vm10, %vm2498_vm9 }
 0x1ff   :  { %v14316_v26 = vadd.s32 19, %v2039_v11  ;;  %vm2537_vm4 = vcmp.lt.s32.totalorder %v14229_v20, 0  ;;  %v14328_v53 = vadd.s32 18, %v14229_v20  ;;  %v2335_v30 = vshrl.u32 %v14210_v13, 4 }
 0x200   :  { %20448 = vst [vmem:[#allocation31_spill] sm:$0xff] %v14310_v62  ;;  %v1503_v11 = vadd.f32 %v1502_v3, %v13563_v60  ;;  %vm20451_vm7 = vcmp.lt.s32.totalorder %v14142_v9, 0  ;;  %v14343_v27 = vmul.u32.u64.low 3817748708, %v14257_v17  ;;  %v14344_v0 = vmul.u32.u64.high 3817748708, %v14257_v17, %v14343_v27  ;;  %v1504_v13 = vpop.f32.mrf.mxu0  ;;  %v1681_v33 = vpop.f32.mrf.mxu1  ;;  %vm14450_vm9 = vmand %vm2537_vm4, %vm2501_vm2 }
 0x201   :  { %vm14337_vm13 = vmand %vm20451_vm7, %vm2492_vm15  ;;  %vm2535_vm15 = vcmp.lt.s32.totalorder %v14292_v31, 0  ;;  %v14356_v40 = vadd.s32 18, %v14292_v31  ;;  %v14359_v10 = vmul.u32.u64.low 3817748708, %v14308_v50  ;;  %v14360_v5 = vmul.u32.u64.high 3817748708, %v14308_v50, %v14359_v10 }
 0x202   :  { %v14362_v29 = vadd.f32 %v1679_v56, %v1503_v11  ;;  %vm2502_vm7 = vcmp.ne.s32.totalorder %v14314_v18, 0  ;;  %vm2538_vm14 = vcmp.lt.s32.totalorder %v14314_v18, 0  ;;  %v14367_v44 = vsub.s32 %v14127_v22, %v2281_v59  ;;  %v1507_v27 = vpop.f32.mrf.mxu0  ;;  %v3469_v56 = vld [vmem:[#allocation2] sm:$0xe] }
 0x203   :  { %v14370_v4 = vmul.u32.u64.low 3817748708, %v14316_v26  ;;  %v14371_v3 = vmul.u32.u64.high 3817748708, %v14316_v26, %v14370_v4  ;;  %v14377_v13 = vsel %vm14322_vm3, %v14158_v57, %v14131_v61  ;;  %v14383_v11 = vsel %vm14337_vm13, %v14173_v36, %v14142_v9  ;;  %v1684_v57 = vpop.f32.mrf.mxu1  ;;  %vm14438_vm3 = vmand %vm2532_vm12, %vm2496_vm11 }
 0x204   :  { %20456 = vst [vmem:[#allocation32_spill] sm:$0xff] %v14362_v29  ;;  %v2336_v59 = vmul.u32 18, %v2335_v30  ;;  %v2042_v8 = vadd.s32 216, %v13735_v15  ;;  %v1508_v61 = vadd.f32 %v1507_v27, %v13571_v7  ;;  %v14399_v9 = vsel %vm14350_vm8, %v14191_v39, %v14145_v54  ;;  %v1509_v10 = vpop.f32.mrf.mxu0  ;;  %vm14508_vm12 = vmand %vm2538_vm14, %vm2502_vm7 }
 0x205   :  { %v2313_v36 = vshrl.u32 %v14243_v48, 4  ;;  %v2040_v34 = vadd.s32 200, %v13735_v15  ;;  %v14404_v33 = vadd.s32 18, %v14314_v18  ;;  %v3596_v30 = vshll.u32 %v14306_v51, 16  ;;  %v1686_v32 = vpop.f32.mrf.mxu1 }
 0x206   :  { %v2346_v4 = vshrl.u32 %v14274_v6, 4  ;;  %v2045_v7 = vadd.s32 240, %v13735_v15  ;;  %v14409_v27 = vadd.f32 %v1684_v57, %v1508_v61  ;;  %v14415_v54 = vsel %vm14389_vm1, %v14194_v16, %v14151_v12  ;;  %v1510_v39 = vpop.f32.mrf.mxu0 }
 0x207   :  { %vm2500_vm0 = vcmp.ne.s32.totalorder %v14367_v44, 0  ;;  %vm2536_vm5 = vcmp.lt.s32.totalorder %v14367_v44, 0  ;;  %v2608_v6 = vadd.s32 18, %v14367_v44  ;;  %v10999_v32 = vcombine.low %v3469_v56, %v14231_v37  ;;  %v1687_v22 = vpop.f32.mrf.mxu1 }
 0x208   :  { %20459 = vst [vmem:[#allocation33_spill] sm:$0xff] %v14409_v27  ;;  %v14429_v60 = vadd.s32 19, %v2042_v8  ;;  %v14431_v12 = vadd.s32 19, %v2040_v34  ;;  %v1511_v16 = vadd.f32 %v1510_v39, %v13579_v23  ;;  %v14443_v57 = vsub.s32 %v14163_v21, %v2336_v59  ;;  %v1512_v56 = vpop.f32.mrf.mxu0  ;;  %vm14528_vm4 = vmand %vm2536_vm5, %vm2500_vm0 }
 0x209   :  { %v2314_v10 = vmul.u32 18, %v2313_v36  ;;  %v2324_v37 = vshrl.u32 %v14344_v0, 4  ;;  %v2347_v8 = vmul.u32 18, %v2346_v4  ;;  %v14458_v27 = vadd.s32 19, %v2045_v7  ;;  %v1689_v59 = vpop.f32.mrf.mxu1 }
 0x20a   :  { %v14455_v34 = vmul.u32.u64.low 3817748708, %v14429_v60  ;;  %v14456_v39 = vmul.u32.u64.high 3817748708, %v14429_v60, %v14455_v34  ;;  %v14460_v21 = vadd.f32 %v1687_v22, %v1511_v16  ;;  %vm20467_vm10 = vcmp.ne.s32.totalorder %v14292_v31, 0 }
 0x20b   :  { %vm14466_vm11 = vmand %vm2535_vm15, %vm20467_vm10  ;;  %v2379_v36 = vshrl.u32 %v14360_v5, 4  ;;  %v2357_v4 = vshrl.u32 %v14371_v3, 4  ;;  %v2043_v56 = vadd.s32 224, %v13735_v15  ;;  %v1515_v34 = vpop.f32.mrf.mxu0  ;;  %v14477_v7 = vsel %vm14423_vm6, %v14206_v55, %v14161_v35  ;;  %v1692_v59 = vpop.f32.mrf.mxu1 }
 0x20c   :  { %20466 = vst [vmem:[#allocation34_spill] sm:$0xff] %v14460_v21  ;;  %v14483_v16 = vsel %vm14438_vm3, %v14303_v49, %v14226_v46  ;;  %v14486_v22 = vmul.u32.u64.low 3817748708, %v14431_v12  ;;  %v14487_v5 = vmul.u32.u64.high 3817748708, %v14431_v12, %v14486_v22  ;;  %v1516_v3 = vadd.f32 %v1515_v34, %v13587_v38 }
 0x20d   :  { %v3598_v21 = vrot.slane %v3596_v30, 1  ;;  %v2325_v29 = vmul.u32 18, %v2324_v37  ;;  %v14490_v62 = vadd.s32 19, %v2043_v56  ;;  %v1517_v48 = vpop.f32.mrf.mxu0  ;;  %v14496_v35 = vsel %vm14450_vm9, %v14328_v53, %v14229_v20  ;;  %v1694_v53 = vpop.f32.mrf.mxu1 }
 0x20e   :  { %v14502_v46 = vsel %vm14466_vm11, %v14356_v40, %v14292_v31  ;;  %v14513_v55 = vmul.u32.u64.low 3817748708, %v14458_v27  ;;  %v14514_v49 = vmul.u32.u64.high 3817748708, %v14458_v27, %v14513_v55  ;;  %v14516_v20 = vadd.f32 %v1692_v59, %v1516_v3 }
 0x20f   :  { %vm2505_vm2 = vcmp.ne.s32.totalorder %v14443_v57, 0  ;;  %v14519_v30 = vrot.slane %v10999_v32, 1  ;;  %v14522_v31 = vsub.s32 %v14176_v19, %v2314_v10  ;;  %v1518_v40 = vpop.f32.mrf.mxu0  ;;  %v14533_v37 = vsub.s32 %v14212_v14, %v2347_v8  ;;  %v1695_v19 = vpop.f32.mrf.mxu1 }
 0x210   :  { %20472 = vst [vmem:[#allocation35_spill] sm:$0xff] %v14516_v20  ;;  %v2380_v23 = vmul.u32 18, %v2379_v36  ;;  %v2358_v0 = vmul.u32 18, %v2357_v4  ;;  %v2390_v32 = vshrl.u32 %v14456_v39, 4  ;;  %v1519_v56 = vadd.f32 %v1518_v40, %v13595_v52 }
 0x211   :  { %v14541_v10 = vsel %vm14508_vm12, %v14404_v33, %v14314_v18  ;;  %v14544_v34 = vmul.u32.u64.low 3817748708, %v14490_v62  ;;  %v14545_v22 = vmul.u32.u64.high 3817748708, %v14490_v62, %v14544_v34  ;;  %v1520_v3 = vpop.f32.mrf.mxu0  ;;  %vm2541_vm13 = vcmp.lt.s32.totalorder %v14443_v57, 0  ;;  %v1697_v36 = vpop.f32.mrf.mxu1 }
 0x212   :  { %v2613_v14 = vadd.s32 18, %v14443_v57  ;;  %v14550_v8 = vsub.s32 %v14257_v17, %v2325_v29  ;;  %v2046_v52 = vadd.s32 248, %v13735_v15  ;;  %v14553_v39 = vadd.f32 %v1695_v19, %v1519_v56  ;;  %vm14612_vm11 = vmand %vm2541_vm13, %vm2505_vm2 }
 0x213   :  { %v14558_v18 = vsel %vm14528_vm4, %v2608_v6, %v14367_v44  ;;  %vm2503_vm14 = vcmp.ne.s32.totalorder %v14522_v31, 0  ;;  %vm2539_vm8 = vcmp.lt.s32.totalorder %v14522_v31, 0  ;;  %v14563_v33 = vadd.s32 18, %v14522_v31  ;;  %v1523_v4 = vpop.f32.mrf.mxu0  ;;  %v1700_v6 = vpop.f32.mrf.mxu1 }
 0x214   :  { %20475 = vst [vmem:[#allocation36_spill] sm:$0xff] %v14553_v39  ;;  %vm2506_vm15 = vcmp.ne.s32.totalorder %v14533_v37, 0  ;;  %vm2542_vm7 = vcmp.lt.s32.totalorder %v14533_v37, 0  ;;  %v14568_v17 = vsub.s32 %v14308_v50, %v2380_v23  ;;  %v2368_v29 = vshrl.u32 %v14487_v5, 4  ;;  %vm14648_vm4 = vmand %vm2539_vm8, %vm2503_vm14  ;;  %v20556_v39 = vld [vmem:[#allocation13_spill] sm:$0xff] }
 0x215   :  { %v1524_v44 = vadd.f32 %v1523_v4, %v13603_v2  ;;  %v14573_v59 = vsub.s32 %v14316_v26, %v2358_v0  ;;  %v2391_v48 = vmul.u32 18, %v2390_v32  ;;  %v2044_v38 = vadd.s32 232, %v13735_v15  ;;  %v1525_v55 = vpop.f32.mrf.mxu0  ;;  %v1702_v2 = vpop.f32.mrf.mxu1  ;;  %vm14666_vm13 = vmand %vm2542_vm7, %vm2506_vm15 }
 0x216   :  { %v14577_v53 = vadd.s32 18, %v14533_v37  ;;  %vm2504_vm1 = vcmp.ne.s32.totalorder %v14550_v8, 0  ;;  %v2423_v50 = vshrl.u32 %v14514_v49, 4  ;;  %v14581_v40 = vadd.s32 19, %v2046_v52 }
 0x217   :  { %v14583_v5 = vadd.f32 %v1700_v6, %v1524_v44  ;;  %vm2665_vm0 = vcmp.ge.s32.totalorder %v13895_v41, 1  ;;  %vm2701_vm5 = vcmp.le.s32.totalorder %v13895_v41, 16  ;;  %v20477_v26 = vshrl.u32 %v14306_v51, 16  ;;  %v1526_v0 = vpop.f32.mrf.mxu0  ;;  %v1703_v19 = vpop.f32.mrf.mxu1 }
 0x218   :  { %vm2540_vm6 = vcmp.lt.s32.totalorder %v14550_v8, 0  ;;  %v14593_v23 = vadd.s32 18, %v14550_v8  ;;  %vm2509_vm3 = vcmp.ne.s32.totalorder %v14568_v17, 0  ;;  %vm2545_vm9 = vcmp.lt.s32.totalorder %v14568_v17, 0 }
 0x219   :  { %20476 = vst [vmem:[#allocation37_spill] sm:$0xff] %v14583_v5  ;;  %v14589_v61 = vor.u32 %v3598_v21, %v20477_v26  ;;  %v14598_v49 = vadd.s32 18, %v14568_v17  ;;  %v2369_v32 = vmul.u32 18, %v2368_v29  ;;  %v1527_v56 = vadd.f32 %v1526_v0, %v13617_v24  ;;  %v1528_v52 = vpop.f32.mrf.mxu0  ;;  %vm14679_vm8 = vmand %vm2540_vm6, %vm2504_vm1  ;;  %v20514_v5 = vld [vmem:[#allocation4_spill] sm:$0xff] }
 0x21a   :  { %vm2507_vm10 = vcmp.ne.s32.totalorder %v14573_v59, 0  ;;  %v14603_v21 = vsub.s32 %v14429_v60, %v2391_v48  ;;  %v2401_v34 = vshrl.u32 %v14545_v22, 4  ;;  %v14606_v3 = vadd.s32 19, %v2044_v38  ;;  %v1705_v22 = vpop.f32.mrf.mxu1  ;;  %vm14705_vm1 = vmand %vm2665_vm0, %vm2701_vm5 }
 0x21b   :  { %v2424_v24 = vmul.u32 18, %v2423_v50  ;;  %v14617_v4 = vmul.u32.u64.low 3817748708, %v14581_v40  ;;  %v14618_v29 = vmul.u32.u64.high 3817748708, %v14581_v40, %v14617_v4  ;;  %v2049_v60 = vadd.s32 272, %v13735_v15  ;;  %v1531_v38 = vpop.f32.mrf.mxu0  ;;  %vm14719_vm6 = vmand %vm2545_vm9, %vm2509_vm3  ;;  %v20497_v22 = vld [vmem:[#allocation24_spill] sm:$0xff] }
 0x21c   :  { %v14621_v44 = vadd.f32 %v1703_v19, %v1527_v56  ;;  %vm2543_vm12 = vcmp.lt.s32.totalorder %v14573_v59, 0  ;;  %v14625_v6 = vmul.u32.u64.low 3817748708, %v14606_v3  ;;  %v14626_v48 = vmul.u32.u64.high 3817748708, %v14606_v3, %v14625_v6  ;;  %v1708_v56 = vpop.f32.mrf.mxu1 }
 0x21d   :  { %v14629_v55 = vadd.s32 18, %v14573_v59  ;;  %v14632_v50 = vsub.s32 %v14431_v12, %v2369_v32  ;;  %v14634_v2 = vadd.s32 19, %v2049_v60  ;;  %v2047_v26 = vadd.s32 256, %v13735_v15  ;;  %v1533_v4 = vpop.f32.mrf.mxu0  ;;  %vm14756_vm3 = vmand %vm2543_vm12, %vm2507_vm10 }
 0x21e   :  { %20480 = vst [vmem:[#allocation38_spill] sm:$0xff] %v14621_v44  ;;  %v1532_v0 = vadd.f32 %v1531_v38, %v13636_v45  ;;  %v14641_v19 = vsel %vm14612_vm11, %v2613_v14, %v14443_v57  ;;  %vm2510_vm2 = vcmp.ne.s32.totalorder %v14603_v21, 0  ;;  %v2402_v52 = vmul.u32 18, %v2401_v34  ;;  %v1710_v34 = vpop.f32.mrf.mxu1 }
 0x21f   :  { %v14653_v45 = vsub.s32 %v14458_v27, %v2424_v24  ;;  %v2434_v32 = vshrl.u32 %v14618_v29, 4  ;;  %v14657_v57 = vmul.u32.u64.low 3817748708, %v14634_v2  ;;  %v14658_v14 = vmul.u32.u64.high 3817748708, %v14634_v2, %v14657_v57  ;;  %v1534_v29 = vpop.f32.mrf.mxu0 }
 0x220   :  { %v14660_v36 = vadd.f32 %v1708_v56, %v1532_v0  ;;  %v14672_v27 = vadd.s32 18, %v14603_v21  ;;  %v2412_v24 = vshrl.u32 %v14626_v48, 4  ;;  %vm2508_vm15 = vcmp.ne.s32.totalorder %v14632_v50, 0  ;;  %v1711_v56 = vpop.f32.mrf.mxu1 }
 0x221   :  { %vm2544_vm7 = vcmp.lt.s32.totalorder %v14632_v50, 0  ;;  %v2435_v6 = vmul.u32 18, %v2434_v32  ;;  %v14685_v38 = vadd.s32 19, %v2047_v26  ;;  %v1535_v0 = vadd.f32 %v1534_v29, %v13645_v1  ;;  %v1536_v34 = vpop.f32.mrf.mxu0  ;;  %v14699_v26 = vld [vmem:[%s20299_s2] ss:$0 sm:$0xff] }
 0x222   :  { %20483 = vst [vmem:[#allocation39_spill] sm:$0xff] %v14660_v36  ;;  %v14691_v48 = vadd.s32 18, %v14632_v50  ;;  %v14694_v4 = vsub.s32 %v14490_v62, %v2402_v52  ;;  %v2413_v57 = vmul.u32 18, %v2412_v24  ;;  %v20488_v1 = vmov 0  ;;  %v1713_v12 = vpop.f32.mrf.mxu1  ;;  %v14750_v29 = vld [vmem:[%s20300_s3] ss:$0 sm:$0xff] }
 0x223   :  { %v20489_v1 = vsel %vm14705_vm1, 4294967295, %v20488_v1  ;;  %v14713_v62 = vsel %vm14648_vm4, %v14563_v33, %v14522_v31  ;;  %vm2513_vm11 = vcmp.ne.s32.totalorder %v14653_v45, 0  ;;  %v14725_v41 = vsub.s32 %v14581_v40, %v2435_v6 }
 0x224   :  { %20490 = vst [vmem:[#allocation40_spill] sm:$0xff] %v20489_v1  ;;  %v2467_v32 = vshrl.u32 %v14658_v14, 4  ;;  %v14728_v24 = vadd.f32 %v1711_v56, %v1535_v0  ;;  %v14736_v31 = vsel %vm14666_vm13, %v14577_v53, %v14533_v37  ;;  %v14742_v33 = vsel %vm14679_vm8, %v14593_v23, %v14550_v8  ;;  %v11820_v14 = vpop.f32.mrf.mxu0  ;;  %v20555_v1 = vld [vmem:[#allocation8_spill] sm:$0xff] }
 0x225   :  { %v14745_v40 = vsub.s32 %v14606_v3, %v2413_v57  ;;  %vm2549_vm9 = vcmp.lt.s32.totalorder %v14653_v45, 0  ;;  %v14762_v53 = vmul.u32.u64.low 3817748708, %v14685_v38  ;;  %v14763_v23 = vmul.u32.u64.high 3817748708, %v14685_v38, %v14762_v53  ;;  %v20496_v3 = vld [vmem:[#allocation5_spill] sm:$0xff] }
 0x226   :  { %20493 = vst [vmem:[#allocation41_spill] sm:$0xff] %v14728_v24  ;;  %v2468_v8 = vmul.u32 18, %v2467_v32  ;;  %v1758_v60 = vadd.f32 %v11820_v14, %v20496_v3  ;;  %vm20498_vm10 = vcmp.lt.s32.totalorder %v14603_v21, 0  ;;  %v2621_v0 = vadd.s32 18, %v14653_v45  ;;  %v1749_v56 = vpop.f32.mrf.mxu0  ;;  %v20503_v14 = vld [vmem:[#allocation3_spill] sm:$0xff]  ;;  %v20506_v53 = vld [vmem:[#allocation26_spill] sm:$0xff] }
 0x227   :  { %vm14772_vm12 = vmand %vm20498_vm10, %vm2510_vm2  ;;  %vm2511_vm8 = vcmp.ne.s32.totalorder %v14694_v4, 0  ;;  %vm2547_vm0 = vcmp.lt.s32.totalorder %v14694_v4, 0  ;;  %v14783_v57 = vsel %vm14719_vm6, %v14598_v49, %v14568_v17  ;;  %vm2514_vm10 = vcmp.ne.s32.totalorder %v14725_v41, 0 }
 0x228   :  { %vm14789_vm2 = vmand %vm2544_vm7, %vm2508_vm15  ;;  %vm2550_vm4 = vcmp.lt.s32.totalorder %v14725_v41, 0  ;;  %v2469_v32 = vsub.s32 %v14634_v2, %v2468_v8  ;;  %v1901_v12 = vmul.f32 %v14699_v26, %v1758_v60  ;;  %v1750_v52 = vadd.f32 %v1749_v56, %v20503_v14  ;;  %v11821_v49 = vpop.f32.mrf.mxu0  ;;  %v20509_v14 = vld [vmem:[#allocation6_spill] sm:$0xff] }
 0x229   :  { %vm14802_vm6 = vmand %vm2549_vm9, %vm2513_vm11  ;;  %vm2512_vm15 = vcmp.ne.s32.totalorder %v14745_v40, 0  ;;  %vm2548_vm7 = vcmp.lt.s32.totalorder %v14745_v40, 0  ;;  %v2619_v8 = vadd.s32 18, %v14694_v4  ;;  %v2622_v3 = vadd.s32 18, %v14725_v41 }
 0x22a   :  { %vm14814_vm14 = vmand %vm2547_vm0, %vm2511_vm8  ;;  %vm2517_vm11 = vcmp.ne.s32.totalorder %v2469_v32, 0  ;;  %v1944_v60 = vadd.f32 %v14750_v29, %v1901_v12  ;;  %v1899_v56 = vmul.f32 %v14699_v26, %v1750_v52  ;;  %v1761_v44 = vadd.f32 %v11821_v49, %v20509_v14  ;;  %v1752_v52 = vpop.f32.mrf.mxu0 }
 0x22b   :  { %vm2667_vm13 = vcmp.ge.s32.totalorder %v14264_v25, 1  ;;  %vm2703_vm5 = vcmp.le.s32.totalorder %v14264_v25, 16  ;;  %v14829_v24 = vsel %vm14756_vm3, %v14629_v55, %v14573_v59  ;;  %vm14835_vm0 = vmand %vm2550_vm4, %vm2514_vm10  ;;  %vm3385_vm8 = vcmask 1043457  }
 0x22c   :  { %vm3386_vm9 = vsmask.f32 7942  ;;  %v14843_v49 = vsel %vm14772_vm12, %v14672_v27, %v14603_v21  ;;  %v14849_v59 = vsel %vm14789_vm2, %v14691_v48, %v14632_v50  ;;  %vm14855_vm3 = vmand %vm2548_vm7, %vm2512_vm15  ;;  %v2620_v37 = vadd.s32 18, %v14745_v40  ;;  %v20539_v50 = vld [vmem:[#allocation10_spill] sm:$0xff] }
 0x22d   :  { %v2625_v14 = vadd.s32 18, %v2469_v32  ;;  %v1980_v6 = vmax.f32 %v1944_v60, 0.0  ;;  %v1942_v21 = vadd.f32 %v14750_v29, %v1899_v56  ;;  %v1902_v27 = vmul.f32 %v14699_v26, %v1761_v44  ;;  %v11824_v60 = vpop.f32.mrf.mxu0 }
 0x22e   :  { %v1753_v34 = vadd.f32 %v1752_v52, %v20514_v5  ;;  %vm20515_vm4 = vcmp.lt.s32.totalorder %v2469_v32, 0  ;;  %vm20518_vm2 = vcmp.le.s32.totalorder %v14047_v28, 16  ;;  %vm20519_vm10 = vcmp.ge.s32.totalorder %v14047_v28, 1 }
 0x22f   :  { %vm14865_vm12 = vmand %vm20515_vm4, %vm2517_vm11  ;;  %v20520_v48 = vmov 0  ;;  %v14880_v44 = vsel %vm14802_vm6, %v2621_v0, %v14653_v45  ;;  %v14885_v5 = vsel %vm14814_vm14, %v2619_v8, %v14694_v4  ;;  %v14890_v56 = vsel %vm14835_vm0, %v2622_v3, %v14725_v41  ;;  %v20530_v41 = vld [vmem:[#allocation9_spill] sm:$0xff]  ;;  %v1765_v8 = vpop.f32.mrf.mxu0 }
 0x230   :  { %vm14873_vm15 = vmand %vm20519_vm10, %vm20518_vm2  ;;  %20523 = vst [vmem:[#allocation24_spill] sm:$0xff] %v14885_v5  ;;  %v2845_v52 = vsel %vm14705_vm1, %v1980_v6, 0.0  ;;  %v1978_v36 = vmax.f32 %v1942_v21, 0.0  ;;  %vm2987_vm7 = vsmask.f32 5392  ;;  %v1945_v45 = vadd.f32 %v14750_v29, %v1902_v27  ;;  %v20533_v27 = vld [vmem:[#allocation7_spill] sm:$0xff] }
 0x231   :  { %v20521_v48 = vsel %vm14873_vm15, 4294967295, %v20520_v48  ;;  %20524 = vst [vmem:[#allocation3_spill] sm:$0xff] %v14890_v56  ;;  %v1900_v0 = vmul.f32 %v14699_v26, %v1753_v34  ;;  %v11628_v17 = vpack.c.bf16 %v2845_v52, %v2845_v52  ;;  %vm20525_vm14 = vcmp.le.s32.totalorder %v14053_v63, 16  ;;  %v11825_v55 = vpop.f32.mrf.mxu0  ;;  %v20557_v56 = vld [vmem:[#allocation11_spill] sm:$0xff] }
 0x232   :  { %20522 = vst [vmem:[#allocation5_spill] sm:$0xff] %v20521_v48  ;;  %vm20526_vm6 = vcmp.ge.s32.totalorder %v14053_v63, 1  ;;  %v20527_v4 = vmov 0  ;;  %v1774_v2 = vadd.f32 %v11824_v60, %v20530_v41  ;;  %v14909_v3 = vsel %vm14855_vm3, %v2620_v37, %v14745_v40 }
 0x233   :  { %vm14901_vm11 = vmand %vm20526_vm6, %vm20525_vm14  ;;  %20531 = vst [vmem:[#allocation6_spill] sm:$0xff] %v14909_v3  ;;  %v14913_v12 = vsel %vm14865_vm12, %v2625_v14, %v2469_v32  ;;  %v2843_v6 = vsel %vm14873_vm15, %v1978_v36, 0.0  ;;  %v1981_v63 = vmax.f32 %v1945_v45, 0.0  ;;  %v1943_v21 = vadd.f32 %v14750_v29, %v1900_v0 }
 0x234   :  { %v20528_v4 = vsel %vm14901_vm11, 4294967295, %v20527_v4  ;;  %20532 = vst [vmem:[#allocation4_spill] sm:$0xff] %v14913_v12  ;;  %v1766_v34 = vadd.f32 %v1765_v8, %v20533_v27  ;;  %v3009_v52 = vshrl.u32 %v11628_v17, 16  ;;  %v3012_v60 = vshll.u32 %v11628_v17, 16  ;;  %v3388_v27 = vld [vmem:[#allocation2 + $0x8] sm:$0xe] }
 0x235   :  { %20529 = vst [vmem:[#allocation26_spill] sm:$0xff] %v20528_v4  ;;  %v11626_v41 = vpack.c.bf16 %v2843_v6, %v2843_v6  ;;  %vm20534_vm0 = vcmp.le.s32.totalorder %v20497_v22, 16  ;;  %vm20535_vm3 = vcmp.ge.s32.totalorder %v20497_v22, 1  ;;  %v20536_v40 = vmov 0  ;;  %v1768_v22 = vpop.f32.mrf.mxu0 }
 0x236   :  { %vm14923_vm4 = vmand %vm20535_vm3, %vm20534_vm0  ;;  %v1905_v32 = vmul.f32 %v14699_v26, %v1774_v2  ;;  %v2846_v36 = vsel %vm14901_vm11, %v1981_v63, 0.0  ;;  %v1979_v37 = vmax.f32 %v1943_v21, 0.0  ;;  %v1903_v14 = vmul.f32 %v14699_v26, %v1766_v34 }
 0x237   :  { %v20537_v40 = vsel %vm14923_vm4, 4294967295, %v20536_v40  ;;  %v1777_v45 = vadd.f32 %v11825_v55, %v20539_v50  ;;  %v3011_v0 = vrot.slane %v3009_v52, 6  ;;  %v3014_v17 = vrot.slane %v3012_v60, 7  ;;  %vm14950_vm0 = vmand %vm2667_vm13, %vm2703_vm5 }
 0x238   :  { %20538 = vst [vmem:[#allocation9_spill] sm:$0xff] %v20537_v40  ;;  %v2990_v8 = vshrl.u32 %v11626_v41, 16  ;;  %v2993_v6 = vshll.u32 %v11626_v41, 16  ;;  %v11629_v28 = vpack.c.bf16 %v2846_v36, %v2846_v36  ;;  %v2844_v48 = vsel %vm14923_vm4, %v1979_v37, 0.0  ;;  %vm14956_vm3 = vmand %vm3385_vm8, %vm3386_vm9 }
 0x239   :  { %v1948_v2 = vadd.f32 %v14750_v29, %v1905_v32  ;;  %vm20540_vm12 = vcmp.le.s32.totalorder %v20506_v53, 16  ;;  %vm20541_vm2 = vcmp.ge.s32.totalorder %v20506_v53, 1  ;;  %v20542_v63 = vmov 0  ;;  %v11828_v32 = vpop.f32.mrf.mxu0 }
 0x23a   :  { %vm14939_vm10 = vmand %vm20541_vm2, %vm20540_vm12  ;;  %v1946_v21 = vadd.f32 %v14750_v29, %v1903_v14  ;;  %vm2670_vm14 = vcmp.ge.s32.totalorder %v14270_v47, 1  ;;  %vm2706_vm6 = vcmp.le.s32.totalorder %v14270_v47, 16  ;;  %v3015_v34 = vor.u32 %v3014_v17, %v3011_v0 }
 0x23b   :  { %v20543_v63 = vsel %vm14939_vm10, 4294967295, %v20542_v63  ;;  %v2992_v52 = vrot.slane %v2990_v8, 6  ;;  %v2995_v60 = vrot.slane %v2993_v6, 7  ;;  %v11627_v41 = vpack.c.bf16 %v2844_v48, %v2844_v48  ;;  %v1781_v8 = vpop.f32.mrf.mxu0  ;;  %vm14996_vm9 = vmand %vm2670_vm14, %vm2706_vm6 }
 0x23c   :  { %20544 = vst [vmem:[#allocation7_spill] sm:$0xff] %v20543_v63  ;;  %v20545_v53 = vmov 0  ;;  %v20548_v55 = vmov 0  ;;  %v3019_v36 = vshrl.u32 %v11629_v28, 16  ;;  %v3022_v37 = vshll.u32 %v11629_v28, 16 }
 0x23d   :  { %v20546_v53 = vsel %vm14950_vm0, 4294967295, %v20545_v53  ;;  %v20549_v55 = vsel %vm14956_vm3, 4294967295, %v20548_v55  ;;  %v1984_v14 = vmax.f32 %v1948_v2, 0.0  ;;  %v1982_v50 = vmax.f32 %v1946_v21, 0.0 }
 0x23e   :  { %20547 = vst [vmem:[#allocation10_spill] sm:$0xff] %v20546_v53  ;;  %20550 = vst [vmem:[#allocation42_spill] sm:$0xff] %v20549_v55  ;;  %v3017_v25 = vrot.slane %v3015_v34, 4  ;;  %v2996_v48 = vor.u32 %v2995_v60, %v2992_v52  ;;  %v2999_v0 = vshrl.u32 %v11627_v41, 16  ;;  %v3002_v17 = vshll.u32 %v11627_v41, 16 }
 0x23f   :  { %vm2673_vm5 = vcmp.ge.s32.totalorder %v14287_v43, 1  ;;  %vm2709_vm13 = vcmp.le.s32.totalorder %v14287_v43, 16  ;;  %v3021_v6 = vrot.slane %v3019_v36, 6  ;;  %v3024_v40 = vrot.slane %v3022_v37, 7  ;;  %v11829_v37 = vpop.f32.mrf.mxu0 }
 0x240   :  { %v2849_v28 = vsel %vm14939_vm10, %v1984_v14, 0.0  ;;  %v2847_v2 = vsel %vm14950_vm0, %v1982_v50, 0.0  ;;  %vm20551_vm12 = vsmask.f32 1280  ;;  %v20552_v21 = vmov 0 }
 0x241   :  { %vm14972_vm2 = vmor %vm20551_vm12, %vm2987_vm7  ;;  %v2997_v52 = vrot.slane %v2996_v48, 4  ;;  %v3389_v60 = vsel %vm14956_vm3, %v2996_v48, %v3388_v27  ;;  %v3001_v41 = vrot.slane %v2999_v0, 6  ;;  %v3004_v36 = vrot.slane %v3002_v17, 7  ;;  %v1784_v5 = vpop.f32.mrf.mxu0 }
 0x242   :  { %v20553_v21 = vsel %vm14972_vm2, 4294967295, %v20552_v21  ;;  %3390 = vst [vmem:[#allocation2 + $0x8] sm:$0xe] %v3389_v60  ;;  %v3025_v14 = vor.u32 %v3024_v40, %v3021_v6  ;;  %v11632_v50 = vpack.c.bf16 %v2849_v28, %v2849_v28  ;;  %v11630_v53 = vpack.c.bf16 %v2847_v2, %v2847_v2  ;;  %vm15028_vm7 = vmand %vm2673_vm5, %vm2709_vm13 }
 0x243   :  { %20554 = vst [vmem:[#allocation43_spill] sm:$0xff] %v20553_v21  ;;  %v1906_v63 = vmul.f32 %v14699_v26, %v1777_v45  ;;  %v3005_v4 = vor.u32 %v3004_v36, %v3001_v41  ;;  %v1769_v12 = vadd.f32 %v1768_v22, %v20555_v1  ;;  %v1790_v3 = vadd.f32 %v11828_v32, %v20556_v39  ;;  %v20566_v41 = vld [vmem:[#allocation14_spill] sm:$0xff] }
 0x244   :  { %v1782_v20 = vadd.f32 %v1781_v8, %v20557_v56  ;;  %v3026_v27 = vsel %vm14972_vm2, %v3017_v25, %v3025_v14  ;;  %v3027_v48 = vrot.slane %v3025_v14, 4  ;;  %v3049_v0 = vshrl.u32 %v11632_v50, 16  ;;  %v20567_v14 = vld [vmem:[#allocation12_spill] sm:$0xff] }
 0x245   :  { %v3052_v17 = vshll.u32 %v11632_v50, 16  ;;  %3393 = vst [vmem:[#allocation2 + $0x14] sm:$0xf] %v3026_v27  ;;  %v3006_v40 = vsel %vm14972_vm2, %v2997_v52, %v3005_v4  ;;  %v3007_v6 = vrot.slane %v3005_v4, 4  ;;  %v3029_v45 = vshrl.u32 %v11630_v53, 16 }
 0x246   :  { %v3032_v28 = vshll.u32 %v11630_v53, 16  ;;  %3391 = vst [vmem:[#allocation2 + $0xc] sm:$0xf] %v3006_v40  ;;  %v3051_v39 = vrot.slane %v3049_v0, 6  ;;  %v1949_v56 = vadd.f32 %v14750_v29, %v1906_v63  ;;  %v1904_v22 = vmul.f32 %v14699_v26, %v1769_v12  ;;  %v15003_v12 = vpop.f32.mrf.mxu0 }
 0x247   :  { %v3054_v1 = vrot.slane %v3052_v17, 7  ;;  %v3016_v32 = vsel %vm14972_vm2, %v3007_v6, %v3015_v34  ;;  %v3031_v25 = vrot.slane %v3029_v45, 6  ;;  %v20558_v4 = vmov 0 }
 0x248   :  { %v3034_v8 = vrot.slane %v3032_v28, 7  ;;  %v20559_v4 = vsel %vm14996_vm9, 4294967295, %v20558_v4  ;;  %v1909_v53 = vmul.f32 %v14699_v26, %v1790_v3  ;;  %3392 = vst [vmem:[#allocation2 + $0x10] sm:$0xf] %v3016_v32  ;;  %v1985_v34 = vmax.f32 %v1949_v56, 0.0  ;;  %v15049_v28 = vpop.f32.mrf.mxu0 }
 0x249   :  { %20560 = vst [vmem:[#allocation8_spill] sm:$0xff] %v20559_v4  ;;  %v15005_v63 = vor.u32 %v3054_v1, %v3051_v39  ;;  %v1947_v2 = vadd.f32 %v14750_v29, %v1904_v22  ;;  %v1907_v47 = vmul.f32 %v14699_v26, %v1782_v20  ;;  %vm20561_vm14 = vcmp.le.s32.totalorder %v14281_v42, 16 }
 0x24a   :  { %v15009_v52 = vor.u32 %v3034_v8, %v3031_v25  ;;  %vm20562_vm6 = vcmp.ge.s32.totalorder %v14281_v42, 1  ;;  %v20563_v3 = vmov 0  ;;  %v1952_v60 = vadd.f32 %v14750_v29, %v1909_v53 }
 0x24b   :  { %vm15015_vm8 = vmand %vm20562_vm6, %vm20561_vm14  ;;  %v1793_v36 = vadd.f32 %v11829_v37, %v20566_v41  ;;  %v1785_v50 = vadd.f32 %v1784_v5, %v20567_v14  ;;  %v2850_v27 = vsel %vm14996_vm9, %v1985_v34, 0.0  ;;  %v1983_v20 = vmax.f32 %v1947_v2, 0.0 }
 0x24c   :  { %v20564_v3 = vsel %vm15015_vm8, 4294967295, %v20563_v3  ;;  %v20568_v42 = vmov 0  ;;  %v1950_v0 = vadd.f32 %v14750_v29, %v1907_v47  ;;  %v20571_v17 = vshrl.u32 %v14763_v23, 4 }
 0x24d   :  { %20565 = vst [vmem:[#allocation13_spill] sm:$0xff] %v20564_v3  ;;  %v20569_v42 = vsel %vm15028_vm7, 4294967295, %v20568_v42  ;;  %v3057_v5 = vrot.slane %v15005_v63, 4  ;;  %v3036_v37 = vsel %vm14972_vm2, %v3027_v48, %v15009_v52  ;;  %v11633_v6 = vpack.c.bf16 %v2850_v27, %v2850_v27 }
 0x24e   :  { %20570 = vst [vmem:[#allocation11_spill] sm:$0xff] %v20569_v42  ;;  %v15035_v40 = vmul.u32 18, %v20571_v17  ;;  %v1988_v45 = vmax.f32 %v1952_v60, 0.0  ;;  %vm20572_vm14 = vcmp.le.s32.totalorder %v14298_v58, 16  ;;  %vm20573_vm5 = vcmp.ge.s32.totalorder %v14298_v58, 1 }
 0x24f   :  { %vm15045_vm13 = vmand %vm20573_vm5, %vm20572_vm14  ;;  %v20574_v43 = vmov 0  ;;  %3394 = vst [vmem:[#allocation2 + $0x18] sm:$0xf] %v3036_v37  ;;  %v2848_v23 = vsel %vm15015_vm8, %v1983_v20, 0.0  ;;  %v1986_v39 = vmax.f32 %v1950_v0, 0.0  ;;  %v1910_v1 = vmul.f32 %v14699_v26, %v1793_v36  ;;  %v11833_v36 = vpop.f32.mrf.mxu0 }
 0x250   :  { %v20575_v43 = vsel %vm15045_vm13, 4294967295, %v20574_v43  ;;  %v1908_v48 = vmul.f32 %v14699_v26, %v1785_v50  ;;  %v3059_v56 = vshrl.u32 %v11633_v6, 16  ;;  %v3062_v22 = vshll.u32 %v11633_v6, 16 }
 0x251   :  { %20576 = vst [vmem:[#allocation14_spill] sm:$0xff] %v20575_v43  ;;  %v11631_v32 = vpack.c.bf16 %v2848_v23, %v2848_v23  ;;  %v2853_v58 = vsel %vm15028_vm7, %v1988_v45, 0.0  ;;  %v2851_v8 = vsel %vm15045_vm13, %v1986_v39, 0.0  ;;  %v1953_v53 = vadd.f32 %v14750_v29, %v1910_v1 }
 0x252   :  { %v11636_v25 = vpack.c.bf16 %v2853_v58, %v2853_v58  ;;  %v1951_v34 = vadd.f32 %v14750_v29, %v1908_v48  ;;  %v3061_v2 = vrot.slane %v3059_v56, 6  ;;  %v3064_v47 = vrot.slane %v3062_v22, 7 }
 0x253   :  { %v3039_v60 = vshrl.u32 %v11631_v32, 16  ;;  %v3042_v41 = vshll.u32 %v11631_v32, 16  ;;  %v11634_v27 = vpack.c.bf16 %v2851_v8, %v2851_v8  ;;  %v1989_v20 = vmax.f32 %v1953_v53, 0.0 }
 0x254   :  { %v3089_v14 = vshrl.u32 %v11636_v25, 16  ;;  %v3092_v50 = vshll.u32 %v11636_v25, 16  ;;  %vm20577_vm5 = vcmp.le.s32.totalorder %v14377_v13, 16  ;;  %vm20578_vm12 = vcmp.ge.s32.totalorder %v14377_v13, 1  ;;  %v1800_v25 = vpop.f32.mrf.mxu0 }
 0x255   :  { %vm15067_vm13 = vmand %vm20578_vm12, %vm20577_vm5  ;;  %v20579_v0 = vmov 0  ;;  %v3065_v17 = vor.u32 %v3064_v47, %v3061_v2  ;;  %v3041_v37 = vrot.slane %v3039_v60, 6  ;;  %v3044_v6 = vrot.slane %v3042_v41, 7  ;;  %v20587_v47 = vld [vmem:[#allocation17_spill] sm:$0xff] }
 0x256   :  { %v20580_v0 = vsel %vm15067_vm13, 4294967295, %v20579_v0  ;;  %v1987_v45 = vmax.f32 %v1951_v34, 0.0  ;;  %vm2675_vm6 = vcmp.ge.s32.totalorder %v14415_v54, 1  ;;  %vm2711_vm14 = vcmp.le.s32.totalorder %v14415_v54, 16 }
 0x257   :  { %20581 = vst [vmem:[#allocation12_spill] sm:$0xff] %v20580_v0  ;;  %v3091_v23 = vrot.slane %v3089_v14, 6  ;;  %v3094_v39 = vrot.slane %v3092_v50, 7  ;;  %v3069_v1 = vshrl.u32 %v11634_v27, 16  ;;  %v3072_v48 = vshll.u32 %v11634_v27, 16 }
 0x258   :  { %vm20582_vm7 = vcmp.le.s32.totalorder %v14383_v11, 16  ;;  %vm20583_vm8 = vcmp.ge.s32.totalorder %v14383_v11, 1  ;;  %v20584_v13 = vmov 0  ;;  %v3037_v56 = vrot.slane %v15009_v52, 4 }
 0x259   :  { %vm15077_vm12 = vmand %vm20583_vm8, %vm20582_vm7  ;;  %v3066_v22 = vsel %vm14972_vm2, %v3057_v5, %v3065_v17  ;;  %v3045_v32 = vor.u32 %v3044_v6, %v3041_v37  ;;  %v2854_v58 = vsel %vm15067_vm13, %v1989_v20, 0.0  ;;  %v15088_v11 = vor.u32 %v3094_v39, %v3091_v23 }
 0x25a   :  { %v20585_v13 = vsel %vm15077_vm12, 4294967295, %v20584_v13  ;;  %3397 = vst [vmem:[#allocation2 + $0x24] sm:$0xf] %v3066_v22  ;;  %v3071_v8 = vrot.slane %v3069_v1, 6  ;;  %v3074_v53 = vrot.slane %v3072_v48, 7  ;;  %v11637_v34 = vpack.c.bf16 %v2854_v58, %v2854_v58 }
 0x25b   :  { %20586 = vst [vmem:[#allocation44_spill] sm:$0xff] %v20585_v13  ;;  %v3046_v52 = vsel %vm14972_vm2, %v3037_v56, %v3045_v32  ;;  %v3047_v2 = vrot.slane %v3045_v32, 4  ;;  %v2852_v5 = vsel %vm15077_vm12, %v1987_v45, 0.0  ;;  %v1806_v60 = vadd.f32 %v15003_v12, %v20587_v47  ;;  %v20588_v45 = vld [vmem:[#allocation15_spill] sm:$0xff]  ;;  %v11836_v12 = vpop.f32.mrf.mxu0 }
 0x25c   :  { %v3067_v41 = vrot.slane %v3065_v17, 4  ;;  %3395 = vst [vmem:[#allocation2 + $0x1c] sm:$0xf] %v3046_v52  ;;  %v3075_v14 = vor.u32 %v3074_v53, %v3071_v8  ;;  %v3099_v50 = vshrl.u32 %v11637_v34, 16  ;;  %v3102_v27 = vshll.u32 %v11637_v34, 16  ;;  %v20594_v8 = vld [vmem:[#allocation18_spill] sm:$0xff] }
 0x25d   :  { %v3056_v20 = vsel %vm14972_vm2, %v3047_v2, %v15005_v63  ;;  %v11635_v37 = vpack.c.bf16 %v2852_v5, %v2852_v5  ;;  %v1913_v6 = vmul.f32 %v14699_v26, %v1806_v60  ;;  %v1798_v23 = vadd.f32 %v15049_v28, %v20588_v45  ;;  %v20595_v34 = vld [vmem:[#allocation16_spill] sm:$0xff]  ;;  %v20596_v2 = vld [vmem:[#allocation21_spill] sm:$0xff] }
 0x25e   :  { %3396 = vst [vmem:[#allocation2 + $0x20] sm:$0xf] %v3056_v20  ;;  %v3097_v39 = vrot.slane %v15088_v11, 4  ;;  %v3076_v17 = vsel %vm14972_vm2, %v3067_v41, %v3075_v14  ;;  %v3101_v1 = vrot.slane %v3099_v50, 6  ;;  %v3104_v48 = vrot.slane %v3102_v27, 7 }
 0x25f   :  { %3398 = vst [vmem:[#allocation2 + $0x28] sm:$0xf] %v3076_v17  ;;  %v3079_v56 = vshrl.u32 %v11635_v37, 16  ;;  %v3082_v22 = vshll.u32 %v11635_v37, 16  ;;  %v1956_v63 = vadd.f32 %v14750_v29, %v1913_v6  ;;  %vm20589_vm5 = vcmp.le.s32.totalorder %v14399_v9, 16 }
 0x260   :  { %vm20590_vm9 = vcmp.ge.s32.totalorder %v14399_v9, 1  ;;  %v20591_v28 = vmov 0  ;;  %v1911_v32 = vmul.f32 %v14699_v26, %v1798_v23  ;;  %v15119_v58 = vor.u32 %v3104_v48, %v3101_v1  ;;  %v1813_v9 = vpop.f32.mrf.mxu0  ;;  %v20605_v1 = vld [vmem:[#allocation19_spill] sm:$0xff] }
 0x261   :  { %vm15114_vm8 = vmand %vm20590_vm9, %vm20589_vm5  ;;  %v1809_v53 = vadd.f32 %v11833_v36, %v20594_v8  ;;  %v1801_v52 = vadd.f32 %v1800_v25, %v20595_v34  ;;  %v1822_v5 = vadd.f32 %v11836_v12, %v20596_v2  ;;  %v3081_v47 = vrot.slane %v3079_v56, 6 }
 0x262   :  { %v20592_v28 = vsel %vm15114_vm8, 4294967295, %v20591_v28  ;;  %v3084_v60 = vrot.slane %v3082_v22, 7  ;;  %v1992_v41 = vmax.f32 %v1956_v63, 0.0  ;;  %v1954_v50 = vadd.f32 %v14750_v29, %v1911_v32  ;;  %vm15132_vm9 = vmand %vm2675_vm6, %vm2711_vm14  ;;  %v11837_v8 = vpop.f32.mrf.mxu0 }
 0x263   :  { %20593 = vst [vmem:[#allocation17_spill] sm:$0xff] %v20592_v28  ;;  %v3077_v27 = vrot.slane %v3075_v14, 4  ;;  %v3106_v20 = vsel %vm14972_vm2, %v3097_v39, %v15119_v58  ;;  %v20597_v36 = vmov 0  ;;  %v1914_v25 = vmul.f32 %v14699_v26, %v1809_v53 }
 0x264   :  { %v20598_v36 = vsel %vm15132_vm9, 4294967295, %v20597_v36  ;;  %v1912_v37 = vmul.f32 %v14699_v26, %v1801_v52  ;;  %3401 = vst [vmem:[#allocation2 + $0x34] sm:$0xf] %v3106_v20  ;;  %v3085_v14 = vor.u32 %v3084_v60, %v3081_v47  ;;  %v2857_v6 = vsel %vm15114_vm8, %v1992_v41, 0.0 }
 0x265   :  { %20599 = vst [vmem:[#allocation15_spill] sm:$0xff] %v20598_v36  ;;  %v1990_v45 = vmax.f32 %v1954_v50, 0.0  ;;  %vm20600_vm12 = vcmp.le.s32.totalorder %v14477_v7, 16  ;;  %vm20601_vm6 = vcmp.ge.s32.totalorder %v14477_v7, 1  ;;  %v20602_v54 = vmov 0 }
 0x266   :  { %vm15146_vm14 = vmand %vm20601_vm6, %vm20600_vm12  ;;  %v1917_v23 = vmul.f32 %v14699_v26, %v1822_v5  ;;  %v11640_v12 = vpack.c.bf16 %v2857_v6, %v2857_v6  ;;  %v1957_v39 = vadd.f32 %v14750_v29, %v1914_v25  ;;  %v1955_v17 = vadd.f32 %v14750_v29, %v1912_v37 }
 0x267   :  { %v20603_v54 = vsel %vm15146_vm14, 4294967295, %v20602_v54  ;;  %v1814_v48 = vadd.f32 %v1813_v9, %v20605_v1  ;;  %v3086_v56 = vsel %vm14972_vm2, %v3077_v27, %v3085_v14  ;;  %v3087_v22 = vrot.slane %v3085_v14, 4  ;;  %v1816_v14 = vpop.f32.mrf.mxu0 }
 0x268   :  { %20604 = vst [vmem:[#allocation18_spill] sm:$0xff] %v20603_v54  ;;  %v2855_v7 = vsel %vm15132_vm9, %v1990_v45, 0.0  ;;  %vm20606_vm12 = vcmp.le.s32.totalorder %v14483_v16, 16  ;;  %vm20607_vm6 = vcmp.ge.s32.totalorder %v14483_v16, 1  ;;  %v20608_v63 = vmov 0 }
 0x269   :  { %vm15162_vm5 = vmand %vm20607_vm6, %vm20606_vm12  ;;  %v1960_v32 = vadd.f32 %v14750_v29, %v1917_v23  ;;  %3399 = vst [vmem:[#allocation2 + $0x2c] sm:$0xf] %v3086_v56  ;;  %v3129_v53 = vshrl.u32 %v11640_v12, 16  ;;  %v3132_v34 = vshll.u32 %v11640_v12, 16  ;;  %v11638_v52 = vpack.c.bf16 %v2855_v7, %v2855_v7 }
 0x26a   :  { %v20609_v63 = vsel %vm15162_vm5, 4294967295, %v20608_v63  ;;  %v1993_v2 = vmax.f32 %v1957_v39, 0.0  ;;  %vm20611_vm7 = vcmp.le.s32.totalorder %v14496_v35, 16  ;;  %vm20612_vm9 = vcmp.ge.s32.totalorder %v14496_v35, 1 }
 0x26b   :  { %20610 = vst [vmem:[#allocation16_spill] sm:$0xff] %v20609_v63  ;;  %vm15171_vm8 = vmand %vm20612_vm9, %vm20611_vm7  ;;  %v20613_v5 = vmov 0  ;;  %v3096_v16 = vsel %vm14972_vm2, %v3087_v22, %v15088_v11  ;;  %v1991_v47 = vmax.f32 %v1955_v17, 0.0  ;;  %v1996_v60 = vmax.f32 %v1960_v32, 0.0  ;;  %v20616_v32 = vld [vmem:[#allocation22_spill] sm:$0xff] }
 0x26c   :  { %v20614_v5 = vsel %vm15171_vm8, 4294967295, %v20613_v5  ;;  %v1915_v41 = vmul.f32 %v14699_v26, %v1814_v48  ;;  %3400 = vst [vmem:[#allocation2 + $0x30] sm:$0xf] %v3096_v16  ;;  %v3131_v50 = vrot.slane %v3129_v53, 6  ;;  %v3134_v9 = vrot.slane %v3132_v34, 7 }
 0x26d   :  { %20615 = vst [vmem:[#allocation21_spill] sm:$0xff] %v20614_v5  ;;  %v3109_v27 = vshrl.u32 %v11638_v52, 16  ;;  %v3112_v20 = vshll.u32 %v11638_v52, 16  ;;  %v2858_v35 = vsel %vm15146_vm14, %v1993_v2, 0.0  ;;  %v2856_v25 = vsel %vm15162_vm5, %v1991_v47, 0.0  ;;  %v11840_v47 = vpop.f32.mrf.mxu0 }
 0x26e   :  { %v2861_v11 = vsel %vm15171_vm8, %v1996_v60, 0.0  ;;  %v1958_v37 = vadd.f32 %v14750_v29, %v1915_v41  ;;  %v3135_v6 = vor.u32 %v3134_v9, %v3131_v50  ;;  %v11641_v12 = vpack.c.bf16 %v2858_v35, %v2858_v35 }
 0x26f   :  { %v3111_v45 = vrot.slane %v3109_v27, 6  ;;  %v3114_v23 = vrot.slane %v3112_v20, 7  ;;  %v3107_v39 = vrot.slane %v15119_v58, 4  ;;  %v11639_v17 = vpack.c.bf16 %v2856_v25, %v2856_v25 }
 0x270   :  { %v11644_v1 = vpack.c.bf16 %v2861_v11, %v2861_v11  ;;  %v1994_v48 = vmax.f32 %v1958_v37, 0.0  ;;  %v3139_v22 = vshrl.u32 %v11641_v12, 16  ;;  %v3142_v7 = vshll.u32 %v11641_v12, 16  ;;  %v20622_v37 = vld [vmem:[#allocation20_spill] sm:$0xff] }
 0x271   :  { %v3115_v56 = vor.u32 %v3114_v23, %v3111_v45  ;;  %v1825_v53 = vadd.f32 %v11837_v8, %v20616_v32  ;;  %v3119_v34 = vshrl.u32 %v11639_v17, 16  ;;  %v3122_v52 = vshll.u32 %v11639_v17, 16 }
 0x272   :  { %v3169_v2 = vshrl.u32 %v11644_v1, 16  ;;  %v3172_v16 = vshll.u32 %v11644_v1, 16  ;;  %vm20617_vm9 = vcmp.le.s32.totalorder %v14502_v46, 16  ;;  %vm20618_vm6 = vcmp.ge.s32.totalorder %v14502_v46, 1  ;;  %v20623_v1 = vld [vmem:[#allocation27_spill] sm:$0xff] }
 0x273   :  { %vm15198_vm8 = vmand %vm20618_vm6, %vm20617_vm9  ;;  %v20619_v58 = vmov 0  ;;  %v3137_v60 = vrot.slane %v3135_v6, 4  ;;  %v3116_v8 = vsel %vm14972_vm2, %v3107_v39, %v3115_v56  ;;  %v3141_v41 = vrot.slane %v3139_v22, 6  ;;  %v15209_v22 = vpop.f32.mrf.mxu0 }
 0x274   :  { %v20620_v58 = vsel %vm15198_vm8, 4294967295, %v20619_v58  ;;  %v3144_v50 = vrot.slane %v3142_v7, 7  ;;  %3402 = vst [vmem:[#allocation2 + $0x38] sm:$0xf] %v3116_v8  ;;  %v3121_v9 = vrot.slane %v3119_v34, 6  ;;  %v3124_v27 = vrot.slane %v3122_v52, 7 }
 0x275   :  { %20621 = vst [vmem:[#allocation19_spill] sm:$0xff] %v20620_v58  ;;  %v3171_v20 = vrot.slane %v3169_v2, 6  ;;  %v3174_v35 = vrot.slane %v3172_v16, 7  ;;  %v2859_v46 = vsel %vm15198_vm8, %v1994_v48, 0.0  ;;  %v1918_v11 = vmul.f32 %v14699_v26, %v1825_v53  ;;  %v3435_v48 = vld [vmem:[#allocation2 + $0xc] sm:$0xf] }
 0x276   :  { %v3145_v25 = vor.u32 %v3144_v50, %v3141_v41  ;;  %v1817_v45 = vadd.f32 %v1816_v14, %v20622_v37  ;;  %v3117_v23 = vrot.slane %v3115_v56, 4  ;;  %v3125_v12 = vor.u32 %v3124_v27, %v3121_v9  ;;  %v3436_v52 = vld [vmem:[#allocation2 + $0x10] sm:$0xf]  ;;  %v3434_v9 = vld [vmem:[#allocation2 + $0x8] sm:$0xf] }
 0x277   :  { %v11642_v17 = vpack.c.bf16 %v2859_v46, %v2859_v46  ;;  %v1838_v39 = vadd.f32 %v11840_v47, %v20623_v1  ;;  %v1961_v32 = vadd.f32 %v14750_v29, %v1918_v11  ;;  %v15216_v53 = vadd.s32 280, %v13735_v15  ;;  %v3437_v27 = vld [vmem:[#allocation2 + $0x14] sm:$0xf]  ;;  %v3470_v11 = vld [vmem:[#allocation2 + $0x8] sm:$0xe] }
 0x278   :  { %v3146_v7 = vsel %vm14972_vm2, %v3137_v60, %v3145_v25  ;;  %v1916_v34 = vmul.f32 %v14699_v26, %v1817_v45  ;;  %v3126_v14 = vsel %vm14972_vm2, %v3117_v23, %v3125_v12  ;;  %v3127_v56 = vrot.slane %v3125_v12, 4 }
 0x279   :  { %3405 = vst [vmem:[#allocation2 + $0x44] sm:$0xf] %v3146_v7  ;;  %v15220_v2 = vor.u32 %v3174_v35, %v3171_v20  ;;  %v3149_v16 = vshrl.u32 %v11642_v17, 16  ;;  %vm20624_vm6 = vcmp.le.s32.totalorder %v14541_v10, 16  ;;  %vm20625_vm9 = vcmp.ge.s32.totalorder %v14541_v10, 1 }
 0x27a   :  { %vm15226_vm12 = vmand %vm20625_vm9, %vm20624_vm6  ;;  %v20626_v47 = vmov 0  ;;  %3403 = vst [vmem:[#allocation2 + $0x3c] sm:$0xf] %v3126_v14  ;;  %v3152_v60 = vshll.u32 %v11642_v17, 16  ;;  %v1997_v8 = vmax.f32 %v1961_v32, 0.0  ;;  %v1959_v41 = vadd.f32 %v14750_v29, %v1916_v34 }
 0x27b   :  { %v20627_v47 = vsel %vm15226_vm12, 4294967295, %v20626_v47  ;;  %v1921_v50 = vmul.f32 %v14699_v26, %v1838_v39  ;;  %v3136_v20 = vsel %vm14972_vm2, %v3127_v56, %v3135_v6  ;;  %v3151_v35 = vrot.slane %v3149_v16, 6  ;;  %v15246_v26 = vpop.f32.mrf.mxu0 }
 0x27c   :  { %20628 = vst [vmem:[#allocation22_spill] sm:$0xff] %v20627_v47  ;;  %vm20629_vm8 = vcmp.le.s32.totalorder %v14558_v18, 16  ;;  %vm20630_vm9 = vcmp.ge.s32.totalorder %v14558_v18, 1  ;;  %v20631_v10 = vmov 0  ;;  %v15242_v46 = vcombine.low %v3434_v9, %v3435_v48  ;;  %3404 = vst [vmem:[#allocation2 + $0x40] sm:$0xf] %v3136_v20 }
 0x27d   :  { %vm15238_vm6 = vmand %vm20630_vm9, %vm20629_vm8  ;;  %v15244_v37 = vcombine.low %v3436_v52, %v3437_v27  ;;  %v3154_v45 = vrot.slane %v3152_v60, 7  ;;  %v2862_v6 = vsel %vm15226_vm12, %v1997_v8, 0.0  ;;  %v1995_v23 = vmax.f32 %v1959_v41, 0.0  ;;  %v15271_v16 = vpop.f32.mrf.mxu0 }
 0x27e   :  { %v20632_v10 = vsel %vm15238_vm6, 4294967295, %v20631_v10  ;;  %v1964_v12 = vadd.f32 %v14750_v29, %v1921_v50  ;;  %v3147_v18 = vrot.slane %v3145_v25, 4  ;;  %v11645_v17 = vpack.c.bf16 %v2862_v6, %v2862_v6  ;;  %v12210_v50 = vld [vmem:[%s20298_s4 + $0x138] sm:$0xff]  }
 0x27f   :  { %20633 = vst [vmem:[#allocation20_spill] sm:$0xff] %v20632_v10  ;;  %vm20634_vm8 = vcmp.le.s32.totalorder %v14641_v19, 16  ;;  %vm20635_vm9 = vcmp.ge.s32.totalorder %v14641_v19, 1  ;;  %v20636_v1 = vmov 0  ;;  %v3601_v39 = vshll.u32 %v15242_v46, 16 }
 0x280   :  { %vm15255_vm7 = vmand %vm20635_vm9, %vm20634_vm8  ;;  %v15260_v7 = vcombine.low %v3470_v11, %v3435_v48  ;;  %v15262_v32 = vor.u32 %v3154_v45, %v3151_v35  ;;  %v2860_v34 = vsel %vm15238_vm6, %v1995_v23, 0.0  ;;  %v2000_v29 = vmax.f32 %v1964_v12, 0.0  ;;  %v12192_v23 = vld [vmem:[%s20298_s4 + $0x1b8] sm:$0xff]  }
 0x281   :  { %v20637_v1 = vsel %vm15255_vm7, 4294967295, %v20636_v1  ;;  %v15267_v25 = vrot.slane %v15244_v37, 1  ;;  %v3179_v19 = vshrl.u32 %v11645_v17, 16  ;;  %v3182_v52 = vshll.u32 %v11645_v17, 16 }
 0x282   :  { %20638 = vst [vmem:[#allocation27_spill] sm:$0xff] %v20637_v1  ;;  %v11643_v14 = vpack.c.bf16 %v2860_v34, %v2860_v34  ;;  %v3603_v56 = vrot.slane %v3601_v39, 1  ;;  %v3156_v48 = vsel %vm14972_vm2, %v3147_v18, %v15262_v32  ;;  %v2865_v60 = vsel %vm15255_vm7, %v2000_v29, 0.0 }
 0x283   :  { %v3819_v8 = vrot.slane %v15260_v7, 1  ;;  %v3759_v41 = vrot.slane %v15242_v46, 1  ;;  %3406 = vst [vmem:[#allocation2 + $0x48] sm:$0xf] %v3156_v48  ;;  %v3181_v9 = vrot.slane %v3179_v19, 6  ;;  %v3184_v27 = vrot.slane %v3182_v52, 7 }
 0x284   :  { %v3159_v20 = vshrl.u32 %v11643_v14, 16  ;;  %v3162_v35 = vshll.u32 %v11643_v14, 16  ;;  %v11648_v11 = vpack.c.bf16 %v2865_v60, %v2865_v60  ;;  %vm20639_vm8 = vsmask.f32 7424 }
 0x285   :  { %v3604_v45 = vsel %vm20639_vm8, %v14589_v61, %v3603_v56  ;;  %vm20640_vm7 = vcmask 1046528   ;;  %v15294_v12 = vsub.s32 %v14685_v38, %v15035_v40  ;;  %v3177_v18 = vrot.slane %v15220_v2, 4  ;;  %v11844_v61 = vpop.f32.mrf.mxu0  ;;  %v20642_v40 = vld [vmem:[#allocation23_spill] sm:$0xff] }
 0x286   :  { %v3820_v6 = vsel %vm20640_vm7, %v3819_v8, %v15267_v25  ;;  %v15297_v17 = vor.u32 %v3184_v27, %v3181_v9  ;;  %v3161_v39 = vrot.slane %v3159_v20, 6  ;;  %v3164_v34 = vrot.slane %v3162_v35, 7  ;;  %4792 = vmatprep.mubr.bf16.mxu1 %v3604_v45  ;;  %vm20641_vm9 = vmmov %vm20640_vm7  ;;  %v15315_v8 = vld [vmem:[#allocation2 + $0x18] sm:$0xff]  }
 0x287   :  { %4969 = vmatprep.mubr.bf16.mxu0 %v3820_v6  ;;  %v3209_v29 = vshrl.u32 %v11648_v11, 16  ;;  %v3212_v19 = vshll.u32 %v11648_v11, 16  ;;  %4793 = vmatmul.mubr.bf16.vlgmr.msra.gmra.mxu1 %v14306_v51  ;;  %v3760_v38 = vsel %vm20641_vm9, %v14519_v30, %v3759_v41  ;;  %v1830_v52 = vadd.f32 %v15209_v22, %v20642_v40  ;;  %v12213_v30 = vld [vmem:[%s20298_s4 + $0x130] sm:$0xff]  }
 0x288   :  { %v3157_v14 = vrot.slane %v15262_v32, 4  ;;  %v3186_v48 = vsel %vm14972_vm2, %v3177_v18, %v15297_v17  ;;  %v3165_v60 = vor.u32 %v3164_v34, %v3161_v39  ;;  %4970 = vmatmul.mubr.bf16.vlgmr.msra.gmra.mxu0 %v3760_v38  ;;  %v3605_v51 = vshrl.u32 %v15242_v46, 16  ;;  %5115 = vmatpush1.bf16.msra.mxu1 %v12210_v50  ;;  %v15323_v32 = vld [vmem:[%s20299_s2] ss:$0 sm:$0xff]  ;;  %v12195_v50 = vld [vmem:[%s20298_s4 + $0x1b0] sm:$0xff]   ;;  %v1845_v34 = vpop.f32.mrf.mxu0 }
 0x289   :  { %3409 = vst [vmem:[#allocation2 + $0x54] sm:$0xf] %v3186_v48  ;;  %v3211_v22 = vrot.slane %v3209_v29, 6  ;;  %v3214_v9 = vrot.slane %v3212_v19, 7  ;;  %v1919_v27 = vmul.f32 %v15323_v32, %v1830_v52  ;;  %v3609_v20 = vshll.u32 %v15244_v37, 16  ;;  %5292 = vmatpush1.bf16.msra.mxu0 %v12192_v23  ;;  %v20644_v18 = vld [vmem:[#allocation28_spill] sm:$0xff] }
 0x28a   :  { %v20643_v35 = vmov 0   ;;  %v3166_v11 = vsel %vm14972_vm2, %v3157_v14, %v3165_v60  ;;  %v3167_v45 = vrot.slane %v3165_v60, 4  ;;  %v3607_v6 = vor.u32 %v3605_v51, %v3603_v56  ;;  %v15342_v19 = vld [vmem:[%s20300_s3] ss:$0 sm:$0xff]  ;;  %v20650_v14 = vld [vmem:[#allocation25_spill] sm:$0xff] }
 0x28b   :  { %5116 = vmatprep.subr.bf16.mxu1 %v20643_v35  ;;  %v1841_v39 = vadd.f32 %v15246_v26, %v20644_v18  ;;  %5293 = vmatprep.subr.bf16.mxu0 %v20643_v35  ;;  %v3187_v29 = vrot.slane %v15297_v17, 4  ;;  %3407 = vst [vmem:[#allocation2 + $0x4c] sm:$0xf] %v3166_v11  ;;  %v15337_v23 = vor.u32 %v3214_v9, %v3211_v22  ;;  %v3611_v40 = vrot.slane %v3609_v20, 1  ;;  %v20652_v9 = vld [vmem:[#allocation31_spill] sm:$0xff]  ;;  %v20677_v17 = vld [vmem:[#allocation24_spill] sm:$0xff] }
 0x28c   :  { %v1962_v38 = vadd.f32 %v15342_v19, %v1919_v27  ;;  %v3176_v26 = vsel %vm14972_vm2, %v3167_v45, %v15220_v2  ;;  %vm20645_vm6 = vcmp.le.s32.totalorder %v14713_v62, 16  ;;  %vm20646_vm8 = vcmp.ge.s32.totalorder %v14713_v62, 1  ;;  %5117 = vmatpush1.bf16.msra.mxu1 %v12213_v30  ;;  %v12197_v62 = vld [vmem:[%s20298_s4 + $0x1a8] sm:$0xff]  }
 0x28d   :  { %vm15354_vm7 = vmand %vm20646_vm8, %vm20645_vm6  ;;  %v20647_v56 = vmov 0  ;;  %v1922_v52 = vmul.f32 %v15323_v32, %v1841_v39  ;;  %v1833_v48 = vadd.f32 %v15271_v16, %v20650_v14  ;;  %v20333_v60 = vrot.slane %v15315_v8, 1  ;;  %3408 = vst [vmem:[#allocation2 + $0x50] sm:$0xf] %v3176_v26  ;;  %5294 = vmatpush1.bf16.msra.mxu0 %v12195_v50  ;;  %5118 = vmatprep.subr.bf16.mxu1 %v20643_v35  ;;  %v12216_v16 = vld [vmem:[%s20298_s4 + $0x128] sm:$0xff]   ;;  %v15383_v50 = vpop.f32.mrf.mxu0 }
 0x28e   :  { %v20648_v56 = vsel %vm15354_vm7, 4294967295, %v20647_v56  ;;  %v1998_v51 = vmax.f32 %v1962_v38, 0.0  ;;  %vm20651_vm9 = vsmask.f32 7424  ;;  %v3839_v22 = vrot.slane %v3609_v20, 2  ;;  %5295 = vmatprep.subr.bf16.mxu0 %v20643_v35 }
 0x28f   :  { %20649 = vst [vmem:[#allocation23_spill] sm:$0xff] %v20648_v56  ;;  %v3612_v2 = vsel %vm20651_vm9, %v3607_v6, %v3611_v40  ;;  %v1854_v27 = vadd.f32 %v11844_v61, %v20652_v9  ;;  %v1965_v30 = vadd.f32 %v15342_v19, %v1922_v52  ;;  %v1920_v11 = vmul.f32 %v15323_v32, %v1833_v48 }
 0x290   :  { %4800 = vmatprep.mubr.bf16.mxu1 %v3612_v2  ;;  %vm20653_vm6 = vcmask 1046528   ;;  %v2863_v45 = vsel %vm15354_vm7, %v1998_v51, 0.0  ;;  %vm20655_vm9 = vcmp.le.s32.totalorder %v14736_v31, 16  ;;  %vm20656_vm12 = vcmp.ge.s32.totalorder %v14736_v31, 1  ;;  %v12199_v2 = vld [vmem:[%s20298_s4 + $0x1a0] sm:$0xff]   ;;  %5119 = vmatpush1.bf16.msra.mxu1 %v12216_v16 }
 0x291   :  { %v15377_v61 = vsel %vm20653_vm6, %v15267_v25, %v20333_v60  ;;  %vm20654_vm8 = vmmov %vm20653_vm6  ;;  %v20657_v6 = vmov 0  ;;  %v1925_v18 = vmul.f32 %v15323_v32, %v1854_v27  ;;  %4801 = vmatmul.mubr.bf16.gmra.mxu1 %v15242_v46  ;;  %v3613_v39 = vshrl.u32 %v15244_v37, 16  ;;  %5296 = vmatpush1.bf16.msra.mxu0 %v12197_v62  ;;  %v15431_v62 = vpop.f32.mrf.mxu0 }
 0x292   :  { %v3762_v20 = vsel %vm20654_vm8, %v3759_v41, %v15267_v25  ;;  %vm15391_vm5 = vmand %vm20656_vm12, %vm20655_vm9  ;;  %4977 = vmatprep.mubr.bf16.mxu0 %v15377_v61  ;;  %v20660_v25 = vld [vmem:[#allocation29_spill] sm:$0xff]  ;;  %v11646_v38 = vpack.c.bf16 %v2863_v45, %v2863_v45  ;;  %v2001_v26 = vmax.f32 %v1965_v30, 0.0  ;;  %v1963_v52 = vadd.f32 %v15342_v19, %v1920_v11  ;;  %5297 = vmatprep.subr.bf16.mxu0 %v20643_v35 }
 0x293   :  { %v20658_v6 = vsel %vm15391_vm5, 4294967295, %v20657_v6  ;;  %v1846_v41 = vadd.f32 %v1845_v34, %v20660_v25  ;;  %4978 = vmatmul.mubr.bf16.gmra.mxu0 %v3762_v20  ;;  %v15402_v31 = vshll.u32 %v15315_v8, 16  ;;  %vm20661_vm12 = vcmp.le.s32.totalorder %v14742_v33, 16  ;;  %5120 = vmatprep.subr.bf16.mxu1 %v20643_v35 }
 0x294   :  { %20659 = vst [vmem:[#allocation28_spill] sm:$0xff] %v20658_v6  ;;  %vm20662_vm6 = vcmp.ge.s32.totalorder %v14742_v33, 1  ;;  %v20663_v46 = vmov 0  ;;  %v1968_v34 = vadd.f32 %v15342_v19, %v1925_v18  ;;  %v3615_v48 = vor.u32 %v3613_v39, %v3611_v40  ;;  %v12218_v33 = vld [vmem:[%s20298_s4 + $0x120] sm:$0xff]  }
 0x295   :  { %vm15409_vm8 = vmand %vm20662_vm6, %vm20661_vm12  ;;  %v1923_v14 = vmul.f32 %v15323_v32, %v1846_v41  ;;  %v3838_v51 = vrot.slane %v3613_v39, 1  ;;  %v3189_v9 = vshrl.u32 %v11646_v38, 16  ;;  %v3192_v27 = vshll.u32 %v11646_v38, 16  ;;  %5298 = vmatpush1.bf16.msra.mxu0 %v12199_v2  ;;  %5121 = vmatpush1.bf16.msra.mxu1 %v12218_v33  ;;  %v15462_v33 = vld [vmem:[#allocation2 + $0x20] sm:$0xff]  }
 0x296   :  { %v20664_v46 = vsel %vm15409_vm8, 4294967295, %v20663_v46  ;;  %v2866_v30 = vsel %vm15391_vm5, %v2001_v26, 0.0  ;;  %v1999_v11 = vmax.f32 %v1963_v52, 0.0  ;;  %vm20666_vm9 = vcmp.le.s32.totalorder %v14783_v57, 16  ;;  %5299 = vmatprep.subr.bf16.mxu0 %v20643_v35  ;;  %5122 = vmatprep.subr.bf16.mxu1 %v20643_v35 }
 0x297   :  { %20665 = vst [vmem:[#allocation25_spill] sm:$0xff] %v20664_v46  ;;  %vm20667_vm12 = vcmp.ge.s32.totalorder %v14783_v57, 1  ;;  %v20668_v40 = vmov 0  ;;  %v11649_v16 = vpack.c.bf16 %v2866_v30, %v2866_v30  ;;  %v2004_v20 = vmax.f32 %v1968_v34, 0.0  ;;  %v12201_v34 = vld [vmem:[%s20298_s4 + $0x198] sm:$0xff]   ;;  %v11848_v30 = vpop.f32.mrf.mxu0 }
 0x298   :  { %vm15427_vm6 = vmand %vm20667_vm12, %vm20666_vm9  ;;  %v1966_v45 = vadd.f32 %v15342_v19, %v1923_v14  ;;  %v20337_v18 = vrot.slane %v15402_v31, 1  ;;  %v3191_v25 = vrot.slane %v3189_v9, 6  ;;  %v3194_v41 = vrot.slane %v3192_v27, 7 }
 0x299   :  { %v20669_v40 = vsel %vm15427_vm6, 4294967295, %v20668_v40  ;;  %v2864_v57 = vsel %vm15409_vm8, %v1999_v11, 0.0  ;;  %v15439_v39 = vor.u32 %v3839_v22, %v3838_v51  ;;  %v3219_v38 = vshrl.u32 %v11649_v16, 16  ;;  %v12220_v22 = vld [vmem:[%s20298_s4 + $0x118] sm:$0xff]   ;;  %5300 = vmatpush1.bf16.msra.mxu0 %v12201_v34 }
 0x29a   :  { %20670 = vst [vmem:[#allocation31_spill] sm:$0xff] %v20669_v40  ;;  %v3222_v26 = vshll.u32 %v11649_v16, 16  ;;  %v11647_v52 = vpack.c.bf16 %v2864_v57, %v2864_v57  ;;  %v2869_v60 = vsel %vm15427_vm6, %v2004_v20, 0.0  ;;  %v3195_v14 = vor.u32 %v3194_v41, %v3191_v25  ;;  %5123 = vmatpush1.bf16.msra.mxu1 %v12220_v22  ;;  %5301 = vmatprep.subr.bf16.mxu0 %v20643_v35  ;;  %v12222_v22 = vld [vmem:[%s20298_s4 + $0x110] sm:$0xff]  }
 0x29b   :  { %v11652_v51 = vpack.c.bf16 %v2869_v60, %v2869_v60  ;;  %v2002_v9 = vmax.f32 %v1966_v45, 0.0  ;;  %vm20671_vm8 = vcmp.le.s32.totalorder %v14829_v24, 16  ;;  %vm20672_vm6 = vcmp.ge.s32.totalorder %v14829_v24, 1  ;;  %5124 = vmatprep.subr.bf16.mxu1 %v20643_v35 }
 0x29c   :  { %vm15455_vm9 = vmand %vm20672_vm6, %vm20671_vm8  ;;  %v20673_v27 = vmov 0  ;;  %vm20676_vm12 = vsmask.f32 7424  ;;  %v3221_v60 = vrot.slane %v3219_v38, 6  ;;  %v3224_v11 = vrot.slane %v3222_v26, 7 }
 0x29d   :  { %v20674_v27 = vsel %vm15455_vm9, 4294967295, %v20673_v27  ;;  %v3620_v2 = vsel %vm20676_vm12, %v3615_v48, %v20337_v18  ;;  %v3199_v16 = vshrl.u32 %v11647_v52, 16  ;;  %v3202_v20 = vshll.u32 %v11647_v52, 16 }
 0x29e   :  { %20675 = vst [vmem:[#allocation29_spill] sm:$0xff] %v20674_v27  ;;  %4808 = vmatprep.mubr.bf16.mxu1 %v3620_v2  ;;  %v3217_v24 = vrot.slane %v15337_v23, 4  ;;  %v3196_v48 = vsel %vm14972_vm2, %v3187_v29, %v3195_v14  ;;  %v3249_v45 = vshrl.u32 %v11652_v51, 16  ;;  %v3252_v25 = vshll.u32 %v11652_v51, 16  ;;  %v12203_v29 = vld [vmem:[%s20298_s4 + $0x190] sm:$0xff]   ;;  %5125 = vmatpush1.bf16.msra.mxu1 %v12222_v22 }
 0x29f   :  { %4809 = vmatmul.mubr.bf16.gmra.mxu1 %v15244_v37  ;;  %3410 = vst [vmem:[#allocation2 + $0x58] sm:$0xf] %v3196_v48  ;;  %v15476_v41 = vor.u32 %v3224_v11, %v3221_v60  ;;  %v3201_v57 = vrot.slane %v3199_v16, 6  ;;  %v3204_v38 = vrot.slane %v3202_v20, 7  ;;  %v2867_v26 = vsel %vm15455_vm9, %v2002_v9, 0.0  ;;  %v1861_v11 = vpop.f32.mrf.mxu0  ;;  %v20678_v20 = vld [vmem:[#allocation32_spill] sm:$0xff]  ;;  %5302 = vmatpush1.bf16.msra.mxu0 %v12203_v29 }
 0x2a0   :  { %v3251_v52 = vrot.slane %v3249_v45, 6  ;;  %v3254_v51 = vrot.slane %v3252_v25, 7  ;;  %v11650_v2 = vpack.c.bf16 %v2867_v26, %v2867_v26  ;;  %v20338_v60 = vrot.slane %v15462_v33, 1  ;;  %5303 = vmatprep.subr.bf16.mxu0 %v20643_v35  ;;  %5126 = vmatprep.subr.bf16.mxu1 %v20643_v35 }
 0x2a1   :  { %v3197_v9 = vrot.slane %v3195_v14, 4  ;;  %v3226_v34 = vsel %vm14972_vm2, %v3217_v24, %v15476_v41  ;;  %v3205_v16 = vor.u32 %v3204_v38, %v3201_v57  ;;  %v1857_v48 = vadd.f32 %v15383_v50, %v20678_v20  ;;  %v20681_v38 = vld [vmem:[#allocation30_spill] sm:$0xff] }
 0x2a2   :  { %v3227_v45 = vrot.slane %v15476_v41, 4  ;;  %3413 = vst [vmem:[#allocation2 + $0x64] sm:$0xf] %v3226_v34  ;;  %v3229_v25 = vshrl.u32 %v11650_v2, 16  ;;  %v3232_v26 = vshll.u32 %v11650_v2, 16  ;;  %v20679_v14 = vrot.slane %v15315_v8, 1 }
 0x2a3   :  { %vm20680_vm8 = vcmask 1046528   ;;  %v3206_v24 = vsel %vm14972_vm2, %v3197_v9, %v3205_v16  ;;  %v3207_v50 = vrot.slane %v3205_v16, 4  ;;  %v1926_v57 = vmul.f32 %v15323_v32, %v1857_v48  ;;  %v15510_v34 = vld [vmem:[#allocation2 + $0x28] sm:$0xff]   ;;  %v11849_v48 = vpop.f32.mrf.mxu0 }
 0x2a4   :  { %v15502_v18 = vsel %vm20680_vm8, %v20679_v14, %v20338_v60  ;;  %v1849_v41 = vadd.f32 %v15431_v62, %v20681_v38  ;;  %v12205_v2 = vld [vmem:[%s20298_s4 + $0x188] sm:$0xff]   ;;  %3411 = vst [vmem:[#allocation2 + $0x5c] sm:$0xf] %v3206_v24  ;;  %v15515_v20 = vor.u32 %v3254_v51, %v3251_v52  ;;  %v3231_v14 = vrot.slane %v3229_v25, 6  ;;  %v20683_v24 = vld [vmem:[#allocation33_spill] sm:$0xff] }
 0x2a5   :  { %4985 = vmatprep.mubr.bf16.mxu0 %v15502_v18  ;;  %v3234_v9 = vrot.slane %v3232_v26, 7  ;;  %v20682_v16 = vld [vmem:[#allocation35_spill] sm:$0xff]  ;;  %v3216_v62 = vsel %vm14972_vm2, %v3207_v50, %v15337_v23  ;;  %v1969_v29 = vadd.f32 %v15342_v19, %v1926_v57  ;;  %v1862_v52 = vadd.f32 %v1861_v11, %v20683_v24  ;;  %5304 = vmatpush1.bf16.msra.mxu0 %v12205_v2 }
 0x2a6   :  { %v1870_v60 = vadd.f32 %v11848_v30, %v20682_v16  ;;  %4986 = vmatmul.mubr.bf16.gmra.mxu0 %v15377_v61  ;;  %v1924_v38 = vmul.f32 %v15323_v32, %v1849_v41  ;;  %v12224_v30 = vld [vmem:[%s20298_s4 + $0x108] sm:$0xff]   ;;  %3412 = vst [vmem:[#allocation2 + $0x60] sm:$0xf] %v3216_v62  ;;  %vm20684_vm8 = vcmp.le.s32.totalorder %v14843_v49, 16  ;;  %vm20685_vm6 = vcmp.ge.s32.totalorder %v14843_v49, 1  ;;  %v12207_v41 = vld [vmem:[%s20298_s4 + $0x180] sm:$0xff]   ;;  %5305 = vmatprep.subr.bf16.mxu0 %v20643_v35 }
 0x2a7   :  { %v15529_v61 = vor.u32 %v3234_v9, %v3231_v14  ;;  %vm15535_vm12 = vmand %vm20685_vm6, %vm20684_vm8  ;;  %v20686_v23 = vmov 0  ;;  %v15541_v11 = vshrl.u32 %v15315_v8, 16  ;;  %v15544_v22 = vshll.u32 %v15462_v33, 16  ;;  %v20689_v25 = vld [vmem:[#allocation3_spill] sm:$0xff]  ;;  %5127 = vmatpush1.bf16.msra.mxu1 %v12224_v30 }
 0x2a8   :  { %v20687_v23 = vsel %vm15535_vm12, 4294967295, %v20686_v23  ;;  %v1929_v51 = vmul.f32 %v15323_v32, %v1870_v60  ;;  %v2005_v26 = vmax.f32 %v1969_v29, 0.0  ;;  %v1967_v49 = vadd.f32 %v15342_v19, %v1924_v38  ;;  %v20690_v60 = vld [vmem:[#allocation6_spill] sm:$0xff]  ;;  %v1864_v38 = vpop.f32.mrf.mxu0  ;;  %5128 = vmatprep.subr.bf16.mxu1 %v20643_v35 }
 0x2a9   :  { %20688 = vst [vmem:[#allocation24_spill] sm:$0xff] %v20687_v23  ;;  %v1927_v50 = vmul.f32 %v15323_v32, %v1862_v52  ;;  %v20343_v57 = vrot.slane %v15510_v34, 1  ;;  %v3236_v9 = vsel %vm14972_vm2, %v3227_v45, %v15529_v61  ;;  %vm20691_vm5 = vcmp.le.s32.totalorder %v14849_v59, 16  ;;  %v12225_v30 = vld [vmem:[%s20298_s4 + $0x100] sm:$0xff]   ;;  %5306 = vmatpush1.bf16.msra.mxu0 %v12207_v41 }
 0x2aa   :  { %vm20692_vm9 = vcmp.ge.s32.totalorder %v14849_v59, 1  ;;  %v20693_v16 = vmov 0  ;;  %v1972_v2 = vadd.f32 %v15342_v19, %v1929_v51  ;;  %v20696_v62 = vrot.slane %v15402_v31, 1  ;;  %3414 = vst [vmem:[#allocation2 + $0x68] sm:$0xf] %v3236_v9  ;;  %5307 = vmatprep.subr.bf16.mxu0 %v20643_v35 }
 0x2ab   :  { %vm15565_vm7 = vmand %vm20692_vm9, %vm20691_vm5  ;;  %v2870_v45 = vsel %vm15535_vm12, %v2005_v26, 0.0  ;;  %v2003_v24 = vmax.f32 %v1967_v49, 0.0  ;;  %vm20697_vm6 = vcmp.le.s32.totalorder %v14880_v44, 16  ;;  %vm20698_vm5 = vcmp.ge.s32.totalorder %v14880_v44, 1  ;;  %5129 = vmatpush1.bf16.msra.mxu1 %v12225_v30 }
 0x2ac   :  { %v20694_v16 = vsel %vm15565_vm7, 4294967295, %v20693_v16  ;;  %v3623_v29 = vor.u32 %v15541_v11, %v20696_v62  ;;  %vm15580_vm9 = vmand %vm20698_vm5, %vm20697_vm6  ;;  %v20699_v59 = vmov 0  ;;  %v1970_v52 = vadd.f32 %v15342_v19, %v1927_v50  ;;  %v20709_v50 = vld [vmem:[#allocation36_spill] sm:$0xff]  ;;  %5130 = vmatprep.subr.bf16.mxu1 %v20643_v35 }
 0x2ad   :  { %20695 = vst [vmem:[#allocation32_spill] sm:$0xff] %v20694_v16  ;;  %v20700_v59 = vsel %vm15580_vm9, 4294967295, %v20699_v59  ;;  %v20346_v51 = vrot.slane %v15544_v22, 1  ;;  %v11653_v62 = vpack.c.bf16 %v2870_v45, %v2870_v45  ;;  %v2008_v14 = vmax.f32 %v1972_v2, 0.0 }
 0x2ae   :  { %20701 = vst [vmem:[#allocation30_spill] sm:$0xff] %v20700_v59  ;;  %vm20702_vm8 = vcmp.le.s32.totalorder %v20677_v17, 16  ;;  %vm20703_vm12 = vcmp.ge.s32.totalorder %v20677_v17, 1  ;;  %v20704_v26 = vmov 0  ;;  %v20707_v44 = vrot.slane %v15462_v33, 1 }
 0x2af   :  { %vm15590_vm14 = vmand %vm20703_vm12, %vm20702_vm8  ;;  %vm20708_vm6 = vcmask 1046528   ;;  %v1873_v9 = vadd.f32 %v11849_v48, %v20709_v50  ;;  %v2868_v17 = vsel %vm15565_vm7, %v2003_v24, 0.0  ;;  %v2006_v2 = vmax.f32 %v1970_v52, 0.0  ;;  %v12211_v48 = vld [vmem:[%s20298_s4 + $0x1f8] sm:$0xff]  }
 0x2b0   :  { %v20705_v26 = vsel %vm15590_vm14, 4294967295, %v20704_v26  ;;  %v15599_v49 = vsel %vm20708_vm6, %v20707_v44, %v20343_v57  ;;  %vm20710_vm12 = vsmask.f32 7424  ;;  %v20711_v44 = vld [vmem:[#allocation34_spill] sm:$0xff]  ;;  %v3259_v50 = vshrl.u32 %v11653_v62, 16  ;;  %5308 = vmatpush2.bf16.msra.mxu0 %v12211_v48 }
 0x2b1   :  { %20706 = vst [vmem:[#allocation35_spill] sm:$0xff] %v20705_v26  ;;  %v3628_v45 = vsel %vm20710_vm12, %v3623_v29, %v20346_v51  ;;  %4993 = vmatprep.mubr.bf16.mxu0 %v15599_v49  ;;  %v1865_v57 = vadd.f32 %v1864_v38, %v20711_v44  ;;  %v3262_v23 = vshll.u32 %v11653_v62, 16  ;;  %v11651_v27 = vpack.c.bf16 %v2868_v17, %v2868_v17  ;;  %v11852_v44 = vpop.f32.mrf.mxu0 }
 0x2b2   :  { %v2873_v24 = vsel %vm15580_vm9, %v2008_v14, 0.0  ;;  %4816 = vmatprep.mubr.bf16.mxu1 %v3628_v45  ;;  %4994 = vmatmul.mubr.bf16.gmra.mxu0 %v15502_v18  ;;  %v2871_v29 = vsel %vm15590_vm14, %v2006_v2, 0.0  ;;  %v1930_v38 = vmul.f32 %v15323_v32, %v1873_v9  ;;  %v3261_v14 = vrot.slane %v3259_v50, 6  ;;  %v12228_v2 = vld [vmem:[%s20298_s4 + $0x178] sm:$0xff]  }
 0x2b3   :  { %v11656_v52 = vpack.c.bf16 %v2873_v24, %v2873_v24  ;;  %v1928_v41 = vmul.f32 %v15323_v32, %v1865_v57  ;;  %4817 = vmatmul.mubr.bf16.gmra.mxu1 %v15315_v8  ;;  %v3264_v62 = vrot.slane %v3262_v23, 7  ;;  %v3239_v17 = vshrl.u32 %v11651_v27, 16  ;;  %v12214_v24 = vld [vmem:[%s20298_s4 + $0x1f0] sm:$0xff]   ;;  %5309 = vmatprep.subr.bf16.mxu0 %v20643_v35 }
 0x2b4   :  { %v3242_v18 = vshll.u32 %v11651_v27, 16  ;;  %v11654_v57 = vpack.c.bf16 %v2871_v29, %v2871_v29  ;;  %v1973_v8 = vadd.f32 %v15342_v19, %v1930_v38  ;;  %vm20712_vm6 = vcmp.le.s32.totalorder %v20689_v25, 16  ;;  %v20717_v38 = vld [vmem:[#allocation4_spill] sm:$0xff]  ;;  %5131 = vmatpush2.bf16.msra.mxu1 %v12228_v2  ;;  %5310 = vmatpush2.bf16.msra.mxu0 %v12214_v24 }
 0x2b5   :  { %v3289_v9 = vshrl.u32 %v11656_v52, 16  ;;  %v3292_v45 = vshll.u32 %v11656_v52, 16  ;;  %v3265_v23 = vor.u32 %v3264_v62, %v3261_v14  ;;  %v3241_v27 = vrot.slane %v3239_v17, 6  ;;  %5132 = vmatprep.subr.bf16.mxu1 %v20643_v35  ;;  %5311 = vmatprep.subr.bf16.mxu0 %v20643_v35 }
 0x2b6   :  { %v3244_v30 = vrot.slane %v3242_v18, 7  ;;  %v1971_v50 = vadd.f32 %v15342_v19, %v1928_v41  ;;  %v3269_v29 = vshrl.u32 %v11654_v57, 16  ;;  %v3272_v26 = vshll.u32 %v11654_v57, 16 }
 0x2b7   :  { %v3291_v51 = vrot.slane %v3289_v9, 6  ;;  %v3294_v52 = vrot.slane %v3292_v45, 7  ;;  %vm20713_vm12 = vcmp.ge.s32.totalorder %v20689_v25, 1  ;;  %v20714_v48 = vmov 0 }
 0x2b8   :  { %vm15641_vm5 = vmand %vm20713_vm12, %vm20712_vm6  ;;  %vm2697_vm8 = vcmp.ge.s32.totalorder %v20717_v38, 1  ;;  %v3237_v14 = vrot.slane %v15529_v61, 4  ;;  %v20718_v41 = vrot.slane %v15515_v20, 4  ;;  %v3245_v17 = vor.u32 %v3244_v30, %v3241_v27  ;;  %v12229_v61 = vld [vmem:[%s20298_s4 + $0x170] sm:$0xff]   ;;  %v1877_v27 = vpop.f32.mrf.mxu0 }
 0x2b9   :  { %v20715_v48 = vsel %vm15641_vm5, 4294967295, %v20714_v48  ;;  %v2009_v18 = vmax.f32 %v1973_v8, 0.0  ;;  %vm20719_vm14 = vcmp.le.s32.totalorder %v20690_v60, 16  ;;  %vm20720_vm9 = vcmp.ge.s32.totalorder %v20690_v60, 1  ;;  %v12217_v60 = vld [vmem:[%s20298_s4 + $0x1e8] sm:$0xff]   ;;  %5133 = vmatpush2.bf16.msra.mxu1 %v12229_v61 }
 0x2ba   :  { %20716 = vst [vmem:[#allocation33_spill] sm:$0xff] %v20715_v48  ;;  %v3266_v62 = vsel %vm14972_vm2, %v20718_v41, %v3265_v23  ;;  %vm15655_vm7 = vmand %vm20720_vm9, %vm20719_vm14  ;;  %v20721_v25 = vmov 0  ;;  %v3267_v9 = vrot.slane %v3265_v23, 4  ;;  %v3271_v45 = vrot.slane %v3269_v29, 6  ;;  %v20724_v23 = vld [vmem:[#allocation39_spill] sm:$0xff]  ;;  %5312 = vmatpush2.bf16.msra.mxu0 %v12217_v60  ;;  %5134 = vmatprep.subr.bf16.mxu1 %v20643_v35 }
 0x2bb   :  { %v20722_v25 = vsel %vm15655_vm7, 4294967295, %v20721_v25  ;;  %3417 = vst [vmem:[#allocation2 + $0x74] sm:$0xf] %v3266_v62  ;;  %v3274_v57 = vrot.slane %v3272_v26, 7  ;;  %v2007_v41 = vmax.f32 %v1971_v50, 0.0  ;;  %v3246_v2 = vsel %vm14972_vm2, %v3237_v14, %v3245_v17  ;;  %5313 = vmatprep.subr.bf16.mxu0 %v20643_v35 }
 0x2bc   :  { %20723 = vst [vmem:[#allocation3_spill] sm:$0xff] %v20722_v25  ;;  %v3247_v8 = vrot.slane %v3245_v17, 4  ;;  %v2874_v30 = vsel %vm15641_vm5, %v2009_v18, 0.0  ;;  %v1886_v62 = vadd.f32 %v11852_v44, %v20724_v23  ;;  %3415 = vst [vmem:[#allocation2 + $0x6c] sm:$0xf] %v3246_v2  ;;  %v15672_v26 = vor.u32 %v3294_v52, %v3291_v51  ;;  %v20725_v18 = vld [vmem:[#allocation37_spill] sm:$0xff] }
 0x2bd   :  { %v3275_v24 = vor.u32 %v3274_v57, %v3271_v45  ;;  %v11657_v50 = vpack.c.bf16 %v2874_v30, %v2874_v30  ;;  %v2872_v29 = vsel %vm15655_vm7, %v2007_v41, 0.0  ;;  %v1878_v59 = vadd.f32 %v1877_v27, %v20725_v18  ;;  %v12232_v51 = vld [vmem:[%s20298_s4 + $0x168] sm:$0xff]   ;;  %v15700_v30 = vld [vmem:[#allocation2 + $0x30] sm:$0xff]  }
 0x2be   :  { %v3256_v14 = vsel %vm14972_vm2, %v3247_v8, %v15515_v20  ;;  %v11655_v17 = vpack.c.bf16 %v2872_v29, %v2872_v29  ;;  %v1933_v48 = vmul.f32 %v15323_v32, %v1886_v62  ;;  %vm2733_vm14 = vcmp.le.s32.totalorder %v20717_v38, 16  ;;  %v12221_v20 = vld [vmem:[%s20298_s4 + $0x1e0] sm:$0xff]   ;;  %5135 = vmatpush2.bf16.msra.mxu1 %v12232_v51 }
 0x2bf   :  { %3416 = vst [vmem:[#allocation2 + $0x70] sm:$0xf] %v3256_v14  ;;  %v3276_v44 = vsel %vm14972_vm2, %v3267_v9, %v3275_v24  ;;  %v3299_v52 = vshrl.u32 %v11657_v50, 16  ;;  %v3302_v45 = vshll.u32 %v11657_v50, 16  ;;  %v1931_v27 = vmul.f32 %v15323_v32, %v1878_v59  ;;  %v12233_v50 = vld [vmem:[%s20298_s4 + $0x160] sm:$0xff]   ;;  %5314 = vmatpush2.bf16.msra.mxu0 %v12221_v20  ;;  %5136 = vmatprep.subr.bf16.mxu1 %v20643_v35 }
 0x2c0   :  { %3418 = vst [vmem:[#allocation2 + $0x78] sm:$0xf] %v3276_v44  ;;  %v3279_v61 = vshrl.u32 %v11655_v17, 16  ;;  %v3282_v57 = vshll.u32 %v11655_v17, 16  ;;  %v1976_v41 = vadd.f32 %v15342_v19, %v1933_v48  ;;  %vm20726_vm9 = vcmp.ne.s32.totalorder %v15294_v12, 0  ;;  %v12226_v44 = vld [vmem:[%s20298_s4 + $0x1d8] sm:$0xff]   ;;  %5315 = vmatprep.subr.bf16.mxu0 %v20643_v35 }
 0x2c1   :  { %vm20727_vm6 = vcmp.lt.s32.totalorder %v15294_v12, 0  ;;  %v3297_v9 = vrot.slane %v15672_v26, 4  ;;  %v3301_v60 = vrot.slane %v3299_v52, 6  ;;  %v3304_v2 = vrot.slane %v3302_v45, 7 }
 0x2c2   :  { %vm2587_vm12 = vmand %vm20727_vm6, %vm20726_vm9  ;;  %v2623_v8 = vadd.s32 18, %v15294_v12  ;;  %v3281_v23 = vrot.slane %v3279_v61, 6  ;;  %v3284_v62 = vrot.slane %v3282_v57, 7  ;;  %v1974_v48 = vadd.f32 %v15342_v19, %v1931_v27  ;;  %v38_v57 = vld [vmem:[#allocation2 + $0x98] sm:$0xf]  ;;  %5137 = vmatpush2.bf16.msra.mxu1 %v12233_v50 }
 0x2c3   :  { %v15704_v59 = vshrl.u32 %v15462_v33, 16  ;;  %v15709_v29 = vor.u32 %v3304_v2, %v3301_v60  ;;  %v2012_v14 = vmax.f32 %v1976_v41, 0.0  ;;  %v15713_v18 = vshll.u32 %v15510_v34, 16  ;;  %vm15723_vm9 = vmand %vm2697_vm8, %vm2733_vm14  ;;  %v11853_v2 = vpop.f32.mrf.mxu0  ;;  %5316 = vmatpush2.bf16.msra.mxu0 %v12226_v44  ;;  %5138 = vmatprep.subr.bf16.mxu1 %v20643_v35 }
 0x2c4   :  { %v2659_v17 = vsel %vm2587_vm12, %v2623_v8, %v15294_v12  ;;  %v3277_v51 = vrot.slane %v3275_v24, 4  ;;  %v3285_v52 = vor.u32 %v3284_v62, %v3281_v23  ;;  %v20728_v45 = vmov 0  ;;  %v12230_v62 = vld [vmem:[%s20298_s4 + $0x1d0] sm:$0xff]   ;;  %5317 = vmatprep.subr.bf16.mxu0 %v20643_v35 }
 0x2c5   :  { %v20729_v45 = vsel %vm15723_vm9, 4294967295, %v20728_v45  ;;  %v2010_v12 = vmax.f32 %v1974_v48, 0.0  ;;  %vm2695_vm6 = vcmp.ge.s32.totalorder %v2659_v17, 1  ;;  %v3306_v20 = vsel %vm14972_vm2, %v3297_v9, %v15709_v29  ;;  %v12235_v48 = vld [vmem:[%s20298_s4 + $0x158] sm:$0xff]  }
 0x2c6   :  { %20730 = vst [vmem:[#allocation6_spill] sm:$0xff] %v20729_v45  ;;  %vm2731_vm12 = vcmp.le.s32.totalorder %v2659_v17, 16  ;;  %v20731_v24 = vrot.slane %v15544_v22, 1  ;;  %vm35_vm7 = vcmask 1043456   ;;  %3421 = vst [vmem:[#allocation2 + $0x84] sm:$0xf] %v3306_v20  ;;  %v3286_v38 = vsel %vm14972_vm2, %v3277_v51, %v3285_v52  ;;  %5139 = vmatpush2.bf16.msra.mxu1 %v12235_v48 }
 0x2c7   :  { %v3287_v41 = vrot.slane %v3285_v52, 4  ;;  %vm15736_vm8 = vmand %vm2695_vm6, %vm2731_vm12  ;;  %v20732_v27 = vmov 0  ;;  %v3635_v60 = vrot.slane %v15713_v18, 1  ;;  %v20355_v9 = vrot.slane %v15700_v30, 1  ;;  %3419 = vst [vmem:[#allocation2 + $0x7c] sm:$0xf] %v3286_v38  ;;  %5318 = vmatpush2.bf16.msra.mxu0 %v12230_v62  ;;  %5140 = vmatprep.subr.bf16.mxu1 %v20643_v35 }
 0x2c8   :  { %v3631_v61 = vor.u32 %v15704_v59, %v20731_v24  ;;  %v20733_v27 = vsel %vm15736_vm8, 4294967295, %v20732_v27  ;;  %v2877_v8 = vsel %vm15723_vm9, %v2012_v14, 0.0  ;;  %v2875_v23 = vsel %vm15736_vm8, %v2010_v12, 0.0  ;;  %v15771_v38 = vld [vmem:[#allocation2 + $0x38] sm:$0xff]   ;;  %5319 = vmatprep.subr.bf16.mxu0 %v20643_v35 }
 0x2c9   :  { %20734 = vst [vmem:[#allocation36_spill] sm:$0xff] %v20733_v27  ;;  %vm36_vm14 = vsmask.f32 7938  ;;  %v3296_v50 = vsel %vm14972_vm2, %v3287_v41, %v15672_v26  ;;  %v11658_v14 = vpack.c.bf16 %v2875_v23, %v2875_v23  ;;  %vm20735_vm6 = vsmask.f32 7424  ;;  %v20738_v26 = vld [vmem:[#allocation41_spill] sm:$0xff] }
 0x2ca   :  { %v3636_v17 = vsel %vm20735_vm6, %v3631_v61, %v3635_v60  ;;  %v20736_v44 = vrot.slane %v15510_v34, 1  ;;  %vm20737_vm12 = vcmask 1046528   ;;  %vm37_vm8 = vmand %vm35_vm7, %vm36_vm14  ;;  %3420 = vst [vmem:[#allocation2 + $0x80] sm:$0xf] %v3296_v50  ;;  %v1889_v12 = vadd.f32 %v11853_v2, %v20738_v26  ;;  %v15798_v26 = vld [vmem:[#allocation2 + $0x40] sm:$0xff]  }
 0x2cb   :  { %4824 = vmatprep.mubr.bf16.mxu1 %v3636_v17  ;;  %v39_v52 = vsel %vm37_vm8, 0, %v38_v57  ;;  %v3309_v20 = vshrl.u32 %v11658_v14, 16  ;;  %v3312_v24 = vshll.u32 %v11658_v14, 16  ;;  %v2086_v61 = vadd.s32 19, %v15216_v53  ;;  %v12234_v57 = vld [vmem:[%s20298_s4 + $0x1c8] sm:$0xff]   ;;  %v12236_v53 = vld [vmem:[%s20298_s4 + $0x150] sm:$0xff]   ;;  %v1880_v14 = vpop.f32.mrf.mxu0  ;;  %vm20741_vm7 = vmmov %vm20737_vm12 }
 0x2cc   :  { %v15762_v51 = vsel %vm20737_vm12, %v20736_v44, %v20355_v9  ;;  %40 = vst [vmem:[#allocation2 + $0x98] sm:$0xf] %v39_v52  ;;  %4825 = vmatmul.mubr.bf16.gmra.mxu1 %v15462_v33  ;;  %v15773_v41 = vpack.c.bf16 %v2877_v8, %v2877_v8  ;;  %v1934_v23 = vmul.f32 %v15323_v32, %v1889_v12  ;;  %v3307_v8 = vrot.slane %v15709_v29, 4  ;;  %vm20742_vm8 = vmmov %vm20735_vm6 }
 0x2cd   :  { %5001 = vmatprep.mubr.bf16.mxu0 %v15762_v51  ;;  %v3311_v2 = vrot.slane %v3309_v20, 6  ;;  %v3314_v33 = vrot.slane %v3312_v24, 7  ;;  %v2048_v62 = vadd.s32 264, %v13735_v15  ;;  %v15792_v48 = vshrl.u32 %v15510_v34, 16  ;;  %v20739_v20 = vld [vmem:[#allocation38_spill] sm:$0xff]  ;;  %5320 = vmatpush2.bf16.msra.mxu0 %v12234_v57  ;;  %vm20743_vm14 = vmmov %vm20741_vm7 }
 0x2ce   :  { %5002 = vmatmul.mubr.bf16.gmra.mxu0 %v15599_v49  ;;  %v15782_v50 = vmul.u32.u64.low 3817748708, %v2086_v61  ;;  %v15783_v49 = vmul.u32.u64.high 3817748708, %v2086_v61, %v15782_v50  ;;  %v15795_v44 = vshll.u32 %v15700_v30, 16  ;;  %v3771_v52 = vrot.slane %v15771_v38, 1  ;;  %5141 = vmatpush2.bf16.msra.mxu1 %v12236_v53  ;;  %v12238_v15 = vld [vmem:[%s20298_s4 + $0x1c0] sm:$0xff]   ;;  %v15974_v58 = vld [vmem:[#allocation2 + $0x78] sm:$0xff]  }
 0x2cf   :  { %v15789_v17 = vor.u32 %v3314_v33, %v3311_v2  ;;  %v3329_v12 = vshrl.u32 %v15773_v41, 16  ;;  %v1881_v24 = vadd.f32 %v1880_v14, %v20739_v20  ;;  %v2084_v50 = vadd.s32 19, %v2048_v62  ;;  %5321 = vmatprep.subr.bf16.mxu0 %v20643_v35  ;;  %5142 = vmatprep.subr.bf16.mxu1 %v20643_v35 }
 0x2d0   :  { %v1977_v2 = vadd.f32 %v15342_v19, %v1934_v23  ;;  %v2478_v33 = vshrl.u32 %v15783_v49, 4  ;;  %v3639_v9 = vor.u32 %v15792_v48, %v3635_v60  ;;  %v3643_v14 = vrot.slane %v15795_v44, 1 }
 0x2d1   :  { %v3316_v29 = vsel %vm14972_vm2, %v3307_v8, %v15789_v17  ;;  %v15813_v57 = vmul.u32.u64.low 3817748708, %v2084_v50  ;;  %v15814_v53 = vmul.u32.u64.high 3817748708, %v2084_v50, %v15813_v57  ;;  %v15818_v62 = vshrl.u32 %v15700_v30, 16  ;;  %5322 = vmatpush2.bf16.msra.mxu0 %v12238_v15 }
 0x2d2   :  { %3422 = vst [vmem:[#allocation2 + $0x88] sm:$0xf] %v3316_v29  ;;  %v2479_v8 = vmul.u32 18, %v2478_v33  ;;  %v20740_v23 = vrot.slane %v15700_v30, 1  ;;  %v15824_v60 = vshll.u32 %v15771_v38, 16  ;;  %v3773_v20 = vrot.slane %v15798_v26, 1  ;;  %6840 = vmatprep.subr.bf16.mxu0 %v20643_v35 }
 0x2d3   :  { %v12239_v29 = vld [vmem:[%s20298_s4 + $0x148] sm:$0xff]   ;;  %v3332_v57 = vshll.u32 %v15773_v41, 16  ;;  %v1932_v27 = vmul.f32 %v15323_v32, %v1881_v24  ;;  %v3644_v45 = vsel %vm20742_vm8, %v3639_v9, %v3643_v14  ;;  %v3647_v33 = vor.u32 %v15818_v62, %v3643_v14 }
 0x2d4   :  { %v3772_v49 = vsel %vm20741_vm7, %v20740_v23, %v3771_v52  ;;  %v2480_v23 = vsub.s32 %v2086_v61, %v2479_v8  ;;  %4832 = vmatprep.mubr.bf16.mxu1 %v3644_v45  ;;  %v3651_v25 = vrot.slane %v15824_v60, 1  ;;  %v15837_v16 = vsel %vm20743_vm14, %v3771_v52, %v3773_v20  ;;  %v15842_v41 = vld [vmem:[#allocation2 + $0x48] sm:$0xff]   ;;  %vm20744_vm7 = vmmov %vm20742_vm8  ;;  %5143 = vmatpush2.bf16.msra.mxu1 %v12239_v29  ;;  %v12242_v61 = vld [vmem:[%s20298_s4 + $0x140] sm:$0xff]  }
 0x2d5   :  { %5009 = vmatprep.mubr.bf16.mxu0 %v3772_v49  ;;  %v15840_v40 = vshll.u32 %v15798_v26, 16  ;;  %v3331_v32 = vrot.slane %v3329_v12, 6  ;;  %v2456_v9 = vshrl.u32 %v15814_v53, 4  ;;  %4833 = vmatmul.mubr.bf16.gmra.mxu1 %v15510_v34  ;;  %v3334_v52 = vrot.slane %v3332_v57, 7 }
 0x2d6   :  { %5010 = vmatmul.mubr.bf16.gmra.mxu0 %v15762_v51  ;;  %vm2518_vm6 = vcmp.ne.s32.totalorder %v2480_v23, 0  ;;  %vm2554_vm12 = vcmp.lt.s32.totalorder %v2480_v23, 0  ;;  %v2626_v45 = vadd.s32 18, %v2480_v23  ;;  %v3652_v51 = vsel %vm20744_vm7, %v3647_v33, %v3651_v25  ;;  %5144 = vmatprep.subr.bf16.mxu1 %v20643_v35 }
 0x2d7   :  { %5017 = vmatprep.mubr.bf16.mxu0 %v15837_v16  ;;  %v2013_v12 = vmax.f32 %v1977_v2, 0.0  ;;  %vm2590_vm8 = vmand %vm2554_vm12, %vm2518_vm6  ;;  %v2457_v24 = vmul.u32 18, %v2456_v9  ;;  %4840 = vmatprep.mubr.bf16.mxu1 %v3652_v51  ;;  %v15853_v34 = vshrl.u32 %v15771_v38, 16  ;;  %v1975_v53 = vadd.f32 %v15342_v19, %v1932_v27 }
 0x2d8   :  { %v2662_v15 = vsel %vm2590_vm8, %v2626_v45, %v2480_v23  ;;  %v3659_v14 = vrot.slane %v15840_v40, 1  ;;  %v3775_v8 = vrot.slane %v15842_v41, 1  ;;  %v20745_v57 = vmov 0  ;;  %5145 = vmatpush2.bf16.msra.mxu1 %v12242_v61 }
 0x2d9   :  { %vm2698_vm14 = vcmp.ge.s32.totalorder %v2662_v15, 1  ;;  %vm2734_vm7 = vcmp.le.s32.totalorder %v2662_v15, 16  ;;  %v2458_v29 = vsub.s32 %v2084_v50, %v2457_v24  ;;  %v3655_v2 = vor.u32 %v15853_v34, %v3651_v25  ;;  %v15867_v25 = vld [vmem:[#allocation2 + $0x50] sm:$0xff]  }
 0x2da   :  { %vm15860_vm6 = vmand %vm2698_vm14, %vm2734_vm7  ;;  %v3335_v27 = vor.u32 %v3334_v52, %v3331_v32  ;;  %v2011_v9 = vmax.f32 %v1975_v53, 0.0  ;;  %vm20748_vm13 = vcmask 1046528   ;;  %vm3427_vm14 = vsmask.f32 256  ;;  %v3429_v53 = vld [vmem:[#allocation2 + $0x98] sm:$0x1] }
 0x2db   :  { %v20746_v57 = vsel %vm15860_vm6, 4294967295, %v20745_v57  ;;  %v2878_v33 = vsel %vm15860_vm6, %v2013_v12, 0.0  ;;  %vm2516_vm8 = vcmp.ne.s32.totalorder %v2458_v29, 0  ;;  %vm2552_vm9 = vcmp.lt.s32.totalorder %v2458_v29, 0 }
 0x2dc   :  { %20747 = vst [vmem:[#allocation34_spill] sm:$0xff] %v20746_v57  ;;  %v2624_v19 = vadd.s32 18, %v2458_v29  ;;  %v11661_v23 = vpack.c.bf16 %v2878_v33, %v2878_v33  ;;  %vm2588_vm5 = vmand %vm2552_vm9, %vm2516_vm8  ;;  %v3776_v50 = vsel %vm20748_vm13, %v3773_v20, %v3775_v8  ;;  %vm20749_vm7 = vsmask.f32 7424  ;;  %v15898_v57 = vld [vmem:[#allocation2 + $0x58] sm:$0xff]  }
 0x2dd   :  { %4841 = vmatmul.mubr.bf16.gmra.mxu1 %v15700_v30  ;;  %v3660_v51 = vsel %vm20749_vm7, %v3655_v2, %v3659_v14  ;;  %v15872_v61 = vshll.u32 %v15842_v41, 16  ;;  %v3777_v24 = vrot.slane %v15867_v25, 1  ;;  %vm20753_vm13 = vcmask 1040384  }
 0x2de   :  { %5018 = vmatmul.mubr.bf16.gmra.mxu0 %v3772_v49  ;;  %v2660_v45 = vsel %vm2588_vm5, %v2624_v19, %v2458_v29  ;;  %v3339_v12 = vshrl.u32 %v11661_v23, 16  ;;  %v3342_v32 = vshll.u32 %v11661_v23, 16  ;;  %4848 = vmatprep.mubr.bf16.mxu1 %v3660_v51  ;;  %v20750_v49 = vmov 0  ;;  %vm15883_vm5 = vmand %vm20753_vm13, %vm3427_vm14 }
 0x2df   :  { %5025 = vmatprep.mubr.bf16.mxu0 %v3776_v50  ;;  %vm2696_vm12 = vcmp.ge.s32.totalorder %v2660_v45, 1  ;;  %vm2732_vm6 = vcmp.le.s32.totalorder %v2660_v45, 16  ;;  %v20754_v15 = vmov 0  ;;  %v15888_v2 = vshrl.u32 %v15798_v26, 16  ;;  %vm20760_vm14 = vmmov %vm20749_vm7 }
 0x2e0   :  { %vm15874_vm9 = vmand %vm2696_vm12, %vm2732_vm6  ;;  %v3341_v20 = vrot.slane %v3339_v12, 6  ;;  %v3344_v52 = vrot.slane %v3342_v32, 7  ;;  %v20755_v15 = vsel %vm15883_vm5, 4294967295, %v20754_v15  ;;  %v3667_v33 = vrot.slane %v15872_v61, 1 }
 0x2e1   :  { %v20751_v49 = vsel %vm15874_vm9, 4294967295, %v20750_v49  ;;  %v2876_v30 = vsel %vm15874_vm9, %v2011_v9, 0.0  ;;  %20756 = vst [vmem:[#allocation39_spill] sm:$0xff] %v20755_v15  ;;  %v3337_v19 = vrot.slane %v3335_v27, 4  ;;  %v3663_v12 = vor.u32 %v15888_v2, %v3659_v14  ;;  %vm20758_vm12 = vmmov %vm20749_vm7 }
 0x2e2   :  { %20752 = vst [vmem:[#allocation4_spill] sm:$0xff] %v20751_v49  ;;  %v11659_v29 = vpack.c.bf16 %v2876_v30, %v2876_v30  ;;  %v3345_v23 = vor.u32 %v3344_v52, %v3341_v20  ;;  %v3347_v45 = vrot.slane %v3341_v20, 4  ;;  %vm20757_vm6 = vcmask 1046528  }
 0x2e3   :  { %v3778_v30 = vsel %vm20757_vm6, %v3775_v8, %v3777_v24  ;;  %v3668_v14 = vsel %vm20758_vm12, %v3663_v12, %v3667_v33  ;;  %v15907_v8 = vshrl.u32 %v15842_v41, 16  ;;  %v3834_v12 = vshll.u32 %v15260_v7, 16  ;;  %vm20759_vm8 = vmmov %vm20757_vm6 }
 0x2e4   :  { %v3319_v51 = vshrl.u32 %v11659_v29, 16  ;;  %v3322_v9 = vshll.u32 %v11659_v29, 16  ;;  %v3346_v32 = vsel %vm14972_vm2, %v3337_v19, %v3345_v23  ;;  %v3430_v49 = vsel %vm15883_vm5, %v3347_v45, %v3429_v53  ;;  %vm20762_vm13 = vmmov %vm20757_vm6 }
 0x2e5   :  { %3425 = vst [vmem:[#allocation2 + $0x94] sm:$0xf] %v3346_v32  ;;  %3431 = vst [vmem:[#allocation2 + $0x98] sm:$0x1] %v3430_v49  ;;  %4849 = vmatmul.mubr.bf16.gmra.mxu1 %v15771_v38  ;;  %v15903_v29 = vshll.u32 %v15867_v25, 16  ;;  %v3317_v53 = vrot.slane %v15789_v17, 4  ;;  %v3671_v45 = vor.u32 %v15907_v8, %v3667_v33 }
 0x2e6   :  { %5026 = vmatmul.mubr.bf16.gmra.mxu0 %v15837_v16  ;;  %v3321_v52 = vrot.slane %v3319_v51, 6  ;;  %v3324_v20 = vrot.slane %v3322_v9, 7  ;;  %4856 = vmatprep.mubr.bf16.mxu1 %v3668_v14  ;;  %v3779_v19 = vrot.slane %v15898_v57, 1  ;;  %v3831_v9 = vshrl.u32 %v15260_v7, 16  ;;  %vm20763_vm6 = vmmov %vm20758_vm12 }
 0x2e7   :  { %5033 = vmatprep.mubr.bf16.mxu0 %v3778_v30  ;;  %v3675_v51 = vrot.slane %v15903_v29, 1  ;;  %vm3829_vm7 = vsmask.f32 6400  ;;  %vm20764_vm12 = vmmov %vm20763_vm6  ;;  %v3846_v10 = vrot.slane %v15704_v59, 1  ;;  %v3847_v47 = vrot.slane %v15544_v22, 2 }
 0x2e8   :  { %v3325_v16 = vor.u32 %v3324_v20, %v3321_v52  ;;  %v3780_v32 = vsel %vm20759_vm8, %v3777_v24, %v3779_v19  ;;  %v15920_v52 = vshll.u32 %v15898_v57, 16  ;;  %v15922_v20 = vld [vmem:[#allocation2 + $0x60] sm:$0xff]   ;;  %v3833_v14 = vrot.slane %v3831_v9, 1  ;;  %v15931_v24 = vld [vmem:[#allocation2 + $0x68] sm:$0xff]  }
 0x2e9   :  { %v3676_v33 = vsel %vm20760_vm14, %v3671_v45, %v3675_v51  ;;  %20761 = vst [vmem:[#allocation37_spill] sm:$0xff] %v15931_v24  ;;  %v15940_v45 = vld [vmem:[#allocation2 + $0x70] sm:$0xff]   ;;  %v3783_v15 = vrot.slane %v15931_v24, 1  ;;  %vm20766_vm14 = vmmov %vm20759_vm8  ;;  %v16021_v36 = vshll.u32 %v15974_v58, 16  ;;  %v16085_v3 = vshrl.u32 %v15974_v58, 16 }
 0x2ea   :  { %v3326_v49 = vsel %vm14972_vm2, %v3317_v53, %v3325_v16  ;;  %v3327_v23 = vrot.slane %v3325_v16, 4  ;;  %v3683_v7 = vrot.slane %v15920_v52, 1  ;;  %v3836_v53 = vrot.slane %v3834_v12, 2 }
 0x2eb   :  { %3423 = vst [vmem:[#allocation2 + $0x8c] sm:$0xf] %v3326_v49  ;;  %v15934_v16 = vshrl.u32 %v15867_v25, 16  ;;  %v15937_v49 = vshrl.u32 %v15898_v57, 16  ;;  %v20765_v63 = vrot.slane %v15940_v45, 1  ;;  %v4074_v55 = vrot.slane %v16021_v36, 3 }
 0x2ec   :  { %v3336_v17 = vsel %vm14972_vm2, %v3327_v23, %v3335_v27  ;;  %v3781_v27 = vrot.slane %v15922_v20, 1  ;;  %v3837_v9 = vor.u32 %v3836_v53, %v3833_v14  ;;  %v4030_v14 = vrot.slane %v15544_v22, 3 }
 0x2ed   :  { %3424 = vst [vmem:[#allocation2 + $0x90] sm:$0xf] %v3336_v17  ;;  %4857 = vmatmul.mubr.bf16.gmra.mxu1 %v15798_v26  ;;  %v3679_v23 = vor.u32 %v15934_v16, %v3675_v51  ;;  %v15952_v51 = vshll.u32 %v15931_v24, 16  ;;  %v15961_v53 = vshrl.u32 %v15922_v20, 16  ;;  %v15983_v54 = vsel %vm20766_vm14, %v3783_v15, %v20765_v63 }
 0x2ee   :  { %5034 = vmatmul.mubr.bf16.gmra.mxu0 %v3776_v50  ;;  %4864 = vmatprep.mubr.bf16.mxu1 %v3676_v33  ;;  %v15929_v50 = vshll.u32 %v15922_v20, 16  ;;  %v15943_v17 = vsel %vm20762_vm13, %v3779_v19, %v3781_v27  ;;  %v3687_v33 = vor.u32 %v15937_v49, %v3683_v7  ;;  %v4029_v19 = vrot.slane %v15704_v59, 2 }
 0x2ef   :  { %5041 = vmatprep.mubr.bf16.mxu0 %v3780_v32  ;;  %v3684_v46 = vsel %vm20763_vm6, %v3679_v23, %v3683_v7  ;;  %v4033_v7 = vrot.slane %v15792_v48, 2  ;;  %v15967_v56 = vsel %vm20759_vm8, %v3781_v27, %v3783_v15  ;;  %v3699_v1 = vrot.slane %v15952_v51, 1 }
 0x2f0   :  { %v3691_v12 = vrot.slane %v15929_v50, 1  ;;  %v15976_v6 = vor.u32 %v4030_v14, %v4029_v19  ;;  %v4038_v27 = vrot.slane %v15795_v44, 3  ;;  %vm4016_vm13 = vsmask.f32 5376 }
 0x2f1   :  { %v3851_v59 = vrot.slane %v15713_v18, 2  ;;  %v15988_v22 = vshrl.u32 %v15931_v24, 16  ;;  %v15997_v63 = vor.u32 %v3847_v47, %v3846_v10  ;;  %v3854_v15 = vrot.slane %v15818_v62, 1 }
 0x2f2   :  { %v3692_v23 = vsel %vm20764_vm12, %v3687_v33, %v3691_v12  ;;  %v4037_v33 = vrot.slane %v15818_v62, 2  ;;  %v4046_v62 = vrot.slane %v15840_v40, 3  ;;  %vm20769_vm12 = vmmov %vm20759_vm8  ;;  %v4061_v43 = vrot.slane %v15961_v53, 2 }
 0x2f3   :  { %v4062_v42 = vrot.slane %v15929_v50, 3  ;;  %vm20770_vm8 = vmmov %vm20763_vm6 }
 0x2f4   :  { %v4039_v14 = vor.u32 %v4038_v27, %v4037_v33  ;;  %v3855_v27 = vrot.slane %v15795_v44, 2  ;;  %vm20776_vm14 = vmmov %vm20769_vm12 }
 0x2f5   :  { %4865 = vmatmul.mubr.bf16.gmra.mxu1 %v15842_v41 }
 0x2f6   :  { %5042 = vmatmul.mubr.bf16.gmra.mxu0 %v3778_v30  ;;  %v15956_v30 = vsel %vm3829_vm7, %v3837_v9, %v15439_v39  ;;  %4872 = vmatprep.mubr.bf16.mxu1 %v3684_v46  ;;  %v4034_v9 = vrot.slane %v15713_v18, 3  ;;  %v3695_v46 = vor.u32 %v15961_v53, %v3691_v12  ;;  %v3850_v12 = vrot.slane %v15792_v48, 1 }
 0x2f7   :  { %5049 = vmatprep.mubr.bf16.mxu0 %v15943_v17  ;;  %v4042_v18 = vrot.slane %v15824_v60, 3 }
 0x2f8   :  { %v4035_v5 = vor.u32 %v4034_v9, %v4033_v7  ;;  %v4041_v7 = vrot.slane %v15853_v34, 2  ;;  %v3852_v48 = vor.u32 %v3851_v59, %v3850_v12  ;;  %v4045_v12 = vrot.slane %v15888_v2, 2 }
 0x2f9   :  { %v3856_v59 = vor.u32 %v3855_v27, %v3854_v15  ;;  %v3858_v9 = vrot.slane %v15853_v34, 1  ;;  %v4050_v15 = vrot.slane %v15872_v61, 3  ;;  %v3862_v34 = vrot.slane %v15888_v2, 1 }
 0x2fa   :  { %v15992_v19 = vsel %vm4016_vm13, %v15976_v6, %v4035_v5  ;;  %v16006_v33 = vsel %vm4016_vm13, %v4035_v5, %v4039_v14  ;;  %v16011_v47 = vsel %vm3829_vm7, %v15997_v63, %v3852_v48  ;;  %v4043_v10 = vor.u32 %v4042_v18, %v4041_v7  ;;  %v16027_v18 = vld [vmem:[#allocation2 + $0x80] sm:$0xff]  }
 0x2fb   :  { %v3859_v5 = vrot.slane %v15824_v60, 2  ;;  %v4047_v28 = vor.u32 %v4046_v62, %v4045_v12  ;;  %v4049_v7 = vrot.slane %v15907_v8, 2  ;;  %v16030_v13 = vsel %vm3829_vm7, %v3852_v48, %v3856_v59 }
 0x2fc   :  { %v16024_v44 = vsel %vm4016_vm13, %v4039_v14, %v4043_v10  ;;  %v3700_v60 = vsel %vm20763_vm6, %v3695_v46, %v3699_v1  ;;  %v3703_v27 = vor.u32 %v15988_v22, %v3699_v1  ;;  %v3863_v12 = vrot.slane %v15840_v40, 2 }
 0x2fd   :  { %4873 = vmatmul.mubr.bf16.gmra.mxu1 %v15867_v25  ;;  %v3860_v0 = vor.u32 %v3859_v5, %v3858_v9  ;;  %v16037_v14 = vsel %vm4016_vm13, %v4043_v10, %v4047_v28  ;;  %v4051_v48 = vor.u32 %v4050_v15, %v4049_v7  ;;  %v4053_v9 = vrot.slane %v15934_v16, 2 }
 0x2fe   :  { %5050 = vmatmul.mubr.bf16.gmra.mxu0 %v3780_v32  ;;  %4880 = vmatprep.mubr.bf16.mxu1 %v3692_v23  ;;  %v16002_v32 = vshll.u32 %v15940_v45, 16  ;;  %v16016_v23 = vshrl.u32 %v15940_v45, 16  ;;  %v4054_v5 = vrot.slane %v15903_v29, 3  ;;  %v3864_v2 = vor.u32 %v3863_v12, %v3862_v34 }
 0x2ff   :  { %5057 = vmatprep.mubr.bf16.mxu0 %v15967_v56  ;;  %v16042_v62 = vsel %vm3829_vm7, %v3856_v59, %v3860_v0  ;;  %v3866_v46 = vrot.slane %v15907_v8, 1  ;;  %v3867_v40 = vrot.slane %v15872_v61, 2  ;;  %v16058_v59 = vsel %vm4016_vm13, %v4047_v28, %v4051_v48 }
 0x300   :  { %v3707_v1 = vrot.slane %v16002_v32, 1  ;;  %v4055_v7 = vor.u32 %v4054_v5, %v4053_v9  ;;  %v4057_v15 = vrot.slane %v15937_v49, 2  ;;  %v16062_v34 = vsel %vm3829_vm7, %v3860_v0, %v3864_v2  ;;  %v3468_v5 = vld [vmem:[#allocation2 + $0x8c] sm:$0xf] }
 0x301   :  { %v3868_v8 = vor.u32 %v3867_v40, %v3866_v46  ;;  %v4058_v61 = vrot.slane %v15920_v52, 3  ;;  %v3870_v12 = vrot.slane %v15934_v16, 1  ;;  %v20768_v10 = vrot.slane %v15940_v45, 1 }
 0x302   :  { %v16076_v0 = vsel %vm4016_vm13, %v4051_v48, %v4055_v7  ;;  %v3871_v46 = vrot.slane %v15903_v29, 2  ;;  %v3874_v9 = vrot.slane %v15937_v49, 1  ;;  %v3875_v48 = vrot.slane %v15920_v52, 2 }
 0x303   :  { %v16080_v40 = vsel %vm3829_vm7, %v3864_v2, %v3868_v8  ;;  %v4059_v16 = vor.u32 %v4058_v61, %v4057_v15  ;;  %v4063_v15 = vor.u32 %v4062_v42, %v4061_v43  ;;  %v4065_v61 = vrot.slane %v15988_v22, 2 }
 0x304   :  { %v3876_v21 = vor.u32 %v3875_v48, %v3874_v9  ;;  %v3878_v49 = vrot.slane %v15961_v53, 1  ;;  %v3708_v52 = vsel %vm20770_vm8, %v3703_v27, %v3707_v1  ;;  %v16108_v42 = vshll.u32 %v16027_v18, 16  ;;  %vm20781_vm8 = vmmov %vm20763_vm6 }
 0x305   :  { %4881 = vmatmul.mubr.bf16.gmra.mxu1 %v15898_v57  ;;  %v16095_v2 = vsel %vm4016_vm13, %v4055_v7, %v4059_v16  ;;  %v16111_v43 = vsel %vm4016_vm13, %v4059_v16, %v4063_v15  ;;  %v4069_v53 = vrot.slane %v16016_v23, 2  ;;  %v4070_v9 = vrot.slane %v16002_v32, 3 }
 0x306   :  { %5058 = vmatmul.mubr.bf16.gmra.mxu0 %v15943_v17  ;;  %v16054_v17 = vld [vmem:[%s20298_s4 + $0x238] sm:$0xff]   ;;  %4888 = vmatprep.mubr.bf16.mxu1 %v3700_v60  ;;  %v20767_v60 = vrot.slane %v15974_v58, 1  ;;  %v3725_v27 = vshrl.u32 %v16027_v18, 16  ;;  %v3883_v48 = vrot.slane %v15952_v51, 2 }
 0x307   :  { %5065 = vmatprep.mubr.bf16.mxu0 %v15983_v54  ;;  %11854 = vmatprep.subr.bf16.mxu1 %v16054_v17 }
 0x308   :  { %v16072_v28 = vsel %vm20769_vm12, %v20768_v10, %v20767_v60  ;;  %v16087_v10 = vld [vmem:[#allocation2 + $0x88] sm:$0xf]  ;;  %v3872_v60 = vor.u32 %v3871_v46, %v3870_v12  ;;  %v4066_v12 = vrot.slane %v15952_v51, 3  ;;  %v3882_v46 = vrot.slane %v15988_v22, 1 }
 0x309   :  { %v16092_v29 = vcombine.low %v16087_v10, %v3468_v5  ;;  %v3711_v22 = vor.u32 %v16016_v23, %v3707_v1 }
 0x30a   :  { %v16100_v4 = vsel %vm3829_vm7, %v3868_v8, %v3872_v60  ;;  %v16115_v7 = vsel %vm3829_vm7, %v3872_v60, %v3876_v21  ;;  %v4067_v8 = vor.u32 %v4066_v12, %v4065_v61  ;;  %v4071_v60 = vor.u32 %v4070_v9, %v4069_v53 }
 0x30b   :  { %v16123_v16 = vshrl.u32 %v16092_v29, 16  ;;  %v4073_v61 = vrot.slane %v16085_v3, 2  ;;  %v3729_v51 = vshll.u32 %v16092_v29, 16 }
 0x30d   :  { %4889 = vmatmul.mubr.bf16.gmra.mxu1 %v15922_v20  ;;  %v4075_v9 = vor.u32 %v4074_v55, %v4073_v61  ;;  %v20777_v55 = vrot.slane %v16021_v36, 1 }
 0x30e   :  { %5066 = vmatmul.mubr.bf16.gmra.mxu0 %v15967_v56  ;;  %v3879_v56 = vrot.slane %v15929_v50, 2  ;;  %4896 = vmatprep.mubr.bf16.mxu1 %v3708_v52  ;;  %v16126_v50 = vsel %vm4016_vm13, %v4063_v15, %v4067_v8  ;;  %v3884_v52 = vor.u32 %v3883_v48, %v3882_v46  ;;  %v3887_v15 = vrot.slane %v16002_v32, 2 }
 0x30f   :  { %5073 = vmatprep.mubr.bf16.mxu0 %v16072_v28  ;;  %v4078_v46 = vrot.slane %v16108_v42, 3  ;;  %v20774_v48 = vrot.slane %v16027_v18, 1  ;;  %v3891_v32 = vrot.slane %v16021_v36, 2 }
 0x310   :  { %v3880_v5 = vor.u32 %v3879_v56, %v3878_v49  ;;  %v3886_v49 = vrot.slane %v16016_v23, 1  ;;  %v16137_v56 = vsel %vm4016_vm13, %v4067_v8, %v4071_v60  ;;  %v20775_v23 = vrot.slane %v15974_v58, 1 }
 0x311   :  { %20772 = vst [vmem:[#allocation38_spill] sm:$0xff] %v16137_v56  ;;  %v3890_v8 = vrot.slane %v16085_v3, 1 }
 0x312   :  { %v16130_v12 = vsel %vm3829_vm7, %v3876_v21, %v3880_v5  ;;  %v16141_v53 = vsel %vm3829_vm7, %v3880_v5, %v3884_v52  ;;  %v4077_v21 = vrot.slane %v3725_v27, 2  ;;  %v3790_v1 = vsel %vm20776_vm14, %v20775_v23, %v20774_v48  ;;  %vm20783_vm14 = vmmov %vm20769_vm12 }
 0x313   :  { %20771 = vst [vmem:[#allocation41_spill] sm:$0xff] %v16130_v12  ;;  %20773 = vst [vmem:[#allocation45_spill] sm:$0xff] %v16141_v53  ;;  %v3888_v12 = vor.u32 %v3887_v15, %v3886_v49  ;;  %v3716_v5 = vsel %vm20763_vm6, %v3711_v22, %v20777_v55  ;;  %v4081_v53 = vrot.slane %v16123_v16, 2  ;;  %v3892_v15 = vor.u32 %v3891_v32, %v3890_v8 }
 0x314   :  { %v4079_v61 = vor.u32 %v4078_v46, %v4077_v21  ;;  %v4082_v48 = vrot.slane %v3729_v51, 3  ;;  %v3894_v23 = vrot.slane %v3725_v27, 1  ;;  %v20778_v22 = vmov %v20777_v55 }
 0x315   :  { %4897 = vmatmul.mubr.bf16.gmra.mxu1 %v15931_v24  ;;  %v16161_v49 = vsel %vm3829_vm7, %v3884_v52, %v3888_v12  ;;  %v3895_v24 = vrot.slane %v16108_v42, 2  ;;  %v3791_v21 = vrot.slane %v16092_v29, 1  ;;  %v16172_v46 = vsel %vm3829_vm7, %v3888_v12, %v3892_v15 }
 0x316   :  { %5074 = vmatmul.mubr.bf16.gmra.mxu0 %v15983_v54  ;;  %v16157_v54 = vsel %vm4016_vm13, %v4071_v60, %v4075_v9  ;;  %4904 = vmatprep.mubr.bf16.mxu1 %v3716_v5  ;;  %v16164_v56 = vsel %vm4016_vm13, %v4075_v9, %v4079_v61  ;;  %v3719_v60 = vor.u32 %v16085_v3, %v20778_v22  ;;  %v3723_v52 = vrot.slane %v16108_v42, 1  ;;  %v16191_v42 = vld [vmem:[#allocation2 + $0x90] sm:$0xff]  }
 0x317   :  { %5081 = vmatprep.mubr.bf16.mxu0 %v3790_v1  ;;  %v16174_v55 = vor.u32 %v4082_v48, %v4081_v53  ;;  %v3896_v8 = vor.u32 %v3895_v24, %v3894_v23  ;;  %v3898_v32 = vrot.slane %v16123_v16, 1  ;;  %v3899_v9 = vrot.slane %v3729_v51, 2  ;;  %v3475_v23 = vld [vmem:[#allocation2 + $0x10] sm:$0xc] }
 0x318   :  { %v20780_v12 = vrot.slane %v16027_v18, 1  ;;  %v3724_v24 = vsel %vm20781_vm8, %v3719_v60, %v3723_v52  ;;  %v3731_v48 = vrot.slane %v3729_v51, 1  ;;  %v16203_v60 = vld [vmem:[#allocation2 + $0x14] sm:$0xf]  ;;  %vm4128_vm8 = vcmask 1044480  }
 0x319   :  { %v16180_v5 = vsel %vm4016_vm13, %v4079_v61, %v16174_v55  ;;  %v16183_v36 = vsel %vm3829_vm7, %v3892_v15, %v3896_v8  ;;  %v16185_v3 = vor.u32 %v3899_v9, %v3898_v32  ;;  %v3821_v15 = vrot.slane %v16191_v42, 1  ;;  %20784 = vst [vmem:[#allocation48_spill] sm:$0xff] %v16203_v60 }
 0x31a   :  { %v3792_v53 = vsel %vm20769_vm12, %v20780_v12, %v3791_v21  ;;  %v3735_v51 = vor.u32 %v16123_v16, %v3731_v48  ;;  %vm3937_vm12 = vcmask 1045504  }
 0x31b   :  { %20779 = vst [vmem:[#allocation46_spill] sm:$0xff] %v16185_v3  ;;  %v16197_v61 = vsel %vm3829_vm7, %v3896_v8, %v16185_v3  ;;  %v3822_v22 = vsel %vm20783_vm14, %v3791_v21, %v3821_v15  ;;  %v11004_v8 = vcombine.low %v3475_v23, %v16203_v60  ;;  %v3467_v3 = vld [vmem:[#allocation2 + $0x8c] sm:$0x7]  ;;  %v3939_v60 = vrot.slane %v15244_v37, 2  ;;  %v12243_v37 = vld [vmem:[%s20296_s1 + $0x38] sm:$0xff]  }
 0x31c   :  { %20782 = vst [vmem:[#allocation47_spill] sm:$0xff] %v16197_v61  ;;  %v10997_v16 = vcombine.low %v16087_v10, %v3467_v3  ;;  %v3842_v3 = vrot.slane %v15541_v11, 1 }
 0x31d   :  { %4905 = vmatmul.mubr.bf16.gmra.mxu1 %v15940_v45  ;;  %v4018_v9 = vshrl.u32 %v11004_v8, 16  ;;  %v4021_v12 = vshll.u32 %v11004_v8, 16 }
 0x31e   :  { %5082 = vmatmul.mubr.bf16.gmra.mxu0 %v16072_v28  ;;  %4912 = vmatprep.mubr.bf16.mxu1 %v3724_v24  ;;  %v3727_v28 = vor.u32 %v3725_v27, %v3723_v52  ;;  %v4025_v27 = vrot.slane %v15541_v11, 2  ;;  %v3474_v52 = vld [vmem:[#allocation2 + $0x8] sm:$0xc] }
 0x31f   :  { %5089 = vmatprep.mubr.bf16.mxu0 %v3792_v53  ;;  %v4020_v24 = vrot.slane %v4018_v9, 2  ;;  %v16214_v9 = vld [vmem:[#allocation2 + $0x18] sm:$0xff]  }
 0x320   :  { %v3732_v32 = vsel %vm20763_vm6, %v3727_v28, %v3731_v48  ;;  %v4023_v28 = vrot.slane %v4021_v12, 3  ;;  %v3941_v12 = vrot.slane %v16214_v9, 2 }
 0x325   :  { %4913 = vmatmul.mubr.bf16.gmra.mxu1 %v15974_v58 }
 0x326   :  { %5090 = vmatmul.mubr.bf16.gmra.mxu0 %v3790_v1  ;;  %4920 = vmatprep.mubr.bf16.mxu1 %v3732_v32  ;;  %v4026_v1 = vrot.slane %v15402_v31, 3 }
 0x327   :  { %5097 = vmatprep.mubr.bf16.mxu0 %v3822_v22  ;;  %v12432_v22 = vld [vmem:[#allocation2 + $0xc] sm:$0xf] }
 0x328   :  { %v11003_v32 = vcombine.low %v3474_v52, %v12432_v22  ;;  %v4027_v23 = vor.u32 %v4026_v1, %v4025_v27  ;;  %v12254_v27 = vld [vmem:[%s20298_s4 + $0x230] sm:$0xff]   ;;  %v16255_v22 = vld [vmem:[#allocation2 + $0x28] sm:$0xff]  }
 0x329   :  { %v12244_v1 = vld [vmem:[%s20296_s1 + $0x30] sm:$0xff]  }
 0x32a   :  { %v3938_v48 = vrot.slane %v11003_v32, 2  ;;  %v3945_v32 = vrot.slane %v16255_v22, 2 }
 0x32d   :  { %4921 = vmatmul.mubr.bf16.gmra.mxu1 %v16027_v18 }
 0x32e   :  { %5098 = vmatmul.mubr.bf16.gmra.mxu0 %v3792_v53  ;;  %4928 = vmatprep.mubr.bf16.mxu1 %v3735_v51  ;;  %v4024_v53 = vor.u32 %v4023_v28, %v4020_v24  ;;  %v4004_v51 = vrot.slane %v11004_v8, 2  ;;  %v3942_v8 = vsel %vm3937_vm12, %v3939_v60, %v3941_v12  ;;  %v12246_v28 = vld [vmem:[%s20296_s1 + $0x20] sm:$0xff]  }
 0x32f   :  { %5105 = vmatprep.mubr.bf16.mxu0 %v3821_v15  ;;  %v3940_v15 = vsel %vm3937_vm12, %v3938_v48, %v3939_v60  ;;  %v12245_v60 = vld [vmem:[%s20296_s1 + $0x28] sm:$0xff]   ;;  %v12248_v48 = vld [vmem:[%s20296_s1 + $0x10] sm:$0xff]  }
 0x330   :  { %v4028_v61 = vsel %vm4016_vm13, %v4024_v53, %v4027_v23  ;;  %v4005_v10 = vsel %vm3937_vm12, %v4004_v51, %v3941_v12 }
 0x335   :  { %4929 = vmatmul.mubr.bf16.gmra.mxu1 %v10997_v16  ;;  %v12266_v16 = vld [vmem:[%s20298_s4 + $0x210] sm:$0xff]  }
 0x336   :  { %5106 = vmatmul.mubr.bf16.gmra.mxu0 %v3791_v21  ;;  %5146 = vmatprep.mubr.bf16.mxu1 %v3940_v15  ;;  %v4032_v21 = vsel %vm4016_vm13, %v4027_v23, %v15976_v6  ;;  %v16233_v6 = vld [vmem:[#allocation2 + $0x20] sm:$0xff]   ;;  %v16276_v15 = vld [vmem:[#allocation2 + $0x30] sm:$0xff]  }
 0x337   :  { %5323 = vmatprep.mubr.bf16.mxu0 %v4028_v61  ;;  %v3843_v61 = vrot.slane %v15402_v31, 2  ;;  %v3943_v11 = vrot.slane %v16233_v6, 2 }
 0x339   :  { %v3844_v31 = vor.u32 %v3843_v61, %v3842_v3  ;;  %v3944_v52 = vsel %vm3937_vm12, %v3941_v12, %v3943_v11  ;;  %v3946_v23 = vsel %vm3937_vm12, %v3943_v11, %v3945_v32  ;;  %v3947_v12 = vrot.slane %v16276_v15, 2  ;;  %v12250_v3 = vld [vmem:[%s20296_s1] sm:$0xff]   ;;  %v12252_v11 = vld [vmem:[%s20296_s1 + $0x78] sm:$0xff]  }
 0x33a   :  { %v3949_v61 = vrot.slane %v15771_v38, 2 }
 0x33b   :  { %v3845_v24 = vsel %vm3829_vm7, %v15439_v39, %v3844_v31  ;;  %v12263_v39 = vld [vmem:[%s20298_s4 + $0x218] sm:$0xff]   ;;  %v3849_v53 = vsel %vm3829_vm7, %v3844_v31, %v15997_v63  ;;  %v12268_v63 = vld [vmem:[%s20298_s4 + $0x208] sm:$0xff]   ;;  %v3948_v51 = vsel %vm3937_vm12, %v3945_v32, %v3947_v12 }
 0x33c   :  { %v3950_v31 = vsel %vm3937_vm12, %v3947_v12, %v3949_v61 }
 0x33d   :  { %5147 = vmatmul.mubr.bf16.vlgmr.msra.gmra.mxu1 %v15956_v30  ;;  %v12257_v30 = vld [vmem:[%s20298_s4 + $0x228] sm:$0xff]  }
 0x33e   :  { %5324 = vmatmul.mubr.bf16.vlgmr.msra.gmra.mxu0 %v4005_v10  ;;  %5154 = vmatprep.mubr.bf16.mxu1 %v3942_v8 }
 0x33f   :  { %5331 = vmatprep.mubr.bf16.mxu0 %v4032_v21  ;;  %6841 = vmatpush1.bf16.msra.mxu0 %v12243_v37  ;;  %v12271_v37 = vld [vmem:[%s20298_s4 + $0x200] sm:$0xff]  }
 0x340   :  { %6842 = vmatprep.subr.bf16.mxu0 %v20643_v35  ;;  %11855 = vmatpush3.bf16.msra.mxu1 %v16054_v17  ;;  %v12261_v17 = vld [vmem:[%s20298_s4 + $0x220] sm:$0xff]  }
 0x341   :  { %11856 = vmatprep.subr.bf16.mxu1 %v12254_v27 }
 0x343   :  { %6843 = vmatpush1.bf16.msra.mxu0 %v12244_v1 }
 0x344   :  { %6844 = vmatprep.subr.bf16.mxu0 %v20643_v35  ;;  %11857 = vmatpush3.bf16.msra.mxu1 %v12254_v27 }
 0x345   :  { %11858 = vmatprep.subr.bf16.mxu1 %v12257_v30  ;;  %5155 = vmatmul.mubr.bf16.gmra.mxu1 %v3845_v24 }
 0x346   :  { %5332 = vmatmul.mubr.bf16.gmra.mxu0 %v3944_v52  ;;  %5162 = vmatprep.mubr.bf16.mxu1 %v3944_v52 }
 0x347   :  { %5339 = vmatprep.mubr.bf16.mxu0 %v15992_v19  ;;  %6845 = vmatpush1.bf16.msra.mxu0 %v12245_v60  ;;  %v12247_v19 = vld [vmem:[%s20296_s1 + $0x18] sm:$0xff]   ;;  %v4794_v10 = vpop.f32.mrf.mxu1 }
 0x348   :  { %6846 = vmatprep.subr.bf16.mxu0 %v20643_v35  ;;  %11859 = vmatpush3.bf16.msra.mxu1 %v12257_v30  ;;  %v4971_v21 = vpop.f32.mrf.mxu0 }
 0x349   :  { %11860 = vmatprep.subr.bf16.mxu1 %v12261_v17  ;;  %v16297_v27 = vadd.f32 %v4971_v21, %v4794_v10  ;;  %v4796_v8 = vpop.f32.mrf.mxu1 }
 0x34a   :  { %v4973_v1 = vpop.f32.mrf.mxu0  ;;  %v3955_v8 = vrot.slane %v15867_v25, 2 }
 0x34b   :  { %6847 = vmatpush1.bf16.msra.mxu0 %v12246_v28  ;;  %v3951_v28 = vrot.slane %v15798_v26, 2 }
 0x34c   :  { %6848 = vmatprep.subr.bf16.mxu0 %v20643_v35  ;;  %11861 = vmatpush3.bf16.msra.mxu1 %v12261_v17  ;;  %v12253_v17 = vld [vmem:[%s20296_s1 + $0x70] sm:$0xff]  }
 0x34d   :  { %11862 = vmatprep.subr.bf16.mxu1 %v12263_v39  ;;  %5163 = vmatmul.mubr.bf16.gmra.mxu1 %v3849_v53  ;;  %v3952_v53 = vsel %vm3937_vm12, %v3949_v61, %v3951_v28  ;;  %v12259_v61 = vld [vmem:[%s20296_s1 + $0x50] sm:$0xff]  }
 0x34e   :  { %5340 = vmatmul.mubr.bf16.gmra.mxu0 %v3946_v23  ;;  %5170 = vmatprep.mubr.bf16.mxu1 %v3946_v23 }
 0x34f   :  { %5347 = vmatprep.mubr.bf16.mxu0 %v16006_v33  ;;  %6849 = vmatpush1.bf16.msra.mxu0 %v12247_v19  ;;  %v12249_v33 = vld [vmem:[%s20296_s1 + $0x8] sm:$0xff]  }
 0x350   :  { %6850 = vmatprep.subr.bf16.mxu0 %v20643_v35  ;;  %11863 = vmatpush3.bf16.msra.mxu1 %v12263_v39 }
 0x351   :  { %11864 = vmatprep.subr.bf16.mxu1 %v12266_v16 }
 0x353   :  { %6851 = vmatpush1.bf16.msra.mxu0 %v12248_v48 }
 0x354   :  { %6852 = vmatprep.subr.bf16.mxu0 %v20643_v35  ;;  %11865 = vmatpush3.bf16.msra.mxu1 %v12266_v16 }
 0x355   :  { %11866 = vmatprep.subr.bf16.mxu1 %v12268_v63  ;;  %5171 = vmatmul.mubr.bf16.gmra.mxu1 %v16011_v47  ;;  %v4797_v47 = vpop.f32.mrf.mxu1 }
 0x356   :  { %5348 = vmatmul.mubr.bf16.gmra.mxu0 %v3948_v51  ;;  %5178 = vmatprep.mubr.bf16.mxu1 %v3948_v51 }
 0x357   :  { %5355 = vmatprep.mubr.bf16.mxu0 %v16024_v44  ;;  %6853 = vmatpush1.bf16.msra.mxu0 %v12249_v33  ;;  %v4974_v44 = vpop.f32.mrf.mxu0  ;;  %v4799_v38 = vpop.f32.mrf.mxu1  ;;  %v3953_v33 = vrot.slane %v15842_v41, 2 }
 0x358   :  { %6854 = vmatprep.subr.bf16.mxu0 %v20643_v35  ;;  %11867 = vmatpush3.bf16.msra.mxu1 %v12268_v63  ;;  %v16304_v30 = vadd.f32 %v4974_v44, %v4797_v47  ;;  %v12256_v63 = vld [vmem:[%s20296_s1 + $0x60] sm:$0xff]  }
 0x359   :  { %11868 = vmatprep.subr.bf16.mxu1 %v12271_v37  ;;  %v4976_v60 = vpop.f32.mrf.mxu0  ;;  %v4802_v52 = vpop.f32.mrf.mxu1 }
 0x35a   :  { %v12269_v60 = vld [vmem:[%s20296_s1 + $0x40] sm:$0xff]  }
 0x35b   :  { %6855 = vmatpush1.bf16.msra.mxu0 %v12250_v3  ;;  %v4979_v24 = vpop.f32.mrf.mxu0  ;;  %v4804_v39 = vpop.f32.mrf.mxu1 }
 0x35c   :  { %6856 = vmatprep.subr.bf16.mxu0 %v20643_v35  ;;  %11869 = vmatpush3.bf16.msra.mxu1 %v12271_v37  ;;  %v16314_v32 = vadd.f32 %v4979_v24, %v4802_v52  ;;  %v3957_v52 = vrot.slane %v15898_v57, 2  ;;  %v3959_v57 = vrot.slane %v15922_v20, 2  ;;  %v20786_v20 = vld [vmem:[#allocation41_spill] sm:$0xff] }
 0x35d   :  { %7017 = vmatprep.subr.bf16.mxu1 %v20643_v35  ;;  %5179 = vmatmul.mubr.bf16.gmra.mxu1 %v16030_v13  ;;  %v4981_v19 = vpop.f32.mrf.mxu0  ;;  %v4805_v23 = vpop.f32.mrf.mxu1 }
 0x35e   :  { %5356 = vmatmul.mubr.bf16.gmra.mxu0 %v3950_v31  ;;  %5186 = vmatprep.mubr.bf16.mxu1 %v3950_v31  ;;  %v3958_v39 = vsel %vm3937_vm12, %v3955_v8, %v3957_v52 }
 0x35f   :  { %5363 = vmatprep.mubr.bf16.mxu0 %v16037_v14  ;;  %6857 = vmatpush2.bf16.msra.mxu0 %v12252_v11  ;;  %v4982_v13 = vpop.f32.mrf.mxu0  ;;  %v12255_v14 = vld [vmem:[%s20296_s1 + $0x68] sm:$0xff]   ;;  %v4807_v48 = vpop.f32.mrf.mxu1 }
 0x360   :  { %6858 = vmatprep.subr.bf16.mxu0 %v20643_v35  ;;  %v16321_v16 = vadd.f32 %v4982_v13, %v4805_v23  ;;  %v3960_v23 = vsel %vm3937_vm12, %v3957_v52, %v3959_v57  ;;  %v20785_v13 = vld [vmem:[#allocation37_spill] sm:$0xff] }
 0x361   :  { %v4984_v26 = vpop.f32.mrf.mxu0  ;;  %v4810_v12 = vpop.f32.mrf.mxu1 }
 0x363   :  { %6859 = vmatpush2.bf16.msra.mxu0 %v12253_v17  ;;  %v4812_v51 = vpop.f32.mrf.mxu1 }
 0x364   :  { %6860 = vmatprep.subr.bf16.mxu0 %v20643_v35  ;;  %v3963_v51 = vrot.slane %v15940_v45, 2 }
 0x365   :  { %5187 = vmatmul.mubr.bf16.gmra.mxu1 %v16042_v62  ;;  %v4813_v37 = vpop.f32.mrf.mxu1  ;;  %v12258_v62 = vld [vmem:[%s20296_s1 + $0x58] sm:$0xff]  }
 0x366   :  { %5364 = vmatmul.mubr.bf16.gmra.mxu0 %v3952_v53  ;;  %5194 = vmatprep.mubr.bf16.mxu1 %v3952_v53  ;;  %v4987_v10 = vpop.f32.mrf.mxu0 }
 0x367   :  { %5371 = vmatprep.mubr.bf16.mxu0 %v16058_v59  ;;  %6861 = vmatpush2.bf16.msra.mxu0 %v12255_v14  ;;  %v3954_v59 = vsel %vm3937_vm12, %v3951_v28, %v3953_v33  ;;  %v4815_v21 = vpop.f32.mrf.mxu1  ;;  %v16338_v41 = vadd.f32 %v4987_v10, %v4810_v12  ;;  %v3961_v14 = vrot.slane %v20785_v13, 2 }
 0x368   :  { %6862 = vmatprep.subr.bf16.mxu0 %v20643_v35  ;;  %v4989_v3 = vpop.f32.mrf.mxu0 }
 0x369   :  { %v20788_v3 = vld [vmem:[#allocation45_spill] sm:$0xff] }
 0x36a   :  { %v4990_v1 = vpop.f32.mrf.mxu0 }
 0x36b   :  { %6863 = vmatpush2.bf16.msra.mxu0 %v12256_v63  ;;  %v16345_v47 = vadd.f32 %v4990_v1, %v4813_v37  ;;  %v20787_v63 = vld [vmem:[#allocation38_spill] sm:$0xff] }
 0x36c   :  { %6864 = vmatprep.subr.bf16.mxu0 %v20643_v35  ;;  %v4992_v44 = vpop.f32.mrf.mxu0 }
 0x36d   :  { %5195 = vmatmul.mubr.bf16.gmra.mxu1 %v16062_v34  ;;  %v12262_v34 = vld [vmem:[%s20296_s1 + $0x48] sm:$0xff]   ;;  %v3965_v44 = vrot.slane %v15974_v58, 2 }
 0x36e   :  { %5372 = vmatmul.mubr.bf16.gmra.mxu0 %v3954_v59  ;;  %5202 = vmatprep.mubr.bf16.mxu1 %v3954_v59  ;;  %v3964_v59 = vsel %vm3937_vm12, %v3961_v14, %v3963_v51 }
 0x36f   :  { %5379 = vmatprep.mubr.bf16.mxu0 %v16076_v0  ;;  %6865 = vmatpush2.bf16.msra.mxu0 %v12258_v62  ;;  %v3956_v0 = vsel %vm3937_vm12, %v3953_v33, %v3955_v8 }
 0x370   :  { %6866 = vmatprep.subr.bf16.mxu0 %v20643_v35 }
 0x372   :  { %v4995_v11 = vpop.f32.mrf.mxu0 }
 0x373   :  { %6867 = vmatpush2.bf16.msra.mxu0 %v12259_v61  ;;  %v4818_v25 = vpop.f32.mrf.mxu1 }
 0x374   :  { %6868 = vmatprep.subr.bf16.mxu0 %v20643_v35  ;;  %v16354_v31 = vadd.f32 %v4995_v11, %v4818_v25  ;;  %v4997_v38 = vpop.f32.mrf.mxu0 }
 0x375   :  { %5203 = vmatmul.mubr.bf16.gmra.mxu1 %v16080_v40  ;;  %v4820_v24 = vpop.f32.mrf.mxu1  ;;  %v3966_v38 = vsel %vm3937_vm12, %v3963_v51, %v3965_v44 }
 0x376   :  { %5380 = vmatmul.mubr.bf16.gmra.mxu0 %v3956_v0  ;;  %5210 = vmatprep.mubr.bf16.mxu1 %v3956_v0  ;;  %v4998_v17 = vpop.f32.mrf.mxu0 }
 0x377   :  { %5387 = vmatprep.mubr.bf16.mxu0 %v16095_v2  ;;  %6869 = vmatpush2.bf16.msra.mxu0 %v12262_v34  ;;  %v4821_v28 = vpop.f32.mrf.mxu1 }
 0x378   :  { %6870 = vmatprep.subr.bf16.mxu0 %v20643_v35  ;;  %v16361_v40 = vadd.f32 %v4998_v17, %v4821_v28  ;;  %v5000_v2 = vpop.f32.mrf.mxu0  ;;  %v3967_v17 = vrot.slane %v16027_v18, 2 }
 0x379   :  { %v4823_v19 = vpop.f32.mrf.mxu1  ;;  %v3903_v2 = vshrl.u32 %v16191_v42, 16 }
 0x37b   :  { %6871 = vmatpush2.bf16.msra.mxu0 %v12269_v60 }
 0x37c   :  { %7194 = vmatprep.subr.bf16.mxu0 %v20643_v35 }
 0x37d   :  { %5211 = vmatmul.mubr.bf16.gmra.mxu1 %v16100_v4  ;;  %v3962_v4 = vsel %vm3937_vm12, %v3959_v57, %v3961_v14  ;;  %v4085_v14 = vrot.slane %v3903_v2, 2 }
 0x37e   :  { %5388 = vmatmul.mubr.bf16.gmra.mxu0 %v3958_v39  ;;  %5218 = vmatprep.mubr.bf16.mxu1 %v3958_v39  ;;  %v3906_v39 = vshll.u32 %v16191_v42, 16 }
 0x37f   :  { %5395 = vmatprep.mubr.bf16.mxu0 %v16111_v43 }
 0x385   :  { %5219 = vmatmul.mubr.bf16.gmra.mxu1 %v16115_v7 }
 0x386   :  { %5396 = vmatmul.mubr.bf16.gmra.mxu0 %v3960_v23  ;;  %5226 = vmatprep.mubr.bf16.mxu1 %v3960_v23 }
 0x387   :  { %5403 = vmatprep.mubr.bf16.mxu0 %v16126_v50 }
 0x38c   :  { %v4826_v53 = vpop.f32.mrf.mxu1 }
 0x38d   :  { %5227 = vmatmul.mubr.bf16.gmra.mxu1 %v20786_v20  ;;  %v3969_v20 = vrot.slane %v16092_v29, 2 }
 0x38e   :  { %v5003_v48 = vpop.f32.mrf.mxu0  ;;  %5404 = vmatmul.mubr.bf16.gmra.mxu0 %v3962_v4  ;;  %v4828_v43 = vpop.f32.mrf.mxu1  ;;  %5234 = vmatprep.mubr.bf16.mxu1 %v3962_v4 }
 0x38f   :  { %v16372_v26 = vadd.f32 %v5003_v48, %v4826_v53  ;;  %5411 = vmatprep.mubr.bf16.mxu0 %v20787_v63  ;;  %v4086_v53 = vrot.slane %v3906_v39, 3  ;;  %v16403_v43 = vld [vmem:[#allocation2 + $0x98] sm:$0xff]  }
 0x390   :  { %v5005_v12 = vpop.f32.mrf.mxu0  ;;  %v4829_v7 = vpop.f32.mrf.mxu1 }
 0x392   :  { %v5006_v33 = vpop.f32.mrf.mxu0  ;;  %v4831_v37 = vpop.f32.mrf.mxu1 }
 0x393   :  { %v16377_v50 = vadd.f32 %v5006_v33, %v4829_v7  ;;  %v4087_v7 = vor.u32 %v4086_v53, %v4085_v14  ;;  %v20789_v53 = vld [vmem:[#allocation47_spill] sm:$0xff] }
 0x394   :  { %v5008_v62 = vpop.f32.mrf.mxu0 }
 0x395   :  { %v4834_v21 = vpop.f32.mrf.mxu1  ;;  %5235 = vmatmul.mubr.bf16.gmra.mxu1 %v20788_v3  ;;  %v4090_v62 = vshrl.u32 %v16403_v43, 16  ;;  %v16413_v3 = vld [vmem:[#allocation2 + $0xa0] ss:$0 sps:$4 sm:$0x33]  }
 0x396   :  { %v5011_v10 = vpop.f32.mrf.mxu0  ;;  %5412 = vmatmul.mubr.bf16.gmra.mxu0 %v3964_v59  ;;  %5242 = vmatprep.mubr.bf16.mxu1 %v3964_v59  ;;  %v3970_v59 = vsel %vm3937_vm12, %v3967_v17, %v3969_v20 }
 0x397   :  { %5419 = vmatprep.mubr.bf16.mxu0 %v16157_v54  ;;  %v16383_v61 = vadd.f32 %v5011_v10, %v4834_v21  ;;  %v4836_v1 = vpop.f32.mrf.mxu1  ;;  %v4088_v21 = vsel %vm4016_vm13, %v16174_v55, %v4087_v7  ;;  %v4102_v55 = vshll.u32 %v16413_v3, 16 }
 0x398   :  { %v5013_v8 = vpop.f32.mrf.mxu0 }
 0x399   :  { %v4837_v45 = vpop.f32.mrf.mxu1 }
 0x39a   :  { %v5014_v34 = vpop.f32.mrf.mxu0 }
 0x39b   :  { %v16386_v0 = vadd.f32 %v5014_v34, %v4837_v45  ;;  %v4839_v25 = vpop.f32.mrf.mxu1  ;;  %v4092_v34 = vrot.slane %v4090_v62, 2  ;;  %v4006_v62 = vrot.slane %v16403_v43, 2 }
 0x39c   :  { %v5016_v11 = vpop.f32.mrf.mxu0  ;;  %v3971_v25 = vrot.slane %v16191_v42, 2 }
 0x39d   :  { %v4842_v52 = vpop.f32.mrf.mxu1  ;;  %5243 = vmatmul.mubr.bf16.gmra.mxu1 %v16161_v49  ;;  %v3968_v49 = vsel %vm3937_vm12, %v3965_v44, %v3967_v17 }
 0x39e   :  { %v5019_v60 = vpop.f32.mrf.mxu0  ;;  %5420 = vmatmul.mubr.bf16.gmra.mxu0 %v3966_v38  ;;  %5250 = vmatprep.mubr.bf16.mxu1 %v3966_v38 }
 0x39f   :  { %5427 = vmatprep.mubr.bf16.mxu0 %v16164_v56  ;;  %v16391_v54 = vadd.f32 %v5019_v60, %v4842_v52  ;;  %v4844_v58 = vpop.f32.mrf.mxu1  ;;  %v4099_v60 = vshrl.u32 %v16413_v3, 16 }
 0x3a0   :  { %v5021_v24 = vpop.f32.mrf.mxu0 }
 0x3a1   :  { %v4845_v19 = vpop.f32.mrf.mxu1  ;;  %v4101_v42 = vrot.slane %v4099_v60, 2 }
 0x3a2   :  { %v5022_v28 = vpop.f32.mrf.mxu0 }
 0x3a3   :  { %v16396_v57 = vadd.f32 %v5022_v28, %v4845_v19  ;;  %v4847_v13 = vpop.f32.mrf.mxu1  ;;  %v3972_v28 = vsel %vm3937_vm12, %v3969_v20, %v3971_v25  ;;  %v3905_v19 = vrot.slane %v3903_v2, 1 }
 0x3a4   :  { %v5024_v23 = vpop.f32.mrf.mxu0 }
 0x3a5   :  { %v4850_v48 = vpop.f32.mrf.mxu1  ;;  %5251 = vmatmul.mubr.bf16.gmra.mxu1 %v16172_v46  ;;  %v4093_v46 = vshll.u32 %v16403_v43, 16 }
 0x3a6   :  { %v5027_v56 = vpop.f32.mrf.mxu0  ;;  %5428 = vmatmul.mubr.bf16.gmra.mxu0 %v3968_v49  ;;  %5258 = vmatprep.mubr.bf16.mxu1 %v3968_v49  ;;  %v3908_v49 = vrot.slane %v3906_v39, 2 }
 0x3a7   :  { %5435 = vmatprep.mubr.bf16.mxu0 %v16180_v5  ;;  %v16401_v18 = vadd.f32 %v5027_v56, %v4850_v48  ;;  %v4852_v12 = vpop.f32.mrf.mxu1  ;;  %v4095_v45 = vrot.slane %v4093_v46, 3  ;;  %v4104_v56 = vrot.slane %v4102_v55, 3 }
 0x3a8   :  { %v5029_v4 = vpop.f32.mrf.mxu0  ;;  %v3909_v20 = vor.u32 %v3908_v49, %v3905_v19  ;;  %v20791_v19 = vld [vmem:[#allocation48_spill] sm:$0xff]  ;;  %v4130_v49 = vrot.slane %v16214_v9, 3 }
 0x3a9   :  { %v4853_v33 = vpop.f32.mrf.mxu1  ;;  %v4105_v2 = vor.u32 %v4104_v56, %v4101_v42  ;;  %v11083_v9 = vld [vmem:[%s20297_s0 + $0x148] sm:$0xff] }
 0x3aa   :  { %v5030_v63 = vpop.f32.mrf.mxu0 }
 0x3ab   :  { %v16406_v51 = vadd.f32 %v5030_v63, %v4853_v33  ;;  %v4855_v5 = vpop.f32.mrf.mxu1  ;;  %v12264_v63 = vld [vmem:[#allocation2 + $0x98] ss:$0 sps:$4 sm:$0x11]  }
 0x3ac   :  { %v5032_v37 = vpop.f32.mrf.mxu0  ;;  %v4007_v5 = vsel %vm3937_vm12, %v3971_v25, %v4006_v62 }
 0x3ad   :  { %v4858_v8 = vpop.f32.mrf.mxu1  ;;  %5259 = vmatmul.mubr.bf16.gmra.mxu1 %v16183_v36  ;;  %v4096_v36 = vor.u32 %v4095_v45, %v4092_v34  ;;  %v3480_v45 = vld [vmem:[#allocation2 + $0x10] sm:$0x8] }
 0x3ae   :  { %v5035_v10 = vpop.f32.mrf.mxu0  ;;  %5436 = vmatmul.mubr.bf16.gmra.mxu0 %v3970_v59  ;;  %5266 = vmatprep.mubr.bf16.mxu1 %v3970_v59  ;;  %v3973_v59 = vrot.slane %v12264_v63, 2 }
 0x3af   :  { %5443 = vmatprep.mubr.bf16.mxu0 %v4088_v21  ;;  %v16416_v1 = vadd.f32 %v5035_v10, %v4858_v8  ;;  %v4860_v11 = vpop.f32.mrf.mxu1  ;;  %v4097_v13 = vsel %vm4016_vm13, %v4087_v7, %v4096_v36  ;;  %v12267_v10 = vld [vmem:[#allocation2 + $0xa0] ss:$0 sps:$4 sm:$0x11]   ;;  %v4106_v34 = vsel %vm4016_vm13, %v4096_v36, %v4105_v2 }
 0x3b0   :  { %v5037_v44 = vpop.f32.mrf.mxu0  ;;  %v20790_v8 = vld [vmem:[#allocation46_spill] sm:$0xff] }
 0x3b1   :  { %v4861_v52 = vpop.f32.mrf.mxu1  ;;  %v3910_v44 = vsel %vm3829_vm7, %v20790_v8, %v3909_v20  ;;  %v4132_v8 = vrot.slane %v16233_v6, 3 }
 0x3b2   :  { %v5038_v38 = vpop.f32.mrf.mxu0 }
 0x3b3   :  { %v16421_v24 = vadd.f32 %v5038_v38, %v4861_v52  ;;  %v4863_v17 = vpop.f32.mrf.mxu1  ;;  %v3974_v38 = vsel %vm3937_vm12, %v3971_v25, %v3973_v59  ;;  %v3912_v52 = vshll.u32 %v12264_v63, 16  ;;  %v4133_v6 = vsel %vm4128_vm8, %v4130_v49, %v4132_v8 }
 0x3b4   :  { %v5040_v58 = vpop.f32.mrf.mxu0  ;;  %v11120_v17 = vld [vmem:[%s20297_s0 + $0x151] sm:$0xff] }
 0x3b5   :  { %v4866_v14 = vpop.f32.mrf.mxu1  ;;  %5267 = vmatmul.mubr.bf16.gmra.mxu1 %v20789_v53  ;;  %v11119_v58 = vld [vmem:[%s20297_s0 + $0x149] sm:$0xff]  ;;  %v3914_v53 = vrot.slane %v3912_v52, 2 }
 0x3b6   :  { %v5043_v23 = vpop.f32.mrf.mxu0  ;;  %5444 = vmatmul.mubr.bf16.gmra.mxu0 %v3972_v28  ;;  %5274 = vmatprep.mubr.bf16.mxu1 %v3972_v28  ;;  %v4008_v28 = vrot.slane %v12267_v10, 2  ;;  %v5966_v42 = vpack.c.bf16 %v11120_v17, %v11119_v58  ;;  %v11122_v10 = vld [vmem:[%s20297_s0 + $0x161] sm:$0xff]  ;;  %v12273_v17 = vld [vmem:[%s20296_s1 + $0xb8] sm:$0xff]  }
 0x3b7   :  { %5451 = vmatprep.mubr.bf16.mxu0 %v4097_v13  ;;  %v16426_v48 = vadd.f32 %v5043_v23, %v4866_v14  ;;  %v4868_v12 = vpop.f32.mrf.mxu1  ;;  %v11008_v23 = vcombine.low %v3480_v45, %v20791_v19  ;;  %v3915_v2 = vsel %vm3829_vm7, %v3909_v20, %v3914_v53  ;;  %v11121_v20 = vld [vmem:[%s20297_s0 + $0x159] sm:$0xff]  ;;  %v4134_v45 = vrot.slane %v16255_v22, 3 }
 0x3b8   :  { %v5045_v4 = vpop.f32.mrf.mxu0  ;;  %v4009_v12 = vsel %vm3937_vm12, %v4006_v62, %v4008_v28  ;;  %v5967_v52 = vpack.c.bf16 %v11122_v10, %v11121_v20  ;;  %v11085_v19 = vld [vmem:[%s20297_s0 + $0x158] sm:$0xff] }
 0x3b9   :  { %v4869_v37 = vpop.f32.mrf.mxu1  ;;  %v4129_v63 = vrot.slane %v11008_v23, 3  ;;  %v4135_v22 = vsel %vm4128_vm8, %v4132_v8, %v4134_v45  ;;  %v11086_v23 = vld [vmem:[%s20297_s0 + $0x160] sm:$0xff] }
 0x3ba   :  { %v5046_v33 = vpop.f32.mrf.mxu0 }
 0x3bb   :  { %v16429_v7 = vadd.f32 %v5046_v33, %v4869_v37  ;;  %v4871_v46 = vpop.f32.mrf.mxu1 }
 0x3bc   :  { %v5048_v39 = vpop.f32.mrf.mxu0  ;;  %v11084_v46 = vld [vmem:[%s20297_s0 + $0x150] sm:$0xff] }
 0x3bd   :  { %v4874_v11 = vpop.f32.mrf.mxu1  ;;  %5275 = vmatmul.mubr.bf16.gmra.mxu1 %v3910_v44  ;;  %v4131_v39 = vsel %vm4128_vm8, %v4129_v63, %v4130_v49  ;;  %v5912_v44 = vpack.c.bf16 %v11084_v46, %v11083_v9  ;;  %v4136_v63 = vrot.slane %v16276_v15, 3  ;;  %v12276_v15 = vld [vmem:[%s20296_s1 + $0xa8] sm:$0xff]  }
 0x3be   :  { %v5051_v21 = vpop.f32.mrf.mxu0  ;;  %5452 = vmatmul.mubr.bf16.gmra.mxu0 %v4007_v5  ;;  %5282 = vmatprep.mubr.bf16.mxu1 %v3974_v38 }
 0x3bf   :  { %5459 = vmatprep.mubr.bf16.mxu0 %v4106_v34  ;;  %v16436_v60 = vadd.f32 %v5051_v21, %v4874_v11  ;;  %v4876_v36 = vpop.f32.mrf.mxu1  ;;  %v12272_v11 = vld [vmem:[%s20296_s1 + $0x138] sm:$0xff]  }
 0x3c0   :  { %v5053_v55 = vpop.f32.mrf.mxu0 }
 0x3c1   :  { %v4877_v25 = vpop.f32.mrf.mxu1 }
 0x3c2   :  { %v5054_v13 = vpop.f32.mrf.mxu0 }
 0x3c3   :  { %v16446_v56 = vadd.f32 %v5054_v13, %v4877_v25  ;;  %v4879_v4 = vpop.f32.mrf.mxu1  ;;  %v12274_v13 = vld [vmem:[%s20296_s1 + $0x130] sm:$0xff]  }
 0x3c4   :  { %v5056_v14 = vpop.f32.mrf.mxu0  ;;  %v12275_v4 = vld [vmem:[%s20296_s1 + $0xb0] sm:$0xff]  }
 0x3c5   :  { %v4882_v37 = vpop.f32.mrf.mxu1  ;;  %5283 = vmatmul.mubr.bf16.gmra.mxu1 %v3915_v2  ;;  %v11124_v14 = vld [vmem:[%s20297_s0 + $0x171] sm:$0xff] }
 0x3c6   :  { %v5059_v33 = vpop.f32.mrf.mxu0  ;;  %5460 = vmatmul.mubr.bf16.gmra.mxu0 %v4009_v12  ;;  %11870 = vmatprep.mubr.bf16.mxu1 %v4131_v39 }
 0x3c7   :  { %6872 = vmatprep.mubr.bf16.mxu0 %v5966_v42  ;;  %v16457_v5 = vadd.f32 %v5059_v33, %v4882_v37  ;;  %v4884_v59 = vpop.f32.mrf.mxu1  ;;  %v11123_v42 = vld [vmem:[%s20297_s0 + $0x169] sm:$0xff]  ;;  %v5913_v33 = vpack.c.bf16 %v11086_v23, %v11085_v19  ;;  %v12437_v37 = vld [vmem:[#allocation2 + $0x38] sm:$0xff]  }
 0x3c8   :  { %v5061_v62 = vpop.f32.mrf.mxu0  ;;  %v4138_v39 = vrot.slane %v12437_v37, 3  ;;  %v5968_v9 = vpack.c.bf16 %v11124_v14, %v11123_v42  ;;  %v12277_v59 = vld [vmem:[%s20296_s1 + $0x128] sm:$0xff]  }
 0x3c9   :  { %v4885_v34 = vpop.f32.mrf.mxu1 }
 0x3ca   :  { %v5062_v21 = vpop.f32.mrf.mxu0 }
 0x3cb   :  { %v16470_v38 = vadd.f32 %v5062_v21, %v4885_v34  ;;  %v4887_v58 = vpop.f32.mrf.mxu1  ;;  %v4137_v21 = vsel %vm4128_vm8, %v4134_v45, %v4136_v63  ;;  %v11087_v34 = vld [vmem:[%s20297_s0 + $0x168] sm:$0xff] }
 0x3cc   :  { %v5064_v55 = vpop.f32.mrf.mxu0  ;;  %v11126_v58 = vld [vmem:[%s20297_s0 + $0x181] sm:$0xff] }
 0x3cd   :  { %v4890_v28 = vpop.f32.mrf.mxu1  ;;  %11871 = vmatmul.mubr.bf16.vlgmr.msra.gmra.mxu1 %v4133_v6  ;;  %v12278_v6 = vld [vmem:[%s20296_s1 + $0xa0] sm:$0xff]  }
 0x3ce   :  { %v5067_v36 = vpop.f32.mrf.mxu0  ;;  %6873 = vmatmul.mubr.bf16.vlgmr.msra.gmra.mxu0 %v5912_v44  ;;  %11874 = vmatprep.mubr.bf16.mxu1 %v4135_v22  ;;  %v4139_v44 = vsel %vm4128_vm8, %v4136_v63, %v4138_v39  ;;  %v12438_v22 = vld [vmem:[#allocation2 + $0x40] sm:$0xff]  }
 0x3cf   :  { %7195 = vmatpush1.bf16.msra.mxu0 %v12272_v11  ;;  %v16486_v25 = vadd.f32 %v5067_v36, %v4890_v28  ;;  %6880 = vmatprep.mubr.bf16.mxu0 %v5967_v52  ;;  %v4892_v53 = vpop.f32.mrf.mxu1  ;;  %v11088_v11 = vld [vmem:[%s20297_s0 + $0x170] sm:$0xff]  ;;  %v11125_v52 = vld [vmem:[%s20297_s0 + $0x179] sm:$0xff]  ;;  %v4140_v19 = vrot.slane %v12438_v22, 3 }
 0x3d0   :  { %v5069_v49 = vpop.f32.mrf.mxu0  ;;  %7018 = vmatpush1.bf16.msra.mxu1 %v12273_v17  ;;  %7196 = vmatprep.subr.bf16.mxu0 %v20643_v35  ;;  %v12280_v17 = vld [vmem:[%s20296_s1 + $0x120] sm:$0xff]   ;;  %v5914_v23 = vpack.c.bf16 %v11088_v11, %v11087_v34  ;;  %v5969_v14 = vpack.c.bf16 %v11126_v58, %v11125_v52  ;;  %v12281_v34 = vld [vmem:[%s20296_s1 + $0x90] sm:$0xff]  }
 0x3d1   :  { %7019 = vmatprep.subr.bf16.mxu1 %v20643_v35  ;;  %v4893_v2 = vpop.f32.mrf.mxu1  ;;  %v12439_v49 = vld [vmem:[#allocation2 + $0x48] sm:$0xff]   ;;  %v4141_v37 = vsel %vm4128_vm8, %v4138_v39, %v4140_v19 }
 0x3d2   :  { %v5070_v12 = vpop.f32.mrf.mxu0  ;;  %v4142_v42 = vrot.slane %v12439_v49, 3  ;;  %v12282_v49 = vld [vmem:[%s20296_s1 + $0x88] sm:$0xff]  }
 0x3d3   :  { %7197 = vmatpush1.bf16.msra.mxu0 %v12274_v13  ;;  %v16500_v46 = vadd.f32 %v5070_v12, %v4893_v2  ;;  %v4895_v20 = vpop.f32.mrf.mxu1  ;;  %v12284_v12 = vld [vmem:[%s20296_s1 + $0x118] sm:$0xff]  }
 0x3d4   :  { %v5072_v62 = vpop.f32.mrf.mxu0  ;;  %7198 = vmatprep.subr.bf16.mxu0 %v20643_v35  ;;  %7020 = vmatpush1.bf16.msra.mxu1 %v12275_v4  ;;  %v11090_v20 = vld [vmem:[%s20297_s0 + $0x180] sm:$0xff] }
 0x3d5   :  { %7021 = vmatprep.subr.bf16.mxu1 %v20643_v35  ;;  %v4898_v8 = vpop.f32.mrf.mxu1  ;;  %11875 = vmatmul.mubr.bf16.gmra.mxu1 %v4137_v21  ;;  %v4143_v62 = vsel %vm4128_vm8, %v4140_v19, %v4142_v42  ;;  %v11128_v21 = vld [vmem:[%s20297_s0 + $0x191] sm:$0xff] }
 0x3d6   :  { %v5075_v10 = vpop.f32.mrf.mxu0  ;;  %6881 = vmatmul.mubr.bf16.gmra.mxu0 %v5913_v33  ;;  %11878 = vmatprep.mubr.bf16.mxu1 %v4139_v44  ;;  %v12279_v33 = vld [vmem:[%s20296_s1 + $0x98] sm:$0xff]  }
 0x3d7   :  { %6888 = vmatprep.mubr.bf16.mxu0 %v5968_v9  ;;  %v16518_v55 = vadd.f32 %v5075_v10, %v4898_v8  ;;  %7199 = vmatpush1.bf16.msra.mxu0 %v12277_v59  ;;  %v4900_v36 = vpop.f32.mrf.mxu1  ;;  %v11089_v59 = vld [vmem:[%s20297_s0 + $0x178] sm:$0xff]  ;;  %v11127_v10 = vld [vmem:[%s20297_s0 + $0x189] sm:$0xff] }
 0x3d8   :  { %v5077_v45 = vpop.f32.mrf.mxu0  ;;  %7022 = vmatpush1.bf16.msra.mxu1 %v12276_v15  ;;  %7200 = vmatprep.subr.bf16.mxu0 %v20643_v35  ;;  %v12287_v8 = vld [vmem:[%s20296_s1 + $0x110] sm:$0xff]   ;;  %v5915_v58 = vpack.c.bf16 %v11090_v20, %v11089_v59  ;;  %v12441_v36 = vld [vmem:[#allocation2 + $0x58] sm:$0xff]   ;;  %v12293_v59 = vld [vmem:[%s20296_s1 + $0x100] sm:$0xff]  }
 0x3d9   :  { %7023 = vmatprep.subr.bf16.mxu1 %v20643_v35  ;;  %v4901_v13 = vpop.f32.mrf.mxu1  ;;  %v12440_v45 = vld [vmem:[#allocation2 + $0x50] sm:$0xff]  }
 0x3da   :  { %v5078_v28 = vpop.f32.mrf.mxu0  ;;  %v4144_v52 = vrot.slane %v12440_v45, 3 }
 0x3db   :  { %v16534_v53 = vadd.f32 %v5078_v28, %v4901_v13  ;;  %7201 = vmatpush1.bf16.msra.mxu0 %v12280_v17  ;;  %v4903_v63 = vpop.f32.mrf.mxu1  ;;  %v5970_v28 = vpack.c.bf16 %v11128_v21, %v11127_v10  ;;  %v12442_v21 = vld [vmem:[#allocation2 + $0x60] sm:$0xff]  }
 0x3dc   :  { %v5080_v4 = vpop.f32.mrf.mxu0  ;;  %7024 = vmatpush1.bf16.msra.mxu1 %v12278_v6  ;;  %7202 = vmatprep.subr.bf16.mxu0 %v20643_v35  ;;  %v4146_v6 = vrot.slane %v12441_v36, 3  ;;  %v12296_v36 = vld [vmem:[%s20296_s1 + $0x178] sm:$0xff]  }
 0x3dd   :  { %7025 = vmatprep.subr.bf16.mxu1 %v20643_v35  ;;  %v4906_v9 = vpop.f32.mrf.mxu1  ;;  %11879 = vmatmul.mubr.bf16.gmra.mxu1 %v4141_v37  ;;  %v4145_v4 = vsel %vm4128_vm8, %v4142_v42, %v4144_v52 }
 0x3de   :  { %v5083_v2 = vpop.f32.mrf.mxu0  ;;  %6889 = vmatmul.mubr.bf16.gmra.mxu0 %v5914_v23  ;;  %11882 = vmatprep.mubr.bf16.mxu1 %v4143_v62  ;;  %v12290_v23 = vld [vmem:[%s20296_s1 + $0x108] sm:$0xff]   ;;  %v4147_v63 = vsel %vm4128_vm8, %v4144_v52, %v4146_v6 }
 0x3df   :  { %6896 = vmatprep.mubr.bf16.mxu0 %v5969_v14  ;;  %v16552_v15 = vadd.f32 %v5083_v2, %v4906_v9  ;;  %7203 = vmatpush1.bf16.msra.mxu0 %v12284_v12  ;;  %v4908_v44 = vpop.f32.mrf.mxu1  ;;  %v11092_v2 = vld [vmem:[%s20297_s0 + $0x190] sm:$0xff]  ;;  %v11129_v9 = vld [vmem:[%s20297_s0 + $0x199] sm:$0xff]  ;;  %v11130_v62 = vld [vmem:[%s20297_s0 + $0x1a1] sm:$0xff] }
 0x3e0   :  { %v5085_v39 = vpop.f32.mrf.mxu0  ;;  %7026 = vmatpush1.bf16.msra.mxu1 %v12279_v33  ;;  %7204 = vmatprep.subr.bf16.mxu0 %v20643_v35  ;;  %v11091_v33 = vld [vmem:[%s20297_s0 + $0x188] sm:$0xff]  ;;  %v5971_v52 = vpack.c.bf16 %v11130_v62, %v11129_v9  ;;  %v12286_v62 = vld [vmem:[%s20296_s1 + $0xf0] sm:$0xff]  }
 0x3e1   :  { %7027 = vmatprep.subr.bf16.mxu1 %v20643_v35  ;;  %v4909_v17 = vpop.f32.mrf.mxu1  ;;  %v12283_v39 = vld [vmem:[%s20296_s1 + $0x80] sm:$0xff]   ;;  %v5916_v44 = vpack.c.bf16 %v11092_v2, %v11091_v33  ;;  %v11131_v33 = vld [vmem:[%s20297_s0 + $0x1a9] sm:$0xff]  ;;  %v11132_v2 = vld [vmem:[%s20297_s0 + $0x1b1] sm:$0xff] }
 0x3e2   :  { %v5086_v11 = vpop.f32.mrf.mxu0 }
 0x3e3   :  { %v16568_v22 = vadd.f32 %v5086_v11, %v4909_v17  ;;  %7205 = vmatpush1.bf16.msra.mxu0 %v12287_v8  ;;  %v4911_v13 = vpop.f32.mrf.mxu1  ;;  %v4148_v8 = vrot.slane %v12442_v21, 3  ;;  %v12443_v11 = vld [vmem:[#allocation2 + $0x68] sm:$0xff]  }
 0x3e4   :  { %v5088_v19 = vpop.f32.mrf.mxu0  ;;  %7028 = vmatpush1.bf16.msra.mxu1 %v12281_v34  ;;  %7206 = vmatprep.subr.bf16.mxu0 %v20643_v35  ;;  %v4150_v45 = vrot.slane %v12443_v11, 3 }
 0x3e5   :  { %7029 = vmatprep.subr.bf16.mxu1 %v20643_v35  ;;  %v4914_v12 = vpop.f32.mrf.mxu1  ;;  %11883 = vmatmul.mubr.bf16.gmra.mxu1 %v4145_v4  ;;  %v12285_v19 = vld [vmem:[%s20296_s1 + $0xf8] sm:$0xff]   ;;  %v4149_v13 = vsel %vm4128_vm8, %v4146_v6, %v4148_v8 }
 0x3e6   :  { %v5091_v14 = vpop.f32.mrf.mxu0  ;;  %6897 = vmatmul.mubr.bf16.gmra.mxu0 %v5915_v58  ;;  %11886 = vmatprep.mubr.bf16.mxu1 %v4147_v63  ;;  %v11093_v4 = vld [vmem:[%s20297_s0 + $0x198] sm:$0xff] }
 0x3e7   :  { %6904 = vmatprep.mubr.bf16.mxu0 %v5970_v28  ;;  %v16586_v37 = vadd.f32 %v5091_v14, %v4914_v12  ;;  %7207 = vmatpush1.bf16.msra.mxu0 %v12290_v23  ;;  %v4916_v20 = vpop.f32.mrf.mxu1  ;;  %v4151_v14 = vsel %vm4128_vm8, %v4148_v8, %v4150_v45  ;;  %v11094_v12 = vld [vmem:[%s20297_s0 + $0x1a0] sm:$0xff]  ;;  %v12445_v8 = vld [vmem:[#allocation2 + $0x78] sm:$0xff]  }
 0x3e8   :  { %v5093_v42 = vpop.f32.mrf.mxu0  ;;  %7030 = vmatpush1.bf16.msra.mxu1 %v12282_v49  ;;  %7208 = vmatprep.subr.bf16.mxu0 %v20643_v35  ;;  %v12444_v20 = vld [vmem:[#allocation2 + $0x70] sm:$0xff]  }
 0x3e9   :  { %7031 = vmatprep.subr.bf16.mxu1 %v20643_v35  ;;  %v4917_v34 = vpop.f32.mrf.mxu1  ;;  %v12297_v42 = vld [vmem:[%s20296_s1 + $0x170] sm:$0xff]  }
 0x3ea   :  { %v5094_v10 = vpop.f32.mrf.mxu0 }
 0x3eb   :  { %v16602_v58 = vadd.f32 %v5094_v10, %v4917_v34  ;;  %7209 = vmatpush1.bf16.msra.mxu0 %v12293_v59  ;;  %v4919_v28 = vpop.f32.mrf.mxu1  ;;  %v5917_v10 = vpack.c.bf16 %v11094_v12, %v11093_v4  ;;  %v5972_v34 = vpack.c.bf16 %v11132_v2, %v11131_v33  ;;  %v11096_v4 = vld [vmem:[%s20297_s0 + $0x1b0] sm:$0xff]  ;;  %v11134_v33 = vld [vmem:[%s20297_s0 + $0x1c1] sm:$0xff] }
 0x3ec   :  { %v5096_v17 = vpop.f32.mrf.mxu0  ;;  %7032 = vmatpush1.bf16.msra.mxu1 %v12283_v39  ;;  %7210 = vmatprep.subr.bf16.mxu0 %v20643_v35  ;;  %v4152_v39 = vrot.slane %v12444_v20, 3  ;;  %v12288_v28 = vld [vmem:[%s20296_s1 + $0xe8] sm:$0xff]   ;;  %v12299_v2 = vld [vmem:[%s20296_s1 + $0x160] sm:$0xff]  }
 0x3ed   :  { %7033 = vmatprep.subr.bf16.mxu1 %v20643_v35  ;;  %v4922_v49 = vpop.f32.mrf.mxu1  ;;  %11887 = vmatmul.mubr.bf16.gmra.mxu1 %v4149_v13  ;;  %v12298_v17 = vld [vmem:[%s20296_s1 + $0x168] sm:$0xff]  }
 0x3ee   :  { %v5099_v23 = vpop.f32.mrf.mxu0  ;;  %6905 = vmatmul.mubr.bf16.gmra.mxu0 %v5916_v44  ;;  %11890 = vmatprep.mubr.bf16.mxu1 %v4151_v14  ;;  %v4154_v44 = vrot.slane %v12445_v8, 3  ;;  %v11095_v14 = vld [vmem:[%s20297_s0 + $0x1a8] sm:$0xff] }
 0x3ef   :  { %6912 = vmatprep.mubr.bf16.mxu0 %v5971_v52  ;;  %v16620_v63 = vadd.f32 %v5099_v23, %v4922_v49  ;;  %7211 = vmatpush2.bf16.msra.mxu0 %v12296_v36  ;;  %v4924_v9 = vpop.f32.mrf.mxu1  ;;  %v4153_v23 = vsel %vm4128_vm8, %v4150_v45, %v4152_v39 }
 0x3f0   :  { %v5101_v6 = vpop.f32.mrf.mxu0  ;;  %7034 = vmatpush2.bf16.msra.mxu1 %v12285_v19  ;;  %7212 = vmatprep.subr.bf16.mxu0 %v20643_v35  ;;  %v4155_v49 = vsel %vm4128_vm8, %v4152_v39, %v4154_v44  ;;  %v12289_v9 = vld [vmem:[%s20296_s1 + $0xe0] sm:$0xff]   ;;  %v5918_v39 = vpack.c.bf16 %v11096_v4, %v11095_v14 }
 0x3f1   :  { %7035 = vmatprep.subr.bf16.mxu1 %v20643_v35  ;;  %v4925_v21 = vpop.f32.mrf.mxu1  ;;  %v11133_v6 = vld [vmem:[%s20297_s0 + $0x1b9] sm:$0xff] }
 0x3f2   :  { %v5102_v59 = vpop.f32.mrf.mxu0  ;;  %v5973_v8 = vpack.c.bf16 %v11134_v33, %v11133_v6  ;;  %v11098_v14 = vld [vmem:[%s20297_s0 + $0x1c0] sm:$0xff]  ;;  %v11136_v6 = vld [vmem:[%s20297_s0 + $0x1d1] sm:$0xff] }
 0x3f3   :  { %v16636_v11 = vadd.f32 %v5102_v59, %v4925_v21  ;;  %7213 = vmatpush2.bf16.msra.mxu0 %v12297_v42  ;;  %v4927_v36 = vpop.f32.mrf.mxu1  ;;  %v12446_v59 = vld [vmem:[#allocation2 + $0x80] sm:$0xff]   ;;  %v4158_v21 = vrot.slane %v16092_v29, 3  ;;  %v12301_v33 = vld [vmem:[%s20296_s1 + $0x150] sm:$0xff]  }
 0x3f4   :  { %v5104_v52 = vpop.f32.mrf.mxu0  ;;  %7036 = vmatpush2.bf16.msra.mxu1 %v12286_v62  ;;  %7214 = vmatprep.subr.bf16.mxu0 %v20643_v35  ;;  %v4156_v20 = vrot.slane %v12446_v59, 3 }
 0x3f5   :  { %7037 = vmatprep.subr.bf16.mxu1 %v20643_v35  ;;  %v4930_v13 = vpop.f32.mrf.mxu1  ;;  %11891 = vmatmul.mubr.bf16.gmra.mxu1 %v4153_v23 }
 0x3f6   :  { %v5107_v19 = vpop.f32.mrf.mxu0  ;;  %6913 = vmatmul.mubr.bf16.gmra.mxu0 %v5917_v10  ;;  %11894 = vmatprep.mubr.bf16.mxu1 %v4155_v49  ;;  %v4157_v29 = vsel %vm4128_vm8, %v4154_v44, %v4156_v20  ;;  %v11097_v49 = vld [vmem:[%s20297_s0 + $0x1b8] sm:$0xff] }
 0x3f7   :  { %6920 = vmatprep.mubr.bf16.mxu0 %v5972_v34  ;;  %v16654_v12 = vadd.f32 %v5107_v19, %v4930_v13  ;;  %7215 = vmatpush2.bf16.msra.mxu0 %v12298_v17  ;;  %v4932_v42 = vpop.f32.mrf.mxu1  ;;  %v12300_v17 = vld [vmem:[%s20296_s1 + $0x158] sm:$0xff]   ;;  %v4159_v13 = vsel %vm4128_vm8, %v4156_v20, %v4158_v21  ;;  %v5919_v20 = vpack.c.bf16 %v11098_v14, %v11097_v49  ;;  %v11100_v14 = vld [vmem:[%s20297_s0 + $0x1d0] sm:$0xff] }
 0x3f8   :  { %v5109_v45 = vpop.f32.mrf.mxu0  ;;  %7038 = vmatpush2.bf16.msra.mxu1 %v12288_v28  ;;  %7216 = vmatprep.subr.bf16.mxu0 %v20643_v35  ;;  %v12291_v28 = vld [vmem:[%s20296_s1 + $0xd8] sm:$0xff]  }
 0x3f9   :  { %7039 = vmatprep.subr.bf16.mxu1 %v20643_v35  ;;  %v4933_v10 = vpop.f32.mrf.mxu1  ;;  %v11135_v45 = vld [vmem:[%s20297_s0 + $0x1c9] sm:$0xff] }
 0x3fa   :  { %v5110_v62 = vpop.f32.mrf.mxu0 }
 0x3fb   :  { %v16671_v34 = vadd.f32 %v5110_v62, %v4933_v10  ;;  %7217 = vmatpush2.bf16.msra.mxu0 %v12299_v2  ;;  %v4935_v36 = vpop.f32.mrf.mxu1  ;;  %v12447_v62 = vld [vmem:[#allocation2 + $0x90] sm:$0xff]   ;;  %v5974_v10 = vpack.c.bf16 %v11136_v6, %v11135_v45  ;;  %v11137_v45 = vld [vmem:[%s20297_s0 + $0x1d9] sm:$0xff]  ;;  %v11138_v6 = vld [vmem:[%s20297_s0 + $0x1e1] sm:$0xff] }
 0x3fc   :  { %v5112_v52 = vpop.f32.mrf.mxu0  ;;  %7040 = vmatpush2.bf16.msra.mxu1 %v12289_v9  ;;  %7218 = vmatprep.subr.bf16.mxu0 %v20643_v35  ;;  %v4160_v59 = vrot.slane %v12447_v62, 3 }
 0x3fd   :  { %7041 = vmatprep.subr.bf16.mxu1 %v20643_v35  ;;  %v5148_v23 = vpop.f32.mrf.mxu1  ;;  %11895 = vmatmul.mubr.bf16.gmra.mxu1 %v4157_v29 }
 0x3fe   :  { %v5325_v19 = vpop.f32.mrf.mxu0  ;;  %6921 = vmatmul.mubr.bf16.gmra.mxu0 %v5918_v39  ;;  %v5149_v4 = vadd.f32 %v5148_v23, %v16297_v27  ;;  %11898 = vmatprep.mubr.bf16.mxu1 %v4159_v13  ;;  %v12292_v27 = vld [vmem:[%s20296_s1 + $0xd0] sm:$0xff]  }
 0x3ff   :  { %6928 = vmatprep.mubr.bf16.mxu0 %v5973_v8  ;;  %7219 = vmatpush2.bf16.msra.mxu0 %v12300_v17  ;;  %v5150_v2 = vpop.f32.mrf.mxu1  ;;  %v12302_v17 = vld [vmem:[%s20296_s1 + $0x148] sm:$0xff]  }
 0x400   :  { %v5327_v44 = vpop.f32.mrf.mxu0  ;;  %7042 = vmatpush2.bf16.msra.mxu1 %v12291_v28  ;;  %7220 = vmatprep.subr.bf16.mxu0 %v20643_v35  ;;  %v16703_v42 = vadd.f32 %v5325_v19, %v5149_v4  ;;  %v4162_v28 = vrot.slane %v16403_v43, 3  ;;  %v12294_v19 = vld [vmem:[%s20296_s1 + $0xc8] sm:$0xff]  }
 0x401   :  { %7043 = vmatprep.subr.bf16.mxu1 %v20643_v35  ;;  %v5151_v39 = vpop.f32.mrf.mxu1  ;;  %v11099_v43 = vld [vmem:[%s20297_s0 + $0x1c8] sm:$0xff] }
 0x402   :  { %v5328_v9 = vpop.f32.mrf.mxu0  ;;  %v5152_v8 = vadd.f32 %v5151_v39, %v16304_v30  ;;  %v4161_v30 = vsel %vm4128_vm8, %v4158_v21, %v4160_v59  ;;  %v4163_v49 = vsel %vm4128_vm8, %v4160_v59, %v4162_v28  ;;  %v12295_v21 = vld [vmem:[%s20296_s1 + $0xc0] sm:$0xff]   ;;  %v5920_v39 = vpack.c.bf16 %v11100_v14, %v11099_v43  ;;  %v11155_v43 = vld [vmem:[%s20297_s0 + $0x14a] sm:$0xff] }
 0x403   :  { %7221 = vmatpush2.bf16.msra.mxu0 %v12301_v33  ;;  %v5153_v36 = vpop.f32.mrf.mxu1  ;;  %v12303_v33 = vld [vmem:[%s20296_s1 + $0x140] sm:$0xff]  }
 0x404   :  { %v5330_v52 = vpop.f32.mrf.mxu0  ;;  %7044 = vmatpush2.bf16.msra.mxu1 %v12292_v27  ;;  %7222 = vmatprep.subr.bf16.mxu0 %v20643_v35  ;;  %v16715_v29 = vadd.f32 %v5328_v9, %v5152_v8  ;;  %v11158_v27 = vld [vmem:[%s20297_s0 + $0x162] sm:$0xff]  ;;  %v16749_v9 = vld [vmem:[%s20296_s1 + $0x238] sm:$0xff]   ;;  %v5975_v8 = vpack.c.bf16 %v11138_v6, %v11137_v45 }
 0x405   :  { %7045 = vmatprep.subr.bf16.mxu1 %v20643_v35  ;;  %v5156_v13 = vpop.f32.mrf.mxu1  ;;  %11899 = vmatmul.mubr.bf16.gmra.mxu1 %v4161_v30  ;;  %v11160_v6 = vld [vmem:[%s20297_s0 + $0x172] sm:$0xff] }
 0x406   :  { %v5333_v23 = vpop.f32.mrf.mxu0  ;;  %6929 = vmatmul.mubr.bf16.gmra.mxu0 %v5919_v20  ;;  %v5157_v4 = vadd.f32 %v5156_v13, %v16314_v32  ;;  %11902 = vmatprep.mubr.bf16.mxu1 %v4163_v49  ;;  %v11157_v32 = vld [vmem:[%s20297_s0 + $0x15a] sm:$0xff]  ;;  %v4164_v20 = vrot.slane %v16413_v3, 3 }
 0x407   :  { %6936 = vmatprep.mubr.bf16.mxu0 %v5974_v10  ;;  %7223 = vmatpush2.bf16.msra.mxu0 %v12302_v17  ;;  %v5158_v2 = vpop.f32.mrf.mxu1  ;;  %v16756_v36 = vpack.c.bf16 %v11158_v27, %v11157_v32  ;;  %v11102_v49 = vld [vmem:[%s20297_s0 + $0x1e0] sm:$0xff] }
 0x408   :  { %v5335_v44 = vpop.f32.mrf.mxu0  ;;  %7046 = vmatpush2.bf16.msra.mxu1 %v12294_v19  ;;  %7224 = vmatprep.subr.bf16.mxu0 %v20643_v35  ;;  %v16751_v62 = vadd.f32 %v5333_v23, %v5157_v4  ;;  %v4165_v3 = vsel %vm4128_vm8, %v4162_v28, %v4164_v20  ;;  %v11139_v4 = vld [vmem:[%s20297_s0 + $0x1e9] sm:$0xff] }
 0x409   :  { %7047 = vmatprep.subr.bf16.mxu1 %v20643_v35  ;;  %v5159_v10 = vpop.f32.mrf.mxu1  ;;  %v11140_v44 = vld [vmem:[%s20297_s0 + $0x1f1] sm:$0xff] }
 0x40a   :  { %v5336_v59 = vpop.f32.mrf.mxu0  ;;  %v5160_v52 = vadd.f32 %v5159_v10, %v16321_v16  ;;  %v11101_v16 = vld [vmem:[%s20297_s0 + $0x1d8] sm:$0xff]  ;;  %v5976_v20 = vpack.c.bf16 %v11140_v44, %v11139_v4  ;;  %v11162_v4 = vld [vmem:[%s20297_s0 + $0x182] sm:$0xff] }
 0x40b   :  { %7225 = vmatpush2.bf16.msra.mxu0 %v12303_v33  ;;  %v5161_v19 = vpop.f32.mrf.mxu1  ;;  %v5921_v32 = vpack.c.bf16 %v11102_v49, %v11101_v16 }
 0x40c   :  { %v5338_v17 = vpop.f32.mrf.mxu0  ;;  %7048 = vmatpush2.bf16.msra.mxu1 %v12295_v21  ;;  %11906 = vmatprep.subr.bf16.mxu0 %v16749_v9  ;;  %v16759_v23 = vadd.f32 %v5336_v59, %v5160_v52  ;;  %v11156_v21 = vld [vmem:[%s20297_s0 + $0x152] sm:$0xff] }
 0x40d   :  { %7371 = vmatprep.subr.bf16.mxu1 %v20643_v35  ;;  %v5164_v13 = vpop.f32.mrf.mxu1  ;;  %11903 = vmatmul.mubr.bf16.gmra.mxu1 %v4165_v3  ;;  %v6020_v59 = vpack.c.bf16 %v11156_v21, %v11155_v43  ;;  %v12305_v52 = vld [vmem:[%s20296_s1 + $0x1b8] sm:$0xff]  }
 0x40e   :  { %v5341_v30 = vpop.f32.mrf.mxu0  ;;  %6937 = vmatmul.mubr.bf16.gmra.mxu0 %v5920_v39  ;;  %v5165_v28 = vadd.f32 %v5164_v13, %v16338_v41  ;;  %7049 = vmatprep.mubr.bf16.mxu1 %v16756_v36  ;;  %v11159_v41 = vld [vmem:[%s20297_s0 + $0x16a] sm:$0xff]  ;;  %v11141_v43 = vld [vmem:[%s20297_s0 + $0x1f9] sm:$0xff] }
 0x40f   :  { %6944 = vmatprep.mubr.bf16.mxu0 %v5975_v8  ;;  %v5166_v45 = vpop.f32.mrf.mxu1  ;;  %v16792_v8 = vpack.c.bf16 %v11160_v6, %v11159_v41  ;;  %v11103_v13 = vld [vmem:[%s20297_s0 + $0x1e8] sm:$0xff] }
 0x410   :  { %v5343_v14 = vpop.f32.mrf.mxu0  ;;  %v16789_v33 = vadd.f32 %v5341_v30, %v5165_v28  ;;  %v11142_v28 = vld [vmem:[%s20297_s0 + $0x201] sm:$0xff] }
 0x411   :  { %v5167_v27 = vpop.f32.mrf.mxu1  ;;  %v12306_v14 = vld [vmem:[%s20296_s1 + $0x1b0] sm:$0xff]  }
 0x412   :  { %v5344_v2 = vpop.f32.mrf.mxu0  ;;  %v5168_v39 = vadd.f32 %v5167_v27, %v16345_v47  ;;  %v11104_v47 = vld [vmem:[%s20297_s0 + $0x1f0] sm:$0xff] }
 0x413   :  { %v5169_v17 = vpop.f32.mrf.mxu1  ;;  %v5922_v41 = vpack.c.bf16 %v11104_v47, %v11103_v13  ;;  %v11143_v47 = vld [vmem:[%s20297_s0 + $0x209] sm:$0xff] }
 0x414   :  { %v5346_v10 = vpop.f32.mrf.mxu0  ;;  %v16797_v19 = vadd.f32 %v5344_v2, %v5168_v39  ;;  %v5977_v2 = vpack.c.bf16 %v11142_v28, %v11141_v43  ;;  %v11164_v43 = vld [vmem:[%s20297_s0 + $0x192] sm:$0xff] }
 0x415   :  { %v5172_v30 = vpop.f32.mrf.mxu1  ;;  %7050 = vmatmul.mubr.bf16.vlgmr.msra.gmra.mxu1 %v6020_v59 }
 0x416   :  { %v5349_v3 = vpop.f32.mrf.mxu0  ;;  %6945 = vmatmul.mubr.bf16.gmra.mxu0 %v5921_v32  ;;  %v5173_v16 = vadd.f32 %v5172_v30, %v16354_v31  ;;  %7057 = vmatprep.mubr.bf16.mxu1 %v16792_v8  ;;  %v11161_v31 = vld [vmem:[%s20297_s0 + $0x17a] sm:$0xff] }
 0x417   :  { %6952 = vmatprep.mubr.bf16.mxu0 %v5976_v20  ;;  %7372 = vmatpush1.bf16.msra.mxu1 %v12305_v52  ;;  %v5174_v21 = vpop.f32.mrf.mxu1  ;;  %v16826_v59 = vpack.c.bf16 %v11162_v4, %v11161_v31  ;;  %v12307_v20 = vld [vmem:[%s20296_s1 + $0x1a8] sm:$0xff]  }
 0x418   :  { %v5351_v49 = vpop.f32.mrf.mxu0  ;;  %7373 = vmatprep.subr.bf16.mxu1 %v20643_v35  ;;  %v16823_v44 = vadd.f32 %v5349_v3, %v5173_v16  ;;  %v11106_v3 = vld [vmem:[%s20297_s0 + $0x200] sm:$0xff] }
 0x419   :  { %v5175_v6 = vpop.f32.mrf.mxu1  ;;  %v12309_v16 = vld [vmem:[%s20296_s1 + $0x1a0] sm:$0xff]  }
 0x41a   :  { %v5352_v45 = vpop.f32.mrf.mxu0  ;;  %v5176_v32 = vadd.f32 %v5175_v6, %v16361_v40  ;;  %v11105_v40 = vld [vmem:[%s20297_s0 + $0x1f8] sm:$0xff] }
 0x41b   :  { %7374 = vmatpush1.bf16.msra.mxu1 %v12306_v14  ;;  %v5177_v39 = vpop.f32.mrf.mxu1  ;;  %v5923_v21 = vpack.c.bf16 %v11106_v3, %v11105_v40  ;;  %v11145_v3 = vld [vmem:[%s20297_s0 + $0x219] sm:$0xff] }
 0x41c   :  { %v5354_v27 = vpop.f32.mrf.mxu0  ;;  %7375 = vmatprep.subr.bf16.mxu1 %v20643_v35  ;;  %v16832_v10 = vadd.f32 %v5352_v45, %v5176_v32 }
 0x41d   :  { %v5180_v17 = vpop.f32.mrf.mxu1  ;;  %7058 = vmatmul.mubr.bf16.gmra.mxu1 %v16756_v36  ;;  %v11144_v36 = vld [vmem:[%s20297_s0 + $0x211] sm:$0xff] }
 0x41e   :  { %v5357_v52 = vpop.f32.mrf.mxu0  ;;  %6953 = vmatmul.mubr.bf16.gmra.mxu0 %v5922_v41  ;;  %v5181_v30 = vadd.f32 %v5180_v17, %v16372_v26  ;;  %7065 = vmatprep.mubr.bf16.mxu1 %v16826_v59  ;;  %v11163_v26 = vld [vmem:[%s20297_s0 + $0x18a] sm:$0xff]  ;;  %v5978_v4 = vpack.c.bf16 %v11144_v36, %v11143_v47  ;;  %v11166_v47 = vld [vmem:[%s20297_s0 + $0x1a2] sm:$0xff] }
 0x41f   :  { %6960 = vmatprep.mubr.bf16.mxu0 %v5977_v2  ;;  %7376 = vmatpush1.bf16.msra.mxu1 %v12307_v20  ;;  %v5182_v49 = vpop.f32.mrf.mxu1  ;;  %v16862_v6 = vpack.c.bf16 %v11164_v43, %v11163_v26  ;;  %v12310_v2 = vld [vmem:[%s20296_s1 + $0x198] sm:$0xff]  }
 0x420   :  { %v5359_v13 = vpop.f32.mrf.mxu0  ;;  %7377 = vmatprep.subr.bf16.mxu1 %v20643_v35  ;;  %v16859_v28 = vadd.f32 %v5357_v52, %v5181_v30  ;;  %v11108_v52 = vld [vmem:[%s20297_s0 + $0x210] sm:$0xff] }
 0x421   :  { %v5183_v31 = vpop.f32.mrf.mxu1  ;;  %v12311_v30 = vld [vmem:[%s20296_s1 + $0x190] sm:$0xff]  }
 0x422   :  { %v5360_v14 = vpop.f32.mrf.mxu0  ;;  %v5184_v45 = vadd.f32 %v5183_v31, %v16377_v50  ;;  %v11107_v50 = vld [vmem:[%s20297_s0 + $0x208] sm:$0xff] }
 0x423   :  { %7378 = vmatpush1.bf16.msra.mxu1 %v12309_v16  ;;  %v5185_v32 = vpop.f32.mrf.mxu1  ;;  %v5924_v49 = vpack.c.bf16 %v11108_v52, %v11107_v50  ;;  %v11147_v52 = vld [vmem:[%s20297_s0 + $0x229] sm:$0xff] }
 0x424   :  { %v5362_v41 = vpop.f32.mrf.mxu0  ;;  %7379 = vmatprep.subr.bf16.mxu1 %v20643_v35  ;;  %v16868_v27 = vadd.f32 %v5360_v14, %v5184_v45 }
 0x425   :  { %v5188_v39 = vpop.f32.mrf.mxu1  ;;  %7066 = vmatmul.mubr.bf16.gmra.mxu1 %v16792_v8  ;;  %v11146_v8 = vld [vmem:[%s20297_s0 + $0x221] sm:$0xff] }
 0x426   :  { %v5365_v20 = vpop.f32.mrf.mxu0  ;;  %6961 = vmatmul.mubr.bf16.gmra.mxu0 %v5923_v21  ;;  %v5189_v17 = vadd.f32 %v5188_v39, %v16383_v61  ;;  %7073 = vmatprep.mubr.bf16.mxu1 %v16862_v6  ;;  %v11165_v61 = vld [vmem:[%s20297_s0 + $0x19a] sm:$0xff]  ;;  %v5979_v43 = vpack.c.bf16 %v11146_v8, %v11145_v3  ;;  %v11168_v3 = vld [vmem:[%s20297_s0 + $0x1b2] sm:$0xff] }
 0x427   :  { %6968 = vmatprep.mubr.bf16.mxu0 %v5978_v4  ;;  %7380 = vmatpush1.bf16.msra.mxu1 %v12310_v2  ;;  %v5190_v13 = vpop.f32.mrf.mxu1  ;;  %v16898_v31 = vpack.c.bf16 %v11166_v47, %v11165_v61  ;;  %v12312_v4 = vld [vmem:[%s20296_s1 + $0x188] sm:$0xff]  }
 0x428   :  { %v5367_v40 = vpop.f32.mrf.mxu0  ;;  %7381 = vmatprep.subr.bf16.mxu1 %v20643_v35  ;;  %v16895_v36 = vadd.f32 %v5365_v20, %v5189_v17  ;;  %v11110_v20 = vld [vmem:[%s20297_s0 + $0x220] sm:$0xff] }
 0x429   :  { %v5191_v26 = vpop.f32.mrf.mxu1  ;;  %v12314_v17 = vld [vmem:[%s20296_s1 + $0x180] sm:$0xff]  }
 0x42a   :  { %v5368_v16 = vpop.f32.mrf.mxu0  ;;  %v5192_v14 = vadd.f32 %v5191_v26, %v16386_v0  ;;  %v11109_v0 = vld [vmem:[%s20297_s0 + $0x218] sm:$0xff] }
 0x42b   :  { %7382 = vmatpush1.bf16.msra.mxu1 %v12311_v30  ;;  %v5193_v45 = vpop.f32.mrf.mxu1  ;;  %v5925_v13 = vpack.c.bf16 %v11110_v20, %v11109_v0  ;;  %v11149_v20 = vld [vmem:[%s20297_s0 + $0x239] sm:$0xff] }
 0x42c   :  { %v5370_v21 = vpop.f32.mrf.mxu0  ;;  %7383 = vmatprep.subr.bf16.mxu1 %v20643_v35  ;;  %v16904_v41 = vadd.f32 %v5368_v16, %v5192_v14 }
 0x42d   :  { %v5196_v32 = vpop.f32.mrf.mxu1  ;;  %7074 = vmatmul.mubr.bf16.gmra.mxu1 %v16826_v59  ;;  %v11148_v59 = vld [vmem:[%s20297_s0 + $0x231] sm:$0xff] }
 0x42e   :  { %v5373_v2 = vpop.f32.mrf.mxu0  ;;  %6969 = vmatmul.mubr.bf16.gmra.mxu0 %v5924_v49  ;;  %v5197_v39 = vadd.f32 %v5196_v32, %v16391_v54  ;;  %7081 = vmatprep.mubr.bf16.mxu1 %v16898_v31  ;;  %v11167_v54 = vld [vmem:[%s20297_s0 + $0x1aa] sm:$0xff]  ;;  %v5980_v47 = vpack.c.bf16 %v11148_v59, %v11147_v52  ;;  %v11170_v52 = vld [vmem:[%s20297_s0 + $0x1c2] sm:$0xff] }
 0x42f   :  { %6976 = vmatprep.mubr.bf16.mxu0 %v5979_v43  ;;  %7384 = vmatpush1.bf16.msra.mxu1 %v12312_v4  ;;  %v5198_v40 = vpop.f32.mrf.mxu1  ;;  %v16934_v26 = vpack.c.bf16 %v11168_v3, %v11167_v54  ;;  %v12315_v43 = vld [vmem:[%s20296_s1 + $0x1f8] sm:$0xff]  }
 0x430   :  { %v5375_v50 = vpop.f32.mrf.mxu0  ;;  %7385 = vmatprep.subr.bf16.mxu1 %v20643_v35  ;;  %v16931_v8 = vadd.f32 %v5373_v2, %v5197_v39  ;;  %v11112_v2 = vld [vmem:[%s20297_s0 + $0x230] sm:$0xff] }
 0x431   :  { %v5199_v61 = vpop.f32.mrf.mxu1  ;;  %v12316_v39 = vld [vmem:[%s20296_s1 + $0x1f0] sm:$0xff]  }
 0x432   :  { %v5376_v30 = vpop.f32.mrf.mxu0  ;;  %v5200_v16 = vadd.f32 %v5199_v61, %v16396_v57  ;;  %v11111_v57 = vld [vmem:[%s20297_s0 + $0x228] sm:$0xff] }
 0x433   :  { %7386 = vmatpush1.bf16.msra.mxu1 %v12314_v17  ;;  %v5201_v14 = vpop.f32.mrf.mxu1  ;;  %v5926_v40 = vpack.c.bf16 %v11112_v2, %v11111_v57  ;;  %v11151_v2 = vld [vmem:[%s20297_s0 + $0x249] sm:$0xff] }
 0x434   :  { %v5378_v49 = vpop.f32.mrf.mxu0  ;;  %7387 = vmatprep.subr.bf16.mxu1 %v20643_v35  ;;  %v16940_v21 = vadd.f32 %v5376_v30, %v5200_v16 }
 0x435   :  { %v5204_v45 = vpop.f32.mrf.mxu1  ;;  %7082 = vmatmul.mubr.bf16.gmra.mxu1 %v16862_v6  ;;  %v11150_v6 = vld [vmem:[%s20297_s0 + $0x241] sm:$0xff] }
 0x436   :  { %v5381_v4 = vpop.f32.mrf.mxu0  ;;  %6977 = vmatmul.mubr.bf16.gmra.mxu0 %v5925_v13  ;;  %v5205_v32 = vadd.f32 %v5204_v45, %v16401_v18  ;;  %7089 = vmatprep.mubr.bf16.mxu1 %v16934_v26  ;;  %v11169_v18 = vld [vmem:[%s20297_s0 + $0x1ba] sm:$0xff]  ;;  %v5981_v3 = vpack.c.bf16 %v11150_v6, %v11149_v20  ;;  %v11172_v20 = vld [vmem:[%s20297_s0 + $0x1d2] sm:$0xff] }
 0x437   :  { %6984 = vmatprep.mubr.bf16.mxu0 %v5980_v47  ;;  %7388 = vmatpush2.bf16.msra.mxu1 %v12315_v43  ;;  %v5206_v50 = vpop.f32.mrf.mxu1  ;;  %v16970_v61 = vpack.c.bf16 %v11170_v52, %v11169_v18  ;;  %v12317_v47 = vld [vmem:[%s20296_s1 + $0x1e8] sm:$0xff]  }
 0x438   :  { %v5383_v0 = vpop.f32.mrf.mxu0  ;;  %7389 = vmatprep.subr.bf16.mxu1 %v20643_v35  ;;  %v16967_v59 = vadd.f32 %v5381_v4, %v5205_v32  ;;  %v11114_v4 = vld [vmem:[%s20297_s0 + $0x240] sm:$0xff] }
 0x439   :  { %v5207_v54 = vpop.f32.mrf.mxu1  ;;  %v12318_v32 = vld [vmem:[%s20296_s1 + $0x1e0] sm:$0xff]  }
 0x43a   :  { %v5384_v17 = vpop.f32.mrf.mxu0  ;;  %v5208_v30 = vadd.f32 %v5207_v54, %v16406_v51  ;;  %v11113_v51 = vld [vmem:[%s20297_s0 + $0x238] sm:$0xff] }
 0x43b   :  { %7390 = vmatpush2.bf16.msra.mxu1 %v12316_v39  ;;  %v5209_v16 = vpop.f32.mrf.mxu1  ;;  %v5927_v50 = vpack.c.bf16 %v11114_v4, %v11113_v51  ;;  %v11153_v4 = vld [vmem:[%s20297_s0 + $0x259] sm:$0xff] }
 0x43c   :  { %v5386_v13 = vpop.f32.mrf.mxu0  ;;  %7391 = vmatprep.subr.bf16.mxu1 %v20643_v35  ;;  %v16976_v49 = vadd.f32 %v5384_v17, %v5208_v30 }
 0x43d   :  { %v5212_v14 = vpop.f32.mrf.mxu1  ;;  %7090 = vmatmul.mubr.bf16.gmra.mxu1 %v16898_v31  ;;  %v11152_v31 = vld [vmem:[%s20297_s0 + $0x251] sm:$0xff] }
 0x43e   :  { %v5389_v43 = vpop.f32.mrf.mxu0  ;;  %6985 = vmatmul.mubr.bf16.gmra.mxu0 %v5926_v40  ;;  %v5213_v45 = vadd.f32 %v5212_v14, %v16416_v1  ;;  %7097 = vmatprep.mubr.bf16.mxu1 %v16970_v61  ;;  %v11171_v1 = vld [vmem:[%s20297_s0 + $0x1ca] sm:$0xff]  ;;  %v5982_v52 = vpack.c.bf16 %v11152_v31, %v11151_v2  ;;  %v11174_v2 = vld [vmem:[%s20297_s0 + $0x1e2] sm:$0xff] }
 0x43f   :  { %6992 = vmatprep.mubr.bf16.mxu0 %v5981_v3  ;;  %7392 = vmatpush2.bf16.msra.mxu1 %v12317_v47  ;;  %v5214_v0 = vpop.f32.mrf.mxu1  ;;  %v17006_v54 = vpack.c.bf16 %v11172_v20, %v11171_v1  ;;  %v12320_v3 = vld [vmem:[%s20296_s1 + $0x1d8] sm:$0xff]  }
 0x440   :  { %v5391_v57 = vpop.f32.mrf.mxu0  ;;  %7393 = vmatprep.subr.bf16.mxu1 %v20643_v35  ;;  %v17003_v6 = vadd.f32 %v5389_v43, %v5213_v45  ;;  %v11116_v43 = vld [vmem:[%s20297_s0 + $0x250] sm:$0xff] }
 0x441   :  { %v5215_v18 = vpop.f32.mrf.mxu1  ;;  %v12321_v45 = vld [vmem:[%s20296_s1 + $0x1d0] sm:$0xff]  }
 0x442   :  { %v5392_v39 = vpop.f32.mrf.mxu0  ;;  %v5216_v17 = vadd.f32 %v5215_v18, %v16421_v24  ;;  %v11115_v24 = vld [vmem:[%s20297_s0 + $0x248] sm:$0xff] }
 0x443   :  { %7394 = vmatpush2.bf16.msra.mxu1 %v12318_v32  ;;  %v5217_v30 = vpop.f32.mrf.mxu1  ;;  %v5928_v0 = vpack.c.bf16 %v11116_v43, %v11115_v24  ;;  %v11230_v43 = vld [vmem:[%s20297_s0 + $0x15c] sm:$0xff] }
 0x444   :  { %v5394_v40 = vpop.f32.mrf.mxu0  ;;  %7395 = vmatprep.subr.bf16.mxu1 %v20643_v35  ;;  %v17012_v13 = vadd.f32 %v5392_v39, %v5216_v17 }
 0x445   :  { %v5220_v16 = vpop.f32.mrf.mxu1  ;;  %7098 = vmatmul.mubr.bf16.gmra.mxu1 %v16934_v26  ;;  %v11154_v26 = vld [vmem:[%s20297_s0 + $0x261] sm:$0x3f] }
 0x446   :  { %v5397_v47 = vpop.f32.mrf.mxu0  ;;  %6993 = vmatmul.mubr.bf16.gmra.mxu0 %v5927_v50  ;;  %v5221_v14 = vadd.f32 %v5220_v16, %v16426_v48  ;;  %7105 = vmatprep.mubr.bf16.mxu1 %v17006_v54  ;;  %v11173_v48 = vld [vmem:[%s20297_s0 + $0x1da] sm:$0xff]  ;;  %v5983_v20 = vpack.c.bf16 %v11154_v26, %v11153_v4  ;;  %v11176_v4 = vld [vmem:[%s20297_s0 + $0x1f2] sm:$0xff] }
 0x447   :  { %7000 = vmatprep.mubr.bf16.mxu0 %v5982_v52  ;;  %7396 = vmatpush2.bf16.msra.mxu1 %v12320_v3  ;;  %v5222_v57 = vpop.f32.mrf.mxu1  ;;  %v17042_v18 = vpack.c.bf16 %v11174_v2, %v11173_v48  ;;  %v12322_v52 = vld [vmem:[%s20296_s1 + $0x1c8] sm:$0xff]  }
 0x448   :  { %v5399_v51 = vpop.f32.mrf.mxu0  ;;  %7397 = vmatprep.subr.bf16.mxu1 %v20643_v35  ;;  %v17039_v31 = vadd.f32 %v5397_v47, %v5221_v14  ;;  %v11118_v47 = vld [vmem:[%s20297_s0 + $0x260] sm:$0x3f] }
 0x449   :  { %v5223_v1 = vpop.f32.mrf.mxu1  ;;  %v12323_v14 = vld [vmem:[%s20296_s1 + $0x1c0] sm:$0xff]  }
 0x44a   :  { %v5400_v32 = vpop.f32.mrf.mxu0  ;;  %v5224_v39 = vadd.f32 %v5223_v1, %v16429_v7  ;;  %v11117_v7 = vld [vmem:[%s20297_s0 + $0x258] sm:$0xff] }
 0x44b   :  { %7398 = vmatpush2.bf16.msra.mxu1 %v12321_v45  ;;  %v5225_v17 = vpop.f32.mrf.mxu1  ;;  %v5929_v57 = vpack.c.bf16 %v11118_v47, %v11117_v7  ;;  %v11177_v7 = vld [vmem:[%s20297_s0 + $0x1fa] sm:$0xff] }
 0x44c   :  { %v5402_v50 = vpop.f32.mrf.mxu0  ;;  %7399 = vmatprep.subr.bf16.mxu1 %v20643_v35  ;;  %v17048_v40 = vadd.f32 %v5400_v32, %v5224_v39  ;;  %v11194_v17 = vld [vmem:[%s20297_s0 + $0x15b] sm:$0xff] }
 0x44d   :  { %v5228_v30 = vpop.f32.mrf.mxu1  ;;  %7106 = vmatmul.mubr.bf16.gmra.mxu1 %v16970_v61  ;;  %v11231_v61 = vld [vmem:[%s20297_s0 + $0x164] sm:$0xff] }
 0x44e   :  { %v5405_v3 = vpop.f32.mrf.mxu0  ;;  %7001 = vmatmul.mubr.bf16.gmra.mxu0 %v5928_v0  ;;  %v5229_v16 = vadd.f32 %v5228_v30, %v16436_v60  ;;  %7113 = vmatprep.mubr.bf16.mxu1 %v17042_v18  ;;  %v11175_v60 = vld [vmem:[%s20297_s0 + $0x1ea] sm:$0xff]  ;;  %v6133_v2 = vpack.c.bf16 %v11231_v61, %v11230_v43 }
 0x44f   :  { %7008 = vmatprep.mubr.bf16.mxu0 %v5983_v20  ;;  %7400 = vmatpush2.bf16.msra.mxu1 %v12322_v52  ;;  %v5230_v51 = vpop.f32.mrf.mxu1  ;;  %v17078_v1 = vpack.c.bf16 %v11176_v4, %v11175_v60 }
 0x450   :  { %v5407_v24 = vpop.f32.mrf.mxu0  ;;  %7401 = vmatprep.subr.bf16.mxu1 %v20643_v35  ;;  %v17075_v26 = vadd.f32 %v5405_v3, %v5229_v16  ;;  %v11232_v16 = vld [vmem:[%s20297_s0 + $0x16c] sm:$0xff] }
 0x451   :  { %v5231_v48 = vpop.f32.mrf.mxu1 }
 0x452   :  { %v5408_v45 = vpop.f32.mrf.mxu0  ;;  %v5232_v32 = vadd.f32 %v5231_v48, %v16446_v56  ;;  %v11195_v56 = vld [vmem:[%s20297_s0 + $0x163] sm:$0xff]  ;;  %v12308_v48 = vld [vmem:[%s20296_s1 + $0x230] sm:$0xff]  }
 0x453   :  { %7402 = vmatpush2.bf16.msra.mxu1 %v12323_v14  ;;  %v5233_v20 = vpop.f32.mrf.mxu1  ;;  %v6079_v61 = vpack.c.bf16 %v11195_v56, %v11194_v17  ;;  %v12313_v17 = vld [vmem:[%s20296_s1 + $0x228] sm:$0xff]  }
 0x454   :  { %v5410_v0 = vpop.f32.mrf.mxu0  ;;  %9750 = vmatprep.subr.bf16.mxu1 %v20643_v35  ;;  %v17081_v39 = vadd.f32 %v5408_v45, %v5232_v32  ;;  %v11197_v20 = vld [vmem:[%s20297_s0 + $0x173] sm:$0xff] }
 0x455   :  { %v5236_v52 = vpop.f32.mrf.mxu1  ;;  %7114 = vmatmul.mubr.bf16.gmra.mxu1 %v17006_v54  ;;  %v11178_v54 = vld [vmem:[%s20297_s0 + $0x202] sm:$0xff] }
 0x456   :  { %v5413_v50 = vpop.f32.mrf.mxu0  ;;  %7009 = vmatmul.mubr.bf16.gmra.mxu0 %v5929_v57  ;;  %v5237_v3 = vadd.f32 %v5236_v52, %v16457_v5  ;;  %7121 = vmatprep.mubr.bf16.mxu1 %v17078_v1  ;;  %v11233_v5 = vld [vmem:[%s20297_s0 + $0x174] sm:$0xff]  ;;  %v17107_v4 = vpack.c.bf16 %v11178_v54, %v11177_v7 }
 0x457   :  { %7226 = vmatprep.mubr.bf16.mxu0 %v6133_v2  ;;  %v5238_v47 = vpop.f32.mrf.mxu1  ;;  %v17109_v45 = vpack.c.bf16 %v11233_v5, %v11232_v16 }
 0x458   :  { %v5415_v30 = vpop.f32.mrf.mxu0  ;;  %v17104_v24 = vadd.f32 %v5413_v50, %v5237_v3  ;;  %v11180_v3 = vld [vmem:[%s20297_s0 + $0x212] sm:$0xff] }
 0x459   :  { %v5239_v14 = vpop.f32.mrf.mxu1 }
 0x45a   :  { %v5416_v43 = vpop.f32.mrf.mxu0  ;;  %v5240_v51 = vadd.f32 %v5239_v14, %v16470_v38  ;;  %v11196_v38 = vld [vmem:[%s20297_s0 + $0x16b] sm:$0xff] }
 0x45b   :  { %v5241_v57 = vpop.f32.mrf.mxu1  ;;  %v6080_v47 = vpack.c.bf16 %v11197_v20, %v11196_v38  ;;  %v11236_v20 = vld [vmem:[%s20297_s0 + $0x18c] sm:$0xff] }
 0x45c   :  { %v5418_v60 = vpop.f32.mrf.mxu0  ;;  %v17114_v2 = vadd.f32 %v5416_v43, %v5240_v51  ;;  %v12319_v51 = vld [vmem:[%s20296_s1 + $0x220] sm:$0xff]  }
 0x45d   :  { %v5244_v0 = vpop.f32.mrf.mxu1  ;;  %7122 = vmatmul.mubr.bf16.gmra.mxu1 %v17042_v18  ;;  %v11234_v18 = vld [vmem:[%s20297_s0 + $0x17c] sm:$0xff] }
 0x45e   :  { %v5421_v32 = vpop.f32.mrf.mxu0  ;;  %7227 = vmatmul.mubr.bf16.vlgmr.msra.gmra.mxu0 %v6079_v61  ;;  %v5245_v50 = vadd.f32 %v5244_v0, %v16486_v25  ;;  %7129 = vmatprep.mubr.bf16.mxu1 %v17107_v4  ;;  %v11179_v25 = vld [vmem:[%s20297_s0 + $0x20a] sm:$0xff] }
 0x45f   :  { %11907 = vmatpush3.bf16.msra.mxu0 %v16749_v9  ;;  %7234 = vmatprep.mubr.bf16.mxu0 %v17109_v45  ;;  %v11235_v9 = vld [vmem:[%s20297_s0 + $0x184] sm:$0xff]  ;;  %v5246_v56 = vpop.f32.mrf.mxu1  ;;  %v17147_v61 = vpack.c.bf16 %v11180_v3, %v11179_v25 }
 0x460   :  { %v5423_v52 = vpop.f32.mrf.mxu0  ;;  %11908 = vmatprep.subr.bf16.mxu0 %v12308_v48  ;;  %v17142_v30 = vadd.f32 %v5421_v32, %v5245_v50  ;;  %v17144_v16 = vpack.c.bf16 %v11235_v9, %v11234_v18  ;;  %v12324_v18 = vld [vmem:[%s20296_s1 + $0x218] sm:$0xff]  }
 0x461   :  { %v5247_v54 = vpop.f32.mrf.mxu1  ;;  %v11181_v52 = vld [vmem:[%s20297_s0 + $0x21a] sm:$0xff] }
 0x462   :  { %v5424_v7 = vpop.f32.mrf.mxu0  ;;  %v5248_v5 = vadd.f32 %v5247_v54, %v16500_v46  ;;  %v11198_v46 = vld [vmem:[%s20297_s0 + $0x17b] sm:$0xff] }
 0x463   :  { %11909 = vmatpush3.bf16.msra.mxu0 %v12308_v48  ;;  %v5249_v14 = vpop.f32.mrf.mxu1  ;;  %v11199_v48 = vld [vmem:[%s20297_s0 + $0x183] sm:$0xff] }
 0x464   :  { %v5426_v43 = vpop.f32.mrf.mxu0  ;;  %11910 = vmatprep.subr.bf16.mxu0 %v12313_v17  ;;  %v17152_v60 = vadd.f32 %v5424_v7, %v5248_v5  ;;  %v6081_v25 = vpack.c.bf16 %v11199_v48, %v11198_v46 }
 0x465   :  { %v5252_v32 = vpop.f32.mrf.mxu1  ;;  %7130 = vmatmul.mubr.bf16.gmra.mxu1 %v17078_v1  ;;  %v11237_v1 = vld [vmem:[%s20297_s0 + $0x194] sm:$0xff] }
 0x466   :  { %v5429_v57 = vpop.f32.mrf.mxu0  ;;  %7235 = vmatmul.mubr.bf16.gmra.mxu0 %v6080_v47  ;;  %v5253_v0 = vadd.f32 %v5252_v32, %v16518_v55  ;;  %7137 = vmatprep.mubr.bf16.mxu1 %v17147_v61  ;;  %v11182_v55 = vld [vmem:[%s20297_s0 + $0x222] sm:$0xff]  ;;  %v12325_v43 = vld [vmem:[%s20296_s1 + $0x210] sm:$0xff]  }
 0x467   :  { %7242 = vmatprep.mubr.bf16.mxu0 %v17144_v16  ;;  %11911 = vmatpush3.bf16.msra.mxu0 %v12313_v17  ;;  %v5254_v50 = vpop.f32.mrf.mxu1  ;;  %v17181_v17 = vpack.c.bf16 %v11237_v1, %v11236_v20  ;;  %v17184_v54 = vpack.c.bf16 %v11182_v55, %v11181_v52  ;;  %v11183_v20 = vld [vmem:[%s20297_s0 + $0x22a] sm:$0xff] }
 0x468   :  { %v5431_v38 = vpop.f32.mrf.mxu0  ;;  %11912 = vmatprep.subr.bf16.mxu0 %v12319_v51  ;;  %v17179_v9 = vadd.f32 %v5429_v57, %v5253_v0  ;;  %v11238_v0 = vld [vmem:[%s20297_s0 + $0x19c] sm:$0xff]  ;;  %v12326_v1 = vld [vmem:[%s20296_s1 + $0x208] sm:$0xff]  }
 0x469   :  { %v5255_v3 = vpop.f32.mrf.mxu1 }
 0x46a   :  { %v5432_v56 = vpop.f32.mrf.mxu0  ;;  %v5256_v7 = vadd.f32 %v5255_v3, %v16534_v53  ;;  %v11200_v53 = vld [vmem:[%s20297_s0 + $0x18b] sm:$0xff] }
 0x46b   :  { %11913 = vmatpush3.bf16.msra.mxu0 %v12319_v51  ;;  %v5257_v5 = vpop.f32.mrf.mxu1  ;;  %v11201_v51 = vld [vmem:[%s20297_s0 + $0x193] sm:$0xff] }
 0x46c   :  { %v5434_v47 = vpop.f32.mrf.mxu0  ;;  %11914 = vmatprep.subr.bf16.mxu0 %v12324_v18  ;;  %v17189_v14 = vadd.f32 %v5432_v56, %v5256_v7  ;;  %v6082_v55 = vpack.c.bf16 %v11201_v51, %v11200_v53  ;;  %v12327_v5 = vld [vmem:[%s20296_s1 + $0x200] sm:$0xff]  }
 0x46d   :  { %v5260_v32 = vpop.f32.mrf.mxu1  ;;  %7138 = vmatmul.mubr.bf16.gmra.mxu1 %v17107_v4  ;;  %v11239_v4 = vld [vmem:[%s20297_s0 + $0x1a4] sm:$0xff] }
 0x46e   :  { %v5437_v57 = vpop.f32.mrf.mxu0  ;;  %7243 = vmatmul.mubr.bf16.gmra.mxu0 %v6081_v25  ;;  %v5261_v46 = vadd.f32 %v5260_v32, %v16552_v15  ;;  %7145 = vmatprep.mubr.bf16.mxu1 %v17184_v54  ;;  %v11184_v15 = vld [vmem:[%s20297_s0 + $0x232] sm:$0xff] }
 0x46f   :  { %7250 = vmatprep.mubr.bf16.mxu0 %v17181_v17  ;;  %11915 = vmatpush3.bf16.msra.mxu0 %v12324_v18  ;;  %v5262_v38 = vpop.f32.mrf.mxu1  ;;  %v17218_v18 = vpack.c.bf16 %v11239_v4, %v11238_v0  ;;  %v6034_v7 = vpack.c.bf16 %v11184_v15, %v11183_v20  ;;  %v11185_v4 = vld [vmem:[%s20297_s0 + $0x23a] sm:$0xff] }
 0x470   :  { %v5439_v48 = vpop.f32.mrf.mxu0  ;;  %11916 = vmatprep.subr.bf16.mxu0 %v12325_v43  ;;  %v17216_v50 = vadd.f32 %v5437_v57, %v5261_v46 }
 0x471   :  { %v5263_v56 = vpop.f32.mrf.mxu1  ;;  %v11240_v48 = vld [vmem:[%s20297_s0 + $0x1ac] sm:$0xff] }
 0x472   :  { %v5440_v52 = vpop.f32.mrf.mxu0  ;;  %v5264_v25 = vadd.f32 %v5263_v56, %v16568_v22  ;;  %v11202_v22 = vld [vmem:[%s20297_s0 + $0x19b] sm:$0xff] }
 0x473   :  { %11917 = vmatpush3.bf16.msra.mxu0 %v12325_v43  ;;  %v5265_v47 = vpop.f32.mrf.mxu1  ;;  %v11203_v43 = vld [vmem:[%s20297_s0 + $0x1a3] sm:$0xff] }
 0x474   :  { %v5442_v3 = vpop.f32.mrf.mxu0  ;;  %11918 = vmatprep.subr.bf16.mxu0 %v12326_v1  ;;  %v17224_v32 = vadd.f32 %v5440_v52, %v5264_v25  ;;  %v6083_v15 = vpack.c.bf16 %v11203_v43, %v11202_v22  ;;  %v11242_v43 = vld [vmem:[%s20297_s0 + $0x1bc] sm:$0xff] }
 0x475   :  { %v5268_v46 = vpop.f32.mrf.mxu1  ;;  %7146 = vmatmul.mubr.bf16.gmra.mxu1 %v17147_v61  ;;  %v11241_v61 = vld [vmem:[%s20297_s0 + $0x1b4] sm:$0xff] }
 0x476   :  { %v5445_v57 = vpop.f32.mrf.mxu0  ;;  %7251 = vmatmul.mubr.bf16.gmra.mxu0 %v6082_v55  ;;  %v5269_v53 = vadd.f32 %v5268_v46, %v16586_v37  ;;  %7153 = vmatprep.mubr.bf16.mxu1 %v6034_v7  ;;  %v11186_v37 = vld [vmem:[%s20297_s0 + $0x242] sm:$0xff]  ;;  %v17249_v55 = vpack.c.bf16 %v11241_v61, %v11240_v48  ;;  %v11187_v48 = vld [vmem:[%s20297_s0 + $0x24a] sm:$0xff]  ;;  %v11188_v61 = vld [vmem:[%s20297_s0 + $0x252] sm:$0xff] }
 0x477   :  { %7258 = vmatprep.mubr.bf16.mxu0 %v17218_v18  ;;  %11919 = vmatpush3.bf16.msra.mxu0 %v12326_v1  ;;  %v5270_v0 = vpop.f32.mrf.mxu1  ;;  %v6035_v25 = vpack.c.bf16 %v11186_v37, %v11185_v4 }
 0x478   :  { %v5447_v51 = vpop.f32.mrf.mxu0  ;;  %11920 = vmatprep.subr.bf16.mxu0 %v12327_v5  ;;  %v17247_v38 = vadd.f32 %v5445_v57, %v5269_v53  ;;  %v11204_v57 = vld [vmem:[%s20297_s0 + $0x1ab] sm:$0xff] }
 0x479   :  { %v5271_v52 = vpop.f32.mrf.mxu1 }
 0x47a   :  { %v5448_v20 = vpop.f32.mrf.mxu0  ;;  %v5272_v56 = vadd.f32 %v5271_v52, %v16602_v58  ;;  %v11205_v58 = vld [vmem:[%s20297_s0 + $0x1b3] sm:$0xff] }
 0x47b   :  { %11921 = vmatpush3.bf16.msra.mxu0 %v12327_v5  ;;  %v5273_v3 = vpop.f32.mrf.mxu1  ;;  %v6084_v4 = vpack.c.bf16 %v11205_v58, %v11204_v57 }
 0x47c   :  { %v5450_v1 = vpop.f32.mrf.mxu0  ;;  %9927 = vmatprep.subr.bf16.mxu0 %v20643_v35  ;;  %v17253_v47 = vadd.f32 %v5448_v20, %v5272_v56  ;;  %v17281_v56 = vpack.c.bf16 %v11188_v61, %v11187_v48 }
 0x47d   :  { %v5276_v51 = vpop.f32.mrf.mxu1  ;;  %7154 = vmatmul.mubr.bf16.gmra.mxu1 %v17184_v54  ;;  %v11243_v54 = vld [vmem:[%s20297_s0 + $0x1c4] sm:$0xff] }
 0x47e   :  { %v5453_v46 = vpop.f32.mrf.mxu0  ;;  %7259 = vmatmul.mubr.bf16.gmra.mxu0 %v6083_v15  ;;  %v5277_v5 = vadd.f32 %v5276_v51, %v16620_v63  ;;  %7161 = vmatprep.mubr.bf16.mxu1 %v6035_v25  ;;  %v17278_v20 = vpack.c.bf16 %v11243_v54, %v11242_v43  ;;  %v17303_v54 = vld [vmem:[%s20297_s0 + $0x25a] sm:$0xff] }
 0x47f   :  { %7266 = vmatprep.mubr.bf16.mxu0 %v17249_v55  ;;  %v5278_v53 = vpop.f32.mrf.mxu1 }
 0x480   :  { %v5455_v22 = vpop.f32.mrf.mxu0  ;;  %v17276_v63 = vadd.f32 %v5453_v46, %v5277_v5  ;;  %v11206_v46 = vld [vmem:[%s20297_s0 + $0x1bb] sm:$0xff]  ;;  %v11244_v5 = vld [vmem:[%s20297_s0 + $0x1cc] sm:$0xff] }
 0x481   :  { %v5279_v37 = vpop.f32.mrf.mxu1 }
 0x482   :  { %20792 = vst [vmem:[#allocation37_spill] sm:$0xff] %v17276_v63  ;;  %v5456_v0 = vpop.f32.mrf.mxu0  ;;  %v5280_v15 = vadd.f32 %v5279_v37, %v16636_v11  ;;  %v11207_v11 = vld [vmem:[%s20297_s0 + $0x1c3] sm:$0xff] }
 0x483   :  { %v5281_v1 = vpop.f32.mrf.mxu1  ;;  %v6085_v61 = vpack.c.bf16 %v11207_v11, %v11206_v46  ;;  %v11209_v46 = vld [vmem:[%s20297_s0 + $0x1d3] sm:$0xff] }
 0x484   :  { %v5458_v52 = vpop.f32.mrf.mxu0  ;;  %v17283_v3 = vadd.f32 %v5456_v0, %v5280_v15 }
 0x485   :  { %v5284_v22 = vpop.f32.mrf.mxu1  ;;  %7162 = vmatmul.mubr.bf16.gmra.mxu1 %v6034_v7  ;;  %v11245_v7 = vld [vmem:[%s20297_s0 + $0x1d4] sm:$0xff] }
 0x486   :  { %20793 = vst [vmem:[#allocation41_spill] sm:$0xff] %v17283_v3  ;;  %v5461_v51 = vpop.f32.mrf.mxu0  ;;  %7267 = vmatmul.mubr.bf16.gmra.mxu0 %v6084_v4  ;;  %v5285_v57 = vadd.f32 %v5284_v22, %v16654_v12  ;;  %7169 = vmatprep.mubr.bf16.mxu1 %v17281_v56  ;;  %v11191_v12 = vld [vmem:[%s20297_s0 + $0x262] sm:$0xff]  ;;  %v17310_v4 = vpack.c.bf16 %v11245_v7, %v11244_v5  ;;  %v17340_v7 = vld [vmem:[%s20302_s6] ss:$0 sm:$0xff] }
 0x487   :  { %7274 = vmatprep.mubr.bf16.mxu0 %v17278_v20  ;;  %v5286_v43 = vpop.f32.mrf.mxu1  ;;  %v6041_v52 = vpack.c.bf16 %v11191_v12, %v17303_v54  ;;  %v11246_v5 = vld [vmem:[%s20297_s0 + $0x1dc] sm:$0xff] }
 0x488   :  { %v5463_v58 = vpop.f32.mrf.mxu0  ;;  %v17308_v53 = vadd.f32 %v5461_v51, %v5285_v57  ;;  %20794 = vst [vmem:[#allocation38_spill] sm:$0xff] %v17310_v4  ;;  %v17321_v51 = vld [vmem:[%s20301_s5] ss:$0 sm:$0xff] }
 0x489   :  { %v5287_v0 = vpop.f32.mrf.mxu1 }
 0x48a   :  { %v5464_v48 = vpop.f32.mrf.mxu0  ;;  %v5288_v37 = vadd.f32 %v5287_v0, %v16671_v34  ;;  %v11208_v34 = vld [vmem:[%s20297_s0 + $0x1cb] sm:$0xff] }
 0x48b   :  { %v5289_v1 = vpop.f32.mrf.mxu1 }
 0x48c   :  { %v5466_v15 = vpop.f32.mrf.mxu0  ;;  %v17314_v22 = vadd.f32 %v5464_v48, %v5288_v37  ;;  %v11193_v48 = vld [vmem:[%s20297_s0 + $0x272] sm:$0x3f] }
 0x48d   :  { %v11872_v43 = vpop.f32.mrf.mxu1  ;;  %7170 = vmatmul.mubr.bf16.gmra.mxu1 %v6035_v25  ;;  %v11247_v25 = vld [vmem:[%s20297_s0 + $0x1e4] sm:$0xff]  ;;  %v6086_v15 = vpack.c.bf16 %v11209_v46, %v11208_v34 }
 0x48e   :  { %20795 = vst [vmem:[#allocation45_spill] sm:$0xff] %v17314_v22  ;;  %v17316_v58 = vpop.f32.mrf.mxu0  ;;  %7275 = vmatmul.mubr.bf16.gmra.mxu0 %v6085_v61  ;;  %v5511_v11 = vadd.f32 %v11872_v43, %v16751_v62  ;;  %7177 = vmatprep.mubr.bf16.mxu1 %v6041_v52  ;;  %v11192_v62 = vld [vmem:[%s20297_s0 + $0x26a] sm:$0xff]  ;;  %v17355_v43 = vpack.c.bf16 %v11247_v25, %v11246_v5 }
 0x48f   :  { %20796 = vst [vmem:[#allocation47_spill] sm:$0xff] %v17316_v58  ;;  %7282 = vmatprep.mubr.bf16.mxu0 %v17310_v4  ;;  %v5502_v12 = vpop.f32.mrf.mxu1  ;;  %v5733_v52 = vld [vmem:[%s20297_s0 + $0x23] sm:$0xff] }
 0x490   :  { %v6876_v57 = vpop.f32.mrf.mxu0  ;;  %v5654_v61 = vmul.f32 %v17321_v51, %v5511_v11  ;;  %v5503_v0 = vadd.f32 %v5502_v12, %v16703_v42  ;;  %20798 = vst [vmem:[#allocation48_spill] sm:$0xff] %v17355_v43  ;;  %v6042_v11 = vpack.c.bf16 %v11193_v48, %v11192_v62  ;;  %v5731_v42 = vld [vmem:[%s20297_s0 + $0x13] sm:$0xff]  ;;  %v5734_v62 = vld [vmem:[%s20297_s0 + $0x2b] sm:$0xff] }
 0x491   :  { %v11873_v1 = vpop.f32.mrf.mxu1 }
 0x492   :  { %v17350_v37 = vpop.f32.mrf.mxu0  ;;  %v5697_v57 = vadd.f32 %v17340_v7, %v5654_v61  ;;  %v5652_v58 = vmul.f32 %v17321_v51, %v5503_v0  ;;  %v5514_v4 = vadd.f32 %v11873_v1, %v16759_v23  ;;  %v11210_v23 = vld [vmem:[%s20297_s0 + $0x1db] sm:$0xff] }
 0x493   :  { %20797 = vst [vmem:[#allocation46_spill] sm:$0xff] %v17350_v37  ;;  %v5505_v34 = vpop.f32.mrf.mxu1  ;;  %v11249_v1 = vld [vmem:[%s20297_s0 + $0x1f4] sm:$0xff] }
 0x494   :  { %v6879_v3 = vpop.f32.mrf.mxu0  ;;  %v5769_v46 = vadd.f32 %v5733_v52, %v5697_v57  ;;  %v5695_v12 = vadd.f32 %v17340_v7, %v5652_v58  ;;  %v5655_v37 = vmul.f32 %v17321_v51, %v5514_v4  ;;  %v5506_v5 = vadd.f32 %v5505_v34, %v16715_v29  ;;  %v11190_v4 = vld [vmem:[%s20297_s0 + $0x262] sm:$0x3f]  ;;  %v11248_v58 = vld [vmem:[%s20297_s0 + $0x1ec] sm:$0xff]  ;;  %v11270_v57 = vld [vmem:[%s20297_s0 + $0x175] sm:$0xff] }
 0x495   :  { %v11211_v3 = vld [vmem:[%s20297_s0 + $0x1e3] sm:$0xff]  ;;  %v11876_v29 = vpop.f32.mrf.mxu1  ;;  %7178 = vmatmul.mubr.bf16.gmra.mxu1 %v17281_v56  ;;  %v11269_v56 = vld [vmem:[%s20297_s0 + $0x16d] sm:$0xff] }
 0x496   :  { %v17366_v25 = vpop.f32.mrf.mxu0  ;;  %7283 = vmatmul.mubr.bf16.gmra.mxu0 %v6086_v15  ;;  %v5805_v48 = vmax.f32 %v5769_v46, 0.0  ;;  %v5767_v61 = vadd.f32 %v5731_v42, %v5695_v12  ;;  %v5698_v0 = vadd.f32 %v17340_v7, %v5655_v37  ;;  %v5653_v15 = vmul.f32 %v17321_v51, %v5506_v5  ;;  %7185 = vmatprep.mubr.bf16.mxu1 %v6042_v11  ;;  %v5732_v37 = vld [vmem:[%s20297_s0 + $0x1b] sm:$0xff] }
 0x497   :  { %20799 = vst [vmem:[#allocation49_spill] sm:$0xff] %v17366_v25  ;;  %7290 = vmatprep.mubr.bf16.mxu0 %v17355_v43  ;;  %v5527_v42 = vadd.f32 %v11876_v29, %v16823_v44  ;;  %v5518_v34 = vpop.f32.mrf.mxu1  ;;  %v6087_v11 = vpack.c.bf16 %v11211_v3, %v11210_v23  ;;  %v6037_v43 = vpack.c.bf16 %v11190_v4, %v17303_v54 }
 0x498   :  { %v6884_v52 = vpop.f32.mrf.mxu0  ;;  %5841 = vst [vmem:[%s20303_s7 + $0x10] sm:$0xff] %v5805_v48  ;;  %v5803_v46 = vmax.f32 %v5767_v61, 0.0  ;;  %v5770_v12 = vadd.f32 %v5734_v62, %v5698_v0  ;;  %v5696_v5 = vadd.f32 %v17340_v7, %v5653_v15  ;;  %v17409_v44 = vpack.c.bf16 %v11249_v1, %v11248_v58  ;;  %v5735_v58 = vld [vmem:[%s20297_s0 + $0x33] sm:$0xff] }
 0x499   :  { %v5519_v52 = vadd.f32 %v5518_v34, %v16789_v33  ;;  %v5658_v22 = vmul.f32 %v17321_v51, %v5527_v42  ;;  %v11877_v63 = vpop.f32.mrf.mxu1  ;;  %v6192_v23 = vpack.c.bf16 %v11270_v57, %v11269_v56  ;;  %v5737_v33 = vld [vmem:[%s20297_s0 + $0x43] sm:$0xff] }
 0x49a   :  { %v17405_v25 = vpop.f32.mrf.mxu0  ;;  %5839 = vst [vmem:[%s20303_s7] sm:$0xff] %v5803_v46  ;;  %v5806_v3 = vmax.f32 %v5770_v12, 0.0  ;;  %v5768_v62 = vadd.f32 %v5732_v37, %v5696_v5  ;;  %v5530_v54 = vadd.f32 %v11877_v63, %v16832_v10  ;;  %v11212_v63 = vld [vmem:[%s20297_s0 + $0x1eb] sm:$0xff] }
 0x49b   :  { %v5656_v29 = vmul.f32 %v17321_v51, %v5519_v52  ;;  %v5701_v48 = vadd.f32 %v17340_v7, %v5658_v22  ;;  %v5521_v61 = vpop.f32.mrf.mxu1  ;;  %v11213_v22 = vld [vmem:[%s20297_s0 + $0x1f3] sm:$0xff]  ;;  %v5738_v37 = vld [vmem:[%s20297_s0 + $0x4b] sm:$0xff]  ;;  %v11271_v52 = vld [vmem:[%s20297_s0 + $0x17d] sm:$0xff] }
 0x49c   :  { %v6887_v4 = vpop.f32.mrf.mxu0  ;;  %5842 = vst [vmem:[%s20303_s7 + $0x18] sm:$0xff] %v5806_v3  ;;  %v5804_v0 = vmax.f32 %v5768_v62, 0.0  ;;  %v5659_v1 = vmul.f32 %v17321_v51, %v5530_v54  ;;  %v5522_v56 = vadd.f32 %v5521_v61, %v16797_v19  ;;  %v11250_v19 = vld [vmem:[%s20297_s0 + $0x1fc] sm:$0xff]  ;;  %v11272_v3 = vld [vmem:[%s20297_s0 + $0x185] sm:$0xff] }
 0x49d   :  { %v5699_v15 = vadd.f32 %v17340_v7, %v5656_v29  ;;  %v5773_v57 = vadd.f32 %v5737_v33, %v5701_v48  ;;  %v11880_v42 = vpop.f32.mrf.mxu1  ;;  %7186 = vmatmul.mubr.bf16.gmra.mxu1 %v6037_v43  ;;  %v11251_v43 = vld [vmem:[%s20297_s0 + $0x204] sm:$0xff]  ;;  %v5736_v33 = vld [vmem:[%s20297_s0 + $0x3b] sm:$0xff]  ;;  %v6088_v29 = vpack.c.bf16 %v11213_v22, %v11212_v63 }
 0x49e   :  { %v17429_v10 = vpop.f32.mrf.mxu0  ;;  %7291 = vmatmul.mubr.bf16.gmra.mxu0 %v6087_v11  ;;  %5840 = vst [vmem:[%s20303_s7 + $0x8] sm:$0xff] %v5804_v0  ;;  %v5702_v11 = vadd.f32 %v17340_v7, %v5659_v1  ;;  %v5657_v46 = vmul.f32 %v17321_v51, %v5522_v56  ;;  %v5543_v12 = vadd.f32 %v11880_v42, %v16895_v36  ;;  %v5741_v61 = vld [vmem:[%s20297_s0 + $0x63] sm:$0xff] }
 0x49f   :  { %7298 = vmatprep.mubr.bf16.mxu0 %v17409_v44  ;;  %v5771_v34 = vadd.f32 %v5735_v58, %v5699_v15  ;;  %7403 = vmatprep.mubr.bf16.mxu1 %v6192_v23  ;;  %v5809_v62 = vmax.f32 %v5773_v57, 0.0  ;;  %v5534_v36 = vpop.f32.mrf.mxu1  ;;  %v17473_v1 = vpack.c.bf16 %v11251_v43, %v11250_v19  ;;  %v6193_v56 = vpack.c.bf16 %v11272_v3, %v11271_v52  ;;  %v11215_v52 = vld [vmem:[%s20297_s0 + $0x203] sm:$0xff] }
 0x4a0   :  { %v6892_v5 = vpop.f32.mrf.mxu0  ;;  %v5774_v54 = vadd.f32 %v5738_v37, %v5702_v11  ;;  %v5700_v4 = vadd.f32 %v17340_v7, %v5657_v46  ;;  %v5662_v48 = vmul.f32 %v17321_v51, %v5543_v12  ;;  %v5535_v0 = vadd.f32 %v5534_v36, %v16859_v28  ;;  %v5739_v46 = vld [vmem:[%s20297_s0 + $0x53] sm:$0xff] }
 0x4a1   :  { %v5807_v23 = vmax.f32 %v5771_v34, 0.0  ;;  %5845 = vst [vmem:[%s20303_s7 + $0x30] sm:$0xff] %v5809_v62  ;;  %v11881_v15 = vpop.f32.mrf.mxu1  ;;  %v5742_v62 = vld [vmem:[%s20297_s0 + $0x6b] sm:$0xff] }
 0x4a2   :  { %v17464_v58 = vpop.f32.mrf.mxu0  ;;  %v5810_v63 = vmax.f32 %v5774_v54, 0.0  ;;  %v5772_v22 = vadd.f32 %v5736_v33, %v5700_v4  ;;  %v5705_v57 = vadd.f32 %v17340_v7, %v5662_v48  ;;  %v5546_v37 = vadd.f32 %v11881_v15, %v16904_v41  ;;  %v11214_v41 = vld [vmem:[%s20297_s0 + $0x1fb] sm:$0xff]  ;;  %v11273_v48 = vld [vmem:[%s20297_s0 + $0x18d] sm:$0xff] }
 0x4a3   :  { %5843 = vst [vmem:[%s20303_s7 + $0x20] sm:$0xff] %v5807_v23  ;;  %v5660_v34 = vmul.f32 %v17321_v51, %v5535_v0  ;;  %v5537_v11 = vpop.f32.mrf.mxu1  ;;  %v5740_v15 = vld [vmem:[%s20297_s0 + $0x5b] sm:$0xff] }
 0x4a4   :  { %v6895_v42 = vpop.f32.mrf.mxu0  ;;  %5846 = vst [vmem:[%s20303_s7 + $0x38] sm:$0xff] %v5810_v63  ;;  %v5808_v28 = vmax.f32 %v5772_v22, 0.0  ;;  %v5777_v19 = vadd.f32 %v5741_v61, %v5705_v57  ;;  %v5663_v12 = vmul.f32 %v17321_v51, %v5546_v37  ;;  %v5538_v5 = vadd.f32 %v5537_v11, %v16868_v27  ;;  %v11252_v27 = vld [vmem:[%s20297_s0 + $0x20c] sm:$0xff]  ;;  %v11274_v61 = vld [vmem:[%s20297_s0 + $0x195] sm:$0xff]  ;;  %v5745_v11 = vld [vmem:[%s20297_s0 + $0x83] sm:$0xff] }
 0x4a5   :  { %v5703_v3 = vadd.f32 %v17340_v7, %v5660_v34  ;;  %v11884_v33 = vpop.f32.mrf.mxu1  ;;  %7404 = vmatmul.mubr.bf16.vlgmr.msra.gmra.mxu1 %v17109_v45  ;;  %v11253_v45 = vld [vmem:[%s20297_s0 + $0x214] sm:$0xff]  ;;  %v6089_v63 = vpack.c.bf16 %v11215_v52, %v11214_v41 }
 0x4a6   :  { %v17489_v43 = vpop.f32.mrf.mxu0  ;;  %7299 = vmatmul.mubr.bf16.gmra.mxu0 %v6088_v29  ;;  %5844 = vst [vmem:[%s20303_s7 + $0x28] sm:$0xff] %v5808_v28  ;;  %v5813_v36 = vmax.f32 %v5777_v19, 0.0  ;;  %v5706_v29 = vadd.f32 %v17340_v7, %v5663_v12  ;;  %v5661_v23 = vmul.f32 %v17321_v51, %v5538_v5  ;;  %v5559_v54 = vadd.f32 %v11884_v33, %v16967_v59 }
 0x4a7   :  { %7306 = vmatprep.mubr.bf16.mxu0 %v17473_v1  ;;  %7411 = vmatprep.mubr.bf16.mxu1 %v6193_v56  ;;  %v5775_v0 = vadd.f32 %v5739_v46, %v5703_v3  ;;  %v5550_v59 = vpop.f32.mrf.mxu1  ;;  %v17535_v19 = vpack.c.bf16 %v11253_v45, %v11252_v27  ;;  %v6194_v46 = vpack.c.bf16 %v11274_v61, %v11273_v48  ;;  %v5746_v48 = vld [vmem:[%s20297_s0 + $0x8b] sm:$0xff] }
 0x4a8   :  { %v6900_v4 = vpop.f32.mrf.mxu0  ;;  %5849 = vst [vmem:[%s20303_s7 + $0x50] sm:$0xff] %v5813_v36  ;;  %v5778_v56 = vadd.f32 %v5742_v62, %v5706_v29  ;;  %v5704_v22 = vadd.f32 %v17340_v7, %v5661_v23  ;;  %v5666_v57 = vmul.f32 %v17321_v51, %v5559_v54  ;;  %v5551_v37 = vadd.f32 %v5550_v59, %v16931_v8  ;;  %v5743_v8 = vld [vmem:[%s20297_s0 + $0x73] sm:$0xff] }
 0x4a9   :  { %v5811_v34 = vmax.f32 %v5775_v0, 0.0  ;;  %v11885_v28 = vpop.f32.mrf.mxu1  ;;  %v11216_v4 = vld [vmem:[%s20297_s0 + $0x20b] sm:$0xff] }
 0x4aa   :  { %v17530_v42 = vpop.f32.mrf.mxu0  ;;  %v5814_v12 = vmax.f32 %v5778_v56, 0.0  ;;  %v5776_v5 = vadd.f32 %v5740_v15, %v5704_v22  ;;  %v5709_v41 = vadd.f32 %v17340_v7, %v5666_v57  ;;  %v5664_v52 = vmul.f32 %v17321_v51, %v5551_v37  ;;  %v11275_v22 = vld [vmem:[%s20297_s0 + $0x19d] sm:$0xff]  ;;  %v11276_v57 = vld [vmem:[%s20297_s0 + $0x1a5] sm:$0xff] }
 0x4ab   :  { %5847 = vst [vmem:[%s20303_s7 + $0x40] sm:$0xff] %v5811_v34  ;;  %v5562_v62 = vadd.f32 %v11885_v28, %v16976_v49  ;;  %v5553_v33 = vpop.f32.mrf.mxu1  ;;  %v11217_v49 = vld [vmem:[%s20297_s0 + $0x213] sm:$0xff] }
 0x4ac   :  { %v6903_v3 = vpop.f32.mrf.mxu0  ;;  %5850 = vst [vmem:[%s20303_s7 + $0x58] sm:$0xff] %v5814_v12  ;;  %v5812_v27 = vmax.f32 %v5776_v5, 0.0  ;;  %v5781_v36 = vadd.f32 %v5745_v11, %v5709_v41  ;;  %v5707_v29 = vadd.f32 %v17340_v7, %v5664_v52  ;;  %v5554_v23 = vadd.f32 %v5553_v33, %v16940_v21  ;;  %v11254_v21 = vld [vmem:[%s20297_s0 + $0x21c] sm:$0xff] }
 0x4ad   :  { %v5667_v45 = vmul.f32 %v17321_v51, %v5562_v62  ;;  %v11888_v61 = vpop.f32.mrf.mxu1  ;;  %7412 = vmatmul.mubr.bf16.gmra.mxu1 %v17144_v16  ;;  %v11255_v16 = vld [vmem:[%s20297_s0 + $0x224] sm:$0xff]  ;;  %v6090_v11 = vpack.c.bf16 %v11217_v49, %v11216_v4  ;;  %v6195_v33 = vpack.c.bf16 %v11276_v57, %v11275_v22  ;;  %v5747_v49 = vld [vmem:[%s20297_s0 + $0x93] sm:$0xff] }
 0x4ae   :  { %v17551_v54 = vpop.f32.mrf.mxu0  ;;  %7307 = vmatmul.mubr.bf16.gmra.mxu0 %v6089_v63  ;;  %5848 = vst [vmem:[%s20303_s7 + $0x48] sm:$0xff] %v5812_v27  ;;  %v5817_v0 = vmax.f32 %v5781_v36, 0.0  ;;  %v5779_v15 = vadd.f32 %v5743_v8, %v5707_v29  ;;  %v5665_v59 = vmul.f32 %v17321_v51, %v5554_v23  ;;  %v5575_v63 = vadd.f32 %v11888_v61, %v17039_v31  ;;  %v5744_v31 = vld [vmem:[%s20297_s0 + $0x7b] sm:$0xff]  ;;  %v5749_v3 = vld [vmem:[%s20297_s0 + $0xa3] sm:$0xff]  ;;  %v11256_v22 = vld [vmem:[%s20297_s0 + $0x22c] sm:$0xff] }
 0x4af   :  { %7314 = vmatprep.mubr.bf16.mxu0 %v17535_v19  ;;  %7419 = vmatprep.mubr.bf16.mxu1 %v6194_v46  ;;  %v5710_v37 = vadd.f32 %v17340_v7, %v5667_v45  ;;  %v5566_v34 = vpop.f32.mrf.mxu1  ;;  %v17597_v62 = vpack.c.bf16 %v11255_v16, %v11254_v21 }
 0x4b0   :  { %v6908_v56 = vpop.f32.mrf.mxu0  ;;  %5853 = vst [vmem:[%s20303_s7 + $0x70] sm:$0xff] %v5817_v0  ;;  %v5815_v28 = vmax.f32 %v5779_v15, 0.0  ;;  %v5708_v46 = vadd.f32 %v17340_v7, %v5665_v59  ;;  %v5670_v12 = vmul.f32 %v17321_v51, %v5575_v63  ;;  %v5567_v5 = vadd.f32 %v5566_v34, %v17003_v6  ;;  %v11219_v59 = vld [vmem:[%s20297_s0 + $0x223] sm:$0xff]  ;;  %v5750_v63 = vld [vmem:[%s20297_s0 + $0xab] sm:$0xff] }
 0x4b1   :  { %v5782_v52 = vadd.f32 %v5746_v48, %v5710_v37  ;;  %v11889_v8 = vpop.f32.mrf.mxu1 }
 0x4b2   :  { %v17592_v41 = vpop.f32.mrf.mxu0  ;;  %5851 = vst [vmem:[%s20303_s7 + $0x60] sm:$0xff] %v5815_v28  ;;  %v5780_v27 = vadd.f32 %v5744_v31, %v5708_v46  ;;  %v5713_v36 = vadd.f32 %v17340_v7, %v5670_v12  ;;  %v5668_v6 = vmul.f32 %v17321_v51, %v5567_v5  ;;  %v5578_v29 = vadd.f32 %v11889_v8, %v17048_v40  ;;  %v11218_v40 = vld [vmem:[%s20297_s0 + $0x21b] sm:$0xff] }
 0x4b3   :  { %v5818_v4 = vmax.f32 %v5782_v52, 0.0  ;;  %v5569_v45 = vpop.f32.mrf.mxu1  ;;  %v11278_v28 = vld [vmem:[%s20297_s0 + $0x1b5] sm:$0xff]  ;;  %v6091_v5 = vpack.c.bf16 %v11219_v59, %v11218_v40 }
 0x4b4   :  { %v6911_v23 = vpop.f32.mrf.mxu0  ;;  %v5816_v48 = vmax.f32 %v5780_v27, 0.0  ;;  %v5785_v61 = vadd.f32 %v5749_v3, %v5713_v36  ;;  %v5711_v21 = vadd.f32 %v17340_v7, %v5668_v6  ;;  %v5671_v0 = vmul.f32 %v17321_v51, %v5578_v29  ;;  %v5748_v3 = vld [vmem:[%s20297_s0 + $0x9b] sm:$0xff]  ;;  %v5753_v6 = vld [vmem:[%s20297_s0 + $0xc3] sm:$0xff] }
 0x4b5   :  { %5854 = vst [vmem:[%s20303_s7 + $0x78] sm:$0xff] %v5818_v4  ;;  %v5570_v56 = vadd.f32 %v5569_v45, %v17012_v13  ;;  %v11892_v16 = vpop.f32.mrf.mxu1  ;;  %7420 = vmatmul.mubr.bf16.gmra.mxu1 %v17181_v17  ;;  %v11257_v17 = vld [vmem:[%s20297_s0 + $0x234] sm:$0xff] }
 0x4b6   :  { %v17610_v15 = vpop.f32.mrf.mxu0  ;;  %7315 = vmatmul.mubr.bf16.gmra.mxu0 %v6090_v11  ;;  %5852 = vst [vmem:[%s20303_s7 + $0x68] sm:$0xff] %v5816_v48  ;;  %v5821_v57 = vmax.f32 %v5785_v61, 0.0  ;;  %v5783_v37 = vadd.f32 %v5747_v49, %v5711_v21  ;;  %v5714_v31 = vadd.f32 %v17340_v7, %v5671_v0  ;;  %v5591_v34 = vadd.f32 %v11892_v16, %v17104_v24  ;;  %v11277_v11 = vld [vmem:[%s20297_s0 + $0x1ad] sm:$0xff] }
 0x4b7   :  { %7322 = vmatprep.mubr.bf16.mxu0 %v17597_v62  ;;  %7427 = vmatprep.mubr.bf16.mxu1 %v6195_v33  ;;  %v5669_v46 = vmul.f32 %v17321_v51, %v5570_v56  ;;  %v5582_v12 = vpop.f32.mrf.mxu1  ;;  %v17659_v23 = vpack.c.bf16 %v11257_v17, %v11256_v22  ;;  %v6196_v4 = vpack.c.bf16 %v11278_v28, %v11277_v11  ;;  %v5751_v0 = vld [vmem:[%s20297_s0 + $0xb3] sm:$0xff] }
 0x4b8   :  { %v6916_v13 = vpop.f32.mrf.mxu0  ;;  %5857 = vst [vmem:[%s20303_s7 + $0x90] sm:$0xff] %v5821_v57  ;;  %v5819_v24 = vmax.f32 %v5783_v37, 0.0  ;;  %v5786_v52 = vadd.f32 %v5750_v63, %v5714_v31  ;;  %v5674_v8 = vmul.f32 %v17321_v51, %v5591_v34  ;;  %v5583_v33 = vadd.f32 %v5582_v12, %v17075_v26  ;;  %v11221_v57 = vld [vmem:[%s20297_s0 + $0x233] sm:$0xff]  ;;  %v5754_v31 = vld [vmem:[%s20297_s0 + $0xcb] sm:$0xff] }
 0x4b9   :  { %v5712_v36 = vadd.f32 %v17340_v7, %v5669_v46  ;;  %v11893_v29 = vpop.f32.mrf.mxu1  ;;  %v11259_v12 = vld [vmem:[%s20297_s0 + $0x244] sm:$0xff] }
 0x4ba   :  { %v17653_v27 = vpop.f32.mrf.mxu0  ;;  %5855 = vst [vmem:[%s20303_s7 + $0x80] sm:$0xff] %v5819_v24  ;;  %v5822_v49 = vmax.f32 %v5786_v52, 0.0  ;;  %v5717_v45 = vadd.f32 %v17340_v7, %v5674_v8  ;;  %v5672_v26 = vmul.f32 %v17321_v51, %v5583_v33  ;;  %v5594_v48 = vadd.f32 %v11893_v29, %v17114_v2  ;;  %v11220_v2 = vld [vmem:[%s20297_s0 + $0x22b] sm:$0xff]  ;;  %v5752_v24 = vld [vmem:[%s20297_s0 + $0xbb] sm:$0xff] }
 0x4bb   :  { %v5784_v21 = vadd.f32 %v5748_v3, %v5712_v36  ;;  %v5585_v40 = vpop.f32.mrf.mxu1  ;;  %v6092_v8 = vpack.c.bf16 %v11221_v57, %v11220_v2 }
 0x4bc   :  { %v6919_v61 = vpop.f32.mrf.mxu0  ;;  %5858 = vst [vmem:[%s20303_s7 + $0x98] sm:$0xff] %v5822_v49  ;;  %v5789_v59 = vadd.f32 %v5753_v6, %v5717_v45  ;;  %v5715_v63 = vadd.f32 %v17340_v7, %v5672_v26  ;;  %v5675_v56 = vmul.f32 %v17321_v51, %v5594_v48  ;;  %v5586_v16 = vadd.f32 %v5585_v40, %v17081_v39  ;;  %v11258_v39 = vld [vmem:[%s20297_s0 + $0x23c] sm:$0xff] }
 0x4bd   :  { %v5820_v37 = vmax.f32 %v5784_v21, 0.0  ;;  %v11896_v34 = vpop.f32.mrf.mxu1  ;;  %7428 = vmatmul.mubr.bf16.gmra.mxu1 %v17218_v18  ;;  %v11279_v18 = vld [vmem:[%s20297_s0 + $0x1bd] sm:$0xff]  ;;  %v17718_v26 = vpack.c.bf16 %v11259_v12, %v11258_v39 }
 0x4be   :  { %v17676_v22 = vpop.f32.mrf.mxu0  ;;  %7323 = vmatmul.mubr.bf16.gmra.mxu0 %v6091_v5  ;;  %v5825_v13 = vmax.f32 %v5789_v59, 0.0  ;;  %v5787_v17 = vadd.f32 %v5751_v0, %v5715_v63  ;;  %v5718_v11 = vadd.f32 %v17340_v7, %v5675_v56  ;;  %v5673_v28 = vmul.f32 %v17321_v51, %v5586_v16  ;;  %7435 = vmatprep.mubr.bf16.mxu1 %v6196_v4  ;;  %v11280_v5 = vld [vmem:[%s20297_s0 + $0x1c5] sm:$0xff]  ;;  %v5755_v63 = vld [vmem:[%s20297_s0 + $0xd3] sm:$0xff] }
 0x4bf   :  { %7330 = vmatprep.mubr.bf16.mxu0 %v17659_v23  ;;  %5856 = vst [vmem:[%s20303_s7 + $0x88] sm:$0xff] %v5820_v37  ;;  %v5607_v52 = vadd.f32 %v11896_v34, %v17179_v9  ;;  %v5598_v3 = vpop.f32.mrf.mxu1  ;;  %v6197_v9 = vpack.c.bf16 %v11280_v5, %v11279_v18  ;;  %v5757_v21 = vld [vmem:[%s20297_s0 + $0xe3] sm:$0xff]  ;;  %v11281_v5 = vld [vmem:[%s20297_s0 + $0x1cd] sm:$0xff] }
 0x4c0   :  { %v6924_v46 = vpop.f32.mrf.mxu0  ;;  %5861 = vst [vmem:[%s20303_s7 + $0xb0] sm:$0xff] %v5825_v13  ;;  %v5823_v33 = vmax.f32 %v5787_v17, 0.0  ;;  %v5790_v36 = vadd.f32 %v5754_v31, %v5718_v11  ;;  %v5716_v6 = vadd.f32 %v17340_v7, %v5673_v28  ;;  %v5599_v29 = vadd.f32 %v5598_v3, %v17142_v30  ;;  %v11222_v31 = vld [vmem:[%s20297_s0 + $0x23b] sm:$0xff]  ;;  %v11223_v34 = vld [vmem:[%s20297_s0 + $0x243] sm:$0xff]  ;;  %v5758_v13 = vld [vmem:[%s20297_s0 + $0xeb] sm:$0xff] }
 0x4c1   :  { %v5678_v49 = vmul.f32 %v17321_v51, %v5607_v52  ;;  %v11897_v45 = vpop.f32.mrf.mxu1  ;;  %v5756_v3 = vld [vmem:[%s20297_s0 + $0xdb] sm:$0xff] }
 0x4c2   :  { %v17715_v4 = vpop.f32.mrf.mxu0  ;;  %5859 = vst [vmem:[%s20303_s7 + $0xa0] sm:$0xff] %v5823_v33  ;;  %v5826_v48 = vmax.f32 %v5790_v36, 0.0  ;;  %v5788_v61 = vadd.f32 %v5752_v24, %v5716_v6  ;;  %v5676_v30 = vmul.f32 %v17321_v51, %v5599_v29  ;;  %v5610_v0 = vadd.f32 %v11897_v45, %v17189_v14  ;;  %v11282_v24 = vld [vmem:[%s20297_s0 + $0x1d5] sm:$0xff] }
 0x4c3   :  { %v5721_v59 = vadd.f32 %v17340_v7, %v5678_v49  ;;  %v5601_v56 = vpop.f32.mrf.mxu1  ;;  %v12328_v33 = vld [vmem:[%s20298_s4 + $0x38] sm:$0xff]  }
 0x4c4   :  { %v6927_v40 = vpop.f32.mrf.mxu0  ;;  %5862 = vst [vmem:[%s20303_s7 + $0xb8] sm:$0xff] %v5826_v48  ;;  %v5824_v16 = vmax.f32 %v5788_v61, 0.0  ;;  %v5719_v2 = vadd.f32 %v17340_v7, %v5676_v30  ;;  %v5679_v57 = vmul.f32 %v17321_v51, %v5610_v0  ;;  %v5602_v37 = vadd.f32 %v5601_v56, %v17152_v60  ;;  %v11260_v60 = vld [vmem:[%s20297_s0 + $0x24c] sm:$0xff]  ;;  %9751 = vmatpush1.bf16.msra.mxu1 %v12328_v33 }
 0x4c5   :  { %v5793_v39 = vadd.f32 %v5757_v21, %v5721_v59  ;;  %v11900_v17 = vpop.f32.mrf.mxu1  ;;  %7436 = vmatmul.mubr.bf16.gmra.mxu1 %v17249_v55  ;;  %v11261_v55 = vld [vmem:[%s20297_s0 + $0x254] sm:$0xff]  ;;  %v6198_v30 = vpack.c.bf16 %v11282_v24, %v11281_v5  ;;  %9752 = vmatprep.subr.bf16.mxu1 %v20643_v35  ;;  %v11283_v5 = vld [vmem:[%s20297_s0 + $0x1dd] sm:$0xff]  ;;  %v11284_v24 = vld [vmem:[%s20297_s0 + $0x1e5] sm:$0xff] }
 0x4c6   :  { %v17738_v14 = vpop.f32.mrf.mxu0  ;;  %7331 = vmatmul.mubr.bf16.gmra.mxu0 %v6092_v8  ;;  %5860 = vst [vmem:[%s20303_s7 + $0xa8] sm:$0xff] %v5824_v16  ;;  %v5791_v11 = vadd.f32 %v5755_v63, %v5719_v2  ;;  %v5722_v28 = vadd.f32 %v17340_v7, %v5679_v57  ;;  %v5677_v46 = vmul.f32 %v17321_v51, %v5602_v37  ;;  %v5759_v37 = vld [vmem:[%s20297_s0 + $0xf3] sm:$0xff] }
 0x4c7   :  { %7338 = vmatprep.mubr.bf16.mxu0 %v17718_v26  ;;  %v5623_v12 = vadd.f32 %v11900_v17, %v17247_v38  ;;  %7443 = vmatprep.mubr.bf16.mxu1 %v6197_v9  ;;  %v5829_v52 = vmax.f32 %v5793_v39, 0.0  ;;  %v5614_v38 = vpop.f32.mrf.mxu1  ;;  %v6093_v8 = vpack.c.bf16 %v11223_v34, %v11222_v31  ;;  %v5761_v9 = vld [vmem:[%s20297_s0 + $0x103] sm:$0xff]  ;;  %v17786_v21 = vpack.c.bf16 %v11261_v55, %v11260_v60  ;;  %v11224_v39 = vld [vmem:[%s20297_s0 + $0x24b] sm:$0xff] }
 0x4c8   :  { %v6932_v18 = vpop.f32.mrf.mxu0  ;;  %v5827_v36 = vmax.f32 %v5791_v11, 0.0  ;;  %v5794_v6 = vadd.f32 %v5758_v13, %v5722_v28  ;;  %v5720_v29 = vadd.f32 %v17340_v7, %v5677_v46  ;;  %v5615_v48 = vadd.f32 %v5614_v38, %v17216_v50  ;;  %v11225_v13 = vld [vmem:[%s20297_s0 + $0x253] sm:$0xff]  ;;  %v5762_v60 = vld [vmem:[%s20297_s0 + $0x10b] sm:$0xff] }
 0x4c9   :  { %v5682_v49 = vmul.f32 %v17321_v51, %v5623_v12  ;;  %5865 = vst [vmem:[%s20303_s7 + $0xd0] sm:$0xff] %v5829_v52  ;;  %v11901_v61 = vpop.f32.mrf.mxu1  ;;  %v6094_v38 = vpack.c.bf16 %v11225_v13, %v11224_v39 }
 0x4ca   :  { %v17777_v45 = vpop.f32.mrf.mxu0  ;;  %5863 = vst [vmem:[%s20303_s7 + $0xc0] sm:$0xff] %v5827_v36  ;;  %v5830_v0 = vmax.f32 %v5794_v6, 0.0  ;;  %v5792_v40 = vadd.f32 %v5756_v3, %v5720_v29  ;;  %v5626_v63 = vadd.f32 %v11901_v61, %v17253_v47  ;;  %v5680_v50 = vmul.f32 %v17321_v51, %v5615_v48  ;;  %v5760_v3 = vld [vmem:[%s20297_s0 + $0xfb] sm:$0xff]  ;;  %v5765_v61 = vld [vmem:[%s20297_s0 + $0x123] sm:$0xff] }
 0x4cb   :  { %v5725_v59 = vadd.f32 %v17340_v7, %v5682_v49  ;;  %v5617_v16 = vpop.f32.mrf.mxu1  ;;  %v20800_v29 = vld [vmem:[#allocation37_spill] sm:$0xff] }
 0x4cc   :  { %v6935_v56 = vpop.f32.mrf.mxu0  ;;  %5866 = vst [vmem:[%s20303_s7 + $0xd8] sm:$0xff] %v5830_v0  ;;  %v5828_v2 = vmax.f32 %v5792_v40, 0.0  ;;  %v5683_v31 = vmul.f32 %v17321_v51, %v5626_v63  ;;  %v5618_v47 = vadd.f32 %v5617_v16, %v17224_v32  ;;  %v5723_v17 = vadd.f32 %v17340_v7, %v5680_v50  ;;  %v11262_v32 = vld [vmem:[%s20297_s0 + $0x25c] sm:$0xff] }
 0x4cd   :  { %v5797_v57 = vadd.f32 %v5761_v9, %v5725_v59  ;;  %v11904_v11 = vpop.f32.mrf.mxu1  ;;  %7444 = vmatmul.mubr.bf16.gmra.mxu1 %v17278_v20  ;;  %v11263_v20 = vld [vmem:[%s20297_s0 + $0x264] sm:$0xff]  ;;  %v6199_v40 = vpack.c.bf16 %v11284_v24, %v11283_v5 }
 0x4ce   :  { %v17803_v34 = vpop.f32.mrf.mxu0  ;;  %7339 = vmatmul.mubr.bf16.gmra.mxu0 %v6093_v8  ;;  %5864 = vst [vmem:[%s20303_s7 + $0xc8] sm:$0xff] %v5828_v2  ;;  %v5726_v46 = vadd.f32 %v17340_v7, %v5683_v31  ;;  %v5681_v12 = vmul.f32 %v17321_v51, %v5618_v47  ;;  %v5639_v18 = vadd.f32 %v11904_v11, %v17308_v53  ;;  %v12329_v8 = vld [vmem:[%s20298_s4 + $0x30] sm:$0xff]  }
 0x4cf   :  { %7346 = vmatprep.mubr.bf16.mxu0 %v17786_v21  ;;  %v5833_v28 = vmax.f32 %v5797_v57, 0.0  ;;  %7451 = vmatprep.mubr.bf16.mxu1 %v6198_v30  ;;  %v5795_v52 = vadd.f32 %v5759_v37, %v5723_v17  ;;  %v5630_v53 = vpop.f32.mrf.mxu1  ;;  %v17852_v0 = vpack.c.bf16 %v11263_v20, %v11262_v32  ;;  %v5763_v2 = vld [vmem:[%s20297_s0 + $0x113] sm:$0xff]  ;;  %v5766_v5 = vld [vmem:[%s20297_s0 + $0x12b] sm:$0x3f] }
 0x4d0   :  { %v6940_v55 = vpop.f32.mrf.mxu0  ;;  %v5798_v33 = vadd.f32 %v5762_v60, %v5726_v46  ;;  %v5724_v36 = vadd.f32 %v17340_v7, %v5681_v12  ;;  %v5686_v6 = vmul.f32 %v17321_v51, %v5639_v18  ;;  %v5631_v49 = vadd.f32 %v5630_v53, %v20800_v29  ;;  %9753 = vmatpush1.bf16.msra.mxu1 %v12329_v8  ;;  %v20801_v57 = vld [vmem:[#allocation45_spill] sm:$0xff]  ;;  %v20803_v46 = vld [vmem:[#allocation38_spill] sm:$0xff] }
 0x4d1   :  { %5869 = vst [vmem:[%s20303_s7 + $0xf0] sm:$0xff] %v5833_v28  ;;  %v5831_v48 = vmax.f32 %v5795_v52, 0.0  ;;  %v11905_v30 = vpop.f32.mrf.mxu1  ;;  %9754 = vmatprep.subr.bf16.mxu1 %v20643_v35  ;;  %v20802_v17 = vld [vmem:[#allocation41_spill] sm:$0xff]  ;;  %v11227_v18 = vld [vmem:[%s20297_s0 + $0x263] sm:$0xff] }
 0x4d2   :  { %v17847_v9 = vpop.f32.mrf.mxu0  ;;  %v5834_v59 = vmax.f32 %v5798_v33, 0.0  ;;  %v5796_v63 = vadd.f32 %v5760_v3, %v5724_v36  ;;  %v5729_v56 = vadd.f32 %v17340_v7, %v5686_v6  ;;  %v5684_v50 = vmul.f32 %v17321_v51, %v5631_v49  ;;  %v11226_v12 = vld [vmem:[%s20297_s0 + $0x25b] sm:$0xff]  ;;  %v17892_v3 = vld [vmem:[%s20297_s0 + $0x26c] sm:$0xff]  ;;  %v11265_v53 = vld [vmem:[%s20297_s0 + $0x274] sm:$0x3f] }
 0x4d3   :  { %5867 = vst [vmem:[%s20303_s7 + $0xe0] sm:$0xff] %v5831_v48  ;;  %v5642_v37 = vadd.f32 %v11905_v30, %v20801_v57  ;;  %v5633_v31 = vpop.f32.mrf.mxu1  ;;  %v5764_v8 = vld [vmem:[%s20297_s0 + $0x11b] sm:$0xff]  ;;  %v6095_v48 = vpack.c.bf16 %v11227_v18, %v11226_v12  ;;  %v11288_v12 = vld [vmem:[%s20297_s0 + $0x205] sm:$0xff] }
 0x4d4   :  { %v6943_v16 = vpop.f32.mrf.mxu0  ;;  %5870 = vst [vmem:[%s20303_s7 + $0xf8] sm:$0xff] %v5834_v59  ;;  %v5832_v47 = vmax.f32 %v5796_v63, 0.0  ;;  %v5801_v39 = vadd.f32 %v5765_v61, %v5729_v56  ;;  %v5727_v13 = vadd.f32 %v17340_v7, %v5684_v50  ;;  %v5634_v60 = vadd.f32 %v5633_v31, %v20802_v17  ;;  %v11286_v36 = vld [vmem:[%s20297_s0 + $0x1f5] sm:$0xff]  ;;  %v12330_v50 = vld [vmem:[%s20298_s4 + $0x28] sm:$0xff]  }
 0x4d5   :  { %v5687_v32 = vmul.f32 %v17321_v51, %v5642_v37  ;;  %v17872_v28 = vpop.f32.mrf.mxu1  ;;  %7452 = vmatmul.mubr.bf16.gmra.mxu1 %v20803_v46  ;;  %v20804_v31 = vld [vmem:[#allocation48_spill] sm:$0xff]  ;;  %v11287_v46 = vld [vmem:[%s20297_s0 + $0x1fd] sm:$0xff] }
 0x4d6   :  { %v17869_v11 = vpop.f32.mrf.mxu0  ;;  %7347 = vmatmul.mubr.bf16.gmra.mxu0 %v6094_v38  ;;  %5868 = vst [vmem:[%s20303_s7 + $0xe8] sm:$0xff] %v5832_v47  ;;  %v5837_v55 = vmax.f32 %v5801_v39, 0.0  ;;  %v5799_v20 = vadd.f32 %v5763_v2, %v5727_v13  ;;  %v5685_v24 = vmul.f32 %v17321_v51, %v5634_v60  ;;  %7459 = vmatprep.mubr.bf16.mxu1 %v6199_v40  ;;  %v11285_v51 = vld [vmem:[%s20297_s0 + $0x1ed] sm:$0xff]  ;;  %v11306_v60 = vld [vmem:[%s20297_s0 + $0x176] sm:$0xff] }
 0x4d7   :  { %7354 = vmatprep.mubr.bf16.mxu0 %v17852_v0  ;;  %v5730_v38 = vadd.f32 %v17340_v7, %v5687_v32  ;;  %v7053_v33 = vpop.f32.mrf.mxu1  ;;  %v6150_v40 = vpack.c.bf16 %v11265_v53, %v17892_v3  ;;  %v6200_v56 = vpack.c.bf16 %v11286_v36, %v11285_v51  ;;  %9755 = vmatpush1.bf16.msra.mxu1 %v12330_v50  ;;  %v11228_v47 = vld [vmem:[%s20297_s0 + $0x26b] sm:$0xff]  ;;  %v11229_v39 = vld [vmem:[%s20297_s0 + $0x273] sm:$0x3f]  ;;  %v12331_v53 = vld [vmem:[%s20298_s4 + $0x20] sm:$0xff]  }
 0x4d8   :  { %v6948_v52 = vpop.f32.mrf.mxu0  ;;  %5873 = vst [vmem:[%s20303_s7 + $0x110] sm:$0xff] %v5837_v55  ;;  %v5835_v6 = vmax.f32 %v5799_v20, 0.0  ;;  %v5728_v29 = vadd.f32 %v17340_v7, %v5685_v24  ;;  %v11305_v17 = vld [vmem:[%s20297_s0 + $0x16e] sm:$0xff]  ;;  %9756 = vmatprep.subr.bf16.mxu1 %v20643_v35  ;;  %v6096_v55 = vpack.c.bf16 %v11229_v39, %v11228_v47  ;;  %v11307_v51 = vld [vmem:[%s20297_s0 + $0x17e] sm:$0xff]  ;;  %v11308_v36 = vld [vmem:[%s20297_s0 + $0x186] sm:$0xff] }
 0x4d9   :  { %v5802_v61 = vadd.f32 %v5766_v5, %v5730_v38  ;;  %v17913_v30 = vpop.f32.mrf.mxu1  ;;  %v6246_v5 = vpack.c.bf16 %v11306_v60, %v11305_v17  ;;  %v6201_v52 = vpack.c.bf16 %v11288_v12, %v11287_v46  ;;  %v11312_v17 = vld [vmem:[%s20297_s0 + $0x1a6] sm:$0xff]  ;;  %v11314_v46 = vld [vmem:[%s20297_s0 + $0x1b6] sm:$0xff] }
 0x4da   :  { %v17911_v49 = vpop.f32.mrf.mxu0  ;;  %5871 = vst [vmem:[%s20303_s7 + $0x100] sm:$0xff] %v5835_v6  ;;  %v5800_v59 = vadd.f32 %v5764_v8, %v5728_v29  ;;  %v11309_v29 = vld [vmem:[%s20297_s0 + $0x18e] sm:$0xff]  ;;  %v11291_v12 = vld [vmem:[%s20297_s0 + $0x21d] sm:$0xff] }
 0x4db   :  { %v5838_v7 = vmax.f32 %v5802_v61, 0.0  ;;  %v7056_v16 = vpop.f32.mrf.mxu1  ;;  %9757 = vmatpush1.bf16.msra.mxu1 %v12331_v53  ;;  %v11289_v61 = vld [vmem:[%s20297_s0 + $0x20d] sm:$0xff] }
 0x4dc   :  { %v6951_v63 = vpop.f32.mrf.mxu0  ;;  %v5836_v2 = vmax.f32 %v5800_v59, 0.0  ;;  %9758 = vmatprep.subr.bf16.mxu1 %v20643_v35 }
 0x4dd   :  { %5874 = vst [vmem:[%s20303_s7 + $0x118] sm:$0x3f] %v5838_v7  ;;  %v17927_v37 = vpop.f32.mrf.mxu1  ;;  %7460 = vmatmul.mubr.bf16.gmra.mxu1 %v20804_v31  ;;  %v6247_v63 = vpack.c.bf16 %v11308_v36, %v11307_v51  ;;  %v12332_v31 = vld [vmem:[%s20298_s4 + $0x18] sm:$0xff]  }
 0x4de   :  { %v17922_v57 = vpop.f32.mrf.mxu0  ;;  %7355 = vmatmul.mubr.bf16.gmra.mxu0 %v6095_v48  ;;  %5872 = vst [vmem:[%s20303_s7 + $0x108] sm:$0xff] %v5836_v2  ;;  %7467 = vmatprep.mubr.bf16.mxu1 %v6200_v56  ;;  %v11310_v48 = vld [vmem:[%s20297_s0 + $0x196] sm:$0xff] }
 0x4df   :  { %7362 = vmatprep.mubr.bf16.mxu0 %v6150_v40  ;;  %v7061_v32 = vpop.f32.mrf.mxu1  ;;  %v11290_v40 = vld [vmem:[%s20297_s0 + $0x215] sm:$0xff]  ;;  %v6248_v50 = vpack.c.bf16 %v11310_v48, %v11309_v29  ;;  %9759 = vmatpush1.bf16.msra.mxu1 %v12332_v31 }
 0x4e0   :  { %v6956_v13 = vpop.f32.mrf.mxu0  ;;  %v6202_v16 = vpack.c.bf16 %v11290_v40, %v11289_v61  ;;  %v11313_v32 = vld [vmem:[%s20297_s0 + $0x1ae] sm:$0xff]  ;;  %9760 = vmatprep.subr.bf16.mxu1 %v20643_v35  ;;  %v11316_v61 = vld [vmem:[%s20297_s0 + $0x1c6] sm:$0xff] }
 0x4e1   :  { %v17954_v20 = vpop.f32.mrf.mxu1  ;;  %v11311_v13 = vld [vmem:[%s20297_s0 + $0x19e] sm:$0xff]  ;;  %v6250_v53 = vpack.c.bf16 %v11314_v46, %v11313_v32 }
 0x4e2   :  { %v17952_v18 = vpop.f32.mrf.mxu0 }
 0x4e3   :  { %v7064_v38 = vpop.f32.mrf.mxu1 }
 0x4e4   :  { %v6959_v24 = vpop.f32.mrf.mxu0 }
 0x4e5   :  { %v17961_v33 = vpop.f32.mrf.mxu1  ;;  %7468 = vmatmul.mubr.bf16.gmra.mxu1 %v17409_v44  ;;  %v6249_v24 = vpack.c.bf16 %v11312_v17, %v11311_v13 }
 0x4e6   :  { %v17959_v8 = vpop.f32.mrf.mxu0  ;;  %7363 = vmatmul.mubr.bf16.gmra.mxu0 %v6096_v55  ;;  %7475 = vmatprep.mubr.bf16.mxu1 %v6201_v52  ;;  %v11292_v55 = vld [vmem:[%s20297_s0 + $0x225] sm:$0xff] }
 0x4e7   :  { %11922 = vmatprep.mubr.bf16.mxu0 %v6246_v5  ;;  %v7069_v44 = vpop.f32.mrf.mxu1  ;;  %v6203_v51 = vpack.c.bf16 %v11292_v55, %v11291_v12  ;;  %v11319_v55 = vld [vmem:[%s20297_s0 + $0x1de] sm:$0xff] }
 0x4e8   :  { %v6964_v6 = vpop.f32.mrf.mxu0  ;;  %v11315_v44 = vld [vmem:[%s20297_s0 + $0x1be] sm:$0xff] }
 0x4e9   :  { %v17985_v56 = vpop.f32.mrf.mxu1  ;;  %v12333_v6 = vld [vmem:[%s20298_s4 + $0x10] sm:$0xff]   ;;  %v6251_v31 = vpack.c.bf16 %v11316_v61, %v11315_v44  ;;  %v11296_v44 = vld [vmem:[%s20297_s0 + $0x245] sm:$0xff] }
 0x4ea   :  { %v17983_v59 = vpop.f32.mrf.mxu0  ;;  %9761 = vmatpush1.bf16.msra.mxu1 %v12333_v6  ;;  %v11295_v6 = vld [vmem:[%s20297_s0 + $0x23d] sm:$0xff] }
 0x4eb   :  { %v7072_v2 = vpop.f32.mrf.mxu1  ;;  %9762 = vmatprep.subr.bf16.mxu1 %v20643_v35 }
 0x4ec   :  { %v6967_v7 = vpop.f32.mrf.mxu0 }
 0x4ed   :  { %v17992_v39 = vpop.f32.mrf.mxu1  ;;  %7476 = vmatmul.mubr.bf16.gmra.mxu1 %v17473_v1  ;;  %v11293_v7 = vld [vmem:[%s20297_s0 + $0x22d] sm:$0xff] }
 0x4ee   :  { %v17990_v47 = vpop.f32.mrf.mxu0  ;;  %11923 = vmatmul.mubr.bf16.vlgmr.msra.gmra.mxu0 %v6247_v63  ;;  %7483 = vmatprep.mubr.bf16.mxu1 %v6202_v16  ;;  %v11317_v63 = vld [vmem:[%s20297_s0 + $0x1ce] sm:$0xff] }
 0x4ef   :  { %11926 = vmatprep.mubr.bf16.mxu0 %v6248_v50  ;;  %v7077_v1 = vpop.f32.mrf.mxu1  ;;  %v11318_v50 = vld [vmem:[%s20297_s0 + $0x1d6] sm:$0xff] }
 0x4f0   :  { %v6972_v60 = vpop.f32.mrf.mxu0  ;;  %v11294_v16 = vld [vmem:[%s20297_s0 + $0x235] sm:$0xff]  ;;  %v6252_v17 = vpack.c.bf16 %v11318_v50, %v11317_v63 }
 0x4f1   :  { %v18016_v52 = vpop.f32.mrf.mxu1  ;;  %v6204_v32 = vpack.c.bf16 %v11294_v16, %v11293_v7  ;;  %v6205_v7 = vpack.c.bf16 %v11296_v44, %v11295_v6 }
 0x4f2   :  { %v18014_v5 = vpop.f32.mrf.mxu0 }
 0x4f3   :  { %v7080_v36 = vpop.f32.mrf.mxu1 }
 0x4f4   :  { %v6975_v38 = vpop.f32.mrf.mxu0 }
 0x4f5   :  { %v18023_v48 = vpop.f32.mrf.mxu1  ;;  %7484 = vmatmul.mubr.bf16.gmra.mxu1 %v17535_v19  ;;  %v11321_v38 = vld [vmem:[%s20297_s0 + $0x1ee] sm:$0xff] }
 0x4f6   :  { %v18021_v29 = vpop.f32.mrf.mxu0  ;;  %11927 = vmatmul.mubr.bf16.gmra.mxu0 %v6249_v24  ;;  %7491 = vmatprep.mubr.bf16.mxu1 %v6203_v51  ;;  %v11320_v24 = vld [vmem:[%s20297_s0 + $0x1e6] sm:$0xff]  ;;  %v11322_v51 = vld [vmem:[%s20297_s0 + $0x1f6] sm:$0xff] }
 0x4f7   :  { %20805 = vst [vmem:[#allocation37_spill] sm:$0xff] %v18021_v29  ;;  %11930 = vmatprep.mubr.bf16.mxu0 %v6250_v53  ;;  %v7085_v19 = vpop.f32.mrf.mxu1  ;;  %v6254_v50 = vpack.c.bf16 %v11322_v51, %v11321_v38  ;;  %v11297_v38 = vld [vmem:[%s20297_s0 + $0x24d] sm:$0xff]  ;;  %v11298_v51 = vld [vmem:[%s20297_s0 + $0x255] sm:$0xff] }
 0x4f8   :  { %v6980_v40 = vpop.f32.mrf.mxu0 }
 0x4f9   :  { %v18047_v13 = vpop.f32.mrf.mxu1  ;;  %v6253_v40 = vpack.c.bf16 %v11320_v24, %v11319_v55  ;;  %v11325_v55 = vld [vmem:[%s20297_s0 + $0x20e] sm:$0xff]  ;;  %v11326_v24 = vld [vmem:[%s20297_s0 + $0x216] sm:$0xff] }
 0x4fa   :  { %v18045_v2 = vpop.f32.mrf.mxu0  ;;  %v6256_v44 = vpack.c.bf16 %v11326_v24, %v11325_v55  ;;  %v11329_v55 = vld [vmem:[%s20297_s0 + $0x22e] sm:$0xff]  ;;  %v11330_v24 = vld [vmem:[%s20297_s0 + $0x236] sm:$0xff] }
 0x4fb   :  { %20806 = vst [vmem:[#allocation45_spill] sm:$0xff] %v18045_v2  ;;  %v7088_v46 = vpop.f32.mrf.mxu1 }
 0x4fc   :  { %v6983_v60 = vpop.f32.mrf.mxu0 }
 0x4fd   :  { %v18051_v12 = vpop.f32.mrf.mxu1  ;;  %7492 = vmatmul.mubr.bf16.gmra.mxu1 %v17597_v62  ;;  %v12334_v62 = vld [vmem:[%s20298_s4 + $0x8] sm:$0xff]   ;;  %v11323_v60 = vld [vmem:[%s20297_s0 + $0x1fe] sm:$0xff] }
 0x4fe   :  { %v18049_v1 = vpop.f32.mrf.mxu0  ;;  %11931 = vmatmul.mubr.bf16.gmra.mxu0 %v6251_v31  ;;  %7499 = vmatprep.mubr.bf16.mxu1 %v6204_v32  ;;  %v11324_v32 = vld [vmem:[%s20297_s0 + $0x206] sm:$0xff] }
 0x4ff   :  { %20807 = vst [vmem:[#allocation41_spill] sm:$0xff] %v18049_v1  ;;  %11934 = vmatprep.mubr.bf16.mxu0 %v6252_v17  ;;  %v7093_v36 = vpop.f32.mrf.mxu1  ;;  %9763 = vmatpush1.bf16.msra.mxu1 %v12334_v62  ;;  %v20817_v1 = vld [vmem:[#allocation49_spill] sm:$0xff] }
 0x500   :  { %v6988_v53 = vpop.f32.mrf.mxu0  ;;  %9764 = vmatprep.subr.bf16.mxu1 %v20643_v35  ;;  %v6255_v36 = vpack.c.bf16 %v11324_v32, %v11323_v60  ;;  %v11327_v60 = vld [vmem:[%s20297_s0 + $0x21e] sm:$0xff]  ;;  %v11328_v32 = vld [vmem:[%s20297_s0 + $0x226] sm:$0xff]  ;;  %v7060_v2 = vadd.f32 %v17927_v37, %v20817_v1 }
 0x501   :  { %v18077_v63 = vpop.f32.mrf.mxu1  ;;  %v11339_v37 = vld [vmem:[%s20297_s0 + $0x27e] sm:$0xff] }
 0x502   :  { %v18075_v61 = vpop.f32.mrf.mxu0 }
 0x503   :  { %20808 = vst [vmem:[#allocation38_spill] sm:$0xff] %v18075_v61  ;;  %v7096_v16 = vpop.f32.mrf.mxu1  ;;  %v12341_v61 = vld [vmem:[%s20298_s4 + $0x68] sm:$0xff]  }
 0x504   :  { %v6991_v19 = vpop.f32.mrf.mxu0 }
 0x505   :  { %v18082_v17 = vpop.f32.mrf.mxu1  ;;  %7500 = vmatmul.mubr.bf16.gmra.mxu1 %v17659_v23  ;;  %v12335_v23 = vld [vmem:[%s20298_s4] sm:$0xff]  }
 0x506   :  { %v18080_v31 = vpop.f32.mrf.mxu0  ;;  %11935 = vmatmul.mubr.bf16.gmra.mxu0 %v6253_v40  ;;  %7507 = vmatprep.mubr.bf16.mxu1 %v6205_v7 }
 0x507   :  { %20809 = vst [vmem:[#allocation48_spill] sm:$0xff] %v18080_v31  ;;  %11938 = vmatprep.mubr.bf16.mxu0 %v6254_v50  ;;  %v7101_v53 = vpop.f32.mrf.mxu1  ;;  %9765 = vmatpush1.bf16.msra.mxu1 %v12335_v23  ;;  %v6206_v50 = vpack.c.bf16 %v11298_v51, %v11297_v38  ;;  %v11299_v23 = vld [vmem:[%s20297_s0 + $0x25d] sm:$0xff] }
 0x508   :  { %v6996_v46 = vpop.f32.mrf.mxu0  ;;  %9766 = vmatprep.subr.bf16.mxu1 %v20643_v35  ;;  %v11300_v53 = vld [vmem:[%s20297_s0 + $0x265] sm:$0xff]  ;;  %v12336_v38 = vld [vmem:[%s20298_s4 + $0x78] sm:$0xff]  }
 0x509   :  { %v18108_v6 = vpop.f32.mrf.mxu1 }
 0x50a   :  { %v18106_v62 = vpop.f32.mrf.mxu0 }
 0x50b   :  { %20810 = vst [vmem:[#allocation50_spill] sm:$0xff] %v18106_v62  ;;  %v7104_v19 = vpop.f32.mrf.mxu1  ;;  %9767 = vmatpush2.bf16.msra.mxu1 %v12336_v38  ;;  %v11302_v38 = vld [vmem:[%s20297_s0 + $0x275] sm:$0xff] }
 0x50c   :  { %v6999_v40 = vpop.f32.mrf.mxu0  ;;  %v6207_v19 = vpack.c.bf16 %v11300_v53, %v11299_v23  ;;  %9768 = vmatprep.subr.bf16.mxu1 %v20643_v35  ;;  %v11333_v23 = vld [vmem:[%s20297_s0 + $0x24e] sm:$0xff] }
 0x50d   :  { %v18113_v16 = vpop.f32.mrf.mxu1  ;;  %7508 = vmatmul.mubr.bf16.gmra.mxu1 %v17718_v26  ;;  %v6258_v40 = vpack.c.bf16 %v11330_v24, %v11329_v55  ;;  %v11301_v24 = vld [vmem:[%s20297_s0 + $0x26d] sm:$0xff] }
 0x50e   :  { %v18111_v7 = vpop.f32.mrf.mxu0  ;;  %11939 = vmatmul.mubr.bf16.gmra.mxu0 %v6255_v36  ;;  %7515 = vmatprep.mubr.bf16.mxu1 %v6206_v50  ;;  %v6257_v36 = vpack.c.bf16 %v11328_v32, %v11327_v60  ;;  %v11331_v60 = vld [vmem:[%s20297_s0 + $0x23e] sm:$0xff]  ;;  %v11332_v32 = vld [vmem:[%s20297_s0 + $0x246] sm:$0xff] }
 0x50f   :  { %20811 = vst [vmem:[#allocation51_spill] sm:$0xff] %v18111_v7  ;;  %11942 = vmatprep.mubr.bf16.mxu0 %v6256_v44  ;;  %v7109_v26 = vpop.f32.mrf.mxu1 }
 0x510   :  { %v7004_v46 = vpop.f32.mrf.mxu0 }
 0x511   :  { %v18139_v44 = vpop.f32.mrf.mxu1 }
 0x512   :  { %v18137_v51 = vpop.f32.mrf.mxu0 }
 0x513   :  { %20812 = vst [vmem:[#allocation52_spill] sm:$0xff] %v18137_v51  ;;  %v7112_v46 = vpop.f32.mrf.mxu1  ;;  %v20815_v51 = vld [vmem:[#allocation47_spill] sm:$0xff] }
 0x514   :  { %v7007_v50 = vpop.f32.mrf.mxu0  ;;  %v7052_v62 = vadd.f32 %v17872_v28, %v20815_v51  ;;  %v11336_v28 = vld [vmem:[%s20297_s0 + $0x266] sm:$0xff] }
 0x515   :  { %v18144_v7 = vpop.f32.mrf.mxu1  ;;  %7516 = vmatmul.mubr.bf16.gmra.mxu1 %v17786_v21  ;;  %v11334_v21 = vld [vmem:[%s20297_s0 + $0x256] sm:$0xff] }
 0x516   :  { %v18142_v26 = vpop.f32.mrf.mxu0  ;;  %11943 = vmatmul.mubr.bf16.gmra.mxu0 %v6257_v36  ;;  %7523 = vmatprep.mubr.bf16.mxu1 %v6207_v19  ;;  %v12337_v36 = vld [vmem:[%s20298_s4 + $0xb8] sm:$0xff]   ;;  %v6259_v19 = vpack.c.bf16 %v11332_v32, %v11331_v60 }
 0x517   :  { %20813 = vst [vmem:[#allocation53_spill] sm:$0xff] %v18142_v26  ;;  %11946 = vmatprep.mubr.bf16.mxu0 %v6258_v40  ;;  %v7117_v53 = vpop.f32.mrf.mxu1  ;;  %v12338_v40 = vld [vmem:[%s20298_s4 + $0x70] sm:$0xff]   ;;  %9928 = vmatpush1.bf16.msra.mxu0 %v12337_v36  ;;  %v6208_v26 = vpack.c.bf16 %v11302_v38, %v11301_v24  ;;  %v11335_v24 = vld [vmem:[%s20297_s0 + $0x25e] sm:$0xff] }
 0x518   :  { %v7012_v55 = vpop.f32.mrf.mxu0  ;;  %9769 = vmatpush2.bf16.msra.mxu1 %v12338_v40  ;;  %9929 = vmatprep.subr.bf16.mxu0 %v20643_v35  ;;  %v11303_v40 = vld [vmem:[%s20297_s0 + $0x27d] sm:$0xff] }
 0x519   :  { %v18173_v46 = vpop.f32.mrf.mxu1  ;;  %v6260_v55 = vpack.c.bf16 %v11334_v21, %v11333_v23  ;;  %9770 = vmatprep.subr.bf16.mxu1 %v20643_v35  ;;  %v20816_v21 = vld [vmem:[#allocation46_spill] sm:$0xff] }
 0x51a   :  { %v18171_v50 = vpop.f32.mrf.mxu0  ;;  %v7055_v38 = vadd.f32 %v17913_v30, %v20816_v21 }
 0x51b   :  { %20814 = vst [vmem:[#allocation54_spill] sm:$0xff] %v18171_v50  ;;  %v7120_v31 = vpop.f32.mrf.mxu1  ;;  %v12339_v50 = vld [vmem:[%s20298_s4 + $0xb0] sm:$0xff]  }
 0x51c   :  { %v7015_v53 = vpop.f32.mrf.mxu0  ;;  %v11266_v31 = vld [vmem:[%s20297_s0 + $0x274] sm:$0xff]  ;;  %9930 = vmatpush1.bf16.msra.mxu0 %v12339_v50  ;;  %v6261_v50 = vpack.c.bf16 %v11336_v28, %v11335_v24  ;;  %9771 = vmatpush2.bf16.msra.mxu1 %v12341_v61  ;;  %v11267_v61 = vld [vmem:[%s20297_s0 + $0x27c] sm:$0xff] }
 0x51d   :  { %v18182_v32 = vpop.f32.mrf.mxu1  ;;  %7524 = vmatmul.mubr.bf16.gmra.mxu1 %v17852_v0  ;;  %v11338_v0 = vld [vmem:[%s20297_s0 + $0x276] sm:$0xff]  ;;  %9931 = vmatprep.subr.bf16.mxu0 %v20643_v35  ;;  %v6154_v53 = vpack.c.bf16 %v11266_v31, %v17892_v3  ;;  %v12342_v3 = vld [vmem:[%s20298_s4 + $0xa0] sm:$0xff]  }
 0x51e   :  { %v7228_v60 = vpop.f32.mrf.mxu0  ;;  %11947 = vmatmul.mubr.bf16.gmra.mxu0 %v6259_v19  ;;  %7531 = vmatprep.mubr.bf16.mxu1 %v6208_v26  ;;  %v11304_v26 = vld [vmem:[%s20297_s0 + $0x285] sm:$0x3f] }
 0x51f   :  { %v18184_v23 = vadd.f32 %v7228_v60, %v7052_v62  ;;  %11950 = vmatprep.mubr.bf16.mxu0 %v6260_v55  ;;  %v11337_v62 = vld [vmem:[%s20297_s0 + $0x26e] sm:$0xff]  ;;  %v7125_v36 = vpop.f32.mrf.mxu1  ;;  %9772 = vmatprep.subr.bf16.mxu1 %v20643_v35 }
 0x520   :  { %v7230_v51 = vpop.f32.mrf.mxu0  ;;  %v12340_v19 = vld [vmem:[%s20298_s4 + $0xa8] sm:$0xff]   ;;  %v6209_v36 = vpack.c.bf16 %v11304_v26, %v11303_v40 }
 0x521   :  { %v18215_v30 = vpop.f32.mrf.mxu1  ;;  %v6262_v51 = vpack.c.bf16 %v11338_v0, %v11337_v62  ;;  %9932 = vmatpush1.bf16.msra.mxu0 %v12340_v19  ;;  %v7063_v62 = vadd.f32 %v17954_v20, %v17405_v25  ;;  %v12344_v25 = vld [vmem:[%s20298_s4 + $0x60] sm:$0xff]   ;;  %v7068_v20 = vadd.f32 %v17961_v33, %v17429_v10  ;;  %v7071_v10 = vadd.f32 %v17985_v56, %v17464_v58 }
 0x522   :  { %v7231_v55 = vpop.f32.mrf.mxu0  ;;  %9933 = vmatprep.subr.bf16.mxu0 %v20643_v35  ;;  %9773 = vmatpush2.bf16.msra.mxu1 %v12344_v25  ;;  %v7079_v58 = vadd.f32 %v18016_v52, %v17530_v42  ;;  %v7087_v42 = vadd.f32 %v18047_v13, %v17592_v41 }
 0x523   :  { %v18217_v60 = vadd.f32 %v7231_v55, %v7055_v38  ;;  %v7128_v29 = vpop.f32.mrf.mxu1  ;;  %v12343_v38 = vld [vmem:[%s20298_s4 + $0x98] sm:$0xff]   ;;  %9774 = vmatprep.subr.bf16.mxu1 %v20643_v35 }
 0x524   :  { %v7233_v21 = vpop.f32.mrf.mxu0  ;;  %v11340_v29 = vld [vmem:[%s20297_s0 + $0x286] sm:$0x3f] }
 0x525   :  { %v18228_v28 = vpop.f32.mrf.mxu1  ;;  %7532 = vmatmul.mubr.bf16.gmra.mxu1 %v6154_v53  ;;  %9934 = vmatpush1.bf16.msra.mxu0 %v12342_v3  ;;  %v6263_v26 = vpack.c.bf16 %v11340_v29, %v11339_v37  ;;  %v12345_v21 = vld [vmem:[%s20298_s4 + $0x90] sm:$0xff]  }
 0x526   :  { %v7236_v24 = vpop.f32.mrf.mxu0  ;;  %11951 = vmatmul.mubr.bf16.gmra.mxu0 %v6261_v50  ;;  %7539 = vmatprep.mubr.bf16.mxu1 %v6209_v36 }
 0x527   :  { %v18230_v31 = vadd.f32 %v7236_v24, %v7060_v2  ;;  %11954 = vmatprep.mubr.bf16.mxu0 %v6262_v51  ;;  %v11268_v2 = vld [vmem:[%s20297_s0 + $0x284] sm:$0x3f]  ;;  %v7133_v0 = vpop.f32.mrf.mxu1  ;;  %9935 = vmatprep.subr.bf16.mxu0 %v20643_v35 }
 0x528   :  { %v7238_v1 = vpop.f32.mrf.mxu0  ;;  %v6155_v50 = vpack.c.bf16 %v11268_v2, %v11267_v61 }
 0x529   :  { %v18251_v19 = vpop.f32.mrf.mxu1  ;;  %9936 = vmatpush1.bf16.msra.mxu0 %v12343_v38 }
 0x52a   :  { %v7239_v40 = vpop.f32.mrf.mxu0  ;;  %9937 = vmatprep.subr.bf16.mxu0 %v20643_v35 }
 0x52b   :  { %v18253_v55 = vadd.f32 %v7239_v40, %v7063_v62  ;;  %v7136_v51 = vpop.f32.mrf.mxu1  ;;  %v7076_v62 = vadd.f32 %v17992_v39, %v17489_v43  ;;  %v7084_v43 = vadd.f32 %v18023_v48, %v17551_v54  ;;  %v12346_v54 = vld [vmem:[%s20298_s4 + $0x88] sm:$0xff]  }
 0x52c   :  { %v7241_v53 = vpop.f32.mrf.mxu0 }
 0x52d   :  { %v18264_v3 = vpop.f32.mrf.mxu1  ;;  %7540 = vmatmul.mubr.bf16.gmra.mxu1 %v6155_v50  ;;  %9938 = vmatpush1.bf16.msra.mxu0 %v12345_v21 }
 0x52e   :  { %v7244_v36 = vpop.f32.mrf.mxu0  ;;  %11955 = vmatmul.mubr.bf16.gmra.mxu0 %v6263_v26  ;;  %9939 = vmatprep.subr.bf16.mxu0 %v20643_v35 }
 0x52f   :  { %v18266_v24 = vadd.f32 %v7244_v36, %v7068_v20  ;;  %v7141_v33 = vpop.f32.mrf.mxu1 }
 0x530   :  { %v7246_v37 = vpop.f32.mrf.mxu0 }
 0x531   :  { %v18272_v1 = vpop.f32.mrf.mxu1  ;;  %9940 = vmatpush1.bf16.msra.mxu0 %v12346_v54  ;;  %v7103_v54 = vadd.f32 %v18108_v6, %v17715_v4  ;;  %v7111_v4 = vadd.f32 %v18139_v44, %v17777_v45  ;;  %v12352_v45 = vld [vmem:[%s20298_s4 + $0xe8] sm:$0xff]   ;;  %v7116_v44 = vadd.f32 %v18144_v7, %v17803_v34  ;;  %v12353_v34 = vld [vmem:[%s20298_s4 + $0xe0] sm:$0xff]  }
 0x532   :  { %v7247_v29 = vpop.f32.mrf.mxu0  ;;  %9941 = vmatprep.subr.bf16.mxu0 %v20643_v35 }
 0x533   :  { %v18274_v61 = vadd.f32 %v7247_v29, %v7071_v10  ;;  %v7144_v0 = vpop.f32.mrf.mxu1 }
 0x534   :  { %v7249_v2 = vpop.f32.mrf.mxu0 }
 0x535   :  { %v18278_v40 = vpop.f32.mrf.mxu1 }
 0x536   :  { %v7252_v38 = vpop.f32.mrf.mxu0 }
 0x537   :  { %v18280_v26 = vadd.f32 %v7252_v38, %v7076_v62  ;;  %v7149_v56 = vpop.f32.mrf.mxu1  ;;  %v7092_v62 = vadd.f32 %v18051_v12, %v17610_v15  ;;  %v12348_v15 = vld [vmem:[%s20298_s4 + $0x80] sm:$0xff]  }
 0x538   :  { %v7254_v50 = vpop.f32.mrf.mxu0  ;;  %9942 = vmatpush1.bf16.msra.mxu0 %v12348_v15 }
 0x539   :  { %v18284_v25 = vpop.f32.mrf.mxu1  ;;  %9943 = vmatprep.subr.bf16.mxu0 %v20643_v35 }
 0x53a   :  { %v7255_v53 = vpop.f32.mrf.mxu0 }
 0x53b   :  { %v18286_v20 = vadd.f32 %v7255_v53, %v7079_v58  ;;  %v7152_v39 = vpop.f32.mrf.mxu1  ;;  %v7095_v58 = vadd.f32 %v18077_v63, %v17653_v27  ;;  %v12347_v53 = vld [vmem:[%s20298_s4 + $0x58] sm:$0xff]   ;;  %v7100_v27 = vadd.f32 %v18082_v17, %v17676_v22 }
 0x53c   :  { %v7257_v51 = vpop.f32.mrf.mxu0  ;;  %9775 = vmatpush2.bf16.msra.mxu1 %v12347_v53 }
 0x53d   :  { %v18290_v36 = vpop.f32.mrf.mxu1  ;;  %9776 = vmatprep.subr.bf16.mxu1 %v20643_v35 }
 0x53e   :  { %v7260_v21 = vpop.f32.mrf.mxu0 }
 0x53f   :  { %v18292_v37 = vadd.f32 %v7260_v21, %v7084_v43  ;;  %v7157_v52 = vpop.f32.mrf.mxu1  ;;  %v12349_v21 = vld [vmem:[%s20298_s4 + $0xf8] sm:$0xff]  }
 0x540   :  { %v7262_v10 = vpop.f32.mrf.mxu0  ;;  %9944 = vmatpush2.bf16.msra.mxu0 %v12349_v21 }
 0x541   :  { %v18296_v29 = vpop.f32.mrf.mxu1  ;;  %9945 = vmatprep.subr.bf16.mxu0 %v20643_v35 }
 0x542   :  { %v7263_v33 = vpop.f32.mrf.mxu0 }
 0x543   :  { %v18298_v2 = vadd.f32 %v7263_v33, %v7087_v42  ;;  %v7160_v0 = vpop.f32.mrf.mxu1 }
 0x544   :  { %v7265_v48 = vpop.f32.mrf.mxu0 }
 0x545   :  { %v18306_v41 = vpop.f32.mrf.mxu1 }
 0x546   :  { %v7268_v38 = vpop.f32.mrf.mxu0 }
 0x547   :  { %v18308_v13 = vadd.f32 %v7268_v38, %v7092_v62  ;;  %v7165_v56 = vpop.f32.mrf.mxu1  ;;  %v7108_v38 = vadd.f32 %v18113_v16, %v17738_v14 }
 0x548   :  { %v7270_v50 = vpop.f32.mrf.mxu0 }
 0x549   :  { %v18318_v51 = vpop.f32.mrf.mxu1 }
 0x54a   :  { %v7271_v12 = vpop.f32.mrf.mxu0 }
 0x54b   :  { %v18320_v43 = vadd.f32 %v7271_v12, %v7095_v58  ;;  %v7168_v63 = vpop.f32.mrf.mxu1  ;;  %v12350_v12 = vld [vmem:[%s20298_s4 + $0xf0] sm:$0xff]  }
 0x54c   :  { %v7273_v39 = vpop.f32.mrf.mxu0  ;;  %9946 = vmatpush2.bf16.msra.mxu0 %v12350_v12  ;;  %v12354_v12 = vld [vmem:[%s20298_s4 + $0x48] sm:$0xff]  }
 0x54d   :  { %v18329_v42 = vpop.f32.mrf.mxu1  ;;  %v12351_v39 = vld [vmem:[%s20298_s4 + $0x50] sm:$0xff]   ;;  %9947 = vmatprep.subr.bf16.mxu0 %v20643_v35 }
 0x54e   :  { %v7276_v10 = vpop.f32.mrf.mxu0  ;;  %9777 = vmatpush2.bf16.msra.mxu1 %v12351_v39 }
 0x54f   :  { %v18331_v52 = vadd.f32 %v7276_v10, %v7100_v27  ;;  %v7173_v48 = vpop.f32.mrf.mxu1  ;;  %9778 = vmatprep.subr.bf16.mxu1 %v20643_v35 }
 0x550   :  { %v7278_v33 = vpop.f32.mrf.mxu0  ;;  %9948 = vmatpush2.bf16.msra.mxu0 %v12352_v45 }
 0x551   :  { %v18336_v22 = vpop.f32.mrf.mxu1  ;;  %9949 = vmatprep.subr.bf16.mxu0 %v20643_v35 }
 0x552   :  { %v7279_v62 = vpop.f32.mrf.mxu0  ;;  %9779 = vmatpush2.bf16.msra.mxu1 %v12354_v12 }
 0x553   :  { %v18338_v17 = vadd.f32 %v7279_v62, %v7103_v54  ;;  %v7176_v50 = vpop.f32.mrf.mxu1  ;;  %v7119_v62 = vadd.f32 %v18173_v46, %v17847_v9  ;;  %9780 = vmatprep.subr.bf16.mxu1 %v20643_v35 }
 0x554   :  { %v7281_v0 = vpop.f32.mrf.mxu0  ;;  %9950 = vmatpush2.bf16.msra.mxu0 %v12353_v34 }
 0x555   :  { %v18342_v56 = vpop.f32.mrf.mxu1  ;;  %9951 = vmatprep.subr.bf16.mxu0 %v20643_v35 }
 0x556   :  { %v7284_v58 = vpop.f32.mrf.mxu0 }
 0x557   :  { %v18344_v53 = vadd.f32 %v7284_v58, %v7108_v38  ;;  %v7181_v6 = vpop.f32.mrf.mxu1 }
 0x558   :  { %v7286_v15 = vpop.f32.mrf.mxu0 }
 0x559   :  { %v18354_v16 = vpop.f32.mrf.mxu1  ;;  %v7124_v15 = vadd.f32 %v18182_v32, %v17869_v11 }
 0x55a   :  { %v7287_v14 = vpop.f32.mrf.mxu0 }
 0x55b   :  { %v18356_v27 = vadd.f32 %v7287_v14, %v7111_v4  ;;  %v7184_v21 = vpop.f32.mrf.mxu1 }
 0x55c   :  { %v7289_v63 = vpop.f32.mrf.mxu0  ;;  %v12355_v21 = vld [vmem:[%s20298_s4 + $0xd8] sm:$0xff]  }
 0x55d   :  { %v18365_v33 = vpop.f32.mrf.mxu1  ;;  %v7127_v63 = vadd.f32 %v18215_v30, %v17911_v49  ;;  %9952 = vmatpush2.bf16.msra.mxu0 %v12355_v21 }
 0x55e   :  { %v7292_v10 = vpop.f32.mrf.mxu0  ;;  %9953 = vmatprep.subr.bf16.mxu0 %v20643_v35 }
 0x55f   :  { %v18367_v54 = vadd.f32 %v7292_v10, %v7116_v44  ;;  %v7189_v0 = vpop.f32.mrf.mxu1 }
 0x560   :  { %v7294_v48 = vpop.f32.mrf.mxu0 }
 0x561   :  { %v18372_v50 = vpop.f32.mrf.mxu1  ;;  %v7132_v48 = vadd.f32 %v18228_v28, %v17922_v57  ;;  %v12356_v57 = vld [vmem:[%s20298_s4 + $0xd0] sm:$0xff]  }
 0x562   :  { %v7295_v38 = vpop.f32.mrf.mxu0  ;;  %9954 = vmatpush2.bf16.msra.mxu0 %v12356_v57 }
 0x563   :  { %v18374_v58 = vadd.f32 %v7295_v38, %v7119_v62  ;;  %v7192_v4 = vpop.f32.mrf.mxu1  ;;  %9955 = vmatprep.subr.bf16.mxu0 %v20643_v35 }
 0x564   :  { %v7297_v7 = vpop.f32.mrf.mxu0 }
 0x565   :  { %v7405_v46 = vpop.f32.mrf.mxu1 }
 0x566   :  { %v7300_v6 = vpop.f32.mrf.mxu0  ;;  %v18388_v39 = vadd.f32 %v7405_v46, %v18184_v23  ;;  %v7140_v46 = vadd.f32 %v18264_v3, %v17959_v8  ;;  %v7143_v8 = vadd.f32 %v18272_v1, %v17983_v59  ;;  %v7151_v1 = vadd.f32 %v18284_v25, %v18014_v5 }
 0x567   :  { %v18382_v9 = vadd.f32 %v7300_v6, %v7124_v15  ;;  %v7407_v11 = vpop.f32.mrf.mxu1  ;;  %v12357_v6 = vld [vmem:[%s20298_s4 + $0x40] sm:$0xff]  }
 0x568   :  { %v7302_v14 = vpop.f32.mrf.mxu0  ;;  %9781 = vmatpush2.bf16.msra.mxu1 %v12357_v6 }
 0x569   :  { %v7408_v44 = vpop.f32.mrf.mxu1  ;;  %10104 = vmatprep.subr.bf16.mxu1 %v20643_v35 }
 0x56a   :  { %v7303_v32 = vpop.f32.mrf.mxu0  ;;  %v18399_v10 = vadd.f32 %v7408_v44, %v18217_v60  ;;  %v7135_v60 = vadd.f32 %v18251_v19, %v17952_v18  ;;  %v12358_v19 = vld [vmem:[%s20298_s4 + $0xc8] sm:$0xff]  }
 0x56b   :  { %v18393_v45 = vadd.f32 %v7303_v32, %v7127_v63  ;;  %v7410_v49 = vpop.f32.mrf.mxu1  ;;  %9956 = vmatpush2.bf16.msra.mxu0 %v12358_v19 }
 0x56c   :  { %v7305_v23 = vpop.f32.mrf.mxu0  ;;  %9957 = vmatprep.subr.bf16.mxu0 %v20643_v35 }
 0x56d   :  { %v7413_v0 = vpop.f32.mrf.mxu1 }
 0x56e   :  { %v7308_v30 = vpop.f32.mrf.mxu0  ;;  %v18407_v38 = vadd.f32 %v7413_v0, %v18230_v31 }
 0x56f   :  { %v18404_v62 = vadd.f32 %v7308_v30, %v7132_v48  ;;  %v7415_v7 = vpop.f32.mrf.mxu1 }
 0x570   :  { %v7310_v34 = vpop.f32.mrf.mxu0 }
 0x571   :  { %v18416_v4 = vpop.f32.mrf.mxu1 }
 0x572   :  { %v7311_v15 = vpop.f32.mrf.mxu0 }
 0x573   :  { %v18414_v28 = vadd.f32 %v7311_v15, %v7135_v60  ;;  %v7418_v18 = vpop.f32.mrf.mxu1 }
 0x574   :  { %v7313_v31 = vpop.f32.mrf.mxu0 }
 0x575   :  { %v7421_v63 = vpop.f32.mrf.mxu1 }
 0x576   :  { %v7316_v12 = vpop.f32.mrf.mxu0  ;;  %v18431_v11 = vadd.f32 %v7421_v63, %v18266_v24  ;;  %v7148_v24 = vadd.f32 %v18278_v40, %v17990_v47  ;;  %v20818_v40 = vld [vmem:[#allocation37_spill] sm:$0xff] }
 0x577   :  { %v18428_v14 = vadd.f32 %v7316_v12, %v7140_v46  ;;  %v7423_v3 = vpop.f32.mrf.mxu1  ;;  %v7156_v31 = vadd.f32 %v18290_v36, %v20818_v40  ;;  %v20819_v63 = vld [vmem:[#allocation45_spill] sm:$0xff] }
 0x578   :  { %v7318_v32 = vpop.f32.mrf.mxu0 }
 0x579   :  { %v7424_v23 = vpop.f32.mrf.mxu1  ;;  %v7159_v32 = vadd.f32 %v18296_v29, %v20819_v63  ;;  %v20821_v29 = vld [vmem:[#allocation38_spill] sm:$0xff] }
 0x57a   :  { %v7319_v44 = vpop.f32.mrf.mxu0  ;;  %v18439_v48 = vadd.f32 %v7424_v23, %v18274_v61  ;;  %v12359_v61 = vld [vmem:[%s20298_s4 + $0xc0] sm:$0xff]  }
 0x57b   :  { %v18436_v21 = vadd.f32 %v7319_v44, %v7143_v8  ;;  %v7426_v30 = vpop.f32.mrf.mxu1  ;;  %9958 = vmatpush2.bf16.msra.mxu0 %v12359_v61 }
 0x57c   :  { %v7321_v49 = vpop.f32.mrf.mxu0  ;;  %10281 = vmatprep.subr.bf16.mxu0 %v20643_v35 }
 0x57d   :  { %v18445_v60 = vpop.f32.mrf.mxu1 }
 0x57e   :  { %v7324_v0 = vpop.f32.mrf.mxu0 }
 0x57f   :  { %v18443_v34 = vadd.f32 %v7324_v0, %v7148_v24  ;;  %v7431_v7 = vpop.f32.mrf.mxu1  ;;  %v20820_v24 = vld [vmem:[#allocation41_spill] sm:$0xff] }
 0x580   :  { %v7326_v59 = vpop.f32.mrf.mxu0  ;;  %v7164_v30 = vadd.f32 %v18306_v41, %v20820_v24 }
 0x581   :  { %v18454_v6 = vpop.f32.mrf.mxu1 }
 0x582   :  { %v7327_v15 = vpop.f32.mrf.mxu0 }
 0x583   :  { %v18452_v57 = vadd.f32 %v7327_v15, %v7151_v1  ;;  %v7434_v46 = vpop.f32.mrf.mxu1  ;;  %v7167_v15 = vadd.f32 %v18318_v51, %v20821_v29 }
 0x584   :  { %v7329_v47 = vpop.f32.mrf.mxu0  ;;  %v20822_v46 = vld [vmem:[#allocation48_spill] sm:$0xff] }
 0x585   :  { %v7437_v25 = vpop.f32.mrf.mxu1  ;;  %v7172_v41 = vadd.f32 %v18329_v42, %v20822_v46  ;;  %v20824_v42 = vld [vmem:[#allocation51_spill] sm:$0xff] }
 0x586   :  { %v7332_v18 = vpop.f32.mrf.mxu0  ;;  %v18462_v19 = vadd.f32 %v7437_v25, %v18292_v37 }
 0x587   :  { %v18459_v5 = vadd.f32 %v7332_v18, %v7156_v31  ;;  %v7439_v8 = vpop.f32.mrf.mxu1 }
 0x588   :  { %v7334_v12 = vpop.f32.mrf.mxu0  ;;  %v20823_v8 = vld [vmem:[#allocation50_spill] sm:$0xff] }
 0x589   :  { %v7440_v23 = vpop.f32.mrf.mxu1  ;;  %v7175_v51 = vadd.f32 %v18336_v22, %v20823_v8 }
 0x58a   :  { %v7335_v3 = vpop.f32.mrf.mxu0  ;;  %v18469_v36 = vadd.f32 %v7440_v23, %v18298_v2 }
 0x58b   :  { %v18466_v44 = vadd.f32 %v7335_v3, %v7159_v32  ;;  %v7442_v0 = vpop.f32.mrf.mxu1 }
 0x58c   :  { %v7337_v49 = vpop.f32.mrf.mxu0 }
 0x58d   :  { %v18475_v1 = vpop.f32.mrf.mxu1 }
 0x58e   :  { %v7340_v59 = vpop.f32.mrf.mxu0 }
 0x58f   :  { %v18473_v37 = vadd.f32 %v7340_v59, %v7164_v30  ;;  %v7447_v61 = vpop.f32.mrf.mxu1  ;;  %v7180_v59 = vadd.f32 %v18342_v56, %v20824_v42  ;;  %v8428_v56 = vld [vmem:[#allocation2] sm:$0xf] }
 0x590   :  { %v7342_v7 = vpop.f32.mrf.mxu0 }
 0x591   :  { %v18481_v2 = vpop.f32.mrf.mxu1 }
 0x592   :  { %v7343_v47 = vpop.f32.mrf.mxu0 }
 0x593   :  { %v18479_v40 = vadd.f32 %v7343_v47, %v7167_v15  ;;  %v7450_v18 = vpop.f32.mrf.mxu1 }
 0x594   :  { %v7345_v31 = vpop.f32.mrf.mxu0 }
 0x595   :  { %v18487_v63 = vpop.f32.mrf.mxu1  ;;  %v20826_v31 = vld [vmem:[#allocation52_spill] sm:$0xff] }
 0x596   :  { %v7348_v25 = vpop.f32.mrf.mxu0  ;;  %v7183_v22 = vadd.f32 %v18354_v16, %v20826_v31  ;;  %v20830_v16 = vld [vmem:[#allocation54_spill] sm:$0xff] }
 0x597   :  { %v18485_v12 = vadd.f32 %v7348_v25, %v7172_v41  ;;  %v7455_v3 = vpop.f32.mrf.mxu1 }
 0x598   :  { %v7350_v32 = vpop.f32.mrf.mxu0  ;;  %v8429_v3 = vld [vmem:[#allocation2 + $0x4] sm:$0xf] }
 0x599   :  { %v7456_v24 = vpop.f32.mrf.mxu1  ;;  %v20828_v32 = vld [vmem:[#allocation53_spill] sm:$0xff] }
 0x59a   :  { %v7351_v23 = vpop.f32.mrf.mxu0  ;;  %v18494_v30 = vadd.f32 %v7456_v24, %v18338_v17  ;;  %v7188_v8 = vadd.f32 %v18365_v33, %v20828_v32  ;;  %v8465_v32 = vld [vmem:[#allocation2] sm:$0xe] }
 0x59b   :  { %v18491_v49 = vadd.f32 %v7351_v23, %v7175_v51  ;;  %v7458_v7 = vpop.f32.mrf.mxu1 }
 0x59c   :  { %v7353_v0 = vpop.f32.mrf.mxu0  ;;  %v7191_v7 = vadd.f32 %v18372_v50, %v20830_v16 }
 0x59d   :  { %v7461_v61 = vpop.f32.mrf.mxu1 }
 0x59e   :  { %v7356_v29 = vpop.f32.mrf.mxu0 }
 0x59f   :  { %v18498_v15 = vadd.f32 %v7356_v29, %v7180_v59  ;;  %v7463_v46 = vpop.f32.mrf.mxu1  ;;  %v18508_v59 = vcombine.low %v8428_v56, %v8429_v3 }
 0x5a0   :  { %v7358_v47 = vpop.f32.mrf.mxu0 }
 0x5a1   :  { %20825 = vst [vmem:[#allocation47_spill] sm:$0xff] %v18498_v15  ;;  %v7464_v25 = vpop.f32.mrf.mxu1 }
 0x5a2   :  { %v7359_v41 = vpop.f32.mrf.mxu0 }
 0x5a3   :  { %v18502_v18 = vadd.f32 %v7359_v41, %v7183_v22  ;;  %v7466_v51 = vpop.f32.mrf.mxu1  ;;  %v8591_v41 = vshll.u32 %v18508_v59, 16 }
 0x5a4   :  { %v7361_v17 = vpop.f32.mrf.mxu0  ;;  %v18521_v51 = vld [vmem:[%s20299_s2] ss:$0 sm:$0xff] }
 0x5a5   :  { %20827 = vst [vmem:[#allocation46_spill] sm:$0xff] %v18502_v18  ;;  %v7469_v0 = vpop.f32.mrf.mxu1  ;;  %v8593_v16 = vrot.slane %v8591_v41, 1  ;;  %v7430_v41 = vadd.f32 %v18445_v60, %v18280_v26  ;;  %v18555_v26 = vadd.f32 %v18481_v2, %v18320_v43  ;;  %v18562_v60 = vadd.f32 %v7461_v61, %v18344_v53 }
 0x5a6   :  { %v7364_v23 = vpop.f32.mrf.mxu0  ;;  %v18571_v43 = vadd.f32 %v7464_v25, %v18356_v27 }
 0x5a7   :  { %v18506_v24 = vadd.f32 %v7364_v23, %v7188_v8  ;;  %v7471_v29 = vpop.f32.mrf.mxu1  ;;  %v18527_v23 = vld [vmem:[%s20300_s3] ss:$0 sm:$0xff] }
 0x5a8   :  { %v7366_v42 = vpop.f32.mrf.mxu0  ;;  %v7417_v29 = vadd.f32 %v18416_v4, %v18253_v55 }
 0x5a9   :  { %20829 = vst [vmem:[#allocation49_spill] sm:$0xff] %v18506_v24  ;;  %v7472_v22 = vpop.f32.mrf.mxu1  ;;  %v8589_v42 = vshrl.u32 %v18508_v59, 16 }
 0x5aa   :  { %v7367_v47 = vpop.f32.mrf.mxu0  ;;  %v18515_v33 = vadd.f32 %v7472_v22, %v18374_v58 }
 0x5ab   :  { %v18512_v31 = vadd.f32 %v7367_v47, %v7191_v7  ;;  %v7474_v17 = vpop.f32.mrf.mxu1  ;;  %v11470_v7 = vcombine.low %v8465_v32, %v8429_v3  ;;  %v7433_v3 = vadd.f32 %v18454_v6, %v18286_v20  ;;  %v18542_v4 = vor.u32 %v8593_v16, %v8589_v42 }
 0x5ac   :  { %v7369_v46 = vpop.f32.mrf.mxu0  ;;  %v18559_v20 = vadd.f32 %v18487_v63, %v18331_v52  ;;  %v18574_v52 = vadd.f32 %v7469_v0, %v18367_v54 }
 0x5ad   :  { %20831 = vst [vmem:[#allocation37_spill] sm:$0xff] %v18512_v31  ;;  %v7477_v50 = vpop.f32.mrf.mxu1  ;;  %v18544_v32 = vrot.slane %v11470_v7, 1 }
 0x5ae   :  { %v11924_v8 = vpop.f32.mrf.mxu0  ;;  %v18582_v54 = vadd.f32 %v7477_v50, %v18382_v9 }
 0x5af   :  { %v7591_v56 = vadd.f32 %v11924_v8, %v18407_v38  ;;  %v7479_v22 = vpop.f32.mrf.mxu1 }
 0x5b0   :  { %v7582_v58 = vpop.f32.mrf.mxu0 }
 0x5b1   :  { %v7734_v47 = vmul.f32 %v18521_v51, %v7591_v56  ;;  %v7583_v46 = vadd.f32 %v7582_v58, %v18388_v39  ;;  %v18536_v31 = vpop.f32.mrf.mxu1 }
 0x5b2   :  { %v11925_v17 = vpop.f32.mrf.mxu0 }
 0x5b3   :  { %v7777_v38 = vadd.f32 %v18527_v23, %v7734_v47  ;;  %v7732_v8 = vmul.f32 %v18521_v51, %v7583_v46  ;;  %v7594_v24 = vadd.f32 %v11925_v17, %v7417_v29  ;;  %v7482_v47 = vpop.f32.mrf.mxu1  ;;  %v18551_v29 = vadd.f32 %v18475_v1, %v18308_v13 }
 0x5b4   :  { %v7585_v55 = vpop.f32.mrf.mxu0 }
 0x5b5   :  { %v7813_v39 = vmax.f32 %v7777_v38, 0.0  ;;  %v7775_v56 = vadd.f32 %v18527_v23, %v7732_v8  ;;  %v7735_v58 = vmul.f32 %v18521_v51, %v7594_v24  ;;  %v7586_v22 = vadd.f32 %v7585_v55, %v18399_v10  ;;  %v18568_v1 = vpop.f32.mrf.mxu1 }
 0x5b6   :  { %v11928_v6 = vpop.f32.mrf.mxu0 }
 0x5b7   :  { %v7849_v42 = vsel %vm14705_vm1, %v7813_v39, 0.0  ;;  %v7811_v10 = vmax.f32 %v7775_v56, 0.0  ;;  %v7778_v16 = vadd.f32 %v18527_v23, %v7735_v58  ;;  %v7733_v13 = vmul.f32 %v18521_v51, %v7586_v22  ;;  %v7487_v38 = vpop.f32.mrf.mxu1 }
 0x5b8   :  { %v11664_v2 = vpack.c.bf16 %v7849_v42, %v7849_v42  ;;  %v7607_v53 = vadd.f32 %v11928_v6, %v7430_v41  ;;  %v7598_v63 = vpop.f32.mrf.mxu0 }
 0x5b9   :  { %v7847_v7 = vsel %vm14873_vm15, %v7811_v10, 0.0  ;;  %v7814_v46 = vmax.f32 %v7778_v16, 0.0  ;;  %v7776_v17 = vadd.f32 %v18527_v23, %v7733_v13  ;;  %v7599_v8 = vadd.f32 %v7598_v63, %v18431_v11  ;;  %v7488_v22 = vpop.f32.mrf.mxu1 }
 0x5ba   :  { %v8011_v55 = vshrl.u32 %v11664_v2, 16  ;;  %v8014_v39 = vshll.u32 %v11664_v2, 16  ;;  %v11662_v56 = vpack.c.bf16 %v7847_v7, %v7847_v7  ;;  %v7738_v27 = vmul.f32 %v18521_v51, %v7607_v53  ;;  %v11929_v25 = vpop.f32.mrf.mxu0 }
 0x5bb   :  { %v7850_v41 = vsel %vm14901_vm11, %v7814_v46, 0.0  ;;  %v7812_v58 = vmax.f32 %v7776_v17, 0.0  ;;  %v7736_v47 = vmul.f32 %v18521_v51, %v7599_v8  ;;  %v7490_v50 = vpop.f32.mrf.mxu1 }
 0x5bc   :  { %v8013_v6 = vrot.slane %v8011_v55, 6  ;;  %v8016_v24 = vrot.slane %v8014_v39, 7  ;;  %v7992_v42 = vshrl.u32 %v11662_v56, 16  ;;  %v7995_v11 = vshll.u32 %v11662_v56, 16  ;;  %v7601_v10 = vpop.f32.mrf.mxu0 }
 0x5bd   :  { %v11665_v16 = vpack.c.bf16 %v7850_v41, %v7850_v41  ;;  %v7848_v2 = vsel %vm14923_vm4, %v7812_v58, 0.0  ;;  %v7781_v53 = vadd.f32 %v18527_v23, %v7738_v27  ;;  %v7779_v9 = vadd.f32 %v18527_v23, %v7736_v47  ;;  %v18591_v56 = vpop.f32.mrf.mxu1  ;;  %v8387_v27 = vld [vmem:[#allocation2 + $0x8] sm:$0xe] }
 0x5be   :  { %v8017_v63 = vor.u32 %v8016_v24, %v8013_v6  ;;  %v7994_v61 = vrot.slane %v7992_v42, 6  ;;  %v7997_v7 = vrot.slane %v7995_v11, 7  ;;  %v11663_v46 = vpack.c.bf16 %v7848_v2, %v7848_v2  ;;  %v11932_v17 = vpop.f32.mrf.mxu0 }
 0x5bf   :  { %v8021_v38 = vshrl.u32 %v11665_v16, 16  ;;  %v8024_v8 = vshll.u32 %v11665_v16, 16  ;;  %v7817_v55 = vmax.f32 %v7781_v53, 0.0  ;;  %v7815_v39 = vmax.f32 %v7779_v9, 0.0  ;;  %v7495_v11 = vpop.f32.mrf.mxu1 }
 0x5c0   :  { %v7998_v0 = vor.u32 %v7997_v7, %v7994_v61  ;;  %v8001_v41 = vshrl.u32 %v11663_v46, 16  ;;  %v8004_v13 = vshll.u32 %v11663_v46, 16  ;;  %v7610_v58 = vadd.f32 %v11929_v25, %v7433_v3  ;;  %v7614_v18 = vpop.f32.mrf.mxu0 }
 0x5c1   :  { %v8023_v15 = vrot.slane %v8021_v38, 6  ;;  %v8026_v47 = vrot.slane %v8024_v8, 7  ;;  %v7853_v6 = vsel %vm14939_vm10, %v7817_v55, 0.0  ;;  %v7851_v42 = vsel %vm14950_vm0, %v7815_v39, 0.0  ;;  %v18602_v38 = vpop.f32.mrf.mxu1 }
 0x5c2   :  { %v8019_v16 = vrot.slane %v8017_v63, 4  ;;  %v8388_v53 = vsel %vm14956_vm3, %v7998_v0, %v8387_v27  ;;  %v8003_v9 = vrot.slane %v8001_v41, 6  ;;  %v8006_v61 = vrot.slane %v8004_v13, 7  ;;  %v11933_v8 = vpop.f32.mrf.mxu0 }
 0x5c3   :  { %8389 = vst [vmem:[#allocation2 + $0x8] sm:$0xe] %v8388_v53  ;;  %v8027_v7 = vor.u32 %v8026_v47, %v8023_v15  ;;  %v11668_v3 = vpack.c.bf16 %v7853_v6, %v7853_v6  ;;  %v11666_v25 = vpack.c.bf16 %v7851_v42, %v7851_v42  ;;  %v18600_v46 = vadd.f32 %v7488_v22, %v18414_v28  ;;  %v7498_v28 = vpop.f32.mrf.mxu1 }
 0x5c4   :  { %v7999_v55 = vrot.slane %v7998_v0, 4  ;;  %v8007_v50 = vor.u32 %v8006_v61, %v8003_v9  ;;  %v7739_v39 = vmul.f32 %v18521_v51, %v7610_v58  ;;  %v7602_v24 = vadd.f32 %v7601_v10, %v18439_v48 }
 0x5c5   :  { %v18608_v41 = vadd.f32 %v18536_v31, %v18393_v45  ;;  %v8028_v15 = vsel %vm14972_vm2, %v8019_v16, %v8027_v7  ;;  %v8051_v27 = vshrl.u32 %v11668_v3, 16  ;;  %v8054_v47 = vshll.u32 %v11668_v3, 16  ;;  %v7617_v31 = vpop.f32.mrf.mxu0  ;;  %v18616_v11 = vpop.f32.mrf.mxu1 }
 0x5c6   :  { %8392 = vst [vmem:[#allocation2 + $0x14] sm:$0xf] %v8028_v15  ;;  %v8008_v22 = vsel %vm14972_vm2, %v7999_v55, %v8007_v50  ;;  %v8009_v0 = vrot.slane %v8007_v50, 4  ;;  %v8031_v6 = vshrl.u32 %v11666_v25, 16  ;;  %v8034_v42 = vshll.u32 %v11666_v25, 16 }
 0x5c7   :  { %8390 = vst [vmem:[#allocation2 + $0xc] sm:$0xf] %v8008_v22  ;;  %v8053_v58 = vrot.slane %v8051_v27, 6  ;;  %v8056_v48 = vrot.slane %v8054_v47, 7  ;;  %v7782_v10 = vadd.f32 %v18527_v23, %v7739_v39  ;;  %v7737_v45 = vmul.f32 %v18521_v51, %v7602_v24  ;;  %v7503_v50 = vpop.f32.mrf.mxu1  ;;  %v11936_v22 = vpop.f32.mrf.mxu0 }
 0x5c8   :  { %v8018_v16 = vsel %vm14972_vm2, %v8009_v0, %v8017_v63  ;;  %v8033_v2 = vrot.slane %v8031_v6, 6  ;;  %v8036_v53 = vrot.slane %v8034_v42, 7  ;;  %v7623_v9 = vadd.f32 %v11932_v17, %v18551_v29  ;;  %v20840_v29 = vld [vmem:[#allocation8_spill] sm:$0xff] }
 0x5c9   :  { %8391 = vst [vmem:[#allocation2 + $0x10] sm:$0xf] %v8018_v16  ;;  %v18621_v61 = vor.u32 %v8056_v48, %v8053_v58  ;;  %v7818_v3 = vmax.f32 %v7782_v10, 0.0  ;;  %v7780_v25 = vadd.f32 %v18527_v23, %v7737_v45  ;;  %v7615_v55 = vadd.f32 %v7614_v18, %v18462_v19  ;;  %v18634_v0 = vpop.f32.mrf.mxu1 }
 0x5ca   :  { %v8029_v39 = vrot.slane %v8027_v7, 4  ;;  %v8037_v24 = vor.u32 %v8036_v53, %v8033_v2  ;;  %v7742_v15 = vmul.f32 %v18521_v51, %v7623_v9  ;;  %v7626_v27 = vadd.f32 %v11933_v8, %v18555_v26 }
 0x5cb   :  { %v18629_v63 = vadd.f32 %v18568_v1, %v18404_v62  ;;  %vm20841_vm1 = vnez %v20840_v29  ;;  %v7816_v47 = vmax.f32 %v7780_v25, 0.0  ;;  %v7740_v28 = vmul.f32 %v18521_v51, %v7615_v55  ;;  %v20842_v62 = vld [vmem:[#allocation13_spill] sm:$0xff]  ;;  %v7506_v58 = vpop.f32.mrf.mxu1  ;;  %v7630_v25 = vpop.f32.mrf.mxu0  ;;  %v20844_v29 = vld [vmem:[#allocation11_spill] sm:$0xff] }
 0x5cc   :  { %v7854_v17 = vsel %vm20841_vm1, %v7818_v3, 0.0  ;;  %v8059_v19 = vrot.slane %v18621_v61, 4  ;;  %v8038_v18 = vsel %vm14972_vm2, %v8029_v39, %v8037_v24  ;;  %v7785_v26 = vadd.f32 %v18527_v23, %v7742_v15 }
 0x5cd   :  { %v11669_v7 = vpack.c.bf16 %v7854_v17, %v7854_v17  ;;  %8393 = vst [vmem:[#allocation2 + $0x18] sm:$0xf] %v8038_v18  ;;  %vm20843_vm15 = vnez %v20842_v62  ;;  %v7783_v8 = vadd.f32 %v18527_v23, %v7740_v28  ;;  %v7743_v6 = vmul.f32 %v18521_v51, %v7626_v27  ;;  %v18647_v55 = vpop.f32.mrf.mxu1 }
 0x5ce   :  { %v7852_v1 = vsel %vm20843_vm15, %v7816_v47, 0.0  ;;  %v7618_v42 = vadd.f32 %v7617_v31, %v18469_v36  ;;  %v7821_v16 = vmax.f32 %v7785_v26, 0.0  ;;  %v8039_v2 = vrot.slane %v8037_v24, 4  ;;  %v20846_v31 = vld [vmem:[#allocation14_spill] sm:$0xff] }
 0x5cf   :  { %v8061_v48 = vshrl.u32 %v11669_v7, 16  ;;  %v8064_v10 = vshll.u32 %v11669_v7, 16  ;;  %v11667_v45 = vpack.c.bf16 %v7852_v1, %v7852_v1  ;;  %v7819_v53 = vmax.f32 %v7783_v8, 0.0  ;;  %v7511_v28 = vpop.f32.mrf.mxu1  ;;  %v20848_v8 = vld [vmem:[#allocation12_spill] sm:$0xff] }
 0x5d0   :  { %v7786_v9 = vadd.f32 %v18527_v23, %v7743_v6  ;;  %v7741_v3 = vmul.f32 %v18521_v51, %v7618_v42  ;;  %vm20845_vm11 = vnez %v20844_v29  ;;  %vm20847_vm4 = vnez %v20846_v31 }
 0x5d1   :  { %v8063_v50 = vrot.slane %v8061_v48, 6  ;;  %v8066_v39 = vrot.slane %v8064_v10, 7  ;;  %v8041_v15 = vshrl.u32 %v11667_v45, 16  ;;  %v8044_v27 = vshll.u32 %v11667_v45, 16  ;;  %v11937_v48 = vpop.f32.mrf.mxu0  ;;  %v18657_v10 = vpop.f32.mrf.mxu1 }
 0x5d2   :  { %v7857_v36 = vsel %vm20845_vm11, %v7821_v16, 0.0  ;;  %v7855_v17 = vsel %vm20847_vm4, %v7819_v53, 0.0  ;;  %v7822_v47 = vmax.f32 %v7786_v9, 0.0  ;;  %v7784_v24 = vadd.f32 %v18527_v23, %v7741_v3 }
 0x5d3   :  { %v8067_v18 = vor.u32 %v8066_v39, %v8063_v50  ;;  %v8043_v7 = vrot.slane %v8041_v15, 6  ;;  %v8046_v26 = vrot.slane %v8044_v27, 7  ;;  %v11672_v62 = vpack.c.bf16 %v7857_v36, %v7857_v36  ;;  %v7514_v27 = vpop.f32.mrf.mxu1  ;;  %v7633_v28 = vpop.f32.mrf.mxu0 }
 0x5d4   :  { %v11670_v1 = vpack.c.bf16 %v7855_v17, %v7855_v17  ;;  %vm20849_vm10 = vnez %v20848_v8  ;;  %v7820_v42 = vmax.f32 %v7784_v24, 0.0  ;;  %v7639_v58 = vadd.f32 %v11936_v22, %v18562_v60  ;;  %v20850_v22 = vld [vmem:[#allocation44_spill] sm:$0xff] }
 0x5d5   :  { %v7858_v6 = vsel %vm20849_vm10, %v7822_v47, 0.0  ;;  %v8068_v45 = vsel %vm14972_vm2, %v8059_v19, %v8067_v18  ;;  %v8069_v16 = vrot.slane %v8067_v18, 4  ;;  %v8047_v53 = vor.u32 %v8046_v26, %v8043_v7  ;;  %v18665_v18 = vpop.f32.mrf.mxu1  ;;  %v11940_v27 = vpop.f32.mrf.mxu0 }
 0x5d6   :  { %v8091_v9 = vshrl.u32 %v11672_v62, 16  ;;  %8396 = vst [vmem:[#allocation2 + $0x24] sm:$0xf] %v8068_v45  ;;  %v8094_v3 = vshll.u32 %v11672_v62, 16  ;;  %v8071_v50 = vshrl.u32 %v11670_v1, 16  ;;  %v8074_v39 = vshll.u32 %v11670_v1, 16 }
 0x5d7   :  { %v11673_v15 = vpack.c.bf16 %v7858_v6, %v7858_v6  ;;  %v8048_v29 = vsel %vm14972_vm2, %v8039_v2, %v8047_v53  ;;  %v8049_v36 = vrot.slane %v8047_v53, 4  ;;  %vm20851_vm0 = vnez %v20850_v22  ;;  %v7519_v45 = vpop.f32.mrf.mxu1 }
 0x5d8   :  { %v8093_v60 = vrot.slane %v8091_v9, 6  ;;  %v7856_v31 = vsel %vm20851_vm0, %v7820_v42, 0.0  ;;  %8394 = vst [vmem:[#allocation2 + $0x1c] sm:$0xf] %v8048_v29  ;;  %v8096_v17 = vrot.slane %v8094_v3, 7  ;;  %v8073_v19 = vrot.slane %v8071_v50, 6 }
 0x5d9   :  { %v8076_v47 = vrot.slane %v8074_v39, 7  ;;  %v8101_v24 = vshrl.u32 %v11673_v15, 16  ;;  %v8058_v7 = vsel %vm14972_vm2, %v8049_v36, %v18621_v61  ;;  %v8104_v26 = vshll.u32 %v11673_v15, 16  ;;  %v18680_v29 = vpop.f32.mrf.mxu1  ;;  %v20854_v45 = vld [vmem:[#allocation15_spill] sm:$0xff] }
 0x5da   :  { %v11671_v62 = vpack.c.bf16 %v7856_v31, %v7856_v31  ;;  %v7746_v2 = vmul.f32 %v18521_v51, %v7639_v58  ;;  %8395 = vst [vmem:[#allocation2 + $0x20] sm:$0xf] %v8058_v7  ;;  %v8097_v1 = vor.u32 %v8096_v17, %v8093_v60  ;;  %v7631_v42 = vadd.f32 %v7630_v25, %v18559_v20 }
 0x5db   :  { %v8077_v8 = vor.u32 %v8076_v47, %v8073_v19  ;;  %v8103_v6 = vrot.slane %v8101_v24, 6  ;;  %v8106_v53 = vrot.slane %v8104_v26, 7  ;;  %v18675_v39 = vadd.f32 %v18591_v56, %v18428_v14  ;;  %v7522_v31 = vpop.f32.mrf.mxu1  ;;  %v20852_v24 = vld [vmem:[#allocation17_spill] sm:$0xff] }
 0x5dc   :  { %v8081_v9 = vshrl.u32 %v11671_v62, 16  ;;  %v8084_v3 = vshll.u32 %v11671_v62, 16  ;;  %v7789_v50 = vadd.f32 %v18527_v23, %v7746_v2  ;;  %v8099_v61 = vrot.slane %v8097_v1, 4 }
 0x5dd   :  { %v8078_v58 = vsel %vm14972_vm2, %v8069_v16, %v8077_v8  ;;  %v7744_v15 = vmul.f32 %v18521_v51, %v7631_v42  ;;  %v18682_v20 = vor.u32 %v8106_v53, %v8103_v6  ;;  %v18687_v14 = vadd.f32 %v18634_v0, %v18452_v57 }
 0x5de   :  { %8397 = vst [vmem:[#allocation2 + $0x28] sm:$0xf] %v8078_v58  ;;  %v8083_v25 = vrot.slane %v8081_v9, 6  ;;  %v8086_v36 = vrot.slane %v8084_v3, 7  ;;  %v7825_v60 = vmax.f32 %v7789_v50, 0.0  ;;  %v7642_v56 = vadd.f32 %v11937_v48, %v18571_v43  ;;  %v7646_v43 = vpop.f32.mrf.mxu0  ;;  %v18698_v48 = vpop.f32.mrf.mxu1 }
 0x5df   :  { %v7787_v22 = vadd.f32 %v18527_v23, %v7744_v15  ;;  %v7634_v16 = vadd.f32 %v7633_v28, %v18494_v30  ;;  %v8079_v17 = vrot.slane %v8077_v8, 4  ;;  %v8108_v19 = vsel %vm14972_vm2, %v8099_v61, %v18682_v20 }
 0x5e0   :  { %v8087_v47 = vor.u32 %v8086_v36, %v8083_v25  ;;  %vm20853_vm3 = vnez %v20852_v24  ;;  %8400 = vst [vmem:[#allocation2 + $0x34] sm:$0xf] %v8108_v19  ;;  %v7747_v57 = vmul.f32 %v18521_v51, %v7642_v56  ;;  %v18702_v30 = vadd.f32 %v18602_v38, %v18436_v21  ;;  %v7527_v3 = vpop.f32.mrf.mxu1  ;;  %v11941_v25 = vpop.f32.mrf.mxu0 }
 0x5e1   :  { %v7861_v7 = vsel %vm20853_vm3, %v7825_v60, 0.0  ;;  %v7823_v62 = vmax.f32 %v7787_v22, 0.0  ;;  %v7745_v0 = vmul.f32 %v18521_v51, %v7634_v16  ;;  %v7655_v8 = vadd.f32 %v11940_v27, %v18582_v54  ;;  %v20860_v3 = vld [vmem:[#allocation21_spill] sm:$0xff] }
 0x5e2   :  { %v11676_v26 = vpack.c.bf16 %v7861_v7, %v7861_v7  ;;  %v8088_v28 = vsel %vm14972_vm2, %v8079_v17, %v8087_v47  ;;  %v8089_v2 = vrot.slane %v8087_v47, 4  ;;  %vm20855_vm14 = vnez %v20854_v45  ;;  %v18715_v36 = vpop.f32.mrf.mxu1  ;;  %v20856_v17 = vld [vmem:[#allocation18_spill] sm:$0xff] }
 0x5e3   :  { %8398 = vst [vmem:[#allocation2 + $0x2c] sm:$0xf] %v8088_v28  ;;  %v7859_v53 = vsel %vm20855_vm14, %v7823_v62, 0.0  ;;  %v7790_v9 = vadd.f32 %v18527_v23, %v7747_v57  ;;  %v7788_v38 = vadd.f32 %v18527_v23, %v7745_v0  ;;  %v7750_v61 = vmul.f32 %v18521_v51, %v7655_v8  ;;  %v20858_v62 = vld [vmem:[#allocation16_spill] sm:$0xff] }
 0x5e4   :  { %v8131_v6 = vshrl.u32 %v11676_v26, 16  ;;  %v8134_v42 = vshll.u32 %v11676_v26, 16  ;;  %v8098_v50 = vsel %vm14972_vm2, %v8089_v2, %v8097_v1  ;;  %v11674_v21 = vpack.c.bf16 %v7859_v53, %v7859_v53 }
 0x5e5   :  { %8399 = vst [vmem:[#allocation2 + $0x30] sm:$0xf] %v8098_v50  ;;  %v7826_v15 = vmax.f32 %v7790_v9, 0.0  ;;  %v7647_v27 = vadd.f32 %v7646_v43, %v18574_v52  ;;  %v7824_v56 = vmax.f32 %v7788_v38, 0.0  ;;  %v7793_v16 = vadd.f32 %v18527_v23, %v7750_v61  ;;  %v7530_v52 = vpop.f32.mrf.mxu1 }
 0x5e6   :  { %v8133_v58 = vrot.slane %v8131_v6, 6  ;;  %v8136_v54 = vrot.slane %v8134_v42, 7  ;;  %v8111_v60 = vshrl.u32 %v11674_v21, 16  ;;  %v8114_v22 = vshll.u32 %v11674_v21, 16 }
 0x5e7   :  { %v18720_v1 = vadd.f32 %v18616_v11, %v18443_v34  ;;  %vm20857_vm6 = vnez %v20856_v17  ;;  %v7748_v47 = vmul.f32 %v18521_v51, %v7647_v27  ;;  %vm20859_vm1 = vnez %v20858_v62  ;;  %v7649_v11 = vpop.f32.mrf.mxu0  ;;  %v18731_v2 = vpop.f32.mrf.mxu1 }
 0x5e8   :  { %v18722_v31 = vor.u32 %v8136_v54, %v8133_v58  ;;  %v7862_v19 = vsel %vm20857_vm6, %v7826_v15, 0.0  ;;  %v8113_v24 = vrot.slane %v8111_v60, 6  ;;  %v8116_v7 = vrot.slane %v8114_v22, 7  ;;  %v20862_v22 = vld [vmem:[#allocation19_spill] sm:$0xff] }
 0x5e9   :  { %v11677_v26 = vpack.c.bf16 %v7862_v19, %v7862_v19  ;;  %v7860_v57 = vsel %vm20859_vm1, %v7824_v56, 0.0  ;;  %v8109_v0 = vrot.slane %v18682_v20, 4  ;;  %v7829_v28 = vmax.f32 %v7793_v16, 0.0  ;;  %v7535_v38 = vpop.f32.mrf.mxu1 }
 0x5ea   :  { %v11675_v43 = vpack.c.bf16 %v7860_v57, %v7860_v57  ;;  %v7791_v34 = vadd.f32 %v18527_v23, %v7748_v47  ;;  %v8117_v8 = vor.u32 %v8116_v7, %v8113_v24  ;;  %v7658_v45 = vadd.f32 %v11941_v25, %v18608_v41  ;;  %v11944_v25 = vpop.f32.mrf.mxu0  ;;  %v8430_v38 = vld [vmem:[#allocation2 + $0x8] sm:$0xf] }
 0x5eb   :  { %v8141_v6 = vshrl.u32 %v11677_v26, 16  ;;  %v8144_v42 = vshll.u32 %v11677_v26, 16  ;;  %vm20861_vm15 = vnez %v20860_v3  ;;  %v8139_v20 = vrot.slane %v18722_v31, 4  ;;  %v18741_v56 = vpop.f32.mrf.mxu1 }
 0x5ec   :  { %v8121_v53 = vshrl.u32 %v11675_v43, 16  ;;  %v8124_v9 = vshll.u32 %v11675_v43, 16  ;;  %v7865_v50 = vsel %vm20861_vm15, %v7829_v28, 0.0  ;;  %v7827_v21 = vmax.f32 %v7791_v34, 0.0  ;;  %v8431_v34 = vld [vmem:[#allocation2 + $0xc] sm:$0xf] }
 0x5ed   :  { %v8118_v61 = vsel %vm14972_vm2, %v8109_v0, %v8117_v8  ;;  %v8143_v58 = vrot.slane %v8141_v6, 6  ;;  %v8146_v54 = vrot.slane %v8144_v42, 7  ;;  %v11680_v60 = vpack.c.bf16 %v7865_v50, %v7865_v50  ;;  %v7538_v62 = vpop.f32.mrf.mxu1 }
 0x5ee   :  { %8401 = vst [vmem:[#allocation2 + $0x38] sm:$0xf] %v8118_v61  ;;  %v8123_v15 = vrot.slane %v8121_v53, 6  ;;  %v8126_v27 = vrot.slane %v8124_v9, 7  ;;  %vm20863_vm11 = vnez %v20862_v22  ;;  %v7751_v19 = vmul.f32 %v18521_v51, %v7658_v45 }
 0x5ef   :  { %v7863_v41 = vsel %vm20863_vm11, %v7827_v21, 0.0  ;;  %v8147_v16 = vor.u32 %v8146_v54, %v8143_v58  ;;  %v7650_v47 = vadd.f32 %v7649_v11, %v18515_v33  ;;  %v8119_v52 = vrot.slane %v8117_v8, 4  ;;  %v8432_v33 = vld [vmem:[#allocation2 + $0x10] sm:$0xf]  ;;  %v7662_v11 = vpop.f32.mrf.mxu0  ;;  %v18749_v8 = vpop.f32.mrf.mxu1 }
 0x5f0   :  { %v11678_v17 = vpack.c.bf16 %v7863_v41, %v7863_v41  ;;  %v8127_v24 = vor.u32 %v8126_v27, %v8123_v15  ;;  %v8171_v7 = vshrl.u32 %v11680_v60, 16  ;;  %v8174_v26 = vshll.u32 %v11680_v60, 16  ;;  %v8433_v15 = vld [vmem:[#allocation2 + $0x14] sm:$0xf] }
 0x5f1   :  { %v8148_v57 = vsel %vm14972_vm2, %v8139_v20, %v8147_v16  ;;  %v8149_v0 = vrot.slane %v8147_v16, 4  ;;  %v7794_v50 = vadd.f32 %v18527_v23, %v7751_v19  ;;  %v7749_v21 = vmul.f32 %v18521_v51, %v7650_v47  ;;  %v7543_v27 = vpop.f32.mrf.mxu1  ;;  %v8466_v16 = vld [vmem:[#allocation2 + $0x8] sm:$0xe]  ;;  %v18774_v47 = vpop.f32.mrf.mxu0 }
 0x5f2   :  { %v8151_v43 = vshrl.u32 %v11678_v17, 16  ;;  %v8154_v28 = vshll.u32 %v11678_v17, 16  ;;  %8404 = vst [vmem:[#allocation2 + $0x44] sm:$0xf] %v8148_v57  ;;  %v8128_v6 = vsel %vm14972_vm2, %v8119_v52, %v8127_v24  ;;  %v8129_v42 = vrot.slane %v8127_v24, 4 }
 0x5f3   :  { %v8173_v45 = vrot.slane %v8171_v7, 6  ;;  %v8176_v53 = vrot.slane %v8174_v26, 7  ;;  %8402 = vst [vmem:[#allocation2 + $0x3c] sm:$0xf] %v8128_v6  ;;  %v7671_v58 = vadd.f32 %v11944_v25, %v18675_v39  ;;  %v18759_v54 = vcombine.low %v8430_v38, %v8431_v34  ;;  %v18776_v52 = vpop.f32.mrf.mxu1 }
 0x5f4   :  { %v8153_v9 = vrot.slane %v8151_v43, 6  ;;  %v8156_v3 = vrot.slane %v8154_v28, 7  ;;  %v8138_v20 = vsel %vm14972_vm2, %v8129_v42, %v18722_v31  ;;  %v7830_v22 = vmax.f32 %v7794_v50, 0.0  ;;  %v7665_v50 = vpop.f32.mrf.mxu0 }
 0x5f5   :  { %v18756_v61 = vor.u32 %v8176_v53, %v8173_v45  ;;  %8403 = vst [vmem:[#allocation2 + $0x40] sm:$0xf] %v8138_v20  ;;  %v7792_v41 = vadd.f32 %v18527_v23, %v7749_v21  ;;  %v18764_v17 = vcombine.low %v8432_v33, %v8433_v15  ;;  %v18768_v31 = vadd.f32 %v18647_v55, %v18459_v5  ;;  %v20864_v5 = vld [vmem:[#allocation22_spill] sm:$0xff] }
 0x5f6   :  { %v18761_v60 = vor.u32 %v8156_v3, %v8153_v9  ;;  %v7754_v19 = vmul.f32 %v18521_v51, %v7671_v58  ;;  %v8596_v39 = vshll.u32 %v18759_v54, 16  ;;  %v18772_v25 = vcombine.low %v8466_v16, %v8431_v34  ;;  %v7546_v34 = vpop.f32.mrf.mxu1  ;;  %v12365_v3 = vld [vmem:[%s20298_s4 + $0x138] sm:$0xff]  }
 0x5f7   :  { %v18783_v7 = vadd.f32 %v18657_v10, %v18466_v44  ;;  %vm20865_vm4 = vnez %v20864_v5  ;;  %v7828_v26 = vmax.f32 %v7792_v41, 0.0  ;;  %v18789_v28 = vrot.slane %v18764_v17, 1  ;;  %v12384_v20 = vld [vmem:[%s20298_s4 + $0x1b8] sm:$0xff]   ;;  %v20870_v41 = vld [vmem:[#allocation27_spill] sm:$0xff]  ;;  %v12387_v34 = vld [vmem:[%s20298_s4 + $0x1b0] sm:$0xff]  }
 0x5f8   :  { %v8158_v24 = vsel %vm14972_vm2, %v8149_v0, %v18761_v60  ;;  %v7866_v55 = vsel %vm20865_vm4, %v7830_v22, 0.0  ;;  %v7797_v57 = vadd.f32 %v18527_v23, %v7754_v19  ;;  %v8598_v43 = vrot.slane %v8596_v39, 1  ;;  %v20866_v0 = vld [vmem:[#allocation20_spill] sm:$0xff] }
 0x5f9   :  { %8405 = vst [vmem:[#allocation2 + $0x48] sm:$0xf] %v8158_v24  ;;  %v11681_v62 = vpack.c.bf16 %v7866_v55, %v7866_v55  ;;  %v8179_v6 = vrot.slane %v18756_v61, 4  ;;  %vm20867_vm10 = vnez %v20866_v0  ;;  %v18796_v44 = vadd.f32 %v18665_v18, %v18473_v37  ;;  %v11948_v55 = vpop.f32.mrf.mxu0 }
 0x5fa   :  { %v7864_v42 = vsel %vm20867_vm10, %v7828_v26, 0.0  ;;  %v8813_v10 = vrot.slane %v18772_v25, 1  ;;  %v7833_v9 = vmax.f32 %v7797_v57, 0.0  ;;  %vm20868_vm0 = vsmask.f32 7424 }
 0x5fb   :  { %v8181_v45 = vshrl.u32 %v11681_v62, 16  ;;  %v8184_v53 = vshll.u32 %v11681_v62, 16  ;;  %v11679_v33 = vpack.c.bf16 %v7864_v42, %v7864_v42  ;;  %v8599_v21 = vsel %vm20868_vm0, %v18542_v4, %v8598_v43  ;;  %vm20875_vm15 = vmmov %vm20868_vm0 }
 0x5fc   :  { %vm20869_vm3 = vcmask 1046528   ;;  %v8753_v37 = vrot.slane %v18759_v54, 1  ;;  %v7663_v18 = vadd.f32 %v7662_v11, %v18629_v63  ;;  %9782 = vmatprep.mubr.bf16.mxu1 %v8599_v21  ;;  %vm20871_vm14 = vnez %v20870_v41 }
 0x5fd   :  { %v8814_v38 = vsel %vm20869_vm3, %v8813_v10, %v18789_v28  ;;  %v8183_v58 = vrot.slane %v8181_v45, 6  ;;  %v8186_v15 = vrot.slane %v8184_v53, 7  ;;  %v8161_v27 = vshrl.u32 %v11679_v33, 16  ;;  %9783 = vmatmul.mubr.bf16.vlgmr.msra.gmra.mxu1 %v18508_v59  ;;  %vm20872_vm6 = vmmov %vm20869_vm3  ;;  %v12368_v59 = vld [vmem:[%s20298_s4 + $0x130] sm:$0xff]  }
 0x5fe   :  { %v8164_v22 = vshll.u32 %v11679_v33, 16  ;;  %9959 = vmatprep.mubr.bf16.mxu0 %v8814_v38  ;;  %v7869_v4 = vsel %vm20871_vm14, %v7833_v9, 0.0  ;;  %v8754_v63 = vsel %vm20872_vm6, %v18544_v32, %v8753_v37  ;;  %v7752_v11 = vmul.f32 %v18521_v51, %v7663_v18  ;;  %10105 = vmatpush1.bf16.msra.mxu1 %v12365_v3  ;;  %v12370_v38 = vld [vmem:[%s20298_s4 + $0x128] sm:$0xff]   ;;  %vm20876_vm11 = vmmov %vm20869_vm3 }
 0x5ff   :  { %v8600_v16 = vshrl.u32 %v18759_v54, 16  ;;  %v18820_v19 = vor.u32 %v8186_v15, %v8183_v58  ;;  %v8163_v39 = vrot.slane %v8161_v27, 6  ;;  %v11684_v5 = vpack.c.bf16 %v7869_v4, %v7869_v4  ;;  %9960 = vmatmul.mubr.bf16.vlgmr.msra.gmra.mxu0 %v8754_v63  ;;  %10106 = vmatprep.subr.bf16.mxu1 %v20643_v35  ;;  %vm20877_vm4 = vmmov %vm20869_vm3 }
 0x600   :  { %v8166_v24 = vrot.slane %v8164_v22, 7  ;;  %v8159_v26 = vrot.slane %v18761_v60, 4  ;;  %v7795_v32 = vadd.f32 %v18527_v23, %v7752_v11  ;;  %v8604_v57 = vshll.u32 %v18764_v17, 16  ;;  %10282 = vmatpush1.bf16.msra.mxu0 %v12384_v20  ;;  %v20873_v20 = vld [vmem:[#allocation23_spill] sm:$0xff]  ;;  %vm20884_vm14 = vmmov %vm20875_vm15 }
 0x601   :  { %v8602_v62 = vor.u32 %v8600_v16, %v8598_v43  ;;  %v8188_v0 = vsel %vm14972_vm2, %v8179_v6, %v18820_v19  ;;  %v8211_v10 = vshrl.u32 %v11684_v5, 16  ;;  %v18837_v60 = vadd.f32 %v18680_v29, %v18479_v40  ;;  %v18839_v43 = vld [vmem:[#allocation2 + $0x18] sm:$0xff]   ;;  %10283 = vmatprep.subr.bf16.mxu0 %v20643_v35  ;;  %v7678_v29 = vpop.f32.mrf.mxu0 }
 0x602   :  { %v8167_v42 = vor.u32 %v8166_v24, %v8163_v39  ;;  %v8189_v45 = vrot.slane %v18820_v19, 4  ;;  %8408 = vst [vmem:[#allocation2 + $0x54] sm:$0xf] %v8188_v0  ;;  %v8214_v53 = vshll.u32 %v11684_v5, 16  ;;  %v7831_v33 = vmax.f32 %v7795_v32, 0.0  ;;  %10107 = vmatpush1.bf16.msra.mxu1 %v12368_v59  ;;  %v18881_v5 = vld [vmem:[#allocation2 + $0x20] sm:$0xff]  }
 0x603   :  { %v18843_v9 = vrot.slane %v8604_v57, 1  ;;  %v8213_v21 = vrot.slane %v8211_v10, 6  ;;  %v7674_v40 = vadd.f32 %v18774_v47, %v18702_v30  ;;  %vm20874_vm1 = vnez %v20873_v20  ;;  %10108 = vmatprep.subr.bf16.mxu1 %v20643_v35  ;;  %v18883_v59 = vpop.f32.mrf.mxu0  ;;  %v12393_v19 = vld [vmem:[%s20298_s4 + $0x198] sm:$0xff]  }
 0x604   :  { %v8168_v6 = vsel %vm14972_vm2, %v8159_v26, %v8167_v42  ;;  %v8169_v3 = vrot.slane %v8167_v42, 4  ;;  %v8216_v18 = vrot.slane %v8214_v53, 7  ;;  %v7867_v58 = vsel %vm20874_vm1, %v7831_v33, 0.0  ;;  %10284 = vmatpush1.bf16.msra.mxu0 %v12387_v34  ;;  %vm20887_vm1 = vmmov %vm20877_vm4 }
 0x605   :  { %8406 = vst [vmem:[#allocation2 + $0x4c] sm:$0xf] %v8168_v6  ;;  %v8607_v15 = vsel %vm20875_vm15, %v8602_v62, %v18843_v9  ;;  %v7666_v27 = vadd.f32 %v7665_v50, %v18600_v46  ;;  %v11682_v47 = vpack.c.bf16 %v7867_v58, %v7867_v58  ;;  %v7755_v22 = vmul.f32 %v18521_v51, %v7674_v40  ;;  %v18912_v40 = vpop.f32.mrf.mxu0  ;;  %vm20889_vm15 = vmmov %vm20887_vm1 }
 0x606   :  { %v8178_v30 = vsel %vm14972_vm2, %v8169_v3, %v18756_v61  ;;  %9790 = vmatprep.mubr.bf16.mxu1 %v8607_v15  ;;  %v8757_v41 = vrot.slane %v18839_v43, 1  ;;  %10285 = vmatprep.subr.bf16.mxu0 %v20643_v35  ;;  %v18864_v4 = vor.u32 %v8216_v18, %v8213_v21  ;;  %v18866_v63 = vrot.slane %v8604_v57, 2  ;;  %v12389_v61 = vld [vmem:[%s20298_s4 + $0x1a8] sm:$0xff]   ;;  %v20880_v18 = vld [vmem:[#allocation25_spill] sm:$0xff] }
 0x607   :  { %8407 = vst [vmem:[#allocation2 + $0x50] sm:$0xf] %v8178_v30  ;;  %v7753_v46 = vmul.f32 %v18521_v51, %v7666_v27  ;;  %v7687_v50 = vadd.f32 %v11948_v55, %v18768_v31  ;;  %9791 = vmatmul.mubr.bf16.gmra.mxu1 %v18759_v54  ;;  %v8191_v11 = vshrl.u32 %v11682_v47, 16  ;;  %v8194_v16 = vshll.u32 %v11682_v47, 16  ;;  %v12372_v31 = vld [vmem:[%s20298_s4 + $0x120] sm:$0xff]  }
 0x608   :  { %v7798_v39 = vadd.f32 %v18527_v23, %v7755_v22  ;;  %v18879_v24 = vsel %vm20876_vm11, %v18789_v28, %v8757_v41  ;;  %10109 = vmatpush1.bf16.msra.mxu1 %v12370_v38  ;;  %v8219_v55 = vrot.slane %v18864_v4, 4  ;;  %v8756_v62 = vsel %vm20877_vm4, %v8753_v37, %v18789_v28  ;;  %10286 = vmatpush1.bf16.msra.mxu0 %v12389_v61  ;;  %v12391_v54 = vld [vmem:[%s20298_s4 + $0x1a0] sm:$0xff]   ;;  %v20878_v37 = vld [vmem:[#allocation28_spill] sm:$0xff]  ;;  %vm20892_vm4 = vmmov %vm20884_vm14 }
 0x609   :  { %v7796_v26 = vadd.f32 %v18527_v23, %v7753_v46  ;;  %9967 = vmatprep.mubr.bf16.mxu0 %v18879_v24  ;;  %v7758_v32 = vmul.f32 %v18521_v51, %v7687_v50  ;;  %10110 = vmatprep.subr.bf16.mxu1 %v20643_v35  ;;  %v8193_v57 = vrot.slane %v8191_v11, 6  ;;  %v8196_v34 = vrot.slane %v8194_v16, 7  ;;  %v20882_v50 = vld [vmem:[#allocation31_spill] sm:$0xff] }
 0x60a   :  { %v7834_v0 = vmax.f32 %v7798_v39, 0.0  ;;  %9968 = vmatmul.mubr.bf16.gmra.mxu0 %v8756_v62  ;;  %v7679_v42 = vadd.f32 %v7678_v29, %v18720_v1  ;;  %v8608_v33 = vshrl.u32 %v18764_v17, 16  ;;  %v18901_v6 = vshll.u32 %v18839_v43, 16  ;;  %v12374_v29 = vld [vmem:[%s20298_s4 + $0x118] sm:$0xff]   ;;  %10287 = vmatprep.subr.bf16.mxu0 %v20643_v35 }
 0x60b   :  { %v7832_v10 = vmax.f32 %v7796_v26, 0.0  ;;  %v7801_v53 = vadd.f32 %v18527_v23, %v7758_v32  ;;  %v18906_v28 = vor.u32 %v8196_v34, %v8193_v57  ;;  %vm20879_vm10 = vnez %v20878_v37 }
 0x60c   :  { %v7870_v3 = vsel %vm20879_vm10, %v7834_v0, 0.0  ;;  %v7756_v1 = vmul.f32 %v18521_v51, %v7679_v42  ;;  %v8759_v21 = vrot.slane %v18881_v5, 1  ;;  %10111 = vmatpush1.bf16.msra.mxu1 %v12372_v31  ;;  %vm20881_vm0 = vnez %v20880_v18  ;;  %10288 = vmatpush1.bf16.msra.mxu0 %v12391_v54  ;;  %v11952_v31 = vpop.f32.mrf.mxu0  ;;  %v20885_v54 = vld [vmem:[#allocation29_spill] sm:$0xff] }
 0x60d   :  { %v11685_v38 = vpack.c.bf16 %v7870_v3, %v7870_v3  ;;  %v7868_v20 = vsel %vm20881_vm0, %v7832_v10, 0.0  ;;  %v7837_v58 = vmax.f32 %v7801_v53, 0.0  ;;  %v8610_v15 = vor.u32 %v8608_v33, %v18843_v9  ;;  %10112 = vmatprep.subr.bf16.mxu1 %v20643_v35  ;;  %10289 = vmatprep.subr.bf16.mxu0 %v20643_v35  ;;  %v12395_v3 = vld [vmem:[%s20298_s4 + $0x190] sm:$0xff]  }
 0x60e   :  { %v8198_v51 = vsel %vm14972_vm2, %v8189_v45, %v18906_v28  ;;  %v8199_v27 = vrot.slane %v18906_v28, 4  ;;  %v11683_v30 = vpack.c.bf16 %v7868_v20, %v7868_v20  ;;  %v7799_v47 = vadd.f32 %v18527_v23, %v7756_v1  ;;  %v12376_v23 = vld [vmem:[%s20298_s4 + $0x110] sm:$0xff]  }
 0x60f   :  { %8409 = vst [vmem:[#allocation2 + $0x58] sm:$0xf] %v8198_v51  ;;  %v8221_v22 = vshrl.u32 %v11685_v38, 16  ;;  %v8224_v46 = vshll.u32 %v11685_v38, 16  ;;  %vm20883_vm3 = vnez %v20882_v50  ;;  %v8614_v9 = vrot.slane %v18901_v6, 1  ;;  %v20888_v50 = vld [vmem:[#allocation47_spill] sm:$0xff] }
 0x610   :  { %v7873_v61 = vsel %vm20883_vm3, %v7837_v58, 0.0  ;;  %v8201_v11 = vshrl.u32 %v11683_v30, 16  ;;  %v8204_v45 = vshll.u32 %v11683_v30, 16  ;;  %v7835_v39 = vmax.f32 %v7799_v47, 0.0  ;;  %10113 = vmatpush1.bf16.msra.mxu1 %v12374_v29  ;;  %10290 = vmatpush1.bf16.msra.mxu0 %v12393_v19 }
 0x611   :  { %v11688_v16 = vpack.c.bf16 %v7873_v61, %v7873_v61  ;;  %v8223_v26 = vrot.slane %v8221_v22, 6  ;;  %v8226_v32 = vrot.slane %v8224_v46, 7  ;;  %v8615_v62 = vsel %vm20884_vm14, %v8610_v15, %v8614_v9  ;;  %10114 = vmatprep.subr.bf16.mxu1 %v20643_v35  ;;  %v18981_v46 = vld [vmem:[#allocation2 + $0x28] sm:$0xff]   ;;  %10291 = vmatprep.subr.bf16.mxu0 %v20643_v35 }
 0x612   :  { %v8831_v57 = vrot.slane %v8608_v33, 1  ;;  %v8203_v34 = vrot.slane %v8201_v11, 6  ;;  %v8206_v0 = vrot.slane %v8204_v45, 7  ;;  %9798 = vmatprep.mubr.bf16.mxu1 %v8615_v62  ;;  %vm20886_vm6 = vnez %v20885_v54 }
 0x613   :  { %v8251_v42 = vshrl.u32 %v11688_v16, 16  ;;  %v8254_v10 = vshll.u32 %v11688_v16, 16  ;;  %v18943_v53 = vor.u32 %v8226_v32, %v8223_v26  ;;  %v7871_v28 = vsel %vm20886_vm6, %v7835_v39, 0.0  ;;  %9799 = vmatmul.mubr.bf16.gmra.mxu1 %v18764_v17 }
 0x614   :  { %v18948_v37 = vor.u32 %v18866_v63, %v8831_v57  ;;  %v18955_v33 = vsel %vm20887_vm1, %v8757_v41, %v8759_v21  ;;  %v8207_v1 = vor.u32 %v8206_v0, %v8203_v34  ;;  %v11686_v18 = vpack.c.bf16 %v7871_v28, %v7871_v28  ;;  %v7694_v63 = vpop.f32.mrf.mxu0  ;;  %10115 = vmatpush1.bf16.msra.mxu1 %v12376_v23  ;;  %v12378_v41 = vld [vmem:[%s20298_s4 + $0x108] sm:$0xff]  }
 0x615   :  { %v8253_v29 = vrot.slane %v8251_v42, 6  ;;  %v8256_v38 = vrot.slane %v8254_v10, 7  ;;  %9975 = vmatprep.mubr.bf16.mxu0 %v18955_v33  ;;  %v8228_v20 = vsel %vm14972_vm2, %v8219_v55, %v18943_v53  ;;  %v8229_v58 = vrot.slane %v18943_v53, 4  ;;  %10116 = vmatprep.subr.bf16.mxu1 %v20643_v35 }
 0x616   :  { %v7526_v15 = vadd.f32 %v18698_v48, %v18485_v12  ;;  %v7690_v51 = vadd.f32 %v18883_v59, %v18783_v7  ;;  %9976 = vmatmul.mubr.bf16.gmra.mxu0 %v18879_v24  ;;  %8412 = vst [vmem:[#allocation2 + $0x64] sm:$0xf] %v8228_v20  ;;  %v8208_v30 = vsel %vm14972_vm2, %v8199_v27, %v8207_v1  ;;  %v8209_v47 = vrot.slane %v8207_v1, 4  ;;  %v18989_v7 = vld [vmem:[%s20299_s2] ss:$0 sm:$0xff]  ;;  %v11953_v11 = vpop.f32.mrf.mxu0  ;;  %v20893_v20 = vld [vmem:[#allocation32_spill] sm:$0xff] }
 0x617   :  { %v8231_v22 = vshrl.u32 %v11686_v18, 16  ;;  %v7529_v55 = vadd.f32 %v18715_v36, %v18491_v49  ;;  %8410 = vst [vmem:[#allocation2 + $0x5c] sm:$0xf] %v8208_v30  ;;  %v18984_v12 = vor.u32 %v8256_v38, %v8253_v29  ;;  %v8234_v48 = vshll.u32 %v11686_v18, 16  ;;  %10292 = vmatpush1.bf16.msra.mxu0 %v12395_v3  ;;  %v12397_v49 = vld [vmem:[%s20298_s4 + $0x188] sm:$0xff]  }
 0x618   :  { %v7759_v24 = vmul.f32 %v18989_v7, %v7690_v51  ;;  %v7682_v59 = vadd.f32 %v18912_v40, %v18687_v14  ;;  %v8218_v36 = vsel %vm14972_vm2, %v8209_v47, %v18864_v4  ;;  %v19002_v61 = vadd.f32 %v18731_v2, %v20888_v50  ;;  %10117 = vmatpush1.bf16.msra.mxu1 %v12378_v41  ;;  %v12380_v14 = vld [vmem:[%s20298_s4 + $0x100] sm:$0xff]   ;;  %v7697_v54 = vpop.f32.mrf.mxu0 }
 0x619   :  { %v8233_v27 = vrot.slane %v8231_v22, 6  ;;  %v7703_v19 = vadd.f32 %v11952_v31, %v7526_v15  ;;  %10293 = vmatprep.subr.bf16.mxu0 %v20643_v35  ;;  %8411 = vst [vmem:[#allocation2 + $0x60] sm:$0xf] %v8218_v36  ;;  %v8236_v40 = vrot.slane %v8234_v48, 7  ;;  %v19011_v4 = vld [vmem:[%s20300_s3] ss:$0 sm:$0xff]  ;;  %v7695_v16 = vadd.f32 %v7694_v63, %v18796_v44  ;;  %10118 = vmatprep.subr.bf16.mxu1 %v20643_v35 }
 0x61a   :  { %v7802_v45 = vadd.f32 %v19011_v4, %v7759_v24  ;;  %v7757_v2 = vmul.f32 %v18989_v7, %v7682_v59  ;;  %v19019_v31 = vshrl.u32 %v18839_v43, 16  ;;  %v19022_v23 = vshll.u32 %v18881_v5, 16  ;;  %v12399_v44 = vld [vmem:[%s20298_s4 + $0x180] sm:$0xff]   ;;  %v12401_v22 = vld [vmem:[%s20298_s4 + $0x1f8] sm:$0xff]  }
 0x61b   :  { %v7762_v39 = vmul.f32 %v18989_v7, %v7703_v19  ;;  %v8761_v26 = vrot.slane %v18981_v46, 1  ;;  %v19025_v32 = vor.u32 %v8236_v40, %v8233_v27  ;;  %v7760_v34 = vmul.f32 %v18989_v7, %v7695_v16  ;;  %10294 = vmatpush1.bf16.msra.mxu0 %v12397_v49  ;;  %v20895_v15 = vld [vmem:[#allocation46_spill] sm:$0xff]  ;;  %v12386_v27 = vld [vmem:[%s20298_s4 + $0x170] sm:$0xff]  }
 0x61c   :  { %v7838_v62 = vmax.f32 %v7802_v45, 0.0  ;;  %v7800_v57 = vadd.f32 %v19011_v4, %v7757_v2  ;;  %v8618_v42 = vor.u32 %v19019_v31, %v8614_v9  ;;  %v8622_v10 = vrot.slane %v19022_v23, 1  ;;  %10119 = vmatpush1.bf16.msra.mxu1 %v12380_v14  ;;  %10295 = vmatprep.subr.bf16.mxu0 %v20643_v35  ;;  %v20890_v9 = vld [vmem:[#allocation24_spill] sm:$0xff]  ;;  %v20898_v45 = vld [vmem:[#allocation35_spill] sm:$0xff] }
 0x61d   :  { %v7805_v0 = vadd.f32 %v19011_v4, %v7762_v39  ;;  %v19042_v53 = vsel %vm20889_vm15, %v8759_v21, %v8761_v26  ;;  %v8259_v28 = vrot.slane %v18984_v12, 4  ;;  %v8238_v3 = vsel %vm14972_vm2, %v8229_v58, %v19025_v32  ;;  %10120 = vmatprep.subr.bf16.mxu1 %v20643_v35  ;;  %v12383_v21 = vld [vmem:[%s20298_s4 + $0x178] sm:$0xff]   ;;  %v11956_v39 = vpop.f32.mrf.mxu0 }
 0x61e   :  { %vm20891_vm11 = vnez %v20890_v9  ;;  %v7836_v29 = vmax.f32 %v7800_v57, 0.0  ;;  %9983 = vmatprep.mubr.bf16.mxu0 %v19042_v53  ;;  %8413 = vst [vmem:[#allocation2 + $0x68] sm:$0xf] %v8238_v3  ;;  %v7803_v63 = vadd.f32 %v19011_v4, %v7760_v34  ;;  %v8623_v41 = vsel %vm20892_vm4, %v8618_v42, %v8622_v10 }
 0x61f   :  { %v7874_v1 = vsel %vm20891_vm11, %v7838_v62, 0.0  ;;  %v7841_v18 = vmax.f32 %v7805_v0, 0.0  ;;  %9984 = vmatmul.mubr.bf16.gmra.mxu0 %v18955_v33  ;;  %vm20894_vm10 = vnez %v20893_v20  ;;  %9806 = vmatprep.mubr.bf16.mxu1 %v8623_v41  ;;  %v19065_v51 = vadd.f32 %v18741_v56, %v20895_v15  ;;  %v20896_v33 = vld [vmem:[#allocation30_spill] sm:$0xff]  ;;  %v12402_v62 = vld [vmem:[%s20298_s4 + $0x1f0] sm:$0xff]  }
 0x620   :  { %v11689_v38 = vpack.c.bf16 %v7874_v1, %v7874_v1  ;;  %v7872_v58 = vsel %vm20894_vm10, %v7836_v29, 0.0  ;;  %v7706_v30 = vadd.f32 %v11953_v11, %v7529_v55  ;;  %v7698_v47 = vadd.f32 %v7697_v54, %v18837_v60  ;;  %10296 = vmatpush1.bf16.msra.mxu0 %v12399_v44  ;;  %9807 = vmatmul.mubr.bf16.gmra.mxu1 %v18839_v43  ;;  %v12390_v1 = vld [vmem:[%s20298_s4 + $0x168] sm:$0xff]   ;;  %v20900_v20 = vld [vmem:[#allocation33_spill] sm:$0xff]  ;;  %vm20910_vm10 = vmmov %vm20887_vm1 }
 0x621   :  { %v11687_v59 = vpack.c.bf16 %v7872_v58, %v7872_v58  ;;  %vm20897_vm0 = vnez %v20896_v33  ;;  %10297 = vmatprep.subr.bf16.mxu0 %v20643_v35  ;;  %v7839_v36 = vmax.f32 %v7803_v63, 0.0  ;;  %10121 = vmatpush2.bf16.msra.mxu1 %v12383_v21  ;;  %vm20899_vm3 = vnez %v20898_v45  ;;  %v20902_v33 = vld [vmem:[#allocation3_spill] sm:$0xff] }
 0x622   :  { %v8261_v48 = vshrl.u32 %v11689_v38, 16  ;;  %v8264_v24 = vshll.u32 %v11689_v38, 16  ;;  %v7877_v49 = vsel %vm20897_vm0, %v7841_v18, 0.0  ;;  %v7763_v55 = vmul.f32 %v18989_v7, %v7706_v30  ;;  %10122 = vmatprep.subr.bf16.mxu1 %v20643_v35  ;;  %v7710_v30 = vpop.f32.mrf.mxu0  ;;  %vm20911_vm0 = vmmov %vm20892_vm4 }
 0x623   :  { %v11692_v56 = vpack.c.bf16 %v7877_v49, %v7877_v49  ;;  %v7761_v60 = vmul.f32 %v18989_v7, %v7698_v47  ;;  %v8241_v11 = vshrl.u32 %v11687_v59, 16  ;;  %v8244_v14 = vshll.u32 %v11687_v59, 16 }
 0x624   :  { %v8263_v50 = vrot.slane %v8261_v48, 6  ;;  %v8266_v19 = vrot.slane %v8264_v24, 7  ;;  %v7875_v2 = vsel %vm20899_vm3, %v7839_v36, 0.0  ;;  %v7806_v16 = vadd.f32 %v19011_v4, %v7763_v55  ;;  %10298 = vmatpush2.bf16.msra.mxu0 %v12401_v22  ;;  %v12394_v55 = vld [vmem:[%s20298_s4 + $0x160] sm:$0xff]   ;;  %v11957_v45 = vpop.f32.mrf.mxu0 }
 0x625   :  { %v8291_v43 = vshrl.u32 %v11692_v56, 16  ;;  %v8294_v40 = vshll.u32 %v11692_v56, 16  ;;  %v8243_v34 = vrot.slane %v8241_v11, 6  ;;  %v8246_v44 = vrot.slane %v8244_v14, 7  ;;  %10299 = vmatprep.subr.bf16.mxu0 %v20643_v35  ;;  %10123 = vmatpush2.bf16.msra.mxu1 %v12386_v27  ;;  %v20904_v56 = vld [vmem:[#allocation49_spill] sm:$0xff] }
 0x626   :  { %v8267_v57 = vor.u32 %v8266_v19, %v8263_v50  ;;  %v11690_v0 = vpack.c.bf16 %v7875_v2, %v7875_v2  ;;  %v7842_v3 = vmax.f32 %v7806_v16, 0.0  ;;  %v7804_v9 = vadd.f32 %v19011_v4, %v7761_v60  ;;  %10124 = vmatprep.subr.bf16.mxu1 %v20643_v35 }
 0x627   :  { %v8293_v42 = vrot.slane %v8291_v43, 6  ;;  %v8296_v54 = vrot.slane %v8294_v40, 7  ;;  %v8239_v29 = vrot.slane %v19025_v32, 4  ;;  %v8247_v38 = vor.u32 %v8246_v44, %v8243_v34  ;;  %v12405_v32 = vld [vmem:[%s20298_s4 + $0x1e8] sm:$0xff]   ;;  %v19119_v40 = vld [vmem:[#allocation2 + $0x30] sm:$0xff]  }
 0x628   :  { %v8268_v21 = vsel %vm14972_vm2, %v8259_v28, %v8267_v57  ;;  %v8271_v18 = vshrl.u32 %v11690_v0, 16  ;;  %v8274_v41 = vshll.u32 %v11690_v0, 16  ;;  %vm20901_vm14 = vnez %v20900_v20  ;;  %10300 = vmatpush2.bf16.msra.mxu0 %v12402_v62  ;;  %v12398_v0 = vld [vmem:[%s20298_s4 + $0x158] sm:$0xff]  }
 0x629   :  { %8416 = vst [vmem:[#allocation2 + $0x74] sm:$0xf] %v8268_v21  ;;  %v19096_v63 = vor.u32 %v8296_v54, %v8293_v42  ;;  %v7878_v58 = vsel %vm20901_vm14, %v7842_v3, 0.0  ;;  %v7840_v15 = vmax.f32 %v7804_v9, 0.0  ;;  %v8248_v28 = vsel %vm14972_vm2, %v8239_v29, %v8247_v38  ;;  %10301 = vmatprep.subr.bf16.mxu0 %v20643_v35  ;;  %10125 = vmatpush2.bf16.msra.mxu1 %v12390_v1  ;;  %vm20916_vm14 = vmmov %vm20911_vm0 }
 0x62a   :  { %v8249_v47 = vrot.slane %v8247_v38, 4  ;;  %v8273_v22 = vrot.slane %v8271_v18, 6  ;;  %v11693_v48 = vpack.c.bf16 %v7878_v58, %v7878_v58  ;;  %v8269_v24 = vrot.slane %v8267_v57, 4  ;;  %8414 = vst [vmem:[#allocation2 + $0x6c] sm:$0xf] %v8248_v28  ;;  %10126 = vmatprep.subr.bf16.mxu1 %v20643_v35  ;;  %v7713_v18 = vpop.f32.mrf.mxu0 }
 0x62b   :  { %v8276_v59 = vrot.slane %v8274_v41, 7  ;;  %vm20903_vm6 = vnez %v20902_v33  ;;  %v7542_v36 = vadd.f32 %v18749_v8, %v20904_v56  ;;  %v8299_v11 = vrot.slane %v19096_v63, 4 }
 0x62c   :  { %v7876_v49 = vsel %vm20903_vm6, %v7840_v15, 0.0  ;;  %v8258_v60 = vsel %vm14972_vm2, %v8249_v47, %v18984_v12  ;;  %v8301_v27 = vshrl.u32 %v11693_v48, 16  ;;  %v8304_v50 = vshll.u32 %v11693_v48, 16  ;;  %10302 = vmatpush2.bf16.msra.mxu0 %v12405_v32  ;;  %v12406_v12 = vld [vmem:[%s20298_s4 + $0x1e0] sm:$0xff]   ;;  %v20905_v15 = vld [vmem:[#allocation37_spill] sm:$0xff]  ;;  %vm20917_vm6 = vmmov %vm20887_vm1 }
 0x62d   :  { %v11691_v19 = vpack.c.bf16 %v7876_v49, %v7876_v49  ;;  %8415 = vst [vmem:[#allocation2 + $0x70] sm:$0xf] %v8258_v60  ;;  %v8277_v14 = vor.u32 %v8276_v59, %v8273_v22  ;;  %v7719_v43 = vadd.f32 %v11956_v39, %v7542_v36  ;;  %v7711_v8 = vadd.f32 %v7710_v30, %v19002_v61  ;;  %v19159_v48 = vld [vmem:[#allocation2 + $0x38] sm:$0xff]   ;;  %v20908_v36 = vld [vmem:[#allocation36_spill] sm:$0xff] }
 0x62e   :  { %v8303_v2 = vrot.slane %v8301_v27, 6  ;;  %v8306_v16 = vrot.slane %v8304_v50, 7  ;;  %10303 = vmatprep.subr.bf16.mxu0 %v20643_v35  ;;  %v19130_v44 = vshrl.u32 %v18881_v5, 16  ;;  %10127 = vmatpush2.bf16.msra.mxu1 %v12394_v55  ;;  %v19141_v21 = vshll.u32 %v18981_v46, 16  ;;  %v20906_v49 = vld [vmem:[#allocation6_spill] sm:$0xff] }
 0x62f   :  { %v8281_v62 = vshrl.u32 %v11691_v19, 16  ;;  %v8284_v57 = vshll.u32 %v11691_v19, 16  ;;  %v8278_v34 = vsel %vm14972_vm2, %v8269_v24, %v8277_v14  ;;  %v7766_v39 = vmul.f32 %v18989_v7, %v7719_v43  ;;  %10128 = vmatprep.subr.bf16.mxu1 %v20643_v35 }
 0x630   :  { %v7764_v61 = vmul.f32 %v18989_v7, %v7711_v8  ;;  %v8279_v42 = vrot.slane %v8277_v14, 4  ;;  %8417 = vst [vmem:[#allocation2 + $0x78] sm:$0xf] %v8278_v34  ;;  %v19135_v54 = vor.u32 %v8306_v16, %v8303_v2  ;;  %v8763_v38 = vrot.slane %v19119_v40, 1  ;;  %10304 = vmatpush2.bf16.msra.mxu0 %v12406_v12 }
 0x631   :  { %v8283_v3 = vrot.slane %v8281_v62, 6  ;;  %v8286_v9 = vrot.slane %v8284_v57, 7  ;;  %v7809_v1 = vadd.f32 %v19011_v4, %v7766_v39  ;;  %v8626_v58 = vor.u32 %v19130_v44, %v8622_v10  ;;  %10305 = vmatprep.subr.bf16.mxu0 %v20643_v35  ;;  %v12408_v10 = vld [vmem:[%s20298_s4 + $0x1d8] sm:$0xff]   ;;  %v19195_v62 = vld [vmem:[#allocation2 + $0x40] sm:$0xff]  }
 0x632   :  { %v7807_v29 = vadd.f32 %v19011_v4, %v7764_v61  ;;  %v8308_v41 = vsel %vm14972_vm2, %v8299_v11, %v19135_v54  ;;  %v7545_v30 = vadd.f32 %v18776_v52, %v20905_v15  ;;  %v8630_v47 = vrot.slane %v19141_v21, 1  ;;  %10129 = vmatpush2.bf16.msra.mxu1 %v12398_v0  ;;  %v20912_v15 = vld [vmem:[#allocation34_spill] sm:$0xff] }
 0x633   :  { %v8287_v20 = vor.u32 %v8286_v9, %v8283_v3  ;;  %8420 = vst [vmem:[#allocation2 + $0x84] sm:$0xf] %v8308_v41  ;;  %v7845_v32 = vmax.f32 %v7809_v1, 0.0  ;;  %v19157_v22 = vsel %vm20887_vm1, %v8761_v26, %v8763_v38  ;;  %v7714_v33 = vadd.f32 %v7713_v18, %v19065_v51  ;;  %10130 = vmatprep.subr.bf16.mxu1 %v20643_v35  ;;  %v12403_v26 = vld [vmem:[%s20298_s4 + $0x150] sm:$0xff]  }
 0x634   :  { %v7843_v28 = vmax.f32 %v7807_v29, 0.0  ;;  %9991 = vmatprep.mubr.bf16.mxu0 %v19157_v22  ;;  %v7722_v59 = vadd.f32 %v11957_v45, %v7545_v30  ;;  %vm20907_vm15 = vnez %v20906_v49  ;;  %vm20909_vm11 = vnez %v20908_v36  ;;  %10306 = vmatpush2.bf16.msra.mxu0 %v12408_v10  ;;  %v19235_v10 = vld [vmem:[%s20298_s4 + $0x238] sm:$0xff]  }
 0x635   :  { %v8288_v52 = vsel %vm14972_vm2, %v8279_v42, %v8287_v20  ;;  %v8289_v24 = vrot.slane %v8287_v20, 4  ;;  %v7881_v56 = vsel %vm20907_vm15, %v7845_v32, 0.0  ;;  %v8631_v60 = vsel %vm20892_vm4, %v8626_v58, %v8630_v47  ;;  %9992 = vmatmul.mubr.bf16.gmra.mxu0 %v19042_v53  ;;  %10307 = vmatprep.subr.bf16.mxu0 %v20643_v35  ;;  %v12411_v58 = vld [vmem:[%s20298_s4 + $0x140] sm:$0xff]   ;;  %vm20921_vm15 = vmmov %vm20911_vm0 }
 0x636   :  { %8418 = vst [vmem:[#allocation2 + $0x7c] sm:$0xf] %v8288_v52  ;;  %v7879_v55 = vsel %vm20909_vm11, %v7843_v28, 0.0  ;;  %v19179_v27 = vshrl.u32 %v18981_v46, 16  ;;  %v11696_v50 = vpack.c.bf16 %v7881_v56, %v7881_v56  ;;  %9814 = vmatprep.mubr.bf16.mxu1 %v8631_v60  ;;  %v7767_v11 = vmul.f32 %v18989_v7, %v7722_v59  ;;  %10131 = vmatpush2.bf16.msra.mxu1 %v12403_v26  ;;  %v12415_v56 = vld [vmem:[%s20298_s4 + $0x1c0] sm:$0xff]   ;;  %vm20923_vm11 = vmmov %vm20911_vm0 }
 0x637   :  { %v8298_v51 = vsel %vm14972_vm2, %v8289_v24, %v19096_v63  ;;  %v11694_v19 = vpack.c.bf16 %v7879_v55, %v7879_v55  ;;  %v7765_v14 = vmul.f32 %v18989_v7, %v7714_v33  ;;  %9815 = vmatmul.mubr.bf16.gmra.mxu1 %v18881_v5  ;;  %v19189_v53 = vshll.u32 %v19119_v40, 16  ;;  %v12409_v63 = vld [vmem:[%s20298_s4 + $0x1d0] sm:$0xff]   ;;  %v12407_v5 = vld [vmem:[%s20298_s4 + $0x148] sm:$0xff]   ;;  %10132 = vmatprep.subr.bf16.mxu1 %v20643_v35 }
 0x638   :  { %8419 = vst [vmem:[#allocation2 + $0x80] sm:$0xf] %v8298_v51  ;;  %v8634_v43 = vor.u32 %v19179_v27, %v8630_v47  ;;  %v8765_v8 = vrot.slane %v19159_v48, 1  ;;  %v8331_v45 = vshrl.u32 %v11696_v50, 16  ;;  %v8334_v12 = vshll.u32 %v11696_v50, 16  ;;  %10308 = vmatpush2.bf16.msra.mxu0 %v12409_v63  ;;  %v19229_v47 = vld [vmem:[#allocation2 + $0x48] sm:$0xff]  }
 0x639   :  { %v8311_v2 = vshrl.u32 %v11694_v19, 16  ;;  %v8314_v16 = vshll.u32 %v11694_v19, 16  ;;  %v7810_v7 = vadd.f32 %v19011_v4, %v7767_v11  ;;  %v7808_v57 = vadd.f32 %v19011_v4, %v7765_v14  ;;  %v12413_v4 = vld [vmem:[%s20298_s4 + $0x1c8] sm:$0xff]   ;;  %10309 = vmatprep.subr.bf16.mxu0 %v20643_v35 }
 0x63a   :  { %v8638_v34 = vrot.slane %v19189_v53, 1  ;;  %v19205_v39 = vsel %vm20910_vm10, %v8763_v38, %v8765_v8  ;;  %v8309_v61 = vrot.slane %v19135_v54, 4  ;;  %v8333_v0 = vrot.slane %v8331_v45, 6  ;;  %10133 = vmatpush2.bf16.msra.mxu1 %v12407_v5  ;;  %vm20925_vm10 = vmmov %vm20911_vm0 }
 0x63b   :  { %v8313_v42 = vrot.slane %v8311_v2, 6  ;;  %v8316_v3 = vrot.slane %v8314_v16, 7  ;;  %9999 = vmatprep.mubr.bf16.mxu0 %v19205_v39  ;;  %v8336_v9 = vrot.slane %v8334_v12, 7  ;;  %v7846_v1 = vmax.f32 %v7810_v7, 0.0  ;;  %10134 = vmatprep.subr.bf16.mxu1 %v20643_v35 }
 0x63c   :  { %v7844_v29 = vmax.f32 %v7808_v57, 0.0  ;;  %v8639_v18 = vsel %vm20911_vm0, %v8634_v43, %v8638_v34  ;;  %v19215_v41 = vshrl.u32 %v19119_v40, 16  ;;  %v19218_v54 = vshll.u32 %v19159_v48, 16  ;;  %10310 = vmatpush2.bf16.msra.mxu0 %v12413_v4  ;;  %v8425_v57 = vld [vmem:[#allocation2 + $0x98] sm:$0x1] }
 0x63d   :  { %v8317_v38 = vor.u32 %v8316_v3, %v8313_v42  ;;  %9822 = vmatprep.mubr.bf16.mxu1 %v8639_v18  ;;  %v8767_v20 = vrot.slane %v19195_v62, 1  ;;  %vm20913_vm3 = vnez %v20912_v15  ;;  %10000 = vmatmul.mubr.bf16.gmra.mxu0 %v19157_v22  ;;  %v19245_v49 = vshll.u32 %v19195_v62, 16 }
 0x63e   :  { %v7882_v30 = vsel %vm20913_vm3, %v7846_v1, 0.0  ;;  %v7880_v28 = vsel %vm15874_vm9, %v7844_v29, 0.0  ;;  %v8642_v59 = vor.u32 %v19215_v41, %v8638_v34  ;;  %v8646_v22 = vrot.slane %v19218_v54, 1  ;;  %vm20915_vm9 = vmmov %vm20887_vm1  ;;  %10135 = vmatpush2.bf16.msra.mxu1 %v12411_v58  ;;  %10311 = vmatprep.subr.bf16.mxu0 %v20643_v35 }
 0x63f   :  { %v8318_v52 = vsel %vm14972_vm2, %v8309_v61, %v8317_v38  ;;  %v11697_v24 = vpack.c.bf16 %v7882_v30, %v7882_v30  ;;  %v11695_v33 = vpack.c.bf16 %v7880_v28, %v7880_v28  ;;  %9823 = vmatmul.mubr.bf16.gmra.mxu1 %v18981_v46  ;;  %v8768_v26 = vsel %vm20915_vm9, %v8765_v8, %v8767_v20  ;;  %v19261_v61 = vld [vmem:[#allocation2 + $0x50] sm:$0xff]   ;;  %vm20919_vm1 = vmmov %vm20911_vm0  ;;  %v19283_v30 = vld [vmem:[#allocation2 + $0x58] sm:$0xff]  }
 0x640   :  { %8421 = vst [vmem:[#allocation2 + $0x88] sm:$0xf] %v8318_v52  ;;  %v8337_v36 = vor.u32 %v8336_v9, %v8333_v0  ;;  %10007 = vmatprep.mubr.bf16.mxu0 %v8768_v26  ;;  %v19251_v51 = vshrl.u32 %v19159_v48, 16  ;;  %v8647_v19 = vsel %vm20916_vm14, %v8642_v59, %v8646_v22  ;;  %v8769_v11 = vrot.slane %v19229_v47, 1  ;;  %11958 = vmatprep.subr.bf16.mxu1 %v19235_v10  ;;  %vm20927_vm3 = vmmov %vm20919_vm1 }
 0x641   :  { %v8341_v55 = vshrl.u32 %v11697_v24, 16  ;;  %v8344_v60 = vshll.u32 %v11697_v24, 16  ;;  %v8321_v46 = vshrl.u32 %v11695_v33, 16  ;;  %v8324_v50 = vshll.u32 %v11695_v33, 16  ;;  %9830 = vmatprep.mubr.bf16.mxu1 %v8647_v19  ;;  %10312 = vmatpush2.bf16.msra.mxu0 %v12415_v56  ;;  %v19294_v24 = vld [vmem:[#allocation2 + $0x60] sm:$0xff]   ;;  %vm20929_vm14 = vmmov %vm20919_vm1 }
 0x642   :  { %v8650_v45 = vor.u32 %v19251_v51, %v8646_v22  ;;  %v8654_v12 = vrot.slane %v19245_v49, 1  ;;  %v8339_v2 = vrot.slane %v8337_v36, 4  ;;  %v8319_v7 = vrot.slane %v8317_v38, 4 }
 0x643   :  { %v8343_v14 = vrot.slane %v8341_v55, 6  ;;  %v8346_v43 = vrot.slane %v8344_v60, 7  ;;  %v8323_v8 = vrot.slane %v8321_v46, 6  ;;  %v8326_v63 = vrot.slane %v8324_v50, 7 }
 0x644   :  { %v8770_v35 = vsel %vm20917_vm6, %v8767_v20, %v8769_v11  ;;  %v19272_v29 = vshll.u32 %v19229_v47, 16  ;;  %v8771_v4 = vrot.slane %v19261_v61, 1  ;;  %v19278_v38 = vshrl.u32 %v19195_v62, 16 }
 0x645   :  { %v8347_v16 = vor.u32 %v8346_v43, %v8343_v14  ;;  %v8349_v5 = vrot.slane %v8343_v14, 4  ;;  %v8327_v34 = vor.u32 %v8326_v63, %v8323_v8  ;;  %10008 = vmatmul.mubr.bf16.gmra.mxu0 %v19205_v39  ;;  %v8655_v39 = vsel %vm20919_vm1, %v8650_v45, %v8654_v12 }
 0x646   :  { %10015 = vmatprep.mubr.bf16.mxu0 %v8770_v35  ;;  %v8662_v20 = vrot.slane %v19272_v29, 1  ;;  %v8658_v58 = vor.u32 %v19278_v38, %v8654_v12  ;;  %v19288_v32 = vshll.u32 %v19261_v61, 16  ;;  %v19291_v28 = vshrl.u32 %v19229_v47, 16 }
 0x647   :  { %v8348_v0 = vsel %vm14972_vm2, %v8339_v2, %v8347_v16  ;;  %v8426_v3 = vsel %vm15883_vm5, %v8349_v5, %v8425_v57  ;;  %v8328_v9 = vsel %vm14972_vm2, %v8319_v7, %v8327_v34  ;;  %v8329_v1 = vrot.slane %v8327_v34, 4  ;;  %9831 = vmatmul.mubr.bf16.gmra.mxu1 %v19119_v40  ;;  %vm20920_vm5 = vmmov %vm20917_vm6  ;;  %v19337_v34 = vld [vmem:[#allocation2 + $0x70] sm:$0xff]  }
 0x648   :  { %8424 = vst [vmem:[#allocation2 + $0x94] sm:$0xf] %v8348_v0  ;;  %8427 = vst [vmem:[#allocation2 + $0x98] sm:$0x1] %v8426_v3  ;;  %9838 = vmatprep.mubr.bf16.mxu1 %v8655_v39  ;;  %v8772_v15 = vsel %vm20920_vm5, %v8769_v11, %v8771_v4  ;;  %v8663_v13 = vsel %vm20921_vm15, %v8658_v58, %v8662_v20  ;;  %v8773_v52 = vrot.slane %v19283_v30, 1  ;;  %v8824_v59 = vshrl.u32 %v18772_v25, 16 }
 0x649   :  { %8422 = vst [vmem:[#allocation2 + $0x8c] sm:$0xf] %v8328_v9  ;;  %v8338_v18 = vsel %vm14972_vm2, %v8329_v1, %v8337_v36  ;;  %v8666_v33 = vor.u32 %v19291_v28, %v8662_v20  ;;  %v8670_v22 = vrot.slane %v19288_v32, 1  ;;  %v8827_v56 = vshll.u32 %v18772_v25, 16  ;;  %v19303_v36 = vld [vmem:[#allocation2 + $0x68] sm:$0xff]   ;;  %vm20922_vm2 = vmmov %vm20920_vm5 }
 0x64a   :  { %8423 = vst [vmem:[#allocation2 + $0x90] sm:$0xf] %v8338_v18  ;;  %v19306_v55 = vsel %vm20922_vm2, %v8771_v4, %v8773_v52  ;;  %v8775_v60 = vrot.slane %v19294_v24, 1  ;;  %v19310_v46 = vshll.u32 %v19294_v24, 16  ;;  %v19314_v50 = vshrl.u32 %v19261_v61, 16  ;;  %vm20924_vm4 = vmmov %vm20922_vm2 }
 0x64b   :  { %v8671_v25 = vsel %vm20923_vm11, %v8666_v33, %v8670_v22  ;;  %v19320_v11 = vshrl.u32 %v19283_v30, 16  ;;  %v8826_v14 = vrot.slane %v8824_v59, 1  ;;  %v8777_v43 = vrot.slane %v19303_v36, 1  ;;  %vm20926_vm0 = vmmov %vm20922_vm2 }
 0x64c   :  { %v9016_v8 = vrot.slane %v19019_v31, 2  ;;  %v9017_v63 = vrot.slane %v18901_v6, 3  ;;  %v8829_v45 = vrot.slane %v8827_v56, 2  ;;  %v8674_v12 = vor.u32 %v19314_v50, %v8670_v22  ;;  %vm20928_vm9 = vmmov %vm20926_vm0 }
 0x64d   :  { %10016 = vmatmul.mubr.bf16.gmra.mxu0 %v8768_v26  ;;  %v19300_v26 = vshll.u32 %v19283_v30, 16  ;;  %v19327_v2 = vsel %vm20924_vm4, %v8773_v52, %v8775_v60  ;;  %v8686_v16 = vrot.slane %v19310_v46, 1  ;;  %v9020_v5 = vrot.slane %v19130_v44, 2  ;;  %vm20930_vm6 = vmmov %vm20926_vm0 }
 0x64e   :  { %10023 = vmatprep.mubr.bf16.mxu0 %v8772_v15  ;;  %v19332_v7 = vshrl.u32 %v19294_v24, 16  ;;  %v19335_v57 = vshll.u32 %v19303_v36, 16  ;;  %v9021_v0 = vrot.slane %v19022_v23, 3  ;;  %v8835_v9 = vrot.slane %v19019_v31, 1  ;;  %vm20938_vm5 = vmmov %vm20919_vm1 }
 0x64f   :  { %9839 = vmatmul.mubr.bf16.gmra.mxu1 %v19159_v48  ;;  %v8678_v19 = vrot.slane %v19300_v26, 1  ;;  %v8836_v1 = vrot.slane %v18901_v6, 2  ;;  %v19345_v39 = vsel %vm20926_vm0, %v8775_v60, %v8777_v43  ;;  %v19347_v18 = vor.u32 %v9017_v63, %v9016_v8  ;;  %vm20941_vm15 = vmmov %vm20926_vm0 }
 0x650   :  { %9846 = vmatprep.mubr.bf16.mxu1 %v8663_v13  ;;  %v9022_v20 = vor.u32 %v9021_v0, %v9020_v5  ;;  %v9024_v13 = vrot.slane %v19179_v27, 2  ;;  %v9025_v52 = vrot.slane %v19141_v21, 3  ;;  %v8839_v31 = vrot.slane %v19130_v44, 1  ;;  %vm20948_vm2 = vmmov %vm20926_vm0 }
 0x651   :  { %v8679_v42 = vsel %vm20925_vm10, %v8674_v12, %v8678_v19  ;;  %v8682_v3 = vor.u32 %v19320_v11, %v8678_v19  ;;  %v8837_v58 = vor.u32 %v8836_v1, %v8835_v9  ;;  %v8690_v6 = vor.u32 %v19332_v7, %v8686_v16  ;;  %vm20949_vm11 = vmmov %vm20919_vm1 }
 0x652   :  { %v8779_v59 = vrot.slane %v19337_v34, 1  ;;  %v19361_v33 = vsel %vm4016_vm13, %v19347_v18, %v9022_v20  ;;  %v8840_v22 = vrot.slane %v19022_v23, 2  ;;  %v9026_v44 = vor.u32 %v9025_v52, %v9024_v13  ;;  %vm20950_vm4 = vmmov %vm20926_vm0 }
 0x653   :  { %v19368_v56 = vsel %vm3829_vm7, %v18948_v37, %v8837_v58  ;;  %v9028_v60 = vrot.slane %v19215_v41, 2  ;;  %v9029_v19 = vrot.slane %v19189_v53, 3  ;;  %v8844_v8 = vrot.slane %v19141_v21, 2  ;;  %vm20951_vm10 = vmmov %vm20919_vm1 }
 0x654   :  { %v19375_v23 = vshrl.u32 %v19303_v36, 16  ;;  %v19378_v63 = vshll.u32 %v19337_v34, 16  ;;  %v9032_v12 = vrot.slane %v19251_v51, 2  ;;  %v9033_v21 = vrot.slane %v19218_v54, 3 }
 0x655   :  { %10024 = vmatmul.mubr.bf16.gmra.mxu0 %v8770_v35  ;;  %v8830_v35 = vor.u32 %v8829_v45, %v8826_v14  ;;  %v8843_v14 = vrot.slane %v19179_v27, 1  ;;  %v19380_v45 = vld [vmem:[#allocation2 + $0x78] sm:$0xff]   ;;  %v8687_v0 = vsel %vm20927_vm3, %v8682_v3, %v8686_v16  ;;  %v8847_v9 = vrot.slane %v19215_v41, 1 }
 0x656   :  { %10031 = vmatprep.mubr.bf16.mxu0 %v19306_v55  ;;  %v8848_v1 = vrot.slane %v19189_v53, 2  ;;  %v9034_v13 = vor.u32 %v9033_v21, %v9032_v12  ;;  %v9036_v52 = vrot.slane %v19278_v38, 2  ;;  %v20394_v16 = vrot.slane %v19380_v45, 1 }
 0x657   :  { %9847 = vmatmul.mubr.bf16.gmra.mxu1 %v19195_v62  ;;  %v19351_v4 = vsel %vm3829_vm7, %v8830_v35, %v18948_v37  ;;  %v19383_v37 = vsel %vm4016_vm13, %v9022_v20, %v9026_v44  ;;  %v9030_v35 = vor.u32 %v9029_v19, %v9028_v60  ;;  %v8845_v27 = vor.u32 %v8844_v8, %v8843_v14 }
 0x658   :  { %9854 = vmatprep.mubr.bf16.mxu1 %v8671_v25  ;;  %v8841_v25 = vor.u32 %v8840_v22, %v8839_v31  ;;  %v8849_v3 = vor.u32 %v8848_v1, %v8847_v9  ;;  %v8851_v41 = vrot.slane %v19251_v51, 1  ;;  %v19411_v53 = vshrl.u32 %v19337_v34, 16  ;;  %v19433_v1 = vld [vmem:[#allocation2 + $0x80] sm:$0xff]  }
 0x659   :  { %v19399_v20 = vsel %vm4016_vm13, %v9026_v44, %v9030_v35  ;;  %v19414_v31 = vsel %vm4016_vm13, %v9030_v35, %v9034_v13  ;;  %v8852_v22 = vrot.slane %v19218_v54, 2  ;;  %v9040_v44 = vrot.slane %v19291_v28, 2 }
 0x65a   :  { %v19387_v5 = vsel %vm3829_vm7, %v8837_v58, %v8841_v25  ;;  %v19402_v58 = vsel %vm3829_vm7, %v8841_v25, %v8845_v27  ;;  %v9041_v51 = vrot.slane %v19272_v29, 3  ;;  %v8855_v25 = vrot.slane %v19278_v38, 1 }
 0x65b   :  { %v8853_v8 = vor.u32 %v8852_v22, %v8851_v41  ;;  %v8856_v54 = vrot.slane %v19245_v49, 2  ;;  %v9045_v21 = vrot.slane %v19288_v32, 3  ;;  %v20395_v9 = vrot.slane %v19378_v63, 1 }
 0x65c   :  { %v9042_v35 = vor.u32 %v9041_v51, %v9040_v44  ;;  %v9048_v41 = vrot.slane %v19320_v11, 2  ;;  %v8863_v22 = vrot.slane %v19314_v50, 1  ;;  %v8464_v44 = vld [vmem:[#allocation2 + $0x8c] sm:$0xf]  ;;  %v8864_v51 = vrot.slane %v19288_v32, 2 }
 0x65d   :  { %10032 = vmatmul.mubr.bf16.gmra.mxu0 %v8772_v15  ;;  %v8694_v15 = vrot.slane %v19335_v57, 1  ;;  %v19436_v38 = vsel %vm3829_vm7, %v8849_v3, %v8853_v8  ;;  %v8868_v32 = vrot.slane %v19300_v26, 2 }
 0x65e   :  { %10039 = vmatprep.mubr.bf16.mxu0 %v19327_v2 }
 0x65f   :  { %9855 = vmatmul.mubr.bf16.gmra.mxu1 %v19229_v47  ;;  %v8695_v19 = vsel %vm20929_vm14, %v8690_v6, %v8694_v15  ;;  %v8698_v14 = vor.u32 %v19375_v23, %v8694_v15  ;;  %v8857_v6 = vor.u32 %v8856_v54, %v8855_v25  ;;  %v8859_v15 = vrot.slane %v19291_v28, 1 }
 0x660   :  { %9862 = vmatprep.mubr.bf16.mxu1 %v8679_v42  ;;  %v19394_v42 = vsel %vm20928_vm9, %v8777_v43, %v8779_v59  ;;  %v9037_v43 = vrot.slane %v19245_v49, 3  ;;  %v19440_v49 = vshll.u32 %v19380_v45, 16  ;;  %v19458_v28 = vsel %vm20930_vm6, %v8779_v59, %v20394_v16  ;;  %v19469_v59 = vld [vmem:[#allocation2 + $0x88] sm:$0xf] }
 0x661   :  { %v8875_v16 = vrot.slane %v19375_v23, 1 }
 0x662   :  { %v9038_v60 = vor.u32 %v9037_v43, %v9036_v52  ;;  %v8860_v52 = vrot.slane %v19272_v29, 2  ;;  %v19447_v43 = vsel %vm3829_vm7, %v8853_v8, %v8857_v6  ;;  %v9053_v8 = vrot.slane %v19310_v46, 3 }
 0x664   :  { %v19428_v12 = vsel %vm4016_vm13, %v9034_v13, %v9038_v60 }
 0x665   :  { %10040 = vmatmul.mubr.bf16.gmra.mxu0 %v19306_v55  ;;  %v19420_v55 = vsel %vm3829_vm7, %v8845_v27, %v8849_v3  ;;  %v9044_v27 = vrot.slane %v19314_v50, 2  ;;  %v9049_v3 = vrot.slane %v19300_v26, 3  ;;  %v19491_v26 = vshll.u32 %v19433_v1, 16 }
 0x666   :  { %10047 = vmatprep.mubr.bf16.mxu0 %v19345_v39 }
 0x667   :  { %9863 = vmatmul.mubr.bf16.gmra.mxu1 %v19261_v61  ;;  %v9046_v13 = vor.u32 %v9045_v21, %v9044_v27  ;;  %v9050_v25 = vor.u32 %v9049_v3, %v9048_v41  ;;  %v8867_v27 = vrot.slane %v19320_v11, 1  ;;  %v19477_v21 = vshrl.u32 %v19380_v45, 16 }
 0x668   :  { %9870 = vmatprep.mubr.bf16.mxu1 %v8687_v0  ;;  %v19443_v0 = vsel %vm4016_vm13, %v9038_v60, %v9042_v35  ;;  %v8861_v60 = vor.u32 %v8860_v52, %v8859_v15  ;;  %v19480_v15 = vcombine.low %v19469_v59, %v8464_v44  ;;  %v9057_v11 = vrot.slane %v19335_v57, 3 }
 0x669   :  { %v19461_v29 = vsel %vm4016_vm13, %v9042_v35, %v9046_v13  ;;  %v8865_v35 = vor.u32 %v8864_v51, %v8863_v22  ;;  %v19483_v52 = vsel %vm4016_vm13, %v9046_v13, %v9050_v25  ;;  %v9056_v22 = vrot.slane %v19375_v23, 2 }
 0x66a   :  { %v19472_v54 = vsel %vm3829_vm7, %v8857_v6, %v8861_v60  ;;  %v8869_v6 = vor.u32 %v8868_v32, %v8867_v27  ;;  %v8871_v44 = vrot.slane %v19332_v7, 1  ;;  %v8872_v13 = vrot.slane %v19310_v46, 2 }
 0x66b   :  { %v19486_v3 = vsel %vm3829_vm7, %v8861_v60, %v8865_v35  ;;  %v19499_v51 = vshrl.u32 %v19433_v1, 16  ;;  %v9061_v32 = vrot.slane %v19378_v63, 3  ;;  %v8703_v46 = vsel %vm20919_vm1, %v8698_v14, %v20395_v9 }
 0x66c   :  { %v19502_v60 = vsel %vm3829_vm7, %v8865_v35, %v8869_v6  ;;  %v8873_v27 = vor.u32 %v8872_v13, %v8871_v44  ;;  %v8710_v14 = vrot.slane %v19440_v49, 1  ;;  %v19527_v44 = vshll.u32 %v19480_v15, 16 }
 0x66d   :  { %10048 = vmatmul.mubr.bf16.gmra.mxu0 %v19327_v2  ;;  %v9052_v2 = vrot.slane %v19332_v7, 2  ;;  %20931 = vst [vmem:[#allocation45_spill] sm:$0xff] %v19502_v60  ;;  %v19513_v7 = vshrl.u32 %v19480_v15, 16  ;;  %v8880_v13 = vrot.slane %v19378_v63, 2  ;;  %v9069_v9 = vrot.slane %v19491_v26, 3 }
 0x66e   :  { %10055 = vmatprep.mubr.bf16.mxu0 %v19394_v42  ;;  %v19521_v23 = vsel %vm3829_vm7, %v8869_v6, %v8873_v27  ;;  %v20935_v60 = vrot.slane %v19378_v63, 1  ;;  %v20939_v63 = vrot.slane %v19433_v1, 1 }
 0x66f   :  { %9871 = vmatmul.mubr.bf16.gmra.mxu1 %v19283_v30  ;;  %v9054_v41 = vor.u32 %v9053_v8, %v9052_v2  ;;  %v9058_v2 = vor.u32 %v9057_v11, %v9056_v22  ;;  %v9060_v8 = vrot.slane %v19411_v53, 2  ;;  %v9064_v22 = vrot.slane %v19477_v21, 2  ;;  %20932 = vst [vmem:[#allocation41_spill] sm:$0xff] %v19521_v23 }
 0x670   :  { %9878 = vmatprep.mubr.bf16.mxu1 %v8695_v19  ;;  %v8883_v23 = vrot.slane %v19477_v21, 1 }
 0x671   :  { %v19494_v19 = vsel %vm4016_vm13, %v9050_v25, %v9054_v41  ;;  %v8876_v25 = vrot.slane %v19335_v57, 2  ;;  %v19516_v35 = vsel %vm4016_vm13, %v9054_v41, %v9058_v2  ;;  %v9062_v57 = vor.u32 %v9061_v32, %v9060_v8  ;;  %v19538_v32 = vld [vmem:[#allocation2 + $0x90] sm:$0xff]  }
 0x672   :  { %v8879_v41 = vrot.slane %v19411_v53, 1  ;;  %v9068_v8 = vrot.slane %v19499_v51, 2 }
 0x673   :  { %v8877_v11 = vor.u32 %v8876_v25, %v8875_v16  ;;  %v19532_v50 = vsel %vm4016_vm13, %v9058_v2, %v9062_v57 }
 0x674   :  { %20933 = vst [vmem:[#allocation38_spill] sm:$0xff] %v19532_v50  ;;  %v8881_v25 = vor.u32 %v8880_v13, %v8879_v41  ;;  %v9073_v41 = vrot.slane %v19527_v44, 3  ;;  %v8887_v13 = vrot.slane %v19499_v51, 1 }
 0x675   :  { %10056 = vmatmul.mubr.bf16.gmra.mxu0 %v19345_v39  ;;  %v9065_v39 = vrot.slane %v19440_v49, 3  ;;  %v19535_v6 = vsel %vm3829_vm7, %v8873_v27, %v8877_v11  ;;  %v8884_v27 = vrot.slane %v19440_v49, 2  ;;  %v8888_v49 = vrot.slane %v19491_v26, 2 }
 0x676   :  { %10063 = vmatprep.mubr.bf16.mxu0 %v19458_v28  ;;  %20934 = vst [vmem:[#allocation48_spill] sm:$0xff] %v19535_v6  ;;  %v9070_v6 = vor.u32 %v9069_v9, %v9068_v8  ;;  %v8896_v8 = vshrl.u32 %v19538_v32, 16 }
 0x677   :  { %9879 = vmatmul.mubr.bf16.gmra.mxu1 %v19294_v24  ;;  %v9066_v16 = vor.u32 %v9065_v39, %v9064_v22  ;;  %v9072_v22 = vrot.slane %v19513_v7, 2  ;;  %v19551_v39 = vsel %vm3829_vm7, %v8877_v11, %v8881_v25 }
 0x678   :  { %9886 = vmatprep.mubr.bf16.mxu1 %v8703_v46  ;;  %v8706_v46 = vor.u32 %v19411_v53, %v20935_v60  ;;  %20937 = vst [vmem:[#allocation51_spill] sm:$0xff] %v19551_v39  ;;  %v20940_v53 = vrot.slane %v19380_v45, 1  ;;  %v8899_v39 = vshll.u32 %v19538_v32, 16 }
 0x679   :  { %v19546_v2 = vsel %vm4016_vm13, %v9062_v57, %v9066_v16  ;;  %v8885_v57 = vor.u32 %v8884_v27, %v8883_v23  ;;  %v19564_v11 = vsel %vm4016_vm13, %v9066_v16, %v9070_v6  ;;  %v9074_v9 = vor.u32 %v9073_v41, %v9072_v22 }
 0x67a   :  { %20936 = vst [vmem:[#allocation50_spill] sm:$0xff] %v19546_v2  ;;  %v8711_v50 = vsel %vm20938_vm5, %v8706_v46, %v8710_v14  ;;  %v8784_v60 = vsel %vm20941_vm15, %v20940_v53, %v20939_v63  ;;  %20942 = vst [vmem:[#allocation52_spill] sm:$0xff] %v19564_v11  ;;  %v8889_v2 = vor.u32 %v8888_v49, %v8887_v13  ;;  %v8891_v23 = vrot.slane %v19513_v7, 1 }
 0x67b   :  { %v19569_v46 = vsel %vm3829_vm7, %v8881_v25, %v8885_v57  ;;  %v9076_v16 = vrot.slane %v8896_v8, 2  ;;  %v9077_v27 = vrot.slane %v8899_v39, 3  ;;  %v8892_v22 = vrot.slane %v19527_v44, 2 }
 0x67c   :  { %20943 = vst [vmem:[#allocation53_spill] sm:$0xff] %v19569_v46  ;;  %v8785_v41 = vrot.slane %v19480_v15, 1  ;;  %v19580_v25 = vsel %vm3829_vm7, %v8885_v57, %v8889_v2  ;;  %v19583_v13 = vrot.slane %v19538_v32, 2  ;;  %v8898_v63 = vrot.slane %v8896_v8, 1 }
 0x67d   :  { %10064 = vmatmul.mubr.bf16.gmra.mxu0 %v19394_v42  ;;  %v19575_v42 = vsel %vm4016_vm13, %v9070_v6, %v9074_v9  ;;  %v19585_v53 = vor.u32 %v9077_v27, %v9076_v16  ;;  %v8893_v49 = vor.u32 %v8892_v22, %v8891_v23  ;;  %v8901_v46 = vrot.slane %v8899_v39, 2  ;;  %v19624_v27 = vld [vmem:[#allocation2 + $0x14] sm:$0xf] }
 0x67e   :  { %10071 = vmatprep.mubr.bf16.mxu0 %v8784_v60  ;;  %20944 = vst [vmem:[#allocation54_spill] sm:$0xff] %v19575_v42  ;;  %v8718_v6 = vrot.slane %v19491_v26, 1  ;;  %v20945_v42 = vrot.slane %v19480_v15, 2  ;;  %v8714_v11 = vor.u32 %v19477_v21, %v8710_v14  ;;  %v20947_v26 = vrot.slane %v19433_v1, 1  ;;  %20952 = vst [vmem:[#allocation5_spill] sm:$0xff] %v19624_v27 }
 0x67f   :  { %9887 = vmatmul.mubr.bf16.gmra.mxu1 %v19303_v36  ;;  %v19597_v57 = vsel %vm4016_vm13, %v9074_v9, %v19585_v53  ;;  %v19600_v16 = vsel %vm3829_vm7, %v8889_v2, %v8893_v49  ;;  %v19602_v23 = vor.u32 %v8901_v46, %v8898_v63  ;;  %v8815_v14 = vrot.slane %v19538_v32, 1  ;;  %v8471_v9 = vld [vmem:[#allocation2 + $0x10] sm:$0xc]  ;;  %v19618_v46 = vld [vmem:[#allocation2 + $0xa0] ss:$0 sps:$4 sm:$0x33]  }
 0x680   :  { %9894 = vmatprep.mubr.bf16.mxu1 %v8711_v50  ;;  %v19592_v50 = vsel %vm3937_vm12, %v20945_v42, %v19583_v13  ;;  %v8786_v39 = vsel %vm20948_vm2, %v20947_v26, %v8785_v41  ;;  %v8719_v21 = vsel %vm20949_vm11, %v8714_v11, %v8718_v6  ;;  %v8726_v2 = vrot.slane %v19527_v44, 1 }
 0x681   :  { %20946 = vst [vmem:[#allocation40_spill] sm:$0xff] %v19602_v23  ;;  %v19610_v8 = vsel %vm3829_vm7, %v8893_v49, %v19602_v23  ;;  %v8722_v63 = vor.u32 %v19499_v51, %v8718_v6  ;;  %v8816_v42 = vsel %vm20950_vm4, %v8785_v41, %v8815_v14  ;;  %v11475_v22 = vcombine.low %v8471_v9, %v19624_v27  ;;  %v8470_v23 = vld [vmem:[#allocation2 + $0x8] sm:$0xc]  ;;  %v8463_v27 = vld [vmem:[#allocation2 + $0x8c] sm:$0x7] }
 0x682   :  { %v20397_v44 = vrot.slane %v19480_v15, 3  ;;  %v9150_v49 = vrot.slane %v19538_v32, 3  ;;  %v9154_v51 = vrot.slane %v19618_v46, 3  ;;  %v8730_v32 = vor.u32 %v19513_v7, %v8726_v2 }
 0x683   :  { %v8727_v11 = vsel %vm20951_vm10, %v8722_v63, %v8726_v2  ;;  %v9009_v9 = vshrl.u32 %v11475_v22, 16  ;;  %v9012_v63 = vshll.u32 %v11475_v22, 16  ;;  %v8996_v2 = vrot.slane %v11475_v22, 2  ;;  %v12418_v22 = vld [vmem:[%s20298_s4 + $0x228] sm:$0xff]  }
 0x684   :  { %v19634_v6 = vsel %vm4128_vm8, %v20397_v44, %v9150_v49  ;;  %v12451_v44 = vld [vmem:[#allocation2 + $0xc] sm:$0xf] }
 0x685   :  { %10072 = vmatmul.mubr.bf16.gmra.mxu0 %v19458_v28  ;;  %v19616_v28 = vld [vmem:[#allocation2 + $0x98] sm:$0xff]   ;;  %20953 = vst [vmem:[#allocation26_spill] sm:$0xff] %v19634_v6  ;;  %v11474_v6 = vcombine.low %v8470_v23, %v12451_v44 }
 0x686   :  { %10079 = vmatprep.mubr.bf16.mxu0 %v8786_v39 }
 0x687   :  { %9895 = vmatmul.mubr.bf16.gmra.mxu1 %v19337_v34 }
 0x688   :  { %9902 = vmatprep.mubr.bf16.mxu1 %v8719_v21 }
 0x68d   :  { %10080 = vmatmul.mubr.bf16.gmra.mxu0 %v8784_v60  ;;  %v9152_v60 = vrot.slane %v19616_v28, 3 }
 0x68e   :  { %10087 = vmatprep.mubr.bf16.mxu0 %v8816_v42  ;;  %v9011_v42 = vrot.slane %v9009_v9, 2  ;;  %v12422_v9 = vld [vmem:[%s20298_s4 + $0x208] sm:$0xff]  }
 0x68f   :  { %9903 = vmatmul.mubr.bf16.gmra.mxu1 %v19380_v45  ;;  %v19637_v26 = vsel %vm4128_vm8, %v9150_v49, %v9152_v60  ;;  %v19640_v21 = vsel %vm4128_vm8, %v9152_v60, %v9154_v51  ;;  %v8931_v49 = vrot.slane %v18764_v17, 2  ;;  %v11468_v60 = vcombine.low %v19469_v59, %v8463_v27  ;;  %v12417_v59 = vld [vmem:[%s20298_s4 + $0x230] sm:$0xff]  }
 0x690   :  { %9910 = vmatprep.mubr.bf16.mxu1 %v8727_v11  ;;  %20954 = vst [vmem:[#allocation9_spill] sm:$0xff] %v19637_v26  ;;  %v9014_v11 = vrot.slane %v9012_v63, 3  ;;  %v8930_v51 = vrot.slane %v11474_v6, 2  ;;  %v12420_v6 = vld [vmem:[%s20298_s4 + $0x218] sm:$0xff]  }
 0x692   :  { %v9015_v26 = vor.u32 %v9014_v11, %v9011_v42 }
 0x694   :  { %v9019_v7 = vsel %vm4016_vm13, %v9015_v26, %v19347_v18 }
 0x695   :  { %10088 = vmatmul.mubr.bf16.gmra.mxu0 %v8786_v39  ;;  %v8932_v39 = vsel %vm3937_vm12, %v8930_v51, %v8931_v49 }
 0x696   :  { %10095 = vmatprep.mubr.bf16.mxu0 %v8815_v14  ;;  %v19649_v14 = vld [vmem:[#allocation2 + $0x18] sm:$0xff]  }
 0x697   :  { %9911 = vmatmul.mubr.bf16.gmra.mxu1 %v19433_v1  ;;  %v8933_v23 = vrot.slane %v19649_v14, 2 }
 0x698   :  { %9918 = vmatprep.mubr.bf16.mxu1 %v8730_v32 }
 0x699   :  { %v8997_v17 = vsel %vm3937_vm12, %v8996_v2, %v8933_v23  ;;  %v8934_v18 = vsel %vm3937_vm12, %v8931_v49, %v8933_v23 }
 0x69d   :  { %10096 = vmatmul.mubr.bf16.gmra.mxu0 %v8785_v41  ;;  %v19660_v41 = vld [vmem:[#allocation2 + $0x20] sm:$0xff]  }
 0x69e   :  { %10313 = vmatprep.mubr.bf16.mxu0 %v9019_v7  ;;  %v8935_v27 = vrot.slane %v19660_v41, 2  ;;  %v8943_v7 = vrot.slane %v19195_v62, 2 }
 0x69f   :  { %9919 = vmatmul.mubr.bf16.gmra.mxu1 %v11468_v60 }
 0x6a0   :  { %10136 = vmatprep.mubr.bf16.mxu1 %v8932_v39  ;;  %v8936_v44 = vsel %vm3937_vm12, %v8933_v23, %v8935_v27 }
 0x6a5   :  { %10314 = vmatmul.mubr.bf16.vlgmr.msra.gmra.mxu0 %v8997_v17 }
 0x6a6   :  { %10321 = vmatprep.mubr.bf16.mxu0 %v19361_v33 }
 0x6a7   :  { %10137 = vmatmul.mubr.bf16.vlgmr.msra.gmra.mxu1 %v19351_v4  ;;  %v12419_v4 = vld [vmem:[%s20298_s4 + $0x220] sm:$0xff]  }
 0x6a8   :  { %10144 = vmatprep.mubr.bf16.mxu1 %v8934_v18  ;;  %11959 = vmatpush3.bf16.msra.mxu1 %v19235_v10  ;;  %v19672_v10 = vld [vmem:[#allocation2 + $0x28] sm:$0xff]  }
 0x6a9   :  { %11960 = vmatprep.subr.bf16.mxu1 %v12417_v59  ;;  %v8937_v33 = vrot.slane %v19672_v10, 2 }
 0x6ab   :  { %v8938_v26 = vsel %vm3937_vm12, %v8935_v27, %v8937_v33 }
 0x6ac   :  { %11961 = vmatpush3.bf16.msra.mxu1 %v12417_v59 }
 0x6ad   :  { %10322 = vmatmul.mubr.bf16.gmra.mxu0 %v8936_v44  ;;  %11962 = vmatprep.subr.bf16.mxu1 %v12418_v22 }
 0x6ae   :  { %10329 = vmatprep.mubr.bf16.mxu0 %v19383_v37  ;;  %v8939_v37 = vrot.slane %v19119_v40, 2  ;;  %v8941_v40 = vrot.slane %v19159_v48, 2 }
 0x6af   :  { %10145 = vmatmul.mubr.bf16.gmra.mxu1 %v19368_v56  ;;  %v12421_v56 = vld [vmem:[%s20298_s4 + $0x210] sm:$0xff]  }
 0x6b0   :  { %10152 = vmatprep.mubr.bf16.mxu1 %v8936_v44  ;;  %11963 = vmatpush3.bf16.msra.mxu1 %v12418_v22  ;;  %v8940_v63 = vsel %vm3937_vm12, %v8937_v33, %v8939_v37  ;;  %v8942_v49 = vsel %vm3937_vm12, %v8939_v37, %v8941_v40  ;;  %v8944_v17 = vsel %vm3937_vm12, %v8941_v40, %v8943_v7  ;;  %v8945_v22 = vrot.slane %v19229_v47, 2 }
 0x6b1   :  { %11964 = vmatprep.subr.bf16.mxu1 %v12419_v4 }
 0x6b2   :  { %v8946_v33 = vsel %vm3937_vm12, %v8943_v7, %v8945_v22 }
 0x6b4   :  { %11965 = vmatpush3.bf16.msra.mxu1 %v12419_v4 }
 0x6b5   :  { %10330 = vmatmul.mubr.bf16.gmra.mxu0 %v8938_v26  ;;  %11966 = vmatprep.subr.bf16.mxu1 %v12420_v6 }
 0x6b6   :  { %10337 = vmatprep.mubr.bf16.mxu0 %v19399_v20  ;;  %v12424_v20 = vld [vmem:[%s20298_s4 + $0x200] sm:$0xff]  }
 0x6b7   :  { %10153 = vmatmul.mubr.bf16.gmra.mxu1 %v19387_v5 }
 0x6b8   :  { %10160 = vmatprep.mubr.bf16.mxu1 %v8938_v26  ;;  %11967 = vmatpush3.bf16.msra.mxu1 %v12420_v6 }
 0x6b9   :  { %11968 = vmatprep.subr.bf16.mxu1 %v12421_v56 }
 0x6bc   :  { %11969 = vmatpush3.bf16.msra.mxu1 %v12421_v56 }
 0x6bd   :  { %10338 = vmatmul.mubr.bf16.gmra.mxu0 %v8940_v63  ;;  %11970 = vmatprep.subr.bf16.mxu1 %v12422_v9  ;;  %v9784_v5 = vpop.f32.mrf.mxu1 }
 0x6be   :  { %10345 = vmatprep.mubr.bf16.mxu0 %v19414_v31 }
 0x6bf   :  { %10161 = vmatmul.mubr.bf16.gmra.mxu1 %v19402_v58  ;;  %v9961_v32 = vpop.f32.mrf.mxu0  ;;  %v9786_v11 = vpop.f32.mrf.mxu1 }
 0x6c0   :  { %10168 = vmatprep.mubr.bf16.mxu1 %v8940_v63  ;;  %11971 = vmatpush3.bf16.msra.mxu1 %v12422_v9  ;;  %v19695_v42 = vadd.f32 %v9961_v32, %v9784_v5 }
 0x6c1   :  { %11972 = vmatprep.subr.bf16.mxu1 %v12424_v20  ;;  %v9963_v60 = vpop.f32.mrf.mxu0  ;;  %v9787_v51 = vpop.f32.mrf.mxu1 }
 0x6c3   :  { %v9964_v31 = vpop.f32.mrf.mxu0  ;;  %v9789_v48 = vpop.f32.mrf.mxu1 }
 0x6c4   :  { %11973 = vmatpush3.bf16.msra.mxu1 %v12424_v20  ;;  %v19700_v58 = vadd.f32 %v9964_v31, %v9787_v51 }
 0x6c5   :  { %10346 = vmatmul.mubr.bf16.gmra.mxu0 %v8942_v49  ;;  %v9966_v39 = vpop.f32.mrf.mxu0 }
 0x6c6   :  { %10353 = vmatprep.mubr.bf16.mxu0 %v19428_v12  ;;  %v20955_v39 = vld [vmem:[#allocation45_spill] sm:$0xff] }
 0x6c7   :  { %10169 = vmatmul.mubr.bf16.gmra.mxu1 %v19420_v55  ;;  %v9792_v23 = vpop.f32.mrf.mxu1 }
 0x6c8   :  { %10176 = vmatprep.mubr.bf16.mxu1 %v8942_v49 }
 0x6c9   :  { %v9794_v2 = vpop.f32.mrf.mxu1 }
 0x6ca   :  { %v9969_v59 = vpop.f32.mrf.mxu0 }
 0x6cb   :  { %v19704_v18 = vadd.f32 %v9969_v59, %v9792_v23  ;;  %v9795_v27 = vpop.f32.mrf.mxu1  ;;  %v20957_v59 = vld [vmem:[#allocation41_spill] sm:$0xff] }
 0x6cc   :  { %v9971_v12 = vpop.f32.mrf.mxu0 }
 0x6cd   :  { %10354 = vmatmul.mubr.bf16.gmra.mxu0 %v8944_v17  ;;  %v9797_v55 = vpop.f32.mrf.mxu1 }
 0x6ce   :  { %10361 = vmatprep.mubr.bf16.mxu0 %v19443_v0  ;;  %v9972_v62 = vpop.f32.mrf.mxu0 }
 0x6cf   :  { %10177 = vmatmul.mubr.bf16.gmra.mxu1 %v19436_v38  ;;  %v19709_v44 = vadd.f32 %v9972_v62, %v9795_v27  ;;  %v8947_v38 = vrot.slane %v19261_v61, 2 }
 0x6d0   :  { %10184 = vmatprep.mubr.bf16.mxu1 %v8944_v17  ;;  %v9974_v4 = vpop.f32.mrf.mxu0 }
 0x6d1   :  { %v8948_v20 = vsel %vm3937_vm12, %v8945_v22, %v8947_v38 }
 0x6d3   :  { %v9800_v6 = vpop.f32.mrf.mxu1 }
 0x6d5   :  { %10362 = vmatmul.mubr.bf16.gmra.mxu0 %v8946_v33  ;;  %v9802_v26 = vpop.f32.mrf.mxu1 }
 0x6d6   :  { %10369 = vmatprep.mubr.bf16.mxu0 %v19461_v29  ;;  %v9977_v0 = vpop.f32.mrf.mxu0 }
 0x6d7   :  { %10185 = vmatmul.mubr.bf16.gmra.mxu1 %v19447_v43  ;;  %v19715_v56 = vadd.f32 %v9977_v0, %v9800_v6  ;;  %v9803_v37 = vpop.f32.mrf.mxu1  ;;  %v8949_v43 = vrot.slane %v19283_v30, 2  ;;  %v8951_v30 = vrot.slane %v19294_v24, 2  ;;  %v20958_v0 = vld [vmem:[#allocation50_spill] sm:$0xff] }
 0x6d8   :  { %10192 = vmatprep.mubr.bf16.mxu1 %v8946_v33  ;;  %v9979_v47 = vpop.f32.mrf.mxu0 }
 0x6d9   :  { %v9805_v63 = vpop.f32.mrf.mxu1  ;;  %v8950_v49 = vsel %vm3937_vm12, %v8947_v38, %v8949_v43  ;;  %v8952_v7 = vsel %vm3937_vm12, %v8949_v43, %v8951_v30  ;;  %v20959_v38 = vld [vmem:[#allocation48_spill] sm:$0xff] }
 0x6da   :  { %v9980_v9 = vpop.f32.mrf.mxu0 }
 0x6db   :  { %v19718_v40 = vadd.f32 %v9980_v9, %v9803_v37 }
 0x6dc   :  { %v9982_v5 = vpop.f32.mrf.mxu0 }
 0x6dd   :  { %10370 = vmatmul.mubr.bf16.gmra.mxu0 %v8948_v20 }
 0x6de   :  { %10377 = vmatprep.mubr.bf16.mxu0 %v19483_v52 }
 0x6df   :  { %10193 = vmatmul.mubr.bf16.gmra.mxu1 %v19472_v54  ;;  %v9985_v61 = vpop.f32.mrf.mxu0 }
 0x6e0   :  { %10200 = vmatprep.mubr.bf16.mxu1 %v8948_v20  ;;  %v9808_v29 = vpop.f32.mrf.mxu1 }
 0x6e1   :  { %v9987_v32 = vpop.f32.mrf.mxu0  ;;  %v19723_v11 = vadd.f32 %v9985_v61, %v9808_v29 }
 0x6e2   :  { %v9810_v60 = vpop.f32.mrf.mxu1 }
 0x6e3   :  { %v9988_v51 = vpop.f32.mrf.mxu0 }
 0x6e4   :  { %v9811_v31 = vpop.f32.mrf.mxu1 }
 0x6e5   :  { %10378 = vmatmul.mubr.bf16.gmra.mxu0 %v8950_v49  ;;  %v9990_v48 = vpop.f32.mrf.mxu0  ;;  %v19728_v54 = vadd.f32 %v9988_v51, %v9811_v31  ;;  %v20961_v51 = vld [vmem:[#allocation51_spill] sm:$0xff] }
 0x6e6   :  { %10385 = vmatprep.mubr.bf16.mxu0 %v19494_v19  ;;  %v9813_v52 = vpop.f32.mrf.mxu1  ;;  %v8953_v19 = vrot.slane %v19303_v36, 2 }
 0x6e7   :  { %10201 = vmatmul.mubr.bf16.gmra.mxu1 %v19486_v3  ;;  %v20956_v3 = vld [vmem:[#allocation38_spill] sm:$0xff] }
 0x6e8   :  { %10208 = vmatprep.mubr.bf16.mxu1 %v8950_v49  ;;  %v8954_v23 = vsel %vm3937_vm12, %v8951_v30, %v8953_v19  ;;  %v20960_v49 = vld [vmem:[#allocation52_spill] sm:$0xff] }
 0x6ed   :  { %10386 = vmatmul.mubr.bf16.gmra.mxu0 %v8952_v7 }
 0x6ee   :  { %10393 = vmatprep.mubr.bf16.mxu0 %v19516_v35  ;;  %v8955_v35 = vrot.slane %v19337_v34, 2  ;;  %v8957_v34 = vrot.slane %v19380_v45, 2  ;;  %v8959_v45 = vrot.slane %v19433_v1, 2 }
 0x6ef   :  { %10209 = vmatmul.mubr.bf16.gmra.mxu1 %v20955_v39 }
 0x6f0   :  { %10216 = vmatprep.mubr.bf16.mxu1 %v8952_v7  ;;  %v8956_v4 = vsel %vm3937_vm12, %v8953_v19, %v8955_v35  ;;  %v8958_v61 = vsel %vm3937_vm12, %v8955_v35, %v8957_v34 }
 0x6f5   :  { %v9993_v2 = vpop.f32.mrf.mxu0  ;;  %10394 = vmatmul.mubr.bf16.gmra.mxu0 %v8954_v23 }
 0x6f6   :  { %10401 = vmatprep.mubr.bf16.mxu0 %v20956_v3 }
 0x6f7   :  { %v9816_v17 = vpop.f32.mrf.mxu1  ;;  %10217 = vmatmul.mubr.bf16.gmra.mxu1 %v20957_v59  ;;  %v9995_v24 = vpop.f32.mrf.mxu0 }
 0x6f8   :  { %v19738_v27 = vadd.f32 %v9993_v2, %v9816_v17  ;;  %10224 = vmatprep.mubr.bf16.mxu1 %v8954_v23  ;;  %v8960_v23 = vsel %vm3937_vm12, %v8957_v34, %v8959_v45  ;;  %v20962_v17 = vld [vmem:[#allocation54_spill] sm:$0xff]  ;;  %v20963_v24 = vld [vmem:[#allocation53_spill] sm:$0xff] }
 0x6f9   :  { %v9818_v12 = vpop.f32.mrf.mxu1  ;;  %v9996_v55 = vpop.f32.mrf.mxu0 }
 0x6fb   :  { %v9819_v22 = vpop.f32.mrf.mxu1  ;;  %v9998_v62 = vpop.f32.mrf.mxu0 }
 0x6fc   :  { %v19741_v36 = vadd.f32 %v9996_v55, %v9819_v22 }
 0x6fd   :  { %v9821_v33 = vpop.f32.mrf.mxu1  ;;  %v10001_v6 = vpop.f32.mrf.mxu0  ;;  %10402 = vmatmul.mubr.bf16.gmra.mxu0 %v8956_v4 }
 0x6fe   :  { %10409 = vmatprep.mubr.bf16.mxu0 %v20958_v0  ;;  %v9084_v33 = vshll.u32 %v19616_v28, 16  ;;  %v20964_v0 = vrot.slane %v19480_v15, 2 }
 0x6ff   :  { %v9824_v26 = vpop.f32.mrf.mxu1  ;;  %10225 = vmatmul.mubr.bf16.gmra.mxu1 %v20959_v38  ;;  %v10003_v47 = vpop.f32.mrf.mxu0 }
 0x700   :  { %v19746_v37 = vadd.f32 %v10001_v6, %v9824_v26  ;;  %10232 = vmatprep.mubr.bf16.mxu1 %v8956_v4  ;;  %v9081_v4 = vshrl.u32 %v19616_v28, 16  ;;  %v8962_v26 = vsel %vm3937_vm12, %v8959_v45, %v20964_v0 }
 0x701   :  { %v9826_v9 = vpop.f32.mrf.mxu1  ;;  %v10004_v63 = vpop.f32.mrf.mxu0 }
 0x703   :  { %v9827_v20 = vpop.f32.mrf.mxu1  ;;  %v10006_v5 = vpop.f32.mrf.mxu0 }
 0x704   :  { %v19749_v43 = vadd.f32 %v10004_v63, %v9827_v20  ;;  %v9083_v63 = vrot.slane %v9081_v4, 2  ;;  %v9086_v20 = vrot.slane %v9084_v33, 3  ;;  %v8476_v33 = vld [vmem:[#allocation2 + $0x10] sm:$0x8] }
 0x705   :  { %v9829_v29 = vpop.f32.mrf.mxu1  ;;  %v10009_v32 = vpop.f32.mrf.mxu0  ;;  %10410 = vmatmul.mubr.bf16.gmra.mxu0 %v8958_v61 }
 0x706   :  { %10417 = vmatprep.mubr.bf16.mxu0 %v20960_v49  ;;  %v9093_v49 = vshll.u32 %v19618_v46, 16 }
 0x707   :  { %v9832_v60 = vpop.f32.mrf.mxu1  ;;  %10233 = vmatmul.mubr.bf16.gmra.mxu1 %v20961_v51  ;;  %v10011_v31 = vpop.f32.mrf.mxu0 }
 0x708   :  { %v19754_v48 = vadd.f32 %v10009_v32, %v9832_v60  ;;  %10240 = vmatprep.mubr.bf16.mxu1 %v8958_v61  ;;  %v9090_v32 = vshrl.u32 %v19618_v46, 16  ;;  %v9087_v31 = vor.u32 %v9086_v20, %v9083_v63  ;;  %v20965_v20 = vld [vmem:[#allocation5_spill] sm:$0xff] }
 0x709   :  { %v9834_v30 = vpop.f32.mrf.mxu1  ;;  %v10012_v52 = vpop.f32.mrf.mxu0 }
 0x70b   :  { %v9835_v7 = vpop.f32.mrf.mxu1  ;;  %v10014_v39 = vpop.f32.mrf.mxu0 }
 0x70c   :  { %v19757_v19 = vadd.f32 %v10012_v52, %v9835_v7  ;;  %v9092_v52 = vrot.slane %v9090_v32, 2  ;;  %v9095_v7 = vrot.slane %v9093_v49, 3  ;;  %v9120_v49 = vrot.slane %v19649_v14, 3 }
 0x70d   :  { %v9837_v2 = vpop.f32.mrf.mxu1  ;;  %v10017_v3 = vpop.f32.mrf.mxu0  ;;  %10418 = vmatmul.mubr.bf16.gmra.mxu0 %v8960_v23 }
 0x70e   :  { %10425 = vmatprep.mubr.bf16.mxu0 %v20962_v17  ;;  %v12425_v17 = vld [vmem:[#allocation2 + $0x98] ss:$0 sps:$4 sm:$0x11]  }
 0x70f   :  { %v9840_v59 = vpop.f32.mrf.mxu1  ;;  %10241 = vmatmul.mubr.bf16.gmra.mxu1 %v20963_v24  ;;  %v10019_v35 = vpop.f32.mrf.mxu0  ;;  %v8998_v24 = vrot.slane %v19616_v28, 2  ;;  %v8965_v4 = vrot.slane %v12425_v17, 2 }
 0x710   :  { %v19762_v12 = vadd.f32 %v10017_v3, %v9840_v59  ;;  %10248 = vmatprep.mubr.bf16.mxu1 %v8960_v23  ;;  %v9096_v59 = vor.u32 %v9095_v7, %v9092_v52 }
 0x711   :  { %v9842_v1 = vpop.f32.mrf.mxu1  ;;  %v10020_v55 = vpop.f32.mrf.mxu0  ;;  %v8966_v28 = vsel %vm3937_vm12, %v19583_v13, %v8965_v4 }
 0x713   :  { %v9843_v22 = vpop.f32.mrf.mxu1  ;;  %v10022_v62 = vpop.f32.mrf.mxu0 }
 0x714   :  { %v19766_v6 = vadd.f32 %v10020_v55, %v9843_v22  ;;  %v8999_v55 = vsel %vm3937_vm12, %v19583_v13, %v8998_v24  ;;  %v12427_v22 = vld [vmem:[#allocation2 + $0xa0] ss:$0 sps:$4 sm:$0x11]  }
 0x715   :  { %v9845_v38 = vpop.f32.mrf.mxu1  ;;  %v10025_v47 = vpop.f32.mrf.mxu0  ;;  %10426 = vmatmul.mubr.bf16.gmra.mxu0 %v8962_v26 }
 0x716   :  { %10433 = vmatprep.mubr.bf16.mxu0 %v19597_v57 }
 0x717   :  { %v9848_v34 = vpop.f32.mrf.mxu1  ;;  %10249 = vmatmul.mubr.bf16.gmra.mxu1 %v19580_v25  ;;  %v10027_v9 = vpop.f32.mrf.mxu0  ;;  %v9088_v25 = vsel %vm4016_vm13, %v19585_v53, %v9087_v31 }
 0x718   :  { %v19773_v5 = vadd.f32 %v10025_v47, %v9848_v34  ;;  %10256 = vmatprep.mubr.bf16.mxu1 %v8962_v26  ;;  %v8905_v47 = vshll.u32 %v12425_v17, 16  ;;  %v9000_v34 = vrot.slane %v12427_v22, 2 }
 0x719   :  { %v9850_v61 = vpop.f32.mrf.mxu1  ;;  %v10028_v29 = vpop.f32.mrf.mxu0 }
 0x71a   :  { %v11479_v61 = vcombine.low %v8476_v33, %v20965_v20 }
 0x71b   :  { %v9851_v60 = vpop.f32.mrf.mxu1  ;;  %v10030_v51 = vpop.f32.mrf.mxu0 }
 0x71c   :  { %v19777_v45 = vadd.f32 %v10028_v29, %v9851_v60  ;;  %v9001_v51 = vsel %vm3937_vm12, %v8998_v24, %v9000_v34  ;;  %v9124_v24 = vrot.slane %v19672_v10, 3 }
 0x71d   :  { %v9853_v57 = vpop.f32.mrf.mxu1  ;;  %v10033_v30 = vpop.f32.mrf.mxu0  ;;  %10434 = vmatmul.mubr.bf16.gmra.mxu0 %v19592_v50 }
 0x71e   :  { %10441 = vmatprep.mubr.bf16.mxu0 %v9088_v25  ;;  %v9119_v57 = vrot.slane %v11479_v61, 3 }
 0x71f   :  { %v9856_v39 = vpop.f32.mrf.mxu1  ;;  %10257 = vmatmul.mubr.bf16.gmra.mxu1 %v19600_v16  ;;  %v10035_v23 = vpop.f32.mrf.mxu0 }
 0x720   :  { %v19783_v46 = vadd.f32 %v10033_v30, %v9856_v39  ;;  %10264 = vmatprep.mubr.bf16.mxu1 %v19592_v50  ;;  %v9097_v50 = vsel %vm4016_vm13, %v9087_v31, %v9096_v59  ;;  %v20966_v30 = vld [vmem:[#allocation40_spill] sm:$0xff]  ;;  %v9121_v7 = vsel %vm4128_vm8, %v9119_v57, %v9120_v49 }
 0x721   :  { %v9858_v2 = vpop.f32.mrf.mxu1  ;;  %v10036_v3 = vpop.f32.mrf.mxu0 }
 0x723   :  { %v9859_v35 = vpop.f32.mrf.mxu1  ;;  %v10038_v1 = vpop.f32.mrf.mxu0 }
 0x724   :  { %v19787_v53 = vadd.f32 %v10036_v3, %v9859_v35  ;;  %v9122_v3 = vrot.slane %v19660_v41, 3 }
 0x725   :  { %v9861_v16 = vpop.f32.mrf.mxu1  ;;  %v10041_v62 = vpop.f32.mrf.mxu0  ;;  %10442 = vmatmul.mubr.bf16.gmra.mxu0 %v8999_v55 }
 0x726   :  { %10449 = vmatprep.mubr.bf16.mxu0 %v9097_v50  ;;  %v9123_v22 = vsel %vm4128_vm8, %v9120_v49, %v9122_v3 }
 0x727   :  { %v9864_v0 = vpop.f32.mrf.mxu1  ;;  %10265 = vmatmul.mubr.bf16.gmra.mxu1 %v19610_v8  ;;  %v10043_v26 = vpop.f32.mrf.mxu0  ;;  %v8907_v8 = vrot.slane %v8905_v47, 2  ;;  %v12456_v47 = vld [vmem:[#allocation2 + $0x38] sm:$0xff]  }
 0x728   :  { %v19795_v38 = vadd.f32 %v10041_v62, %v9864_v0  ;;  %10272 = vmatprep.mubr.bf16.mxu1 %v8966_v28  ;;  %v9125_v62 = vsel %vm4128_vm8, %v9122_v3, %v9124_v24  ;;  %v12455_v0 = vld [vmem:[#allocation2 + $0x30] sm:$0xff]   ;;  %v9128_v34 = vrot.slane %v12456_v47, 3 }
 0x729   :  { %v9866_v9 = vpop.f32.mrf.mxu1  ;;  %v10044_v63 = vpop.f32.mrf.mxu0  ;;  %v8908_v25 = vsel %vm3829_vm7, %v20966_v30, %v8907_v8  ;;  %v9126_v28 = vrot.slane %v12455_v0, 3 }
 0x72b   :  { %v9867_v29 = vpop.f32.mrf.mxu1  ;;  %v10046_v32 = vpop.f32.mrf.mxu0  ;;  %v9127_v61 = vsel %vm4128_vm8, %v9124_v24, %v9126_v28 }
 0x72c   :  { %v19799_v60 = vadd.f32 %v10044_v63, %v9867_v29  ;;  %v9129_v32 = vsel %vm4128_vm8, %v9126_v28, %v9128_v34 }
 0x72d   :  { %v9869_v13 = vpop.f32.mrf.mxu1  ;;  %v10049_v31 = vpop.f32.mrf.mxu0  ;;  %10450 = vmatmul.mubr.bf16.gmra.mxu0 %v9001_v51 }
 0x72f   :  { %v9872_v52 = vpop.f32.mrf.mxu1  ;;  %10273 = vmatmul.mubr.bf16.gmra.mxu1 %v8908_v25  ;;  %v10051_v39 = vpop.f32.mrf.mxu0 }
 0x730   :  { %v19805_v23 = vadd.f32 %v10049_v31, %v9872_v52  ;;  %11974 = vmatprep.mubr.bf16.mxu1 %v9121_v7  ;;  %v12457_v31 = vld [vmem:[#allocation2 + $0x40] sm:$0xff]   ;;  %v12458_v52 = vld [vmem:[#allocation2 + $0x48] sm:$0xff]  }
 0x731   :  { %v9874_v14 = vpop.f32.mrf.mxu1  ;;  %v10052_v2 = vpop.f32.mrf.mxu0  ;;  %v9130_v57 = vrot.slane %v12457_v31, 3  ;;  %v9132_v7 = vrot.slane %v12458_v52, 3 }
 0x733   :  { %v9875_v17 = vpop.f32.mrf.mxu1  ;;  %v10054_v59 = vpop.f32.mrf.mxu0  ;;  %v9131_v3 = vsel %vm4128_vm8, %v9128_v34, %v9130_v57 }
 0x734   :  { %v19809_v35 = vadd.f32 %v10052_v2, %v9875_v17  ;;  %v9133_v59 = vsel %vm4128_vm8, %v9130_v57, %v9132_v7  ;;  %v12462_v57 = vld [vmem:[#allocation2 + $0x68] sm:$0xff]  }
 0x735   :  { %v9877_v1 = vpop.f32.mrf.mxu1  ;;  %v10057_v55 = vpop.f32.mrf.mxu0 }
 0x737   :  { %v9880_v16 = vpop.f32.mrf.mxu1  ;;  %11975 = vmatmul.mubr.bf16.vlgmr.msra.gmra.mxu1 %v9123_v22  ;;  %v10059_v4 = vpop.f32.mrf.mxu0 }
 0x738   :  { %v19813_v50 = vadd.f32 %v10057_v55, %v9880_v16  ;;  %11978 = vmatprep.mubr.bf16.mxu1 %v9125_v62  ;;  %v12459_v16 = vld [vmem:[#allocation2 + $0x50] sm:$0xff]  }
 0x739   :  { %v9882_v33 = vpop.f32.mrf.mxu1  ;;  %v10060_v41 = vpop.f32.mrf.mxu0  ;;  %v9134_v62 = vrot.slane %v12459_v16, 3 }
 0x73b   :  { %v9883_v26 = vpop.f32.mrf.mxu1  ;;  %v10062_v10 = vpop.f32.mrf.mxu0  ;;  %v9135_v47 = vsel %vm4128_vm8, %v9132_v7, %v9134_v62 }
 0x73c   :  { %v19815_v9 = vadd.f32 %v10060_v41, %v9883_v26  ;;  %v12460_v41 = vld [vmem:[#allocation2 + $0x58] sm:$0xff]  }
 0x73d   :  { %v9885_v63 = vpop.f32.mrf.mxu1  ;;  %v10065_v20 = vpop.f32.mrf.mxu0  ;;  %v9136_v0 = vrot.slane %v12460_v41, 3 }
 0x73f   :  { %v9888_v29 = vpop.f32.mrf.mxu1  ;;  %11979 = vmatmul.mubr.bf16.gmra.mxu1 %v9127_v61  ;;  %v10067_v49 = vpop.f32.mrf.mxu0  ;;  %v9137_v63 = vsel %vm4128_vm8, %v9134_v62, %v9136_v0 }
 0x740   :  { %v19819_v8 = vadd.f32 %v10065_v20, %v9888_v29  ;;  %11982 = vmatprep.mubr.bf16.mxu1 %v9129_v32  ;;  %v12461_v49 = vld [vmem:[#allocation2 + $0x60] sm:$0xff]  }
 0x741   :  { %v9890_v51 = vpop.f32.mrf.mxu1  ;;  %v10068_v13 = vpop.f32.mrf.mxu0 }
 0x742   :  { %v9138_v51 = vrot.slane %v12461_v49, 3 }
 0x743   :  { %v9891_v30 = vpop.f32.mrf.mxu1  ;;  %v10070_v25 = vpop.f32.mrf.mxu0 }
 0x744   :  { %v19821_v39 = vadd.f32 %v10068_v13, %v9891_v30  ;;  %v9140_v30 = vrot.slane %v12462_v57, 3 }
 0x745   :  { %v9893_v14 = vpop.f32.mrf.mxu1  ;;  %v10073_v2 = vpop.f32.mrf.mxu0 }
 0x746   :  { %v9139_v14 = vsel %vm4128_vm8, %v9136_v0, %v9138_v51 }
 0x747   :  { %v9896_v17 = vpop.f32.mrf.mxu1  ;;  %11983 = vmatmul.mubr.bf16.gmra.mxu1 %v9131_v3  ;;  %v10075_v24 = vpop.f32.mrf.mxu0  ;;  %v9141_v3 = vsel %vm4128_vm8, %v9138_v51, %v9140_v30  ;;  %v12465_v51 = vld [vmem:[#allocation2 + $0x80] sm:$0xff]  }
 0x748   :  { %v19825_v1 = vadd.f32 %v10073_v2, %v9896_v17  ;;  %11986 = vmatprep.mubr.bf16.mxu1 %v9133_v59 }
 0x749   :  { %v9898_v55 = vpop.f32.mrf.mxu1  ;;  %v10076_v22 = vpop.f32.mrf.mxu0 }
 0x74b   :  { %v9899_v4 = vpop.f32.mrf.mxu1  ;;  %v10078_v33 = vpop.f32.mrf.mxu0 }
 0x74c   :  { %v19827_v28 = vadd.f32 %v10076_v22, %v9899_v4  ;;  %v12463_v22 = vld [vmem:[#allocation2 + $0x70] sm:$0xff]   ;;  %v12464_v33 = vld [vmem:[#allocation2 + $0x78] sm:$0xff]  }
 0x74d   :  { %v9901_v26 = vpop.f32.mrf.mxu1  ;;  %v10081_v10 = vpop.f32.mrf.mxu0  ;;  %v9142_v16 = vrot.slane %v12463_v22, 3  ;;  %v9144_v41 = vrot.slane %v12464_v33, 3 }
 0x74f   :  { %v9904_v34 = vpop.f32.mrf.mxu1  ;;  %11987 = vmatmul.mubr.bf16.gmra.mxu1 %v9135_v47  ;;  %v10083_v20 = vpop.f32.mrf.mxu0  ;;  %v9143_v47 = vsel %vm4128_vm8, %v9140_v30, %v9142_v16 }
 0x750   :  { %v19831_v61 = vadd.f32 %v10081_v10, %v9904_v34  ;;  %11990 = vmatprep.mubr.bf16.mxu1 %v9137_v63  ;;  %v9145_v63 = vsel %vm4128_vm8, %v9142_v16, %v9144_v41 }
 0x751   :  { %v9906_v29 = vpop.f32.mrf.mxu1  ;;  %v10084_v32 = vpop.f32.mrf.mxu0 }
 0x753   :  { %v9907_v13 = vpop.f32.mrf.mxu1  ;;  %v10086_v31 = vpop.f32.mrf.mxu0 }
 0x754   :  { %v19833_v25 = vadd.f32 %v10084_v32, %v9907_v13  ;;  %v9146_v13 = vrot.slane %v12465_v51, 3 }
 0x755   :  { %v9909_v52 = vpop.f32.mrf.mxu1  ;;  %v10089_v7 = vpop.f32.mrf.mxu0 }
 0x756   :  { %v9147_v30 = vsel %vm4128_vm8, %v9144_v41, %v9146_v13 }
 0x757   :  { %v9912_v2 = vpop.f32.mrf.mxu1  ;;  %11991 = vmatmul.mubr.bf16.gmra.mxu1 %v9139_v14  ;;  %v10091_v17 = vpop.f32.mrf.mxu0 }
 0x758   :  { %v19837_v59 = vadd.f32 %v10089_v7, %v9912_v2  ;;  %11994 = vmatprep.mubr.bf16.mxu1 %v9141_v3  ;;  %v20967_v3 = vrot.slane %v19480_v15, 3  ;;  %v20968_v15 = vld [vmem:[#allocation26_spill] sm:$0xff] }
 0x759   :  { %v9914_v24 = vpop.f32.mrf.mxu1  ;;  %v10092_v55 = vpop.f32.mrf.mxu0 }
 0x75a   :  { %v9149_v17 = vsel %vm4128_vm8, %v9146_v13, %v20967_v3 }
 0x75b   :  { %v9915_v62 = vpop.f32.mrf.mxu1  ;;  %v10094_v4 = vpop.f32.mrf.mxu0 }
 0x75c   :  { %v19839_v26 = vadd.f32 %v10092_v55, %v9915_v62 }
 0x75d   :  { %v9917_v10 = vpop.f32.mrf.mxu1  ;;  %v10097_v0 = vpop.f32.mrf.mxu0 }
 0x75f   :  { %v9920_v34 = vpop.f32.mrf.mxu1  ;;  %11995 = vmatmul.mubr.bf16.gmra.mxu1 %v9143_v47  ;;  %v10099_v20 = vpop.f32.mrf.mxu0 }
 0x760   :  { %v19843_v29 = vadd.f32 %v10097_v0, %v9920_v34  ;;  %11998 = vmatprep.mubr.bf16.mxu1 %v9145_v63 }
 0x761   :  { %v9922_v32 = vpop.f32.mrf.mxu1  ;;  %v10100_v49 = vpop.f32.mrf.mxu0 }
 0x763   :  { %v9923_v31 = vpop.f32.mrf.mxu1  ;;  %v10102_v57 = vpop.f32.mrf.mxu0 }
 0x764   :  { %v19845_v52 = vadd.f32 %v10100_v49, %v9923_v31 }
 0x765   :  { %v9925_v7 = vpop.f32.mrf.mxu1  ;;  %v10315_v14 = vpop.f32.mrf.mxu0 }
 0x767   :  { %v10138_v2 = vpop.f32.mrf.mxu1  ;;  %11999 = vmatmul.mubr.bf16.gmra.mxu1 %v9147_v30  ;;  %v10317_v24 = vpop.f32.mrf.mxu0 }
 0x768   :  { %v10139_v55 = vadd.f32 %v10138_v2, %v19695_v42  ;;  %12002 = vmatprep.mubr.bf16.mxu1 %v9149_v17  ;;  %v20969_v42 = vld [vmem:[#allocation9_spill] sm:$0xff] }
 0x769   :  { %v10140_v22 = vpop.f32.mrf.mxu1  ;;  %v10318_v16 = vpop.f32.mrf.mxu0 }
 0x76a   :  { %v19852_v62 = vadd.f32 %v10315_v14, %v10139_v55 }
 0x76b   :  { %v10141_v4 = vpop.f32.mrf.mxu1  ;;  %v10320_v33 = vpop.f32.mrf.mxu0 }
 0x76c   :  { %v10142_v10 = vadd.f32 %v10141_v4, %v19700_v58 }
 0x76d   :  { %v10143_v0 = vpop.f32.mrf.mxu1  ;;  %v10323_v41 = vpop.f32.mrf.mxu0 }
 0x76e   :  { %v19855_v47 = vadd.f32 %v10318_v16, %v10142_v10 }
 0x76f   :  { %v10146_v34 = vpop.f32.mrf.mxu1  ;;  %12003 = vmatmul.mubr.bf16.gmra.mxu1 %v20968_v15  ;;  %v10325_v63 = vpop.f32.mrf.mxu0 }
 0x770   :  { %v10147_v20 = vadd.f32 %v10146_v34, %v19704_v18  ;;  %12006 = vmatprep.mubr.bf16.mxu1 %v20969_v42 }
 0x771   :  { %v10148_v32 = vpop.f32.mrf.mxu1  ;;  %v10326_v49 = vpop.f32.mrf.mxu0 }
 0x772   :  { %v19860_v51 = vadd.f32 %v10323_v41, %v10147_v20 }
 0x773   :  { %v10149_v13 = vpop.f32.mrf.mxu1  ;;  %v10328_v31 = vpop.f32.mrf.mxu0 }
 0x774   :  { %v10150_v58 = vadd.f32 %v10149_v13, %v19709_v44 }
 0x775   :  { %v10151_v57 = vpop.f32.mrf.mxu1  ;;  %v10331_v7 = vpop.f32.mrf.mxu0 }
 0x776   :  { %v19863_v14 = vadd.f32 %v10326_v49, %v10150_v58 }
 0x777   :  { %v10154_v30 = vpop.f32.mrf.mxu1  ;;  %12007 = vmatmul.mubr.bf16.gmra.mxu1 %v19640_v21  ;;  %v10333_v2 = vpop.f32.mrf.mxu0 }
 0x778   :  { %v10155_v18 = vadd.f32 %v10154_v30, %v19715_v56 }
 0x779   :  { %v10156_v3 = vpop.f32.mrf.mxu1  ;;  %v10334_v17 = vpop.f32.mrf.mxu0 }
 0x77a   :  { %v19867_v24 = vadd.f32 %v10331_v7, %v10155_v18 }
 0x77b   :  { %v10157_v55 = vpop.f32.mrf.mxu1  ;;  %v10336_v22 = vpop.f32.mrf.mxu0 }
 0x77c   :  { %v10158_v16 = vadd.f32 %v10157_v55, %v19718_v40 }
 0x77d   :  { %v10159_v4 = vpop.f32.mrf.mxu1  ;;  %v10339_v44 = vpop.f32.mrf.mxu0 }
 0x77e   :  { %v19870_v33 = vadd.f32 %v10334_v17, %v10158_v16 }
 0x77f   :  { %v10162_v10 = vpop.f32.mrf.mxu1  ;;  %v10341_v0 = vpop.f32.mrf.mxu0 }
 0x780   :  { %v10163_v41 = vadd.f32 %v10162_v10, %v19723_v11 }
 0x781   :  { %v10164_v21 = vpop.f32.mrf.mxu1  ;;  %v10342_v34 = vpop.f32.mrf.mxu0 }
 0x782   :  { %v19873_v15 = vadd.f32 %v10339_v44, %v10163_v41 }
 0x783   :  { %v10165_v56 = vpop.f32.mrf.mxu1  ;;  %v10344_v63 = vpop.f32.mrf.mxu0 }
 0x784   :  { %v10166_v20 = vadd.f32 %v10165_v56, %v19728_v54 }
 0x785   :  { %v10167_v42 = vpop.f32.mrf.mxu1  ;;  %v10347_v32 = vpop.f32.mrf.mxu0 }
 0x786   :  { %v19876_v49 = vadd.f32 %v10342_v34, %v10166_v20 }
 0x787   :  { %v10170_v40 = vpop.f32.mrf.mxu1  ;;  %v10349_v13 = vpop.f32.mrf.mxu0 }
 0x788   :  { %v10171_v31 = vadd.f32 %v10170_v40, %v19738_v27 }
 0x789   :  { %v10172_v58 = vpop.f32.mrf.mxu1  ;;  %v10350_v57 = vpop.f32.mrf.mxu0 }
 0x78a   :  { %v19879_v7 = vadd.f32 %v10347_v32, %v10171_v31 }
 0x78b   :  { %v10173_v11 = vpop.f32.mrf.mxu1  ;;  %v10352_v30 = vpop.f32.mrf.mxu0 }
 0x78c   :  { %v10174_v2 = vadd.f32 %v10173_v11, %v19741_v36 }
 0x78d   :  { %v10175_v18 = vpop.f32.mrf.mxu1  ;;  %v10355_v3 = vpop.f32.mrf.mxu0 }
 0x78e   :  { %v19882_v17 = vadd.f32 %v10350_v57, %v10174_v2 }
 0x78f   :  { %v10178_v54 = vpop.f32.mrf.mxu1  ;;  %v10357_v55 = vpop.f32.mrf.mxu0 }
 0x790   :  { %v10179_v22 = vadd.f32 %v10178_v54, %v19746_v37 }
 0x791   :  { %v10180_v16 = vpop.f32.mrf.mxu1  ;;  %v10358_v4 = vpop.f32.mrf.mxu0 }
 0x792   :  { %v19885_v44 = vadd.f32 %v10355_v3, %v10179_v22 }
 0x793   :  { %v10181_v27 = vpop.f32.mrf.mxu1  ;;  %v10360_v10 = vpop.f32.mrf.mxu0 }
 0x794   :  { %v10182_v0 = vadd.f32 %v10181_v27, %v19749_v43 }
 0x795   :  { %v10183_v41 = vpop.f32.mrf.mxu1  ;;  %v10363_v21 = vpop.f32.mrf.mxu0 }
 0x796   :  { %v19888_v34 = vadd.f32 %v10358_v4, %v10182_v0 }
 0x797   :  { %v10186_v36 = vpop.f32.mrf.mxu1  ;;  %v10365_v56 = vpop.f32.mrf.mxu0 }
 0x798   :  { %v10187_v63 = vadd.f32 %v10186_v36, %v19754_v48 }
 0x799   :  { %v10188_v20 = vpop.f32.mrf.mxu1  ;;  %v10366_v42 = vpop.f32.mrf.mxu0 }
 0x79a   :  { %v19891_v32 = vadd.f32 %v10363_v21, %v10187_v63 }
 0x79b   :  { %v10189_v37 = vpop.f32.mrf.mxu1  ;;  %v10368_v40 = vpop.f32.mrf.mxu0 }
 0x79c   :  { %v10190_v13 = vadd.f32 %v10189_v37, %v19757_v19 }
 0x79d   :  { %v10191_v31 = vpop.f32.mrf.mxu1  ;;  %v10371_v58 = vpop.f32.mrf.mxu0 }
 0x79e   :  { %v19894_v57 = vadd.f32 %v10366_v42, %v10190_v13 }
 0x79f   :  { %v10194_v43 = vpop.f32.mrf.mxu1  ;;  %v10373_v11 = vpop.f32.mrf.mxu0 }
 0x7a0   :  { %v10195_v30 = vadd.f32 %v10194_v43, %v19762_v12 }
 0x7a1   :  { %v10196_v2 = vpop.f32.mrf.mxu1  ;;  %v10374_v18 = vpop.f32.mrf.mxu0 }
 0x7a2   :  { %v19897_v3 = vadd.f32 %v10371_v58, %v10195_v30 }
 0x7a3   :  { %v10197_v48 = vpop.f32.mrf.mxu1  ;;  %v10376_v54 = vpop.f32.mrf.mxu0 }
 0x7a4   :  { %v10198_v55 = vadd.f32 %v10197_v48, %v19766_v6 }
 0x7a5   :  { %v10199_v22 = vpop.f32.mrf.mxu1  ;;  %v10379_v16 = vpop.f32.mrf.mxu0 }
 0x7a6   :  { %v19900_v4 = vadd.f32 %v10374_v18, %v10198_v55 }
 0x7a7   :  { %v10202_v19 = vpop.f32.mrf.mxu1  ;;  %v10381_v27 = vpop.f32.mrf.mxu0 }
 0x7a8   :  { %v10203_v10 = vadd.f32 %v10202_v19, %v19773_v5 }
 0x7a9   :  { %v10204_v0 = vpop.f32.mrf.mxu1  ;;  %v10382_v41 = vpop.f32.mrf.mxu0 }
 0x7aa   :  { %v19903_v21 = vadd.f32 %v10379_v16, %v10203_v10 }
 0x7ab   :  { %v10205_v12 = vpop.f32.mrf.mxu1  ;;  %v10384_v36 = vpop.f32.mrf.mxu0 }
 0x7ac   :  { %v10206_v56 = vadd.f32 %v10205_v12, %v19777_v45 }
 0x7ad   :  { %v10207_v63 = vpop.f32.mrf.mxu1  ;;  %v10387_v20 = vpop.f32.mrf.mxu0 }
 0x7ae   :  { %v19906_v42 = vadd.f32 %v10382_v41, %v10206_v56 }
 0x7af   :  { %v10210_v6 = vpop.f32.mrf.mxu1  ;;  %v10389_v37 = vpop.f32.mrf.mxu0 }
 0x7b0   :  { %v10211_v40 = vadd.f32 %v10210_v6, %v19783_v46 }
 0x7b1   :  { %v10212_v13 = vpop.f32.mrf.mxu1  ;;  %v10390_v31 = vpop.f32.mrf.mxu0 }
 0x7b2   :  { %v19909_v58 = vadd.f32 %v10387_v20, %v10211_v40 }
 0x7b3   :  { %v10213_v5 = vpop.f32.mrf.mxu1  ;;  %v10392_v43 = vpop.f32.mrf.mxu0 }
 0x7b4   :  { %v10214_v11 = vadd.f32 %v10213_v5, %v19787_v53 }
 0x7b5   :  { %v10215_v30 = vpop.f32.mrf.mxu1  ;;  %v10395_v2 = vpop.f32.mrf.mxu0 }
 0x7b6   :  { %v19912_v18 = vadd.f32 %v10390_v31, %v10214_v11 }
 0x7b7   :  { %v10218_v45 = vpop.f32.mrf.mxu1  ;;  %v10397_v48 = vpop.f32.mrf.mxu0 }
 0x7b8   :  { %v10219_v54 = vadd.f32 %v10218_v45, %v19795_v38 }
 0x7b9   :  { %v10220_v55 = vpop.f32.mrf.mxu1  ;;  %v10398_v22 = vpop.f32.mrf.mxu0 }
 0x7ba   :  { %v19915_v16 = vadd.f32 %v10395_v2, %v10219_v54 }
 0x7bb   :  { %v10221_v46 = vpop.f32.mrf.mxu1  ;;  %v10400_v19 = vpop.f32.mrf.mxu0 }
 0x7bc   :  { %v10222_v27 = vadd.f32 %v10221_v46, %v19799_v60 }
 0x7bd   :  { %v10223_v10 = vpop.f32.mrf.mxu1  ;;  %v10403_v0 = vpop.f32.mrf.mxu0 }
 0x7be   :  { %v19918_v41 = vadd.f32 %v10398_v22, %v10222_v27 }
 0x7bf   :  { %v10226_v53 = vpop.f32.mrf.mxu1  ;;  %v10405_v12 = vpop.f32.mrf.mxu0 }
 0x7c0   :  { %v10227_v36 = vadd.f32 %v10226_v53, %v19805_v23 }
 0x7c1   :  { %v10228_v56 = vpop.f32.mrf.mxu1  ;;  %v10406_v63 = vpop.f32.mrf.mxu0 }
 0x7c2   :  { %v19921_v20 = vadd.f32 %v10403_v0, %v10227_v36 }
 0x7c3   :  { %v10229_v38 = vpop.f32.mrf.mxu1  ;;  %v10408_v6 = vpop.f32.mrf.mxu0 }
 0x7c4   :  { %v10230_v37 = vadd.f32 %v10229_v38, %v19809_v35 }
 0x7c5   :  { %v10231_v40 = vpop.f32.mrf.mxu1  ;;  %v10411_v13 = vpop.f32.mrf.mxu0 }
 0x7c6   :  { %v19924_v31 = vadd.f32 %v10406_v63, %v10230_v37 }
 0x7c7   :  { %v10234_v60 = vpop.f32.mrf.mxu1  ;;  %v10413_v5 = vpop.f32.mrf.mxu0 }
 0x7c8   :  { %v10235_v43 = vadd.f32 %v10234_v60, %v19813_v50 }
 0x7c9   :  { %v10236_v11 = vpop.f32.mrf.mxu1  ;;  %v10414_v30 = vpop.f32.mrf.mxu0 }
 0x7ca   :  { %v19927_v2 = vadd.f32 %v10411_v13, %v10235_v43 }
 0x7cb   :  { %v10237_v23 = vpop.f32.mrf.mxu1  ;;  %v10416_v45 = vpop.f32.mrf.mxu0 }
 0x7cc   :  { %v10238_v48 = vadd.f32 %v10237_v23, %v19815_v9 }
 0x7cd   :  { %v10239_v54 = vpop.f32.mrf.mxu1  ;;  %v10419_v55 = vpop.f32.mrf.mxu0 }
 0x7ce   :  { %v19930_v22 = vadd.f32 %v10414_v30, %v10238_v48 }
 0x7cf   :  { %v10242_v35 = vpop.f32.mrf.mxu1  ;;  %v10421_v46 = vpop.f32.mrf.mxu0 }
 0x7d0   :  { %v10243_v19 = vadd.f32 %v10242_v35, %v19819_v8 }
 0x7d1   :  { %v10244_v27 = vpop.f32.mrf.mxu1  ;;  %v10422_v10 = vpop.f32.mrf.mxu0 }
 0x7d2   :  { %v19933_v0 = vadd.f32 %v10419_v55, %v10243_v19 }
 0x7d3   :  { %v10245_v50 = vpop.f32.mrf.mxu1  ;;  %v10424_v53 = vpop.f32.mrf.mxu0 }
 0x7d4   :  { %v10246_v12 = vadd.f32 %v10245_v50, %v19821_v39 }
 0x7d5   :  { %v10247_v36 = vpop.f32.mrf.mxu1  ;;  %v10427_v56 = vpop.f32.mrf.mxu0 }
 0x7d6   :  { %v19936_v63 = vadd.f32 %v10422_v10, %v10246_v12 }
 0x7d7   :  { %v10250_v9 = vpop.f32.mrf.mxu1  ;;  %v10429_v38 = vpop.f32.mrf.mxu0 }
 0x7d8   :  { %v10251_v6 = vadd.f32 %v10250_v9, %v19825_v1 }
 0x7d9   :  { %v10252_v37 = vpop.f32.mrf.mxu1  ;;  %v10430_v40 = vpop.f32.mrf.mxu0 }
 0x7da   :  { %v19939_v13 = vadd.f32 %v10427_v56, %v10251_v6 }
 0x7db   :  { %v10253_v8 = vpop.f32.mrf.mxu1  ;;  %v10432_v60 = vpop.f32.mrf.mxu0 }
 0x7dc   :  { %v10254_v5 = vadd.f32 %v10253_v8, %v19827_v28 }
 0x7dd   :  { %v10255_v43 = vpop.f32.mrf.mxu1  ;;  %v10435_v11 = vpop.f32.mrf.mxu0 }
 0x7de   :  { %v19942_v30 = vadd.f32 %v10430_v40, %v10254_v5 }
 0x7df   :  { %v10258_v39 = vpop.f32.mrf.mxu1  ;;  %v10437_v23 = vpop.f32.mrf.mxu0 }
 0x7e0   :  { %v10259_v45 = vadd.f32 %v10258_v39, %v19831_v61 }
 0x7e1   :  { %v10260_v48 = vpop.f32.mrf.mxu1  ;;  %v10438_v54 = vpop.f32.mrf.mxu0 }
 0x7e2   :  { %v19945_v55 = vadd.f32 %v10435_v11, %v10259_v45 }
 0x7e3   :  { %v10261_v1 = vpop.f32.mrf.mxu1  ;;  %v10440_v35 = vpop.f32.mrf.mxu0 }
 0x7e4   :  { %v10262_v46 = vadd.f32 %v10261_v1, %v19833_v25 }
 0x7e5   :  { %v10263_v19 = vpop.f32.mrf.mxu1  ;;  %v10443_v27 = vpop.f32.mrf.mxu0 }
 0x7e6   :  { %v19948_v10 = vadd.f32 %v10438_v54, %v10262_v46  ;;  %v19965_v54 = vld [vmem:[%s20301_s5] ss:$0 sm:$0xff]  ;;  %v11556_v19 = vld [vmem:[%s20297_s0 + $0x16b] sm:$0xff] }
 0x7e7   :  { %v10266_v28 = vpop.f32.mrf.mxu1  ;;  %v10445_v50 = vpop.f32.mrf.mxu0 }
 0x7e8   :  { %v10267_v53 = vadd.f32 %v10266_v28, %v19837_v59 }
 0x7e9   :  { %v10268_v12 = vpop.f32.mrf.mxu1  ;;  %v10446_v36 = vpop.f32.mrf.mxu0 }
 0x7ea   :  { %v19951_v56 = vadd.f32 %v10443_v27, %v10267_v53  ;;  %v11554_v53 = vld [vmem:[%s20297_s0 + $0x15b] sm:$0xff] }
 0x7eb   :  { %v10269_v61 = vpop.f32.mrf.mxu1  ;;  %v10448_v9 = vpop.f32.mrf.mxu0 }
 0x7ec   :  { %v10270_v38 = vadd.f32 %v10269_v61, %v19839_v26 }
 0x7ed   :  { %v10271_v6 = vpop.f32.mrf.mxu1  ;;  %v10451_v37 = vpop.f32.mrf.mxu0 }
 0x7ee   :  { %v19954_v40 = vadd.f32 %v10446_v36, %v10270_v38  ;;  %v11557_v38 = vld [vmem:[%s20297_s0 + $0x173] sm:$0xff] }
 0x7ef   :  { %v10274_v25 = vpop.f32.mrf.mxu1  ;;  %v10453_v8 = vpop.f32.mrf.mxu0 }
 0x7f0   :  { %v10275_v60 = vadd.f32 %v10274_v25, %v19843_v29  ;;  %v19971_v29 = vld [vmem:[%s20302_s6] ss:$0 sm:$0xff] }
 0x7f1   :  { %v10276_v5 = vpop.f32.mrf.mxu1  ;;  %v10454_v43 = vpop.f32.mrf.mxu0 }
 0x7f2   :  { %v19957_v11 = vadd.f32 %v10451_v37, %v10275_v60  ;;  %v11555_v60 = vld [vmem:[%s20297_s0 + $0x163] sm:$0xff] }
 0x7f3   :  { %v10277_v59 = vpop.f32.mrf.mxu1  ;;  %v10456_v39 = vpop.f32.mrf.mxu0 }
 0x7f4   :  { %v10278_v23 = vadd.f32 %v10277_v59, %v19845_v52 }
 0x7f5   :  { %v10279_v45 = vpop.f32.mrf.mxu1 }
 0x7f6   :  { %v19960_v48 = vadd.f32 %v10454_v43, %v10278_v23 }
 0x7f7   :  { %v11976_v26 = vpop.f32.mrf.mxu1 }
 0x7f8   :  { %v10501_v1 = vadd.f32 %v11976_v26, %v19860_v51 }
 0x7f9   :  { %v10492_v35 = vpop.f32.mrf.mxu1 }
 0x7fa   :  { %v10644_v46 = vmul.f32 %v19965_v54, %v10501_v1  ;;  %v10493_v52 = vadd.f32 %v10492_v35, %v19852_v62  ;;  %v11560_v35 = vld [vmem:[%s20297_s0 + $0x18b] sm:$0xff] }
 0x7fb   :  { %v11977_v27 = vpop.f32.mrf.mxu1 }
 0x7fc   :  { %v10687_v28 = vadd.f32 %v19971_v29, %v10644_v46  ;;  %v10642_v50 = vmul.f32 %v19965_v54, %v10493_v52  ;;  %v10504_v51 = vadd.f32 %v11977_v27, %v19863_v14 }
 0x7fd   :  { %v10495_v12 = vpop.f32.mrf.mxu1 }
 0x7fe   :  { %v10759_v36 = vadd.f32 %v11556_v19, %v10687_v28  ;;  %v10685_v61 = vadd.f32 %v19971_v29, %v10642_v50  ;;  %v10645_v62 = vmul.f32 %v19965_v54, %v10504_v51  ;;  %v10496_v9 = vadd.f32 %v10495_v12, %v19855_v47 }
 0x7ff   :  { %v11980_v6 = vpop.f32.mrf.mxu1 }
 0x800   :  { %v10795_v37 = vmax.f32 %v10759_v36, 0.0  ;;  %v10757_v25 = vadd.f32 %v11554_v53, %v10685_v61  ;;  %v10688_v14 = vadd.f32 %v19971_v29, %v10645_v62  ;;  %v10643_v8 = vmul.f32 %v19965_v54, %v10496_v9 }
 0x801   :  { %v10517_v5 = vadd.f32 %v11980_v6, %v19873_v15  ;;  %v10508_v43 = vpop.f32.mrf.mxu1 }
 0x802   :  { %11592 = vst [vmem:[%s20303_s7 + $0x130] sm:$0xff] %v10795_v37  ;;  %v10793_v47 = vmax.f32 %v10757_v25, 0.0  ;;  %v10760_v59 = vadd.f32 %v11557_v38, %v10688_v14  ;;  %v10686_v39 = vadd.f32 %v19971_v29, %v10643_v8  ;;  %v10509_v23 = vadd.f32 %v10508_v43, %v19867_v24  ;;  %v11558_v24 = vld [vmem:[%s20297_s0 + $0x17b] sm:$0xff] }
 0x803   :  { %v10648_v45 = vmul.f32 %v19965_v54, %v10517_v5  ;;  %v11981_v26 = vpop.f32.mrf.mxu1 }
 0x804   :  { %11590 = vst [vmem:[%s20303_s7 + $0x120] sm:$0xff] %v10793_v47  ;;  %v10796_v1 = vmax.f32 %v10760_v59, 0.0  ;;  %v10758_v15 = vadd.f32 %v11555_v60, %v10686_v39  ;;  %v10646_v46 = vmul.f32 %v19965_v54, %v10509_v23  ;;  %v10520_v52 = vadd.f32 %v11981_v26, %v19876_v49  ;;  %v11561_v49 = vld [vmem:[%s20297_s0 + $0x193] sm:$0xff] }
 0x805   :  { %v10691_v19 = vadd.f32 %v19971_v29, %v10648_v45  ;;  %v10511_v27 = vpop.f32.mrf.mxu1 }
 0x806   :  { %11593 = vst [vmem:[%s20303_s7 + $0x138] sm:$0xff] %v10796_v1  ;;  %v10794_v28 = vmax.f32 %v10758_v15, 0.0  ;;  %v10689_v50 = vadd.f32 %v19971_v29, %v10646_v46  ;;  %v10649_v51 = vmul.f32 %v19965_v54, %v10520_v52  ;;  %v10512_v53 = vadd.f32 %v10511_v27, %v19870_v33  ;;  %v11559_v33 = vld [vmem:[%s20297_s0 + $0x183] sm:$0xff]  ;;  %v11562_v15 = vld [vmem:[%s20297_s0 + $0x19b] sm:$0xff] }
 0x807   :  { %v10763_v12 = vadd.f32 %v11560_v35, %v10691_v19  ;;  %v11984_v36 = vpop.f32.mrf.mxu1 }
 0x808   :  { %11591 = vst [vmem:[%s20303_s7 + $0x128] sm:$0xff] %v10794_v28  ;;  %v10761_v61 = vadd.f32 %v11558_v24, %v10689_v50  ;;  %v10692_v62 = vadd.f32 %v19971_v29, %v10649_v51  ;;  %v10647_v9 = vmul.f32 %v19965_v54, %v10512_v53  ;;  %v10533_v38 = vadd.f32 %v11984_v36, %v19885_v44  ;;  %v11564_v44 = vld [vmem:[%s20297_s0 + $0x1ab] sm:$0xff] }
 0x809   :  { %v10799_v6 = vmax.f32 %v10763_v12, 0.0  ;;  %v10524_v37 = vpop.f32.mrf.mxu1 }
 0x80a   :  { %v10797_v25 = vmax.f32 %v10761_v61, 0.0  ;;  %v10764_v14 = vadd.f32 %v11561_v49, %v10692_v62  ;;  %v10690_v8 = vadd.f32 %v19971_v29, %v10647_v9  ;;  %v10652_v60 = vmul.f32 %v19965_v54, %v10533_v38 }
 0x80b   :  { %11596 = vst [vmem:[%s20303_s7 + $0x150] sm:$0xff] %v10799_v6  ;;  %v10525_v5 = vadd.f32 %v10524_v37, %v19879_v7  ;;  %v11985_v43 = vpop.f32.mrf.mxu1 }
 0x80c   :  { %11594 = vst [vmem:[%s20303_s7 + $0x140] sm:$0xff] %v10797_v25  ;;  %v10800_v47 = vmax.f32 %v10764_v14, 0.0  ;;  %v10762_v59 = vadd.f32 %v11559_v33, %v10690_v8  ;;  %v10695_v39 = vadd.f32 %v19971_v29, %v10652_v60  ;;  %v10536_v23 = vadd.f32 %v11985_v43, %v19888_v34  ;;  %v11565_v34 = vld [vmem:[%s20297_s0 + $0x1b3] sm:$0xff] }
 0x80d   :  { %v10650_v45 = vmul.f32 %v19965_v54, %v10525_v5  ;;  %v10527_v26 = vpop.f32.mrf.mxu1 }
 0x80e   :  { %11597 = vst [vmem:[%s20303_s7 + $0x158] sm:$0xff] %v10800_v47  ;;  %v10798_v1 = vmax.f32 %v10762_v59, 0.0  ;;  %v10767_v7 = vadd.f32 %v11564_v44, %v10695_v39  ;;  %v10653_v35 = vmul.f32 %v19965_v54, %v10536_v23  ;;  %v10528_v46 = vadd.f32 %v10527_v26, %v19882_v17  ;;  %v11563_v17 = vld [vmem:[%s20297_s0 + $0x1a3] sm:$0xff]  ;;  %v11569_v39 = vld [vmem:[%s20297_s0 + $0x1d3] sm:$0xff] }
 0x80f   :  { %v10693_v52 = vadd.f32 %v19971_v29, %v10650_v45  ;;  %v11988_v19 = vpop.f32.mrf.mxu1 }
 0x810   :  { %11595 = vst [vmem:[%s20303_s7 + $0x148] sm:$0xff] %v10798_v1  ;;  %v10803_v24 = vmax.f32 %v10767_v7, 0.0  ;;  %v10696_v27 = vadd.f32 %v19971_v29, %v10653_v35  ;;  %v10651_v28 = vmul.f32 %v19965_v54, %v10528_v46  ;;  %v10549_v50 = vadd.f32 %v11988_v19, %v19897_v3  ;;  %v11568_v3 = vld [vmem:[%s20297_s0 + $0x1cb] sm:$0xff] }
 0x811   :  { %v10765_v51 = vadd.f32 %v11562_v15, %v10693_v52  ;;  %v10540_v53 = vpop.f32.mrf.mxu1 }
 0x812   :  { %11600 = vst [vmem:[%s20303_s7 + $0x170] sm:$0xff] %v10803_v24  ;;  %v10768_v12 = vadd.f32 %v11565_v34, %v10696_v27  ;;  %v10694_v49 = vadd.f32 %v19971_v29, %v10651_v28  ;;  %v10656_v36 = vmul.f32 %v19965_v54, %v10549_v50  ;;  %v10541_v61 = vadd.f32 %v10540_v53, %v19891_v32  ;;  %v11566_v32 = vld [vmem:[%s20297_s0 + $0x1bb] sm:$0xff] }
 0x813   :  { %v10801_v62 = vmax.f32 %v10765_v51, 0.0  ;;  %v11989_v9 = vpop.f32.mrf.mxu1 }
 0x814   :  { %v10804_v38 = vmax.f32 %v10768_v12, 0.0  ;;  %v10766_v6 = vadd.f32 %v11563_v17, %v10694_v49  ;;  %v10699_v33 = vadd.f32 %v19971_v29, %v10656_v36  ;;  %v10654_v37 = vmul.f32 %v19965_v54, %v10541_v61 }
 0x815   :  { %11598 = vst [vmem:[%s20303_s7 + $0x160] sm:$0xff] %v10801_v62  ;;  %v10552_v25 = vadd.f32 %v11989_v9, %v19900_v4  ;;  %v10543_v14 = vpop.f32.mrf.mxu1 }
 0x816   :  { %11601 = vst [vmem:[%s20303_s7 + $0x178] sm:$0xff] %v10804_v38  ;;  %v10802_v8 = vmax.f32 %v10766_v6, 0.0  ;;  %v10771_v60 = vadd.f32 %v11568_v3, %v10699_v33  ;;  %v10697_v44 = vadd.f32 %v19971_v29, %v10654_v37  ;;  %v10544_v5 = vadd.f32 %v10543_v14, %v19894_v57  ;;  %v11567_v57 = vld [vmem:[%s20297_s0 + $0x1c3] sm:$0xff] }
 0x817   :  { %v10657_v43 = vmul.f32 %v19965_v54, %v10552_v25  ;;  %v11992_v47 = vpop.f32.mrf.mxu1 }
 0x818   :  { %11599 = vst [vmem:[%s20303_s7 + $0x168] sm:$0xff] %v10802_v8  ;;  %v10807_v59 = vmax.f32 %v10771_v60, 0.0  ;;  %v10769_v4 = vadd.f32 %v11566_v32, %v10697_v44  ;;  %v10655_v23 = vmul.f32 %v19965_v54, %v10544_v5  ;;  %v10565_v45 = vadd.f32 %v11992_v47, %v19909_v58  ;;  %v11572_v58 = vld [vmem:[%s20297_s0 + $0x1eb] sm:$0xff]  ;;  %v11571_v32 = vld [vmem:[%s20297_s0 + $0x1e3] sm:$0xff] }
 0x819   :  { %v10700_v26 = vadd.f32 %v19971_v29, %v10657_v43  ;;  %v10556_v1 = vpop.f32.mrf.mxu1 }
 0x81a   :  { %11604 = vst [vmem:[%s20303_s7 + $0x190] sm:$0xff] %v10807_v59  ;;  %v10805_v7 = vmax.f32 %v10769_v4, 0.0  ;;  %v10698_v15 = vadd.f32 %v19971_v29, %v10655_v23  ;;  %v10660_v35 = vmul.f32 %v19965_v54, %v10565_v45  ;;  %v10557_v46 = vadd.f32 %v10556_v1, %v19903_v21  ;;  %v11570_v21 = vld [vmem:[%s20297_s0 + $0x1db] sm:$0xff] }
 0x81b   :  { %v10772_v52 = vadd.f32 %v11569_v39, %v10700_v26  ;;  %v11993_v34 = vpop.f32.mrf.mxu1 }
 0x81c   :  { %11602 = vst [vmem:[%s20303_s7 + $0x180] sm:$0xff] %v10805_v7  ;;  %v10770_v19 = vadd.f32 %v11567_v57, %v10698_v15  ;;  %v10703_v24 = vadd.f32 %v19971_v29, %v10660_v35  ;;  %v10658_v27 = vmul.f32 %v19965_v54, %v10557_v46  ;;  %v10568_v28 = vadd.f32 %v11993_v34, %v19912_v18  ;;  %v11573_v18 = vld [vmem:[%s20297_s0 + $0x1f3] sm:$0xff] }
 0x81d   :  { %v10808_v50 = vmax.f32 %v10772_v52, 0.0  ;;  %v10559_v51 = vpop.f32.mrf.mxu1 }
 0x81e   :  { %v10806_v17 = vmax.f32 %v10770_v19, 0.0  ;;  %v10775_v53 = vadd.f32 %v11572_v58, %v10703_v24  ;;  %v10701_v12 = vadd.f32 %v19971_v29, %v10658_v27  ;;  %v10661_v49 = vmul.f32 %v19965_v54, %v10568_v28 }
 0x81f   :  { %11605 = vst [vmem:[%s20303_s7 + $0x198] sm:$0xff] %v10808_v50  ;;  %v10560_v36 = vadd.f32 %v10559_v51, %v19906_v42  ;;  %v11996_v61 = vpop.f32.mrf.mxu1  ;;  %v11580_v51 = vld [vmem:[%s20297_s0 + $0x22b] sm:$0xff] }
 0x820   :  { %11603 = vst [vmem:[%s20303_s7 + $0x188] sm:$0xff] %v10806_v17  ;;  %v10811_v62 = vmax.f32 %v10775_v53, 0.0  ;;  %v10773_v3 = vadd.f32 %v11570_v21, %v10701_v12  ;;  %v10704_v9 = vadd.f32 %v19971_v29, %v10661_v49  ;;  %v10581_v38 = vadd.f32 %v11996_v61, %v19921_v20  ;;  %v11576_v20 = vld [vmem:[%s20297_s0 + $0x20b] sm:$0xff] }
 0x821   :  { %v10659_v6 = vmul.f32 %v19965_v54, %v10560_v36  ;;  %v10572_v33 = vpop.f32.mrf.mxu1 }
 0x822   :  { %11608 = vst [vmem:[%s20303_s7 + $0x1b0] sm:$0xff] %v10811_v62  ;;  %v10809_v37 = vmax.f32 %v10773_v3, 0.0  ;;  %v10776_v42 = vadd.f32 %v11573_v18, %v10704_v9  ;;  %v10664_v25 = vmul.f32 %v19965_v54, %v10581_v38  ;;  %v10573_v14 = vadd.f32 %v10572_v33, %v19915_v16  ;;  %v11574_v16 = vld [vmem:[%s20297_s0 + $0x1fb] sm:$0xff] }
 0x823   :  { %v10702_v8 = vadd.f32 %v19971_v29, %v10659_v6  ;;  %v11997_v60 = vpop.f32.mrf.mxu1 }
 0x824   :  { %11606 = vst [vmem:[%s20303_s7 + $0x1a0] sm:$0xff] %v10809_v37  ;;  %v10812_v44 = vmax.f32 %v10776_v42, 0.0  ;;  %v10707_v5 = vadd.f32 %v19971_v29, %v10664_v25  ;;  %v10662_v43 = vmul.f32 %v19965_v54, %v10573_v14  ;;  %v10584_v47 = vadd.f32 %v11997_v60, %v19924_v31  ;;  %v11577_v31 = vld [vmem:[%s20297_s0 + $0x213] sm:$0xff] }
 0x825   :  { %v10774_v59 = vadd.f32 %v11571_v32, %v10702_v8  ;;  %v10575_v4 = vpop.f32.mrf.mxu1 }
 0x826   :  { %11609 = vst [vmem:[%s20303_s7 + $0x1b8] sm:$0xff] %v10812_v44  ;;  %v10779_v39 = vadd.f32 %v11576_v20, %v10707_v5  ;;  %v10705_v23 = vadd.f32 %v19971_v29, %v10662_v43  ;;  %v10665_v45 = vmul.f32 %v19965_v54, %v10584_v47  ;;  %v10576_v26 = vadd.f32 %v10575_v4, %v19918_v41  ;;  %v11575_v41 = vld [vmem:[%s20297_s0 + $0x203] sm:$0xff] }
 0x827   :  { %v10810_v57 = vmax.f32 %v10774_v59, 0.0  ;;  %v12000_v1 = vpop.f32.mrf.mxu1 }
 0x828   :  { %v10815_v7 = vmax.f32 %v10779_v39, 0.0  ;;  %v10777_v15 = vadd.f32 %v11574_v16, %v10705_v23  ;;  %v10708_v35 = vadd.f32 %v19971_v29, %v10665_v45  ;;  %v10663_v46 = vmul.f32 %v19965_v54, %v10576_v26  ;;  %v11582_v23 = vld [vmem:[%s20297_s0 + $0x23b] sm:$0xff] }
 0x829   :  { %11607 = vst [vmem:[%s20303_s7 + $0x1a8] sm:$0xff] %v10810_v57  ;;  %v10597_v52 = vadd.f32 %v12000_v1, %v19933_v0  ;;  %v10588_v58 = vpop.f32.mrf.mxu1 }
 0x82a   :  { %11612 = vst [vmem:[%s20303_s7 + $0x1d0] sm:$0xff] %v10815_v7  ;;  %v10813_v34 = vmax.f32 %v10777_v15, 0.0  ;;  %v10780_v19 = vadd.f32 %v11577_v31, %v10708_v35  ;;  %v10706_v24 = vadd.f32 %v19971_v29, %v10663_v46  ;;  %v10589_v27 = vadd.f32 %v10588_v58, %v19927_v2  ;;  %v11578_v2 = vld [vmem:[%s20297_s0 + $0x21b] sm:$0xff] }
 0x82b   :  { %v10668_v28 = vmul.f32 %v19965_v54, %v10597_v52  ;;  %v12001_v50 = vpop.f32.mrf.mxu1 }
 0x82c   :  { %11610 = vst [vmem:[%s20303_s7 + $0x1c0] sm:$0xff] %v10813_v34  ;;  %v10816_v21 = vmax.f32 %v10780_v19, 0.0  ;;  %v10778_v0 = vadd.f32 %v11575_v41, %v10706_v24  ;;  %v10666_v17 = vmul.f32 %v19965_v54, %v10589_v27  ;;  %v10600_v53 = vadd.f32 %v12001_v50, %v19936_v63  ;;  %v11581_v63 = vld [vmem:[%s20297_s0 + $0x233] sm:$0xff] }
 0x82d   :  { %v10711_v12 = vadd.f32 %v19971_v29, %v10668_v28  ;;  %v10591_v49 = vpop.f32.mrf.mxu1 }
 0x82e   :  { %11613 = vst [vmem:[%s20303_s7 + $0x1d8] sm:$0xff] %v10816_v21  ;;  %v10814_v18 = vmax.f32 %v10778_v0, 0.0  ;;  %v10709_v36 = vadd.f32 %v19971_v29, %v10666_v17  ;;  %v10669_v61 = vmul.f32 %v19965_v54, %v10600_v53  ;;  %v10592_v62 = vadd.f32 %v10591_v49, %v19930_v22  ;;  %v11579_v22 = vld [vmem:[%s20297_s0 + $0x223] sm:$0xff] }
 0x82f   :  { %v10783_v3 = vadd.f32 %v11580_v51, %v10711_v12  ;;  %v12004_v9 = vpop.f32.mrf.mxu1 }
 0x830   :  { %11611 = vst [vmem:[%s20303_s7 + $0x1c8] sm:$0xff] %v10814_v18  ;;  %v10781_v38 = vadd.f32 %v11578_v2, %v10709_v36  ;;  %v10712_v6 = vadd.f32 %v19971_v29, %v10669_v61  ;;  %v10667_v33 = vmul.f32 %v19965_v54, %v10592_v62  ;;  %v10613_v37 = vadd.f32 %v12004_v9, %v19945_v55  ;;  %v11584_v55 = vld [vmem:[%s20297_s0 + $0x24b] sm:$0xff] }
 0x831   :  { %v10819_v42 = vmax.f32 %v10783_v3, 0.0  ;;  %v10604_v32 = vpop.f32.mrf.mxu1 }
 0x832   :  { %v10817_v25 = vmax.f32 %v10781_v38, 0.0  ;;  %v10784_v14 = vadd.f32 %v11581_v63, %v10712_v6  ;;  %v10710_v8 = vadd.f32 %v19971_v29, %v10667_v33  ;;  %v10672_v20 = vmul.f32 %v19965_v54, %v10613_v37 }
 0x833   :  { %11616 = vst [vmem:[%s20303_s7 + $0x1f0] sm:$0xff] %v10819_v42  ;;  %v10605_v60 = vadd.f32 %v10604_v32, %v19939_v13  ;;  %v12005_v44 = vpop.f32.mrf.mxu1 }
 0x834   :  { %11614 = vst [vmem:[%s20303_s7 + $0x1e0] sm:$0xff] %v10817_v25  ;;  %v10820_v5 = vmax.f32 %v10784_v14, 0.0  ;;  %v10782_v43 = vadd.f32 %v11579_v22, %v10710_v8  ;;  %v10715_v47 = vadd.f32 %v19971_v29, %v10672_v20  ;;  %v10616_v59 = vadd.f32 %v12005_v44, %v19948_v10  ;;  %v11585_v10 = vld [vmem:[%s20297_s0 + $0x253] sm:$0xff] }
 0x835   :  { %v10670_v16 = vmul.f32 %v19965_v54, %v10605_v60  ;;  %v10607_v4 = vpop.f32.mrf.mxu1 }
 0x836   :  { %11617 = vst [vmem:[%s20303_s7 + $0x1f8] sm:$0xff] %v10820_v5  ;;  %v10818_v39 = vmax.f32 %v10782_v43, 0.0  ;;  %v10787_v13 = vadd.f32 %v11584_v55, %v10715_v47  ;;  %v10673_v45 = vmul.f32 %v19965_v54, %v10616_v59  ;;  %v10608_v26 = vadd.f32 %v10607_v4, %v19942_v30  ;;  %v11583_v30 = vld [vmem:[%s20297_s0 + $0x243] sm:$0xff] }
 0x837   :  { %v10713_v57 = vadd.f32 %v19971_v29, %v10670_v16  ;;  %v12008_v31 = vpop.f32.mrf.mxu1 }
 0x838   :  { %11615 = vst [vmem:[%s20303_s7 + $0x1e8] sm:$0xff] %v10818_v39  ;;  %v10823_v1 = vmax.f32 %v10787_v13, 0.0  ;;  %v10716_v7 = vadd.f32 %v19971_v29, %v10673_v45  ;;  %v10671_v15 = vmul.f32 %v19965_v54, %v10608_v26  ;;  %v10629_v35 = vadd.f32 %v12008_v31, %v19957_v11  ;;  %v11588_v11 = vld [vmem:[%s20297_s0 + $0x26b] sm:$0xff] }
 0x839   :  { %v10785_v46 = vadd.f32 %v11582_v23, %v10713_v57  ;;  %v10620_v41 = vpop.f32.mrf.mxu1 }
 0x83a   :  { %11620 = vst [vmem:[%s20303_s7 + $0x210] sm:$0xff] %v10823_v1  ;;  %v10788_v52 = vadd.f32 %v11585_v10, %v10716_v7  ;;  %v10714_v58 = vadd.f32 %v19971_v29, %v10671_v15  ;;  %v10676_v34 = vmul.f32 %v19965_v54, %v10629_v35  ;;  %v10621_v19 = vadd.f32 %v10620_v41, %v19951_v56  ;;  %v11586_v56 = vld [vmem:[%s20297_s0 + $0x25b] sm:$0xff] }
 0x83b   :  { %v10821_v24 = vmax.f32 %v10785_v46, 0.0  ;;  %v12009_v27 = vpop.f32.mrf.mxu1 }
 0x83c   :  { %v10824_v28 = vmax.f32 %v10788_v52, 0.0  ;;  %v10786_v50 = vadd.f32 %v11583_v30, %v10714_v58  ;;  %v10719_v21 = vadd.f32 %v19971_v29, %v10676_v34  ;;  %v10674_v0 = vmul.f32 %v19965_v54, %v10621_v19 }
 0x83d   :  { %11618 = vst [vmem:[%s20303_s7 + $0x200] sm:$0xff] %v10821_v24  ;;  %v10632_v51 = vadd.f32 %v12009_v27, %v19960_v48  ;;  %v10623_v17 = vpop.f32.mrf.mxu1  ;;  %v11589_v48 = vld [vmem:[%s20297_s0 + $0x273] sm:$0x3f] }
 0x83e   :  { %11621 = vst [vmem:[%s20303_s7 + $0x218] sm:$0xff] %v10824_v28  ;;  %v10822_v53 = vmax.f32 %v10786_v50, 0.0  ;;  %v10791_v12 = vadd.f32 %v11588_v11, %v10719_v21  ;;  %v10717_v2 = vadd.f32 %v19971_v29, %v10674_v0  ;;  %v10624_v49 = vadd.f32 %v10623_v17, %v19954_v40  ;;  %v11587_v40 = vld [vmem:[%s20297_s0 + $0x263] sm:$0xff] }
 0x83f   :  { %v10677_v18 = vmul.f32 %v19965_v54, %v10632_v51 }
 0x840   :  { %11619 = vst [vmem:[%s20303_s7 + $0x208] sm:$0xff] %v10822_v53  ;;  %v10827_v36 = vmax.f32 %v10791_v12, 0.0  ;;  %v10789_v61 = vadd.f32 %v11586_v56, %v10717_v2  ;;  %v10675_v62 = vmul.f32 %v19965_v54, %v10624_v49 }
 0x841   :  { %v10720_v3 = vadd.f32 %v19971_v29, %v10677_v18 }
 0x842   :  { %11624 = vst [vmem:[%s20303_s7 + $0x230] sm:$0xff] %v10827_v36  ;;  %v10825_v63 = vmax.f32 %v10789_v61, 0.0  ;;  %v10718_v9 = vadd.f32 %v19971_v29, %v10675_v62 }
 0x843   :  { %v10792_v38 = vadd.f32 %v11589_v48, %v10720_v3 }
 0x844   :  { %11622 = vst [vmem:[%s20303_s7 + $0x220] sm:$0xff] %v10825_v63  ;;  %v10790_v6 = vadd.f32 %v11587_v40, %v10718_v9 }
 0x845   :  { %v10828_v54 = vmax.f32 %v10792_v38, 0.0 }
 0x846   :  { %v10826_v33 = vmax.f32 %v10790_v6, 0.0 }
 0x847   :  { %11625 = vst [vmem:[%s20303_s7 + $0x238] sm:$0x3f] %v10828_v54 }
 0x848   :  { %11623 = vst [vmem:[%s20303_s7 + $0x228] sm:$0xff] %v10826_v33 }

</bundles_post_ra>
